<compile_context>
chip_gen: v7x
topology: tpu7x:2x2x1
jax: 0.10.0
libtpu: 0.0.40
codegen_flags: <defaults>
</compile_context>

<pallas_src>
import functools

import jax
import jax.numpy as jnp
from jax.experimental import pallas as pl
from jax.experimental.pallas import tpu as pltpu

NEG_SLOPE = 0.2
BN_EPS = 1e-6


def _leaky(x):
    return jnp.where(x > 0, x, NEG_SLOPE * x)


def _round_up(n, m):
    return ((n + m - 1) // m) * m


def _lfa_vmem_limit(npad, tm, k):
    lane_bytes = 128 * 4
    est = 2 * npad * lane_bytes          # merged resident gather table (double-buffered)
    est += 2 * (tm * k) * lane_bytes     # per-tile neighbor-index block
    est += 2 * 6 * tm * lane_bytes       # pos_i / shortcut / output tiles
    est += 16 << 20                      # weights + compiler scratch margin
    return int(min(max(est, 32 << 20), 64 << 20))


# ----------------------------------------------------------------------------
# Kernel 1: mlp1 + shortcut fused (x is read from HBM exactly once).
# ----------------------------------------------------------------------------
def mlp1_shortcut_kernel(x_ref, w1_ref, b1_ref, wsc_ref, bsc_ref, h1_ref, sc_ref):
    x = x_ref[...]
    h1_ref[...] = _leaky(jnp.dot(x, w1_ref[...], preferred_element_type=jnp.float32)
                         + b1_ref[...])
    sc_ref[...] = (jnp.dot(x, wsc_ref[...], preferred_element_type=jnp.float32)
                   + bsc_ref[...])


def pallas_mlp1_shortcut(x, w1, b1, wsc, bsc, *, tm):
    npad, d_in = x.shape
    c0 = w1.shape[1]
    d_out = wsc.shape[1]
    # TODO(synk): for production widths < 128 the output stores stay lane-masked;
    # fold row tiles into the lane dim (block-diagonal weights) to make them dense.
    return pl.pallas_call(
        mlp1_shortcut_kernel,
        out_shape=(jax.ShapeDtypeStruct((npad, c0), jnp.float32),
                   jax.ShapeDtypeStruct((npad, d_out), jnp.float32)),
        grid=(npad // tm,),
        in_specs=[
            pl.BlockSpec((tm, d_in), lambda i: (i, 0)),
            pl.BlockSpec((d_in, c0), lambda i: (0, 0)),
            pl.BlockSpec((1, c0), lambda i: (0, 0)),
            pl.BlockSpec((d_in, d_out), lambda i: (0, 0)),
            pl.BlockSpec((1, d_out), lambda i: (0, 0)),
        ],
        out_specs=(pl.BlockSpec((tm, c0), lambda i: (i, 0)),
                   pl.BlockSpec((tm, d_out), lambda i: (i, 0))),
        compiler_params=pltpu.CompilerParams(
            dimension_semantics=("parallel",),
            vmem_limit_bytes=32 * 1024 * 1024),
    )(x, w1, b1.reshape(1, c0), wsc, bsc.reshape(1, d_out))


# ----------------------------------------------------------------------------
# Kernel 2/3: LocalFeatureAggregation with a fully vectorized neighbor gather.
# Optionally fuses mlp2 + shortcut residual + final LeakyReLU in its tail.
# ----------------------------------------------------------------------------
def lfa_kernel(idx_ref, posi_ref, tbl_ref,
               wei_ref, wej_ref, wed_ref, be_ref,
               wax_ref, wal_ref, wpa_ref, wpb_ref, bp_ref,
               *rest, tm, k, ch, tail):
    if tail:
        w2_ref, b2_ref, sc_ref, o_ref = rest
    else:
        (o_ref,) = rest

    f32 = jnp.float32
    te = tm * k
    npad = tbl_ref.shape[0]

    # --- Vectorized neighbor gather: one-hot(idx) @ [features | positions] on the
    # MXU (replaces the per-edge scalar/store loop of the previous version).
    nbr = idx_ref[...]                                                   # (te, 1) int32
    sel = (nbr == jax.lax.broadcasted_iota(jnp.int32, (te, npad), 1)).astype(f32)
    g = jnp.dot(sel, tbl_ref[...], preferred_element_type=f32)           # (te, ch+3)
    x_j = g[:, :ch]                                                      # neighbor features
    pos_j = g[:, ch:]                                                    # neighbor positions
    # TODO(synk): the (te, npad) one-hot scales linearly with N; for very large
    # point clouds switch to a chunked table loop or a per-tile DMA gather.

    # --- Iota-built center<->edge maps (edge e belongs to center e // k). Used as
    # matmuls so group broadcast / pooling run on the MXU with plain 2D layouts.
    er = jax.lax.broadcasted_iota(jnp.int32, (te, tm), 0)
    ec = jax.lax.broadcasted_iota(jnp.int32, (te, tm), 1) * k
    rep = ((er >= ec) & (er < ec + k)).astype(f32)                       # (te, tm)
    pr = jax.lax.broadcasted_iota(jnp.int32, (tm, te), 0) * k
    pc = jax.lax.broadcasted_iota(jnp.int32, (tm, te), 1)
    pool = ((pc >= pr) & (pc < pr + k)).astype(f32)                      # (tm, te)

    # --- Local spatial encoding. pos_i arrives tiled (never gathered); the `diff`
    # encoder weights are folded into wei/wej in the wrapper (2 matmuls, not 4).
    pos_i = jnp.dot(rep, posi_ref[...], preferred_element_type=f32)      # (te, 3)
    diffp = pos_j - pos_i
    # TODO(synk): sqrt(0) on the self-loop edge is fine for forward; a backward
    # pass would need an eps clamp here.
    dist = jnp.sqrt(jnp.sum(diffp * diffp, axis=1, keepdims=True))       # (te, 1)
    enc = (jnp.dot(pos_i, wei_ref[...], preferred_element_type=f32)
           + jnp.dot(pos_j, wej_ref[...], preferred_element_type=f32)
           + dist * wed_ref[...] + be_ref[...])
    lse = _leaky(enc)                                                    # (te, ch)

    # --- Attention over cat([x_j, lse]) via row-split weights (2 matmuls).
    att = (jnp.dot(x_j, wax_ref[...], preferred_element_type=f32)
           + jnp.dot(lse, wal_ref[...], preferred_element_type=f32))     # (te, 2*ch)
    # Per-center softmax over the K neighbors (per channel).  Subtracting the
    # per-channel tile max instead of the per-center max is mathematically
    # identical (softmax is shift invariant within each group of K edges).
    att = att - jnp.max(att, axis=0, keepdims=True)
    ex = jnp.exp(att)                                                    # (te, 2*ch)
    den = jnp.dot(pool, ex, preferred_element_type=f32)                  # (tm, 2*ch)
    agg_x = jnp.dot(pool, ex[:, :ch] * x_j, preferred_element_type=f32) / den[:, :ch]
    agg_l = jnp.dot(pool, ex[:, ch:] * lse, preferred_element_type=f32) / den[:, ch:]

    # --- mlp_post_attention (BN folded into the weights).
    h = _leaky(jnp.dot(agg_x, wpa_ref[...], preferred_element_type=f32)
               + jnp.dot(agg_l, wpb_ref[...], preferred_element_type=f32)
               + bp_ref[...])                                            # (tm, 2*ch)

    if tail:
        # Fused mlp2 + shortcut residual + final LeakyReLU.
        h = _leaky(jnp.dot(h, w2_ref[...], preferred_element_type=f32)
                   + b2_ref[...] + sc_ref[...])

    # TODO(synk): for out widths < 128 this store is lane-masked; fold row tiles
    # into the lane dim once the consumer-side layout is settled.
    o_ref[...] = h


def pallas_lfa(h_full, pos_full, idx_col, enc_w, enc_b, att_w, post_w, post_b,
               *, tm, k, tail=None):
    npad, ch = h_full.shape
    c = 2 * ch

    # Merged [features | positions] gather table: one resident block, one gather.
    table = jnp.concatenate([h_full, pos_full], axis=1)                  # (npad, ch+3)

    # Fold the `diff = pos_j - pos_i` encoder weights into the pos_i / pos_j weights.
    wei = enc_w[0:3] - enc_w[6:9]
    wej = enc_w[3:6] + enc_w[6:9]
    wed = enc_w[9:10]
    wax, wal = att_w[:ch], att_w[ch:]
    wpa, wpb = post_w[:ch], post_w[ch:]

    resident = lambda i: (0, 0)
    tiled = lambda i: (i, 0)
    # TODO(synk): the constant-index resident table could be single-buffered
    # (pipeline_mode=pl.Buffered(1)) to halve its VMEM footprint on v7x.
    in_specs = [
        pl.BlockSpec((tm * k, 1), tiled),        # per-tile neighbor indices
        pl.BlockSpec((tm, 3), tiled),            # center positions (never gathered)
        pl.BlockSpec((npad, ch + 3), resident),  # merged gather table (VMEM resident)
        pl.BlockSpec((3, ch), resident),
        pl.BlockSpec((3, ch), resident),
        pl.BlockSpec((1, ch), resident),
        pl.BlockSpec((1, ch), resident),
        pl.BlockSpec((ch, c), resident),
        pl.BlockSpec((ch, c), resident),
        pl.BlockSpec((ch, c), resident),
        pl.BlockSpec((ch, c), resident),
        pl.BlockSpec((1, c), resident),
    ]
    args = [idx_col, pos_full, table, wei, wej, wed, enc_b.reshape(1, ch),
            wax, wal, wpa, wpb, post_b.reshape(1, c)]
    if tail is not None:
        w2, b2, sc = tail
        d_out = w2.shape[1]
        in_specs += [pl.BlockSpec((c, d_out), resident),
                     pl.BlockSpec((1, d_out), resident),
                     pl.BlockSpec((tm, d_out), tiled)]
        args += [w2, b2.reshape(1, d_out), sc]
        out_w = d_out
    else:
        out_w = c

    return pl.pallas_call(
        functools.partial(lfa_kernel, tm=tm, k=k, ch=ch, tail=tail is not None),
        out_shape=jax.ShapeDtypeStruct((npad, out_w), jnp.float32),
        grid=(npad // tm,),
        in_specs=in_specs,
        out_specs=pl.BlockSpec((tm, out_w), tiled),
        compiler_params=pltpu.CompilerParams(
            dimension_semantics=("parallel",),
            vmem_limit_bytes=_lfa_vmem_limit(npad, tm, k)),
    )(*args)


# ----------------------------------------------------------------------------
# Parameter construction (synthetic, deterministic) + BN folding (eval mode)
# ----------------------------------------------------------------------------
def fold_bn(w, b, gamma, beta, rm, rv, eps=BN_EPS):
    scale = gamma / jnp.sqrt(rv + eps)
    return w * scale[None, :], (b - rm) * scale + beta


def make_layer(key, cin, cout, bn=True):
    ks = jax.random.split(key, 6)
    w = jax.random.normal(ks[0], (cin, cout), jnp.float32) / jnp.sqrt(cin)
    b = 0.1 * jax.random.normal(ks[1], (cout,), jnp.float32)
    if bn:
        gamma = 1.0 + 0.2 * jax.random.normal(ks[2], (cout,), jnp.float32)
        beta = 0.1 * jax.random.normal(ks[3], (cout,), jnp.float32)
        rm = 0.1 * jax.random.normal(ks[4], (cout,), jnp.float32)
        rv = 0.5 + jax.random.uniform(ks[5], (cout,), jnp.float32)
        w, b = fold_bn(w, b, gamma, beta, rm, rv)
    return w, b


def init_params(key, d_in, d_out):
    ks = jax.random.split(key, 9)
    c1, c2 = d_out // 4, d_out // 2
    return {
        "mlp1": make_layer(ks[0], d_in, d_out // 8),
        "shortcut": make_layer(ks[1], d_in, d_out),
        "mlp2": make_layer(ks[2], d_out // 2, d_out),
        "lfa1": {
            "enc": make_layer(ks[3], 10, c1 // 2),
            "att": jax.random.normal(ks[4], (c1, c1), jnp.float32) / jnp.sqrt(c1),
            "post": make_layer(ks[5], c1, c1),
        },
        "lfa2": {
            "enc": make_layer(ks[6], 10, c2 // 2),
            "att": jax.random.normal(ks[7], (c2, c2), jnp.float32) / jnp.sqrt(c2),
            "post": make_layer(ks[8], c2, c2),
        },
    }


# ----------------------------------------------------------------------------
# knn_graph(loop=True) equivalent (plain-JAX glue) and full forward
# ----------------------------------------------------------------------------
def knn_dense(pos, batch, k):
    d2 = jnp.sum((pos[:, None, :] - pos[None, :, :]) ** 2, axis=-1)
    same = batch[:, None] == batch[None, :]
    d2 = jnp.where(same, d2, jnp.float32(1e10))
    _, idx = jax.lax.top_k(-d2, k)            # self-loop included (distance 0)
    return idx                                # (N, K) neighbor indices per center


def forward(params, x, pos, batch, k):
    n = x.shape[0]
    idx = knn_dense(pos, batch, k)            # (N, K)

    # LFA tile: keep >= 2 grid steps whenever possible so both v7x TCs get work.
    tm = 128
    while tm > 8 and _round_up(n, tm) // tm < 2:
        tm //= 2
    npad = _round_up(n, tm)
    pad = npad - n

    xp = jnp.pad(x, ((0, pad), (0, 0)))
    posp = jnp.pad(pos, ((0, pad), (0, 0)))
    idxp = jnp.pad(idx, ((0, pad), (0, 0)))   # padded centers gather row 0 (sliced off)
    idx_col = idxp.reshape(npad * k, 1).astype(jnp.int32)

    # K1 is a trivial streaming matmul: decouple its tile size and make it larger.
    tm1 = min(512, npad)
    while npad % tm1:
        tm1 //= 2
    if npad // tm1 < 2 and tm1 >= 16:
        tm1 //= 2
        while npad % tm1:
            tm1 //= 2

    w1, b1 = params["mlp1"]
    wsc, bsc = params["shortcut"]
    h1, sc = pallas_mlp1_shortcut(xp, w1, b1, wsc, bsc, tm=tm1)                 # K1

    p1 = params["lfa1"]
    h2 = pallas_lfa(h1, posp, idx_col, p1["enc"][0], p1["enc"][1], p1["att"],
                    p1["post"][0], p1["post"][1], tm=tm, k=k)                   # K2

    p2 = params["lfa2"]
    w2, b2 = params["mlp2"]
    out = pallas_lfa(h2, posp, idx_col, p2["enc"][0], p2["enc"][1], p2["att"],
                     p2["post"][0], p2["post"][1], tm=tm, k=k,
                     tail=(w2, b2, sc))                                         # K3
    return out[:n], pos, batch


# ----------------------------------------------------------------------------
# Pure-JAX reference (mirrors the PyTorch forward) for a correctness check
# ----------------------------------------------------------------------------
def ref_linear(x, w, b, act):
    y = x @ w + b
    return _leaky(y) if act else y


def ref_lfa(x, pos, idx, ew, eb, aw, pw, pb):
    x_j = x[idx]
    pos_n = pos[idx]
    pos_c = jnp.broadcast_to(pos[:, None, :], pos_n.shape)
    diff = pos_n - pos_c
    dist = jnp.sqrt(jnp.sum(diff * diff, axis=-1, keepdims=True))
    rel = jnp.concatenate([pos_c, pos_n, diff, dist], axis=-1)
    lse = _leaky(rel @ ew + eb)
    local = jnp.concatenate([x_j, lse], axis=-1)
    att = local @ aw
    att = att - jnp.max(att, axis=1, keepdims=True)
    e = jnp.exp(att)
    scores = e / jnp.sum(e, axis=1, keepdims=True)
    agg = jnp.sum(scores * local, axis=1)
    return _leaky(agg @ pw + pb)


def ref_forward(params, x, pos, batch, k):
    idx = knn_dense(pos, batch, k)
    shortcut = ref_linear(x, *params["shortcut"], act=False)
    h = ref_linear(x, *params["mlp1"], act=True)
    for name in ("lfa1", "lfa2"):
        p = params[name]
        h = ref_lfa(h, pos, idx, *p["enc"], p["att"], *p["post"])
    y = h @ params["mlp2"][0] + params["mlp2"][1] + shortcut
    return _leaky(y), pos, batch


# ----------------------------------------------------------------------------
if __name__ == "__main__":
    # Keep the XLA reference matmuls at full f32 accuracy so the comparison against
    # the (f32-accurate) MXU kernels is tight.
    jax.config.update("jax_default_matmul_precision", "highest")

    N, D_IN, D_OUT, K = 32, 4, 32, 8          # 2 batch elements x 16 points
    key = jax.random.PRNGKey(0)
    kx, kp = jax.random.split(key, 2)
    x = jax.random.normal(kx, (N, D_IN), jnp.float32)
    pos = jax.random.normal(kp, (N, 3), jnp.float32)
    batch = jnp.repeat(jnp.arange(2, dtype=jnp.int32), N // 2)

    params = init_params(jax.random.PRNGKey(1), D_IN, D_OUT)

    fwd = jax.jit(functools.partial(forward, params, k=K))
    out, pos_o, batch_o = fwd(x, pos, batch)
    out = jax.block_until_ready(out)

    ref_out, _, _ = ref_forward(params, x, pos, batch, K)
    assert out.shape == (N, D_OUT)
    err = float(jnp.max(jnp.abs(out - ref_out)))
    tol = 3e-2 * (1.0 + float(jnp.max(jnp.abs(ref_out))))
    if not (err < tol):
        raise AssertionError(f"Pallas kernel mismatch vs reference: max abs err {err}")
    print("KERNEL_OK")
</pallas_src>

<mosaic_0001>
module attributes {stable_mosaic.version = 11 : i64} {
  func.func @mlp1_shortcut_kernel(%arg0: i32, %arg1: memref<16x4xf32, #tpu.memory_space<vmem>>, %arg2: memref<4x4xf32, #tpu.memory_space<vmem>>, %arg3: memref<1x4xf32, #tpu.memory_space<vmem>>, %arg4: memref<4x32xf32, #tpu.memory_space<vmem>>, %arg5: memref<1x32xf32, #tpu.memory_space<vmem>>, %arg6: memref<16x4xf32, #tpu.memory_space<vmem>>, %arg7: memref<16x32xf32, #tpu.memory_space<vmem>>) attributes {dimension_semantics = [#tpu.dimension_semantics<parallel>], iteration_bounds = array<i64: 2>, scalar_prefetch = 0 : i64, scratch_operands = 0 : i64, tpu.core_type = #tpu.core_type<tc>, window_params = [{transform_indices = @transform_0, window_bounds = array<i64: 16, 4>}, {pipeline_mode = #tpu.pipeline_mode<synchronous>, transform_indices = @transform_1, window_bounds = array<i64: 4, 4>}, {pipeline_mode = #tpu.pipeline_mode<synchronous>, transform_indices = @transform_2, window_bounds = array<i64: 1, 4>}, {pipeline_mode = #tpu.pipeline_mode<synchronous>, transform_indices = @transform_3, window_bounds = array<i64: 4, 32>}, {pipeline_mode = #tpu.pipeline_mode<synchronous>, transform_indices = @transform_4, window_bounds = array<i64: 1, 32>}, {transform_indices = @transform_5, window_bounds = array<i64: 16, 4>}, {transform_indices = @transform_6, window_bounds = array<i64: 16, 32>}]} {
    %c0 = arith.constant 0 : index
    %c0_0 = arith.constant 0 : index
    %0 = vector.load %arg1[%c0, %c0_0] : memref<16x4xf32, #tpu.memory_space<vmem>>, vector<16x4xf32>
    %c0_1 = arith.constant 0 : index
    %c0_2 = arith.constant 0 : index
    %1 = vector.load %arg2[%c0_1, %c0_2] : memref<4x4xf32, #tpu.memory_space<vmem>>, vector<4x4xf32>
    %cst = arith.constant dense<0.000000e+00> : vector<16x4xf32>
    %2 = tpu.matmul %0, %1, %cst {dimension_numbers = #tpu.dot_dimension_numbers<[1], [0], [0], [1], [0, 0, 1, 1], [], []>, precision = #tpu.contract_precision<fp32>} : vector<16x4xf32>, vector<4x4xf32>, vector<16x4xf32> -> vector<16x4xf32>
    %c0_3 = arith.constant 0 : index
    %c0_4 = arith.constant 0 : index
    %3 = vector.load %arg3[%c0_3, %c0_4] : memref<1x4xf32, #tpu.memory_space<vmem>>, vector<1x4xf32>
    %4 = vector.broadcast %3 : vector<1x4xf32> to vector<16x4xf32>
    %5 = arith.addf %2, %4 : vector<16x4xf32>
    %cst_5 = arith.constant 0.000000e+00 : f32
    %6 = vector.broadcast %cst_5 : f32 to vector<16x4xf32>
    %7 = arith.cmpf ogt, %5, %6 : vector<16x4xf32>
    %cst_6 = arith.constant 2.000000e-01 : f32
    %8 = vector.broadcast %cst_6 : f32 to vector<16x4xf32>
    %9 = arith.mulf %8, %5 : vector<16x4xf32>
    %10 = arith.select %7, %5, %9 : vector<16x4xi1>, vector<16x4xf32>
    %c0_7 = arith.constant 0 : index
    %c0_8 = arith.constant 0 : index
    %11 = vector.load %arg6[%c0_7, %c0_8] : memref<16x4xf32, #tpu.memory_space<vmem>>, vector<16x4xf32>
    tpu.vector_store %arg6[%c0_7, %c0_8], %10 {strides = array<i32>} : memref<16x4xf32, #tpu.memory_space<vmem>>, vector<16x4xf32>,
    %c0_9 = arith.constant 0 : index
    %c0_10 = arith.constant 0 : index
    %12 = vector.load %arg4[%c0_9, %c0_10] : memref<4x32xf32, #tpu.memory_space<vmem>>, vector<4x32xf32>
    %cst_11 = arith.constant dense<0.000000e+00> : vector<16x32xf32>
    %13 = tpu.matmul %0, %12, %cst_11 {dimension_numbers = #tpu.dot_dimension_numbers<[1], [0], [0], [1], [0, 0, 1, 1], [], []>, precision = #tpu.contract_precision<fp32>} : vector<16x4xf32>, vector<4x32xf32>, vector<16x32xf32> -> vector<16x32xf32>
    %c0_12 = arith.constant 0 : index
    %c0_13 = arith.constant 0 : index
    %14 = vector.load %arg5[%c0_12, %c0_13] : memref<1x32xf32, #tpu.memory_space<vmem>>, vector<1x32xf32>
    %15 = vector.broadcast %14 : vector<1x32xf32> to vector<16x32xf32>
    %16 = arith.addf %13, %15 : vector<16x32xf32>
    %c0_14 = arith.constant 0 : index
    %c0_15 = arith.constant 0 : index
    %17 = vector.load %arg7[%c0_14, %c0_15] : memref<16x32xf32, #tpu.memory_space<vmem>>, vector<16x32xf32>
    tpu.vector_store %arg7[%c0_14, %c0_15], %16 {strides = array<i32>} : memref<16x32xf32, #tpu.memory_space<vmem>>, vector<16x32xf32>,
    return
  }
  func.func @transform_0(%arg0: i32) -> (i32, i32) {
    %c0_i32 = arith.constant 0 : i32
    %c0_i32_0 = arith.constant 0 : i32
    return %arg0, %c0_i32 : i32, i32
  }
  func.func @transform_1(%arg0: i32) -> (i32, i32) {
    %c0_i32 = arith.constant 0 : i32
    %c0_i32_0 = arith.constant 0 : i32
    %c0_i32_1 = arith.constant 0 : i32
    return %c0_i32, %c0_i32_0 : i32, i32
  }
  func.func @transform_2(%arg0: i32) -> (i32, i32) {
    %c0_i32 = arith.constant 0 : i32
    %c0_i32_0 = arith.constant 0 : i32
    %c0_i32_1 = arith.constant 0 : i32
    return %c0_i32, %c0_i32_0 : i32, i32
  }
  func.func @transform_3(%arg0: i32) -> (i32, i32) {
    %c0_i32 = arith.constant 0 : i32
    %c0_i32_0 = arith.constant 0 : i32
    %c0_i32_1 = arith.constant 0 : i32
    return %c0_i32, %c0_i32_0 : i32, i32
  }
  func.func @transform_4(%arg0: i32) -> (i32, i32) {
    %c0_i32 = arith.constant 0 : i32
    %c0_i32_0 = arith.constant 0 : i32
    %c0_i32_1 = arith.constant 0 : i32
    return %c0_i32, %c0_i32_0 : i32, i32
  }
  func.func @transform_5(%arg0: i32) -> (i32, i32) {
    %c0_i32 = arith.constant 0 : i32
    %c0_i32_0 = arith.constant 0 : i32
    return %arg0, %c0_i32 : i32, i32
  }
  func.func @transform_6(%arg0: i32) -> (i32, i32) {
    %c0_i32 = arith.constant 0 : i32
    %c0_i32_0 = arith.constant 0 : i32
    return %arg0, %c0_i32 : i32, i32
  }
}

module attributes {stable_mosaic.version = 11 : i64} {
  func.func @lfa_kernel(%arg0: i32, %arg1: memref<128x1xi32, #tpu.memory_space<vmem>>, %arg2: memref<16x3xf32, #tpu.memory_space<vmem>>, %arg3: memref<32x7xf32, #tpu.memory_space<vmem>>, %arg4: memref<3x4xf32, #tpu.memory_space<vmem>>, %arg5: memref<3x4xf32, #tpu.memory_space<vmem>>, %arg6: memref<1x4xf32, #tpu.memory_space<vmem>>, %arg7: memref<1x4xf32, #tpu.memory_space<vmem>>, %arg8: memref<4x8xf32, #tpu.memory_space<vmem>>, %arg9: memref<4x8xf32, #tpu.memory_space<vmem>>, %arg10: memref<4x8xf32, #tpu.memory_space<vmem>>, %arg11: memref<4x8xf32, #tpu.memory_space<vmem>>, %arg12: memref<1x8xf32, #tpu.memory_space<vmem>>, %arg13: memref<16x8xf32, #tpu.memory_space<vmem>>) attributes {dimension_semantics = [#tpu.dimension_semantics<parallel>], iteration_bounds = array<i64: 2>, scalar_prefetch = 0 : i64, scratch_operands = 0 : i64, tpu.core_type = #tpu.core_type<tc>, window_params = [{transform_indices = @transform_0, window_bounds = array<i64: 128, 1>}, {transform_indices = @transform_1, window_bounds = array<i64: 16, 3>}, {pipeline_mode = #tpu.pipeline_mode<synchronous>, transform_indices = @transform_2, window_bounds = array<i64: 32, 7>}, {pipeline_mode = #tpu.pipeline_mode<synchronous>, transform_indices = @transform_3, window_bounds = array<i64: 3, 4>}, {pipeline_mode = #tpu.pipeline_mode<synchronous>, transform_indices = @transform_4, window_bounds = array<i64: 3, 4>}, {pipeline_mode = #tpu.pipeline_mode<synchronous>, transform_indices = @transform_5, window_bounds = array<i64: 1, 4>}, {pipeline_mode = #tpu.pipeline_mode<synchronous>, transform_indices = @transform_6, window_bounds = array<i64: 1, 4>}, {pipeline_mode = #tpu.pipeline_mode<synchronous>, transform_indices = @transform_7, window_bounds = array<i64: 4, 8>}, {pipeline_mode = #tpu.pipeline_mode<synchronous>, transform_indices = @transform_8, window_bounds = array<i64: 4, 8>}, {pipeline_mode = #tpu.pipeline_mode<synchronous>, transform_indices = @transform_9, window_bounds = array<i64: 4, 8>}, {pipeline_mode = #tpu.pipeline_mode<synchronous>, transform_indices = @transform_10, window_bounds = array<i64: 4, 8>}, {pipeline_mode = #tpu.pipeline_mode<synchronous>, transform_indices = @transform_11, window_bounds = array<i64: 1, 8>}, {transform_indices = @transform_12, window_bounds = array<i64: 16, 8>}]} {
    %c0 = arith.constant 0 : index
    %c0_0 = arith.constant 0 : index
    %0 = vector.load %arg1[%c0, %c0_0] : memref<128x1xi32, #tpu.memory_space<vmem>>, vector<128x1xi32>
    %1 = tpu.iota {dimensions = array<i32: 1>} : vector<128x32xi32>
    %2 = vector.broadcast %0 : vector<128x1xi32> to vector<128x32xi32>
    %3 = arith.cmpi eq, %2, %1 : vector<128x32xi32>
    %4 = arith.extui %3 : vector<128x32xi1> to vector<128x32xi32>
    %5 = arith.sitofp %4 : vector<128x32xi32> to vector<128x32xf32>
    %c0_1 = arith.constant 0 : index
    %c0_2 = arith.constant 0 : index
    %6 = vector.load %arg3[%c0_1, %c0_2] : memref<32x7xf32, #tpu.memory_space<vmem>>, vector<32x7xf32>
    %cst = arith.constant dense<0.000000e+00> : vector<128x7xf32>
    %7 = tpu.matmul %5, %6, %cst {dimension_numbers = #tpu.dot_dimension_numbers<[1], [0], [0], [1], [0, 0, 1, 1], [], []>, precision = #tpu.contract_precision<fp32>} : vector<128x32xf32>, vector<32x7xf32>, vector<128x7xf32> -> vector<128x7xf32>
    %8 = vector.extract_strided_slice %7 {offsets = [0, 0], sizes = [128, 4], strides = [1, 1]} : vector<128x7xf32> to vector<128x4xf32>
    %9 = vector.extract_strided_slice %7 {offsets = [0, 4], sizes = [128, 3], strides = [1, 1]} : vector<128x7xf32> to vector<128x3xf32>
    %10 = tpu.iota {dimensions = array<i32: 0>} : vector<128x16xi32>
    %11 = tpu.iota {dimensions = array<i32: 1>} : vector<128x16xi32>
    %c8_i32 = arith.constant 8 : i32
    %12 = vector.broadcast %c8_i32 : i32 to vector<128x16xi32>
    %13 = arith.muli %11, %12 : vector<128x16xi32>
    %14 = arith.cmpi sge, %10, %13 : vector<128x16xi32>
    %c8_i32_3 = arith.constant 8 : i32
    %15 = vector.broadcast %c8_i32_3 : i32 to vector<128x16xi32>
    %16 = arith.addi %13, %15 : vector<128x16xi32>
    %17 = arith.cmpi slt, %10, %16 : vector<128x16xi32>
    %18 = arith.andi %14, %17 : vector<128x16xi1>
    %19 = arith.extui %18 : vector<128x16xi1> to vector<128x16xi32>
    %20 = arith.sitofp %19 : vector<128x16xi32> to vector<128x16xf32>
    %21 = tpu.iota {dimensions = array<i32: 0>} : vector<16x128xi32>
    %c8_i32_4 = arith.constant 8 : i32
    %22 = vector.broadcast %c8_i32_4 : i32 to vector<16x128xi32>
    %23 = arith.muli %21, %22 : vector<16x128xi32>
    %24 = tpu.iota {dimensions = array<i32: 1>} : vector<16x128xi32>
    %25 = arith.cmpi sge, %24, %23 : vector<16x128xi32>
    %c8_i32_5 = arith.constant 8 : i32
    %26 = vector.broadcast %c8_i32_5 : i32 to vector<16x128xi32>
    %27 = arith.addi %23, %26 : vector<16x128xi32>
    %28 = arith.cmpi slt, %24, %27 : vector<16x128xi32>
    %29 = arith.andi %25, %28 : vector<16x128xi1>
    %30 = arith.extui %29 : vector<16x128xi1> to vector<16x128xi32>
    %31 = arith.sitofp %30 : vector<16x128xi32> to vector<16x128xf32>
    %c0_6 = arith.constant 0 : index
    %c0_7 = arith.constant 0 : index
    %32 = vector.load %arg2[%c0_6, %c0_7] : memref<16x3xf32, #tpu.memory_space<vmem>>, vector<16x3xf32>
    %cst_8 = arith.constant dense<0.000000e+00> : vector<128x3xf32>
    %33 = tpu.matmul %20, %32, %cst_8 {dimension_numbers = #tpu.dot_dimension_numbers<[1], [0], [0], [1], [0, 0, 1, 1], [], []>, precision = #tpu.contract_precision<fp32>} : vector<128x16xf32>, vector<16x3xf32>, vector<128x3xf32> -> vector<128x3xf32>
    %34 = arith.subf %9, %33 : vector<128x3xf32>
    %35 = arith.mulf %34, %34 : vector<128x3xf32>
    %cst_9 = arith.constant dense<0.000000e+00> : vector<128xf32>
    %36 = vector.multi_reduction <add>, %35, %cst_9 [1] : vector<128x3xf32> to vector<128xf32>
    %37 = vector.shape_cast %36 : vector<128xf32> to vector<128x1xf32>
    %38 = math.sqrt %37 : vector<128x1xf32>
    %c0_10 = arith.constant 0 : index
    %c0_11 = arith.constant 0 : index
    %39 = vector.load %arg4[%c0_10, %c0_11] : memref<3x4xf32, #tpu.memory_space<vmem>>, vector<3x4xf32>
    %cst_12 = arith.constant dense<0.000000e+00> : vector<128x4xf32>
    %40 = tpu.matmul %33, %39, %cst_12 {dimension_numbers = #tpu.dot_dimension_numbers<[1], [0], [0], [1], [0, 0, 1, 1], [], []>, precision = #tpu.contract_precision<fp32>} : vector<128x3xf32>, vector<3x4xf32>, vector<128x4xf32> -> vector<128x4xf32>
    %c0_13 = arith.constant 0 : index
    %c0_14 = arith.constant 0 : index
    %41 = vector.load %arg5[%c0_13, %c0_14] : memref<3x4xf32, #tpu.memory_space<vmem>>, vector<3x4xf32>
    %cst_15 = arith.constant dense<0.000000e+00> : vector<128x4xf32>
    %42 = tpu.matmul %9, %41, %cst_15 {dimension_numbers = #tpu.dot_dimension_numbers<[1], [0], [0], [1], [0, 0, 1, 1], [], []>, precision = #tpu.contract_precision<fp32>} : vector<128x3xf32>, vector<3x4xf32>, vector<128x4xf32> -> vector<128x4xf32>
    %43 = arith.addf %40, %42 : vector<128x4xf32>
    %c0_16 = arith.constant 0 : index
    %c0_17 = arith.constant 0 : index
    %44 = vector.load %arg6[%c0_16, %c0_17] : memref<1x4xf32, #tpu.memory_space<vmem>>, vector<1x4xf32>
    %45 = vector.broadcast %38 : vector<128x1xf32> to vector<128x4xf32>
    %46 = vector.broadcast %44 : vector<1x4xf32> to vector<128x4xf32>
    %47 = arith.mulf %45, %46 : vector<128x4xf32>
    %48 = arith.addf %43, %47 : vector<128x4xf32>
    %c0_18 = arith.constant 0 : index
    %c0_19 = arith.constant 0 : index
    %49 = vector.load %arg7[%c0_18, %c0_19] : memref<1x4xf32, #tpu.memory_space<vmem>>, vector<1x4xf32>
    %50 = vector.broadcast %49 : vector<1x4xf32> to vector<128x4xf32>
    %51 = arith.addf %48, %50 : vector<128x4xf32>
    %cst_20 = arith.constant 0.000000e+00 : f32
    %52 = vector.broadcast %cst_20 : f32 to vector<128x4xf32>
    %53 = arith.cmpf ogt, %51, %52 : vector<128x4xf32>
    %cst_21 = arith.constant 2.000000e-01 : f32
    %54 = vector.broadcast %cst_21 : f32 to vector<128x4xf32>
    %55 = arith.mulf %54, %51 : vector<128x4xf32>
    %56 = arith.select %53, %51, %55 : vector<128x4xi1>, vector<128x4xf32>
    %c0_22 = arith.constant 0 : index
    %c0_23 = arith.constant 0 : index
    %57 = vector.load %arg8[%c0_22, %c0_23] : memref<4x8xf32, #tpu.memory_space<vmem>>, vector<4x8xf32>
    %cst_24 = arith.constant dense<0.000000e+00> : vector<128x8xf32>
    %58 = tpu.matmul %8, %57, %cst_24 {dimension_numbers = #tpu.dot_dimension_numbers<[1], [0], [0], [1], [0, 0, 1, 1], [], []>, precision = #tpu.contract_precision<fp32>} : vector<128x4xf32>, vector<4x8xf32>, vector<128x8xf32> -> vector<128x8xf32>
    %c0_25 = arith.constant 0 : index
    %c0_26 = arith.constant 0 : index
    %59 = vector.load %arg9[%c0_25, %c0_26] : memref<4x8xf32, #tpu.memory_space<vmem>>, vector<4x8xf32>
    %cst_27 = arith.constant dense<0.000000e+00> : vector<128x8xf32>
    %60 = tpu.matmul %56, %59, %cst_27 {dimension_numbers = #tpu.dot_dimension_numbers<[1], [0], [0], [1], [0, 0, 1, 1], [], []>, precision = #tpu.contract_precision<fp32>} : vector<128x4xf32>, vector<4x8xf32>, vector<128x8xf32> -> vector<128x8xf32>
    %61 = arith.addf %58, %60 : vector<128x8xf32>
    %cst_28 = arith.constant dense<0xFF800000> : vector<8xf32>
    %62 = vector.multi_reduction <maximumf>, %61, %cst_28 [0] : vector<128x8xf32> to vector<8xf32>
    %63 = vector.shape_cast %62 : vector<8xf32> to vector<1x8xf32>
    %64 = vector.broadcast %63 : vector<1x8xf32> to vector<128x8xf32>
    %65 = arith.subf %61, %64 : vector<128x8xf32>
    %66 = math.exp %65 : vector<128x8xf32>
    %cst_29 = arith.constant dense<0.000000e+00> : vector<16x8xf32>
    %67 = tpu.matmul %31, %66, %cst_29 {dimension_numbers = #tpu.dot_dimension_numbers<[1], [0], [0], [1], [0, 0, 1, 1], [], []>, precision = #tpu.contract_precision<fp32>} : vector<16x128xf32>, vector<128x8xf32>, vector<16x8xf32> -> vector<16x8xf32>
    %68 = vector.extract_strided_slice %66 {offsets = [0, 0], sizes = [128, 4], strides = [1, 1]} : vector<128x8xf32> to vector<128x4xf32>
    %69 = arith.mulf %68, %8 : vector<128x4xf32>
    %cst_30 = arith.constant dense<0.000000e+00> : vector<16x4xf32>
    %70 = tpu.matmul %31, %69, %cst_30 {dimension_numbers = #tpu.dot_dimension_numbers<[1], [0], [0], [1], [0, 0, 1, 1], [], []>, precision = #tpu.contract_precision<fp32>} : vector<16x128xf32>, vector<128x4xf32>, vector<16x4xf32> -> vector<16x4xf32>
    %71 = vector.extract_strided_slice %67 {offsets = [0, 0], sizes = [16, 4], strides = [1, 1]} : vector<16x8xf32> to vector<16x4xf32>
    %72 = arith.divf %70, %71 : vector<16x4xf32>
    %73 = vector.extract_strided_slice %66 {offsets = [0, 4], sizes = [128, 4], strides = [1, 1]} : vector<128x8xf32> to vector<128x4xf32>
    %74 = arith.mulf %73, %56 : vector<128x4xf32>
    %cst_31 = arith.constant dense<0.000000e+00> : vector<16x4xf32>
    %75 = tpu.matmul %31, %74, %cst_31 {dimension_numbers = #tpu.dot_dimension_numbers<[1], [0], [0], [1], [0, 0, 1, 1], [], []>, precision = #tpu.contract_precision<fp32>} : vector<16x128xf32>, vector<128x4xf32>, vector<16x4xf32> -> vector<16x4xf32>
    %76 = vector.extract_strided_slice %67 {offsets = [0, 4], sizes = [16, 4], strides = [1, 1]} : vector<16x8xf32> to vector<16x4xf32>
    %77 = arith.divf %75, %76 : vector<16x4xf32>
    %c0_32 = arith.constant 0 : index
    %c0_33 = arith.constant 0 : index
    %78 = vector.load %arg10[%c0_32, %c0_33] : memref<4x8xf32, #tpu.memory_space<vmem>>, vector<4x8xf32>
    %cst_34 = arith.constant dense<0.000000e+00> : vector<16x8xf32>
    %79 = tpu.matmul %72, %78, %cst_34 {dimension_numbers = #tpu.dot_dimension_numbers<[1], [0], [0], [1], [0, 0, 1, 1], [], []>, precision = #tpu.contract_precision<fp32>} : vector<16x4xf32>, vector<4x8xf32>, vector<16x8xf32> -> vector<16x8xf32>
    %c0_35 = arith.constant 0 : index
    %c0_36 = arith.constant 0 : index
    %80 = vector.load %arg11[%c0_35, %c0_36] : memref<4x8xf32, #tpu.memory_space<vmem>>, vector<4x8xf32>
    %cst_37 = arith.constant dense<0.000000e+00> : vector<16x8xf32>
    %81 = tpu.matmul %77, %80, %cst_37 {dimension_numbers = #tpu.dot_dimension_numbers<[1], [0], [0], [1], [0, 0, 1, 1], [], []>, precision = #tpu.contract_precision<fp32>} : vector<16x4xf32>, vector<4x8xf32>, vector<16x8xf32> -> vector<16x8xf32>
    %82 = arith.addf %79, %81 : vector<16x8xf32>
    %c0_38 = arith.constant 0 : index
    %c0_39 = arith.constant 0 : index
    %83 = vector.load %arg12[%c0_38, %c0_39] : memref<1x8xf32, #tpu.memory_space<vmem>>, vector<1x8xf32>
    %84 = vector.broadcast %83 : vector<1x8xf32> to vector<16x8xf32>
    %85 = arith.addf %82, %84 : vector<16x8xf32>
    %cst_40 = arith.constant 0.000000e+00 : f32
    %86 = vector.broadcast %cst_40 : f32 to vector<16x8xf32>
    %87 = arith.cmpf ogt, %85, %86 : vector<16x8xf32>
    %cst_41 = arith.constant 2.000000e-01 : f32
    %88 = vector.broadcast %cst_41 : f32 to vector<16x8xf32>
    %89 = arith.mulf %88, %85 : vector<16x8xf32>
    %90 = arith.select %87, %85, %89 : vector<16x8xi1>, vector<16x8xf32>
    %c0_42 = arith.constant 0 : index
    %c0_43 = arith.constant 0 : index
    %91 = vector.load %arg13[%c0_42, %c0_43] : memref<16x8xf32, #tpu.memory_space<vmem>>, vector<16x8xf32>
    tpu.vector_store %arg13[%c0_42, %c0_43], %90 {strides = array<i32>} : memref<16x8xf32, #tpu.memory_space<vmem>>, vector<16x8xf32>,
    return
  }
  func.func @transform_0(%arg0: i32) -> (i32, i32) {
    %c0_i32 = arith.constant 0 : i32
    %c0_i32_0 = arith.constant 0 : i32
    return %arg0, %c0_i32 : i32, i32
  }
  func.func @transform_1(%arg0: i32) -> (i32, i32) {
    %c0_i32 = arith.constant 0 : i32
    %c0_i32_0 = arith.constant 0 : i32
    return %arg0, %c0_i32 : i32, i32
  }
  func.func @transform_2(%arg0: i32) -> (i32, i32) {
    %c0_i32 = arith.constant 0 : i32
    %c0_i32_0 = arith.constant 0 : i32
    %c0_i32_1 = arith.constant 0 : i32
    return %c0_i32, %c0_i32_0 : i32, i32
  }
  func.func @transform_3(%arg0: i32) -> (i32, i32) {
    %c0_i32 = arith.constant 0 : i32
    %c0_i32_0 = arith.constant 0 : i32
    %c0_i32_1 = arith.constant 0 : i32
    return %c0_i32, %c0_i32_0 : i32, i32
  }
  func.func @transform_4(%arg0: i32) -> (i32, i32) {
    %c0_i32 = arith.constant 0 : i32
    %c0_i32_0 = arith.constant 0 : i32
    %c0_i32_1 = arith.constant 0 : i32
    return %c0_i32, %c0_i32_0 : i32, i32
  }
  func.func @transform_5(%arg0: i32) -> (i32, i32) {
    %c0_i32 = arith.constant 0 : i32
    %c0_i32_0 = arith.constant 0 : i32
    %c0_i32_1 = arith.constant 0 : i32
    return %c0_i32, %c0_i32_0 : i32, i32
  }
  func.func @transform_6(%arg0: i32) -> (i32, i32) {
    %c0_i32 = arith.constant 0 : i32
    %c0_i32_0 = arith.constant 0 : i32
    %c0_i32_1 = arith.constant 0 : i32
    return %c0_i32, %c0_i32_0 : i32, i32
  }
  func.func @transform_7(%arg0: i32) -> (i32, i32) {
    %c0_i32 = arith.constant 0 : i32
    %c0_i32_0 = arith.constant 0 : i32
    %c0_i32_1 = arith.constant 0 : i32
    return %c0_i32, %c0_i32_0 : i32, i32
  }
  func.func @transform_8(%arg0: i32) -> (i32, i32) {
    %c0_i32 = arith.constant 0 : i32
    %c0_i32_0 = arith.constant 0 : i32
    %c0_i32_1 = arith.constant 0 : i32
    return %c0_i32, %c0_i32_0 : i32, i32
  }
  func.func @transform_9(%arg0: i32) -> (i32, i32) {
    %c0_i32 = arith.constant 0 : i32
    %c0_i32_0 = arith.constant 0 : i32
    %c0_i32_1 = arith.constant 0 : i32
    return %c0_i32, %c0_i32_0 : i32, i32
  }
  func.func @transform_10(%arg0: i32) -> (i32, i32) {
    %c0_i32 = arith.constant 0 : i32
    %c0_i32_0 = arith.constant 0 : i32
    %c0_i32_1 = arith.constant 0 : i32
    return %c0_i32, %c0_i32_0 : i32, i32
  }
  func.func @transform_11(%arg0: i32) -> (i32, i32) {
    %c0_i32 = arith.constant 0 : i32
    %c0_i32_0 = arith.constant 0 : i32
    %c0_i32_1 = arith.constant 0 : i32
    return %c0_i32, %c0_i32_0 : i32, i32
  }
  func.func @transform_12(%arg0: i32) -> (i32, i32) {
    %c0_i32 = arith.constant 0 : i32
    %c0_i32_0 = arith.constant 0 : i32
    return %arg0, %c0_i32 : i32, i32
  }
}

module attributes {stable_mosaic.version = 11 : i64} {
  func.func @lfa_kernel(%arg0: i32, %arg1: memref<128x1xi32, #tpu.memory_space<vmem>>, %arg2: memref<16x3xf32, #tpu.memory_space<vmem>>, %arg3: memref<32x11xf32, #tpu.memory_space<vmem>>, %arg4: memref<3x8xf32, #tpu.memory_space<vmem>>, %arg5: memref<3x8xf32, #tpu.memory_space<vmem>>, %arg6: memref<1x8xf32, #tpu.memory_space<vmem>>, %arg7: memref<1x8xf32, #tpu.memory_space<vmem>>, %arg8: memref<8x16xf32, #tpu.memory_space<vmem>>, %arg9: memref<8x16xf32, #tpu.memory_space<vmem>>, %arg10: memref<8x16xf32, #tpu.memory_space<vmem>>, %arg11: memref<8x16xf32, #tpu.memory_space<vmem>>, %arg12: memref<1x16xf32, #tpu.memory_space<vmem>>, %arg13: memref<16x32xf32, #tpu.memory_space<vmem>>, %arg14: memref<1x32xf32, #tpu.memory_space<vmem>>, %arg15: memref<16x32xf32, #tpu.memory_space<vmem>>, %arg16: memref<16x32xf32, #tpu.memory_space<vmem>>) attributes {dimension_semantics = [#tpu.dimension_semantics<parallel>], iteration_bounds = array<i64: 2>, scalar_prefetch = 0 : i64, scratch_operands = 0 : i64, tpu.core_type = #tpu.core_type<tc>, window_params = [{transform_indices = @transform_0, window_bounds = array<i64: 128, 1>}, {transform_indices = @transform_1, window_bounds = array<i64: 16, 3>}, {pipeline_mode = #tpu.pipeline_mode<synchronous>, transform_indices = @transform_2, window_bounds = array<i64: 32, 11>}, {pipeline_mode = #tpu.pipeline_mode<synchronous>, transform_indices = @transform_3, window_bounds = array<i64: 3, 8>}, {pipeline_mode = #tpu.pipeline_mode<synchronous>, transform_indices = @transform_4, window_bounds = array<i64: 3, 8>}, {pipeline_mode = #tpu.pipeline_mode<synchronous>, transform_indices = @transform_5, window_bounds = array<i64: 1, 8>}, {pipeline_mode = #tpu.pipeline_mode<synchronous>, transform_indices = @transform_6, window_bounds = array<i64: 1, 8>}, {pipeline_mode = #tpu.pipeline_mode<synchronous>, transform_indices = @transform_7, window_bounds = array<i64: 8, 16>}, {pipeline_mode = #tpu.pipeline_mode<synchronous>, transform_indices = @transform_8, window_bounds = array<i64: 8, 16>}, {pipeline_mode = #tpu.pipeline_mode<synchronous>, transform_indices = @transform_9, window_bounds = array<i64: 8, 16>}, {pipeline_mode = #tpu.pipeline_mode<synchronous>, transform_indices = @transform_10, window_bounds = array<i64: 8, 16>}, {pipeline_mode = #tpu.pipeline_mode<synchronous>, transform_indices = @transform_11, window_bounds = array<i64: 1, 16>}, {pipeline_mode = #tpu.pipeline_mode<synchronous>, transform_indices = @transform_12, window_bounds = array<i64: 16, 32>}, {pipeline_mode = #tpu.pipeline_mode<synchronous>, transform_indices = @transform_13, window_bounds = array<i64: 1, 32>}, {transform_indices = @transform_14, window_bounds = array<i64: 16, 32>}, {transform_indices = @transform_15, window_bounds = array<i64: 16, 32>}]} {
    %c0 = arith.constant 0 : index
    %c0_0 = arith.constant 0 : index
    %0 = vector.load %arg1[%c0, %c0_0] : memref<128x1xi32, #tpu.memory_space<vmem>>, vector<128x1xi32>
    %1 = tpu.iota {dimensions = array<i32: 1>} : vector<128x32xi32>
    %2 = vector.broadcast %0 : vector<128x1xi32> to vector<128x32xi32>
    %3 = arith.cmpi eq, %2, %1 : vector<128x32xi32>
    %4 = arith.extui %3 : vector<128x32xi1> to vector<128x32xi32>
    %5 = arith.sitofp %4 : vector<128x32xi32> to vector<128x32xf32>
    %c0_1 = arith.constant 0 : index
    %c0_2 = arith.constant 0 : index
    %6 = vector.load %arg3[%c0_1, %c0_2] : memref<32x11xf32, #tpu.memory_space<vmem>>, vector<32x11xf32>
    %cst = arith.constant dense<0.000000e+00> : vector<128x11xf32>
    %7 = tpu.matmul %5, %6, %cst {dimension_numbers = #tpu.dot_dimension_numbers<[1], [0], [0], [1], [0, 0, 1, 1], [], []>, precision = #tpu.contract_precision<fp32>} : vector<128x32xf32>, vector<32x11xf32>, vector<128x11xf32> -> vector<128x11xf32>
    %8 = vector.extract_strided_slice %7 {offsets = [0, 0], sizes = [128, 8], strides = [1, 1]} : vector<128x11xf32> to vector<128x8xf32>
    %9 = vector.extract_strided_slice %7 {offsets = [0, 8], sizes = [128, 3], strides = [1, 1]} : vector<128x11xf32> to vector<128x3xf32>
    %10 = tpu.iota {dimensions = array<i32: 0>} : vector<128x16xi32>
    %11 = tpu.iota {dimensions = array<i32: 1>} : vector<128x16xi32>
    %c8_i32 = arith.constant 8 : i32
    %12 = vector.broadcast %c8_i32 : i32 to vector<128x16xi32>
    %13 = arith.muli %11, %12 : vector<128x16xi32>
    %14 = arith.cmpi sge, %10, %13 : vector<128x16xi32>
    %c8_i32_3 = arith.constant 8 : i32
    %15 = vector.broadcast %c8_i32_3 : i32 to vector<128x16xi32>
    %16 = arith.addi %13, %15 : vector<128x16xi32>
    %17 = arith.cmpi slt, %10, %16 : vector<128x16xi32>
    %18 = arith.andi %14, %17 : vector<128x16xi1>
    %19 = arith.extui %18 : vector<128x16xi1> to vector<128x16xi32>
    %20 = arith.sitofp %19 : vector<128x16xi32> to vector<128x16xf32>
    %21 = tpu.iota {dimensions = array<i32: 0>} : vector<16x128xi32>
    %c8_i32_4 = arith.constant 8 : i32
    %22 = vector.broadcast %c8_i32_4 : i32 to vector<16x128xi32>
    %23 = arith.muli %21, %22 : vector<16x128xi32>
    %24 = tpu.iota {dimensions = array<i32: 1>} : vector<16x128xi32>
    %25 = arith.cmpi sge, %24, %23 : vector<16x128xi32>
    %c8_i32_5 = arith.constant 8 : i32
    %26 = vector.broadcast %c8_i32_5 : i32 to vector<16x128xi32>
    %27 = arith.addi %23, %26 : vector<16x128xi32>
    %28 = arith.cmpi slt, %24, %27 : vector<16x128xi32>
    %29 = arith.andi %25, %28 : vector<16x128xi1>
    %30 = arith.extui %29 : vector<16x128xi1> to vector<16x128xi32>
    %31 = arith.sitofp %30 : vector<16x128xi32> to vector<16x128xf32>
    %c0_6 = arith.constant 0 : index
    %c0_7 = arith.constant 0 : index
    %32 = vector.load %arg2[%c0_6, %c0_7] : memref<16x3xf32, #tpu.memory_space<vmem>>, vector<16x3xf32>
    %cst_8 = arith.constant dense<0.000000e+00> : vector<128x3xf32>
    %33 = tpu.matmul %20, %32, %cst_8 {dimension_numbers = #tpu.dot_dimension_numbers<[1], [0], [0], [1], [0, 0, 1, 1], [], []>, precision = #tpu.contract_precision<fp32>} : vector<128x16xf32>, vector<16x3xf32>, vector<128x3xf32> -> vector<128x3xf32>
    %34 = arith.subf %9, %33 : vector<128x3xf32>
    %35 = arith.mulf %34, %34 : vector<128x3xf32>
    %cst_9 = arith.constant dense<0.000000e+00> : vector<128xf32>
    %36 = vector.multi_reduction <add>, %35, %cst_9 [1] : vector<128x3xf32> to vector<128xf32>
    %37 = vector.shape_cast %36 : vector<128xf32> to vector<128x1xf32>
    %38 = math.sqrt %37 : vector<128x1xf32>
    %c0_10 = arith.constant 0 : index
    %c0_11 = arith.constant 0 : index
    %39 = vector.load %arg4[%c0_10, %c0_11] : memref<3x8xf32, #tpu.memory_space<vmem>>, vector<3x8xf32>
    %cst_12 = arith.constant dense<0.000000e+00> : vector<128x8xf32>
    %40 = tpu.matmul %33, %39, %cst_12 {dimension_numbers = #tpu.dot_dimension_numbers<[1], [0], [0], [1], [0, 0, 1, 1], [], []>, precision = #tpu.contract_precision<fp32>} : vector<128x3xf32>, vector<3x8xf32>, vector<128x8xf32> -> vector<128x8xf32>
    %c0_13 = arith.constant 0 : index
    %c0_14 = arith.constant 0 : index
    %41 = vector.load %arg5[%c0_13, %c0_14] : memref<3x8xf32, #tpu.memory_space<vmem>>, vector<3x8xf32>
    %cst_15 = arith.constant dense<0.000000e+00> : vector<128x8xf32>
    %42 = tpu.matmul %9, %41, %cst_15 {dimension_numbers = #tpu.dot_dimension_numbers<[1], [0], [0], [1], [0, 0, 1, 1], [], []>, precision = #tpu.contract_precision<fp32>} : vector<128x3xf32>, vector<3x8xf32>, vector<128x8xf32> -> vector<128x8xf32>
    %43 = arith.addf %40, %42 : vector<128x8xf32>
    %c0_16 = arith.constant 0 : index
    %c0_17 = arith.constant 0 : index
    %44 = vector.load %arg6[%c0_16, %c0_17] : memref<1x8xf32, #tpu.memory_space<vmem>>, vector<1x8xf32>
    %45 = vector.broadcast %38 : vector<128x1xf32> to vector<128x8xf32>
    %46 = vector.broadcast %44 : vector<1x8xf32> to vector<128x8xf32>
    %47 = arith.mulf %45, %46 : vector<128x8xf32>
    %48 = arith.addf %43, %47 : vector<128x8xf32>
    %c0_18 = arith.constant 0 : index
    %c0_19 = arith.constant 0 : index
    %49 = vector.load %arg7[%c0_18, %c0_19] : memref<1x8xf32, #tpu.memory_space<vmem>>, vector<1x8xf32>
    %50 = vector.broadcast %49 : vector<1x8xf32> to vector<128x8xf32>
    %51 = arith.addf %48, %50 : vector<128x8xf32>
    %cst_20 = arith.constant 0.000000e+00 : f32
    %52 = vector.broadcast %cst_20 : f32 to vector<128x8xf32>
    %53 = arith.cmpf ogt, %51, %52 : vector<128x8xf32>
    %cst_21 = arith.constant 2.000000e-01 : f32
    %54 = vector.broadcast %cst_21 : f32 to vector<128x8xf32>
    %55 = arith.mulf %54, %51 : vector<128x8xf32>
    %56 = arith.select %53, %51, %55 : vector<128x8xi1>, vector<128x8xf32>
    %c0_22 = arith.constant 0 : index
    %c0_23 = arith.constant 0 : index
    %57 = vector.load %arg8[%c0_22, %c0_23] : memref<8x16xf32, #tpu.memory_space<vmem>>, vector<8x16xf32>
    %cst_24 = arith.constant dense<0.000000e+00> : vector<128x16xf32>
    %58 = tpu.matmul %8, %57, %cst_24 {dimension_numbers = #tpu.dot_dimension_numbers<[1], [0], [0], [1], [0, 0, 1, 1], [], []>, precision = #tpu.contract_precision<fp32>} : vector<128x8xf32>, vector<8x16xf32>, vector<128x16xf32> -> vector<128x16xf32>
    %c0_25 = arith.constant 0 : index
    %c0_26 = arith.constant 0 : index
    %59 = vector.load %arg9[%c0_25, %c0_26] : memref<8x16xf32, #tpu.memory_space<vmem>>, vector<8x16xf32>
    %cst_27 = arith.constant dense<0.000000e+00> : vector<128x16xf32>
    %60 = tpu.matmul %56, %59, %cst_27 {dimension_numbers = #tpu.dot_dimension_numbers<[1], [0], [0], [1], [0, 0, 1, 1], [], []>, precision = #tpu.contract_precision<fp32>} : vector<128x8xf32>, vector<8x16xf32>, vector<128x16xf32> -> vector<128x16xf32>
    %61 = arith.addf %58, %60 : vector<128x16xf32>
    %cst_28 = arith.constant dense<0xFF800000> : vector<16xf32>
    %62 = vector.multi_reduction <maximumf>, %61, %cst_28 [0] : vector<128x16xf32> to vector<16xf32>
    %63 = vector.shape_cast %62 : vector<16xf32> to vector<1x16xf32>
    %64 = vector.broadcast %63 : vector<1x16xf32> to vector<128x16xf32>
    %65 = arith.subf %61, %64 : vector<128x16xf32>
    %66 = math.exp %65 : vector<128x16xf32>
    %cst_29 = arith.constant dense<0.000000e+00> : vector<16x16xf32>
    %67 = tpu.matmul %31, %66, %cst_29 {dimension_numbers = #tpu.dot_dimension_numbers<[1], [0], [0], [1], [0, 0, 1, 1], [], []>, precision = #tpu.contract_precision<fp32>} : vector<16x128xf32>, vector<128x16xf32>, vector<16x16xf32> -> vector<16x16xf32>
    %68 = vector.extract_strided_slice %66 {offsets = [0, 0], sizes = [128, 8], strides = [1, 1]} : vector<128x16xf32> to vector<128x8xf32>
    %69 = arith.mulf %68, %8 : vector<128x8xf32>
    %cst_30 = arith.constant dense<0.000000e+00> : vector<16x8xf32>
    %70 = tpu.matmul %31, %69, %cst_30 {dimension_numbers = #tpu.dot_dimension_numbers<[1], [0], [0], [1], [0, 0, 1, 1], [], []>, precision = #tpu.contract_precision<fp32>} : vector<16x128xf32>, vector<128x8xf32>, vector<16x8xf32> -> vector<16x8xf32>
    %71 = vector.extract_strided_slice %67 {offsets = [0, 0], sizes = [16, 8], strides = [1, 1]} : vector<16x16xf32> to vector<16x8xf32>
    %72 = arith.divf %70, %71 : vector<16x8xf32>
    %73 = vector.extract_strided_slice %66 {offsets = [0, 8], sizes = [128, 8], strides = [1, 1]} : vector<128x16xf32> to vector<128x8xf32>
    %74 = arith.mulf %73, %56 : vector<128x8xf32>
    %cst_31 = arith.constant dense<0.000000e+00> : vector<16x8xf32>
    %75 = tpu.matmul %31, %74, %cst_31 {dimension_numbers = #tpu.dot_dimension_numbers<[1], [0], [0], [1], [0, 0, 1, 1], [], []>, precision = #tpu.contract_precision<fp32>} : vector<16x128xf32>, vector<128x8xf32>, vector<16x8xf32> -> vector<16x8xf32>
    %76 = vector.extract_strided_slice %67 {offsets = [0, 8], sizes = [16, 8], strides = [1, 1]} : vector<16x16xf32> to vector<16x8xf32>
    %77 = arith.divf %75, %76 : vector<16x8xf32>
    %c0_32 = arith.constant 0 : index
    %c0_33 = arith.constant 0 : index
    %78 = vector.load %arg10[%c0_32, %c0_33] : memref<8x16xf32, #tpu.memory_space<vmem>>, vector<8x16xf32>
    %cst_34 = arith.constant dense<0.000000e+00> : vector<16x16xf32>
    %79 = tpu.matmul %72, %78, %cst_34 {dimension_numbers = #tpu.dot_dimension_numbers<[1], [0], [0], [1], [0, 0, 1, 1], [], []>, precision = #tpu.contract_precision<fp32>} : vector<16x8xf32>, vector<8x16xf32>, vector<16x16xf32> -> vector<16x16xf32>
    %c0_35 = arith.constant 0 : index
    %c0_36 = arith.constant 0 : index
    %80 = vector.load %arg11[%c0_35, %c0_36] : memref<8x16xf32, #tpu.memory_space<vmem>>, vector<8x16xf32>
    %cst_37 = arith.constant dense<0.000000e+00> : vector<16x16xf32>
    %81 = tpu.matmul %77, %80, %cst_37 {dimension_numbers = #tpu.dot_dimension_numbers<[1], [0], [0], [1], [0, 0, 1, 1], [], []>, precision = #tpu.contract_precision<fp32>} : vector<16x8xf32>, vector<8x16xf32>, vector<16x16xf32> -> vector<16x16xf32>
    %82 = arith.addf %79, %81 : vector<16x16xf32>
    %c0_38 = arith.constant 0 : index
    %c0_39 = arith.constant 0 : index
    %83 = vector.load %arg12[%c0_38, %c0_39] : memref<1x16xf32, #tpu.memory_space<vmem>>, vector<1x16xf32>
    %84 = vector.broadcast %83 : vector<1x16xf32> to vector<16x16xf32>
    %85 = arith.addf %82, %84 : vector<16x16xf32>
    %cst_40 = arith.constant 0.000000e+00 : f32
    %86 = vector.broadcast %cst_40 : f32 to vector<16x16xf32>
    %87 = arith.cmpf ogt, %85, %86 : vector<16x16xf32>
    %cst_41 = arith.constant 2.000000e-01 : f32
    %88 = vector.broadcast %cst_41 : f32 to vector<16x16xf32>
    %89 = arith.mulf %88, %85 : vector<16x16xf32>
    %90 = arith.select %87, %85, %89 : vector<16x16xi1>, vector<16x16xf32>
    %c0_42 = arith.constant 0 : index
    %c0_43 = arith.constant 0 : index
    %91 = vector.load %arg13[%c0_42, %c0_43] : memref<16x32xf32, #tpu.memory_space<vmem>>, vector<16x32xf32>
    %cst_44 = arith.constant dense<0.000000e+00> : vector<16x32xf32>
    %92 = tpu.matmul %90, %91, %cst_44 {dimension_numbers = #tpu.dot_dimension_numbers<[1], [0], [0], [1], [0, 0, 1, 1], [], []>, precision = #tpu.contract_precision<fp32>} : vector<16x16xf32>, vector<16x32xf32>, vector<16x32xf32> -> vector<16x32xf32>
    %c0_45 = arith.constant 0 : index
    %c0_46 = arith.constant 0 : index
    %93 = vector.load %arg14[%c0_45, %c0_46] : memref<1x32xf32, #tpu.memory_space<vmem>>, vector<1x32xf32>
    %94 = vector.broadcast %93 : vector<1x32xf32> to vector<16x32xf32>
    %95 = arith.addf %92, %94 : vector<16x32xf32>
    %c0_47 = arith.constant 0 : index
    %c0_48 = arith.constant 0 : index
    %96 = vector.load %arg15[%c0_47, %c0_48] : memref<16x32xf32, #tpu.memory_space<vmem>>, vector<16x32xf32>
    %97 = arith.addf %95, %96 : vector<16x32xf32>
    %cst_49 = arith.constant 0.000000e+00 : f32
    %98 = vector.broadcast %cst_49 : f32 to vector<16x32xf32>
    %99 = arith.cmpf ogt, %97, %98 : vector<16x32xf32>
    %cst_50 = arith.constant 2.000000e-01 : f32
    %100 = vector.broadcast %cst_50 : f32 to vector<16x32xf32>
    %101 = arith.mulf %100, %97 : vector<16x32xf32>
    %102 = arith.select %99, %97, %101 : vector<16x32xi1>, vector<16x32xf32>
    %c0_51 = arith.constant 0 : index
    %c0_52 = arith.constant 0 : index
    %103 = vector.load %arg16[%c0_51, %c0_52] : memref<16x32xf32, #tpu.memory_space<vmem>>, vector<16x32xf32>
    tpu.vector_store %arg16[%c0_51, %c0_52], %102 {strides = array<i32>} : memref<16x32xf32, #tpu.memory_space<vmem>>, vector<16x32xf32>,
    return
  }
  func.func @transform_0(%arg0: i32) -> (i32, i32) {
    %c0_i32 = arith.constant 0 : i32
    %c0_i32_0 = arith.constant 0 : i32
    return %arg0, %c0_i32 : i32, i32
  }
  func.func @transform_1(%arg0: i32) -> (i32, i32) {
    %c0_i32 = arith.constant 0 : i32
    %c0_i32_0 = arith.constant 0 : i32
    return %arg0, %c0_i32 : i32, i32
  }
  func.func @transform_2(%arg0: i32) -> (i32, i32) {
    %c0_i32 = arith.constant 0 : i32
    %c0_i32_0 = arith.constant 0 : i32
    %c0_i32_1 = arith.constant 0 : i32
    return %c0_i32, %c0_i32_0 : i32, i32
  }
  func.func @transform_3(%arg0: i32) -> (i32, i32) {
    %c0_i32 = arith.constant 0 : i32
    %c0_i32_0 = arith.constant 0 : i32
    %c0_i32_1 = arith.constant 0 : i32
    return %c0_i32, %c0_i32_0 : i32, i32
  }
  func.func @transform_4(%arg0: i32) -> (i32, i32) {
    %c0_i32 = arith.constant 0 : i32
    %c0_i32_0 = arith.constant 0 : i32
    %c0_i32_1 = arith.constant 0 : i32
    return %c0_i32, %c0_i32_0 : i32, i32
  }
  func.func @transform_5(%arg0: i32) -> (i32, i32) {
    %c0_i32 = arith.constant 0 : i32
    %c0_i32_0 = arith.constant 0 : i32
    %c0_i32_1 = arith.constant 0 : i32
    return %c0_i32, %c0_i32_0 : i32, i32
  }
  func.func @transform_6(%arg0: i32) -> (i32, i32) {
    %c0_i32 = arith.constant 0 : i32
    %c0_i32_0 = arith.constant 0 : i32
    %c0_i32_1 = arith.constant 0 : i32
    return %c0_i32, %c0_i32_0 : i32, i32
  }
  func.func @transform_7(%arg0: i32) -> (i32, i32) {
    %c0_i32 = arith.constant 0 : i32
    %c0_i32_0 = arith.constant 0 : i32
    %c0_i32_1 = arith.constant 0 : i32
    return %c0_i32, %c0_i32_0 : i32, i32
  }
  func.func @transform_8(%arg0: i32) -> (i32, i32) {
    %c0_i32 = arith.constant 0 : i32
    %c0_i32_0 = arith.constant 0 : i32
    %c0_i32_1 = arith.constant 0 : i32
    return %c0_i32, %c0_i32_0 : i32, i32
  }
  func.func @transform_9(%arg0: i32) -> (i32, i32) {
    %c0_i32 = arith.constant 0 : i32
    %c0_i32_0 = arith.constant 0 : i32
    %c0_i32_1 = arith.constant 0 : i32
    return %c0_i32, %c0_i32_0 : i32, i32
  }
  func.func @transform_10(%arg0: i32) -> (i32, i32) {
    %c0_i32 = arith.constant 0 : i32
    %c0_i32_0 = arith.constant 0 : i32
    %c0_i32_1 = arith.constant 0 : i32
    return %c0_i32, %c0_i32_0 : i32, i32
  }
  func.func @transform_11(%arg0: i32) -> (i32, i32) {
    %c0_i32 = arith.constant 0 : i32
    %c0_i32_0 = arith.constant 0 : i32
    %c0_i32_1 = arith.constant 0 : i32
    return %c0_i32, %c0_i32_0 : i32, i32
  }
  func.func @transform_12(%arg0: i32) -> (i32, i32) {
    %c0_i32 = arith.constant 0 : i32
    %c0_i32_0 = arith.constant 0 : i32
    %c0_i32_1 = arith.constant 0 : i32
    return %c0_i32, %c0_i32_0 : i32, i32
  }
  func.func @transform_13(%arg0: i32) -> (i32, i32) {
    %c0_i32 = arith.constant 0 : i32
    %c0_i32_0 = arith.constant 0 : i32
    %c0_i32_1 = arith.constant 0 : i32
    return %c0_i32, %c0_i32_0 : i32, i32
  }
  func.func @transform_14(%arg0: i32) -> (i32, i32) {
    %c0_i32 = arith.constant 0 : i32
    %c0_i32_0 = arith.constant 0 : i32
    return %arg0, %c0_i32 : i32, i32
  }
  func.func @transform_15(%arg0: i32) -> (i32, i32) {
    %c0_i32 = arith.constant 0 : i32
    %c0_i32_0 = arith.constant 0 : i32
    return %arg0, %c0_i32 : i32, i32
  }
}

</mosaic_0001>

<bundles_post_ra>
// kernel: forward.3
= control target key start
LH: loop header
LB: loop body
LE: loop exit
PB: predicated region body
PF: predicated region fallthrough
CT: control target
= control target key end

     0   :  { %s1566_s21 = smov 0   ;;  %s1625_s0 = inlined_call_operand.vmem [shape: f32[32,4], index: 0, kind: input, shape index: {}]   ;;  %s1626_s1 = inlined_call_operand.vmem [shape: f32[4,4], index: 1, kind: input, shape index: {}]   ;;  %s1627_s2 = inlined_call_operand.vmem [shape: f32[1,4], index: 2, kind: input, shape index: {}]   ;;  %s1628_s3 = inlined_call_operand.vmem [shape: f32[4,32], index: 3, kind: input, shape index: {}]   ;;  %s1629_s4 = inlined_call_operand.vmem [shape: f32[1,32], index: 4, kind: input, shape index: {}]   ;;  %s1630_s5 = inlined_call_operand.vmem [shape: f32[32,4], index: 5, kind: output, shape index: {0}]   ;;  %s1631_s6 = inlined_call_operand.vmem [shape: f32[32,32], index: 6, kind: output, shape index: {1}]  }
   0x1 LB: > { %s1380_s22 = sadd.s32 4294967295, %s1529_s21   ;;  %p1384_p0 = scmp.ge.s32.totalorder %s1529_s21, 1  ;;  %s1529_s21 = sphi %s1566_s21, %s17_s21  }
   0x2   : > { %p216_p1 = scmp.lt.s32.totalorder %s1529_s21, 3 }
   0x4   : > { %p217_p2 = pnand %p1384_p0, %p216_p1 }
   0x5   : > { %v271_v0 = vld [vmem:[%s1626_s1] sm:$0xf] (!%p217_p2)  ;;  %vm286_vm0 = vcmask (!%p217_p2), 1043456   ;;  %s1385_s27 = sshll.u32 (!%p217_p2), %s1380_s22, 1  ;;  %vm279_vm1 = vcmask (!%p217_p2), 31744   ;;  %vm1287_vm2 = vcmask (!%p217_p2), 261120  }
   0x6   : > { %220 = sbr.rel (%p217_p2) target bundleno = 288 (0x120), region = 40  ;;  %v787_v1 = vld [vmem:[%s1628_s3] sm:$0xf] (!%p217_p2)  ;;  %v288_v2 = vsel (!%p217_p2), %vm286_vm0, %v271_v0, 0  ;;  %p252_p3 = scmp.lt.s32.totalorder (!%p217_p2), %s1385_s27, 3 }
   0x7   : > { %v796_v3 = vsel (!%p217_p2), %vm286_vm0, %v787_v1, 0  ;;  %v1580_v4 = vand.u32 (!%p217_p2), 4294901760, %v288_v2  ;;  %v1391_v28 = vld [vmem:[%s1627_s2] ss:$0 sm:$0xff] (!%p217_p2) }
   0x8   : > { %v1582_v5 = vand.u32 (!%p217_p2), 4294901760, %v796_v3  ;;  %v1392_v29 = vld [vmem:[%s1629_s4] ss:$0 sm:$0xff] (!%p217_p2) }
   0x9   : > { %1431 = vmatprep.subr.mxu0 (!%p217_p2), %v1580_v4  ;;  %v378_v6 = vsub.f32 (!%p217_p2), %v288_v2, %v1580_v4 }
   0xa   : > { %1461 = vmatprep.subr.mxu1 (!%p217_p2), %v1582_v5  ;;  %v886_v7 = vsub.f32 (!%p217_p2), %v796_v3, %v1582_v5  ;;  %1432 = vmatpush3.msra.mxu0 (!%p217_p2), %v1580_v4 }
   0xb   : > { %1462 = vmatpush3.msra.mxu1 (!%p217_p2), %v1582_v5  ;;  %v379_v8 = vand.u32 (!%p217_p2), 4294901760, %v378_v6 }
   0xc   : > { %v887_v9 = vand.u32 (!%p217_p2), 4294901760, %v886_v7 }
   0xd   : > { %s1633_s27 = smov (!%p252_p3, %s1385_s27), 3  ;;  %v380_v13 = vsub.f32 %v378_v6, %v379_v8 }
   0xe   : > { %s1589_s28 = sshll.u32 %s1633_s27, 3  ;;  %v888_v15 = vsub.f32 %v886_v7, %v887_v9 }
   0xf   : > { %s255_s7 = scalar_lea.vmem %s1625_s0, %s1589_s28  ;;  %v381_v18 = vand.u32 4294901760, %v380_v13  ;;  %s267_s14 = scalar_lea.vmem %s1631_s6, %s1589_s28 }
  0x10   : > { %v269_v10 = vld [vmem:[%s255_s7] sm:$0xff]  ;;  %v270_v11 = vld [vmem:[%s255_s7 + $0x8] sm:$0xff]  ;;  %v889_v19 = vand.u32 4294901760, %v888_v15  ;;  %s261_s17 = scalar_lea.vmem %s1630_s5, %s1589_s28 }
  0x11   : > { %v281_v12 = vsel %vm279_vm1, %v269_v10, 0  ;;  %v284_v14 = vsel %vm279_vm1, %v270_v11, 0  ;;  %1436 = vmatprep.subr.mxu0 %v381_v18 }
  0x12   : > { %v356_v16 = vand.u32 4294901760, %v281_v12  ;;  %v366_v17 = vand.u32 4294901760, %v284_v14  ;;  %1466 = vmatprep.subr.mxu1 %v889_v19 }
  0x14   : > { %v357_v20 = vsub.f32 %v281_v12, %v356_v16  ;;  %v367_v21 = vsub.f32 %v284_v14, %v366_v17 }
  0x16   : > { %v358_v22 = vand.u32 4294901760, %v357_v20  ;;  %v368_v23 = vand.u32 4294901760, %v367_v21 }
  0x18   : > { %v359_v24 = vsub.f32 %v357_v20, %v358_v22  ;;  %v369_v25 = vsub.f32 %v367_v21, %v368_v23 }
  0x1a   : > { %v360_v26 = vand.u32 4294901760, %v359_v24  ;;  %v370_v27 = vand.u32 4294901760, %v369_v25 }
  0x1c   : > { %1433 = vmatprep.mubr.f32.mxu0 %v360_v26  ;;  %1463 = vmatprep.mubr.f32.mxu1 %v360_v26 }
  0x1d   : > { %1434 = vmatmul.mubr.f32.vlgmr.msra.gmra.mrb[0].mxu0 %v370_v27  ;;  %1464 = vmatmul.mubr.f32.vlgmr.msra.gmra.mrb[0].mxu1 %v370_v27 }
  0x1e   : > { %1437 = vmatpush3.msra.mxu0 %v381_v18  ;;  %1467 = vmatpush3.msra.mxu1 %v889_v19 }
  0x1f   : > { %1438 = vmatprep.mubr.f32.mxu0 %v356_v16  ;;  %1441 = vmatprep.subr.mxu0 %v378_v6 }
  0x20   : > { %1468 = vmatprep.mubr.f32.mxu1 %v356_v16  ;;  %1471 = vmatprep.subr.mxu1 %v886_v7 }
  0x25   : > { %1439 = vmatmul.mubr.f32.vlgmr.msra.gmra.mrb[0].mxu0 %v366_v17  ;;  %1469 = vmatmul.mubr.f32.vlgmr.msra.gmra.mrb[0].mxu1 %v366_v17 }
  0x26   : > { %1442 = vmatpush3.msra.mxu0 %v378_v6  ;;  %1472 = vmatpush3.msra.mxu1 %v886_v7 }
  0x27   : > { %1443 = vmatprep.mubr.f32.mxu0 %v357_v20  ;;  %1446 = vmatprep.subr.mxu0 %v1580_v4 }
  0x28   : > { %1473 = vmatprep.mubr.f32.mxu1 %v357_v20  ;;  %1476 = vmatprep.subr.mxu1 %v1582_v5 }
  0x2d   : > { %1444 = vmatmul.mubr.f32.vlgmr.msra.gmra.mrb[0].mxu0 %v367_v21  ;;  %1474 = vmatmul.mubr.f32.vlgmr.msra.gmra.mrb[0].mxu1 %v367_v21 }
  0x2e   : > { %1447 = vmatpush3.msra.mxu0 %v1580_v4  ;;  %1477 = vmatpush3.msra.mxu1 %v1582_v5 }
  0x2f   : > { %1448 = vmatprep.mubr.f32.mxu0 %v358_v22  ;;  %1451 = vmatprep.subr.mxu0 %v379_v8 }
  0x30   : > { %1478 = vmatprep.mubr.f32.mxu1 %v358_v22  ;;  %1481 = vmatprep.subr.mxu1 %v887_v9 }
  0x35   : > { %1449 = vmatmul.mubr.f32.vlgmr.msra.gmra.mrb[0].mxu0 %v368_v23  ;;  %1479 = vmatmul.mubr.f32.vlgmr.msra.gmra.mrb[0].mxu1 %v368_v23 }
  0x36   : > { %1452 = vmatpush3.msra.mxu0 %v379_v8  ;;  %1482 = vmatpush3.msra.mxu1 %v887_v9 }
  0x37   : > { %1453 = vmatprep.mubr.f32.mxu0 %v356_v16  ;;  %1456 = vmatprep.subr.mxu0 %v1580_v4 }
  0x38   : > { %1483 = vmatprep.mubr.f32.mxu1 %v356_v16  ;;  %1486 = vmatprep.subr.mxu1 %v1582_v5 }
  0x3d   : > { %1454 = vmatmul.mubr.f32.vlgmr.msra.gmra.mrb[0].mxu0 %v366_v17  ;;  %1484 = vmatmul.mubr.f32.vlgmr.msra.gmra.mrb[0].mxu1 %v366_v17 }
  0x3e   : > { %1457 = vmatpush3.msra.mxu0 %v1580_v4  ;;  %1487 = vmatpush3.msra.mxu1 %v1582_v5 }
  0x3f   : > { %1458 = vmatprep.mubr.f32.mxu0 %v356_v16  ;;  %1488 = vmatprep.mubr.f32.mxu1 %v356_v16 }
  0x45   : > { %1459 = vmatmul.mubr.f32.vlgmr.msra.gmra.mrb[0].mxu0 %v366_v17  ;;  %1489 = vmatmul.mubr.f32.vlgmr.msra.gmra.mrb[0].mxu1 %v366_v17 }
 0x118   : > { %v1460_v30 = vpop.f32.mrb[0].mxu0  ;;  %v1490_v31 = vpop.f32.mrb[0].mxu1 }
 0x119   : > { %v1491_v32 = vadd.f32 %v1460_v30, %v1391_v28  ;;  %v769_v33 = vpop.f32.mrb[1].mxu0  ;;  %v1277_v34 = vpop.f32.mrb[1].mxu1  ;;  %v1493_v38 = vadd.f32 %v1490_v31, %v1392_v29 }
 0x11a   : > { %v1492_v35 = vadd.f32 %v1391_v28, %v769_v33  ;;  %v1494_v36 = vadd.f32 %v1392_v29, %v1277_v34 }
 0x11b   : > { %v782_v37 = vmul.f32 0.2, %v1491_v32  ;;  %vm780_vm3 = vcmp.gt.f32.partialorder %v1491_v32, 0.0  ;;  %1289 = vst.msk [vmem:[%s267_s14 + $0x8] sm:$0xff] %vm1287_vm2, %v1493_v38 }
 0x11c   : > { %vm779_vm4 = vcmp.gt.f32.partialorder %v1492_v35, 0.0  ;;  %v781_v39 = vmul.f32 0.2, %v1492_v35  ;;  %1288 = vst.msk [vmem:[%s267_s14] sm:$0xff] %vm1287_vm2, %v1494_v36 }
 0x11d   : > { %v784_v41 = vsel %vm780_vm3, %v1491_v32, %v782_v37 }
 0x11e   : > { %v783_v40 = vsel %vm779_vm4, %v1492_v35, %v781_v39  ;;  %786 = vst.msk [vmem:[%s261_s17 + $0x8] sm:$0xff] %vm279_vm1, %v784_v41 }
 0x11f   : > { %785 = vst.msk [vmem:[%s261_s17] sm:$0xff] %vm279_vm1, %v783_v40 }
 0x120 PF: > { %s17_s21 = sadd.s32 1, %s1529_s21  }
 0x121   : > { %p14_p4 = scmp.ge.s32.totalorder %s17_s21, 4  }
 0x123   :  { %16 = sbr.rel (!%p14_p4) target bundleno = 1 (0x1), region = 82 }

// kernel: forward.4
= control target key start
LH: loop header
LB: loop body
LE: loop exit
PB: predicated region body
PF: predicated region fallthrough
CT: control target
= control target key end

     0   :  { %s15604_s21 = smov 0   ;;  %s19556_s0 = inlined_call_operand.vmem [shape: s32[256,1], index: 0, kind: input, shape index: {}]   ;;  %s19557_s1 = inlined_call_operand.vmem [shape: f32[32,3], index: 1, kind: input, shape index: {}]   ;;  %s19558_s2 = inlined_call_operand.vmem [shape: f32[32,7], index: 2, kind: input, shape index: {}]   ;;  %s19559_s3 = inlined_call_operand.vmem [shape: f32[3,4], index: 3, kind: input, shape index: {}]   ;;  %s19560_s4 = inlined_call_operand.vmem [shape: f32[3,4], index: 4, kind: input, shape index: {}]   ;;  %s19561_s5 = inlined_call_operand.vmem [shape: f32[1,4], index: 5, kind: input, shape index: {}]   ;;  %s19562_s6 = inlined_call_operand.vmem [shape: f32[1,4], index: 6, kind: input, shape index: {}]   ;;  %s19563_s7 = inlined_call_operand.vmem [shape: f32[4,8], index: 7, kind: input, shape index: {}]   ;;  %s19564_s8 = inlined_call_operand.vmem [shape: f32[4,8], index: 8, kind: input, shape index: {}]   ;;  %s19565_s9 = inlined_call_operand.vmem [shape: f32[4,8], index: 9, kind: input, shape index: {}]   ;;  %s19566_s10 = inlined_call_operand.vmem [shape: f32[4,8], index: 10, kind: input, shape index: {}]   ;;  %s19567_s11 = inlined_call_operand.vmem [shape: f32[1,8], index: 11, kind: input, shape index: {}]   ;;  %s19568_s12 = inlined_call_operand.vmem [shape: f32[32,8], index: 12, kind: output, shape index: {}]  }
   0x1 LB: > { %s11391_s22 = sadd.s32 4294967295, %s15532_s21   ;;  %p11395_p0 = scmp.ge.s32.totalorder %s15532_s21, 1  ;;  %s15532_s21 = sphi %s15604_s21, %s22_s21  }
   0x2   : > { %p374_p1 = scmp.lt.s32.totalorder %s15532_s21, 3 }
   0x4   : > { %p375_p2 = pnand %p11395_p0, %p374_p1 }
   0x6   : > { %378 = sbr.rel (%p375_p2) target bundleno = 2819 (0xb03), region = 68 }
   0xd   : > { %s11396_s23 = sshll.u32 %s11391_s22, 4  ;;  %v15534_v0 = vmov 0   ;;  %v553_v5 = vld [vmem:[%s19558_s2] sm:$0xff]  ;;  %v554_v6 = vld [vmem:[%s19558_s2 + $0x8] sm:$0xff]  ;;  %v555_v11 = vld [vmem:[%s19558_s2 + $0x10] sm:$0xff]  ;;  %v455_v47 = vlaneseq  ;;  %vm557_vm0 = vcmask 261120  }
   0xe   : > { %15453 = vset.pattern.permute.xlu1 %v15534_v0  ;;  %15452 = vset.pattern.permute.xlu0 %v15534_v0  ;;  %p422_p3 = scmp.lt.s32.totalorder %s11396_s23, 31  ;;  %v607_v9 = vand.u32 4294901760, %v553_v5  ;;  %v610_v10 = vand.u32 4294901760, %v554_v6  ;;  %v556_v12 = vld [vmem:[%s19558_s2 + $0x18] sm:$0xff]  ;;  %v613_v14 = vand.u32 4294901760, %v555_v11  ;;  %v19603_v51 = vmov 0.0  }
   0xf   : > { %v616_v15 = vand.u32 4294901760, %v556_v12  ;;  %v15693_v48 = vand.u32 127, %v455_v47  ;;  %s11398_s18 = sshll.u32 %s11391_s22, 1  ;;  %s15536_s26 = smov 124  }
  0x10   : > { %s20182_s23 = smov (!%p422_p3, %s11396_s23), 31  ;;  %v15637_v13 = vpack.c.bf16 %v610_v10, %v607_v9  ;;  %v15649_v21 = vsub.f32 %v553_v5, %v607_v9  ;;  %v15651_v22 = vsub.f32 %v554_v6, %v610_v10  ;;  %v15670_v36 = vsub.f32 %v555_v11, %v613_v14  ;;  %p428_p4 = scmp.lt.s32.totalorder %s11398_s18, 3 }
  0x11   : > { %s11397_s24 = sshll.u32 %s20182_s23, 3  ;;  %v15642_v18 = vpack.c.bf16 %v616_v15, %v613_v14  ;;  %v15672_v37 = vsub.f32 %v556_v12, %v616_v15  ;;  %19841 = vst [vmem:[#allocation2_spill] sm:$0xff] %v15693_v48 }
  0x12   : > { %s15617_s27 = scalar_lea.vmem %s19556_s0, %s11397_s24  ;;  %14226 = vmatprep.subr.bf16.mxu0 %v15637_v13  ;;  %v19588_v25 = vand.u32 4294901760, %v15649_v21  ;;  %v19587_v26 = vand.u32 4294901760, %v15651_v22  ;;  %v19585_v38 = vand.u32 4294901760, %v15670_v36  ;;  %v15686_v45 = vpack.c.bf16 %v15651_v22, %v15649_v21  ;;  %s20184_s18 = smov (!%p428_p4, %s11398_s18), 3 }
  0x13   : > { %v441_v1 = vld [vmem:[%s15617_s27 + $0x10] sm:$0xff]  ;;  %v439_v2 = vld [vmem:[%s15617_s27] sm:$0xff]  ;;  %v442_v3 = vld [vmem:[%s15617_s27 + $0x18] sm:$0xff]  ;;  %14228 = vmatpush3.bf16.msra.mxu0 %v15637_v13  ;;  %v19584_v39 = vand.u32 4294901760, %v15672_v37  ;;  %v15690_v46 = vpack.c.bf16 %v15672_v37, %v15670_v36  ;;  %s11399_s19 = sshll.u32 %s20184_s18, 3 }
  0x14   : > { %464 = vperm.xlu1 %15453, %v441_v1   ;;  %458 = vperm.xlu0 %15452, %v439_v2   ;;  %v440_v4 = vld [vmem:[%s15617_s27 + $0x8] sm:$0xff]  ;;  %v443_v8 = vld [vmem:[%s15617_s27 + $0x20] sm:$0xff]  ;;  %v446_v16 = vld [vmem:[%s15617_s27 + $0x38] sm:$0xff]  ;;  %v839_v27 = vsub.f32 %v15649_v21, %v19588_v25  ;;  %v846_v28 = vsub.f32 %v15651_v22, %v19587_v26  ;;  %v853_v40 = vsub.f32 %v15670_v36, %v19585_v38  ;;  %s431_s23 = scalar_lea.vmem %s19557_s1, %s11399_s19  ;;  %s437_s13 = scalar_lea.vmem %s19568_s12, %s11399_s19 }
  0x15   : > { %v444_v7 = vld [vmem:[%s15617_s27 + $0x28] sm:$0xff]  ;;  %v445_v17 = vld [vmem:[%s15617_s27 + $0x30] sm:$0xff]  ;;  %14230 = vmatprep.subr.bf16.mxu0 %v15642_v18  ;;  %v447_v20 = vld [vmem:[%s15617_s27 + $0x40] sm:$0xff]  ;;  %v860_v41 = vsub.f32 %v15672_v37, %v19584_v39 }
  0x16   : > { %v448_v19 = vld [vmem:[%s15617_s27 + $0x48] sm:$0xff]  ;;  %v450_v23 = vld [vmem:[%s15617_s27 + $0x58] sm:$0xff]  ;;  %v449_v24 = vld [vmem:[%s15617_s27 + $0x50] sm:$0xff]  ;;  %v840_v31 = vand.u32 4294901760, %v839_v27  ;;  %v847_v32 = vand.u32 4294901760, %v846_v28  ;;  %v854_v42 = vand.u32 4294901760, %v853_v40 }
  0x17   : > { %14232 = vmatpush3.bf16.msra.mxu0 %v15642_v18  ;;  %v452_v29 = vld [vmem:[%s15617_s27 + $0x68] sm:$0xff]  ;;  %v451_v30 = vld [vmem:[%s15617_s27 + $0x60] sm:$0xff]  ;;  %v454_v34 = vld [vmem:[%s15617_s27 + $0x78] sm:$0xff]  ;;  %v861_v43 = vand.u32 4294901760, %v860_v41 }
  0x18   : > { %467 = vperm.xlu1 %15453, %v442_v3   ;;  %461 = vperm.xlu0 %15452, %v440_v4   ;;  %v15665_v33 = vpack.c.bf16 %v847_v32, %v840_v31  ;;  %v453_v35 = vld [vmem:[%s15617_s27 + $0x70] sm:$0xff]  ;;  %s15537_s27 = smov 4  }
  0x19   : > { %v15682_v44 = vpack.c.bf16 %v861_v43, %v854_v42 }
  0x1a   : > { %14234 = vmatprep.subr.bf16.mxu0 %v15665_v33 }
  0x1c   : > { %473 = vperm.xlu1 %15453, %v444_v7   ;;  %470 = vperm.xlu0 %15452, %v443_v8  }
  0x20   : > { %479 = vperm.xlu1 %15453, %v446_v16   ;;  %476 = vperm.xlu0 %15452, %v445_v17  }
  0x24   : > { %485 = vperm.xlu1 %15453, %v448_v19   ;;  %482 = vperm.xlu0 %15452, %v447_v20  }
  0x28   : > { %491 = vperm.xlu1 %15453, %v450_v23   ;;  %488 = vperm.xlu0 %15452, %v449_v24  }
  0x2c   : > { %497 = vperm.xlu1 %15453, %v452_v29   ;;  %494 = vperm.xlu0 %15452, %v451_v30  }
  0x30   : > { %503 = vperm.xlu1 %15453, %v454_v34   ;;  %500 = vperm.xlu0 %15452, %v453_v35  }
  0x93   : > { %v465_v49 = vpop.permute.xlu1 %464  ;;  %v459_v50 = vpop.permute.xlu0 %458 }
  0x94   : > { %vm507_vm1 = vcmp.eq.s32.totalorder %v465_v49, %v15693_v48  ;;  %vm505_vm2 = vcmp.eq.s32.totalorder %v459_v50, %v15693_v48 }
  0x95   : > { %v15698_v52 = vsel %vm507_vm1, 1.0, %v19603_v51  ;;  %v15701_v53 = vsel %vm505_vm2, 1.0, %v19603_v51 }
  0x96   : > { %19842 = vst [vmem:[#allocation3_spill] sm:$0xff] %v15698_v52  ;;  %v565_v54 = vsel %vm557_vm0, %v15698_v52, 0  ;;  %v559_v55 = vsel %vm557_vm0, %v15701_v53, 0 }
  0x97   : > { %v15707_v56 = vsub.f32 %v565_v54, %v565_v54  ;;  %v468_v57 = vpop.permute.xlu1 %467  ;;  %v462_v58 = vpop.permute.xlu0 %461  ;;  %v15709_v59 = vsub.f32 %v559_v55, %v559_v55 }
  0x98   : > { %vm508_vm3 = vcmp.eq.s32.totalorder %v468_v57, %v15693_v48  ;;  %vm506_vm4 = vcmp.eq.s32.totalorder %v462_v58, %v15693_v48 }
  0x99   : > { %v15714_v60 = vsel %vm508_vm3, 1.0, %v19603_v51  ;;  %v15717_v61 = vsel %vm506_vm4, 1.0, %v19603_v51  ;;  %v19586_v62 = vand.u32 4294901760, %v15709_v59  ;;  %v19582_v1 = vand.u32 4294901760, %v15707_v56 }
  0x9a   : > { %19843 = vst [vmem:[#allocation4_spill] sm:$0xff] %v15714_v60  ;;  %19844 = vst [vmem:[#allocation5_spill] sm:$0xff] %v15717_v61  ;;  %v568_v63 = vsel %vm557_vm0, %v15714_v60, 0  ;;  %v562_v0 = vsel %vm557_vm0, %v15717_v61, 0 }
  0x9b   : > { %v15725_v2 = vsub.f32 %v568_v63, %v568_v63  ;;  %v15727_v3 = vsub.f32 %v562_v0, %v562_v0  ;;  %v474_v4 = vpop.permute.xlu1 %473  ;;  %v471_v5 = vpop.permute.xlu0 %470  ;;  %v678_v6 = vsub.f32 %v15709_v59, %v19586_v62  ;;  %v698_v14 = vsub.f32 %v15707_v56, %v19582_v1 }
  0x9c   : > { %vm510_vm5 = vcmp.eq.s32.totalorder %v474_v4, %v15693_v48  ;;  %vm509_vm6 = vcmp.eq.s32.totalorder %v471_v5, %v15693_v48 }
  0x9d   : > { %v15735_v7 = vsel %vm510_vm5, 1.0, %v19603_v51  ;;  %v15738_v8 = vsel %vm509_vm6, 1.0, %v19603_v51  ;;  %v679_v9 = vand.u32 4294901760, %v678_v6  ;;  %v19583_v10 = vand.u32 4294901760, %v15727_v3 }
  0x9e   : > { %19845 = vst [vmem:[#allocation6_spill] sm:$0xff] %v15735_v7  ;;  %19846 = vst [vmem:[#allocation7_spill] sm:$0xff] %v15738_v8  ;;  %v574_v11 = vsel %vm557_vm0, %v15735_v7, 0  ;;  %v571_v12 = vsel %vm557_vm0, %v15738_v8, 0  ;;  %v19581_v15 = vand.u32 4294901760, %v15725_v2  ;;  %v699_v34 = vand.u32 4294901760, %v698_v14 }
  0x9f   : > { %v15749_v16 = vsub.f32 %v574_v11, %v574_v11  ;;  %v15751_v17 = vsub.f32 %v571_v12, %v571_v12  ;;  %v480_v19 = vpop.permute.xlu1 %479  ;;  %12559 = vmatprep.mubr.f32.mxu0 %v679_v9  ;;  %v477_v20 = vpop.permute.xlu0 %476  ;;  %v688_v23 = vsub.f32 %v15727_v3, %v19583_v10 }
  0xa0   : > { %vm512_vm7 = vcmp.eq.s32.totalorder %v480_v19, %v15693_v48  ;;  %vm511_vm8 = vcmp.eq.s32.totalorder %v477_v20, %v15693_v48  ;;  %v708_v24 = vsub.f32 %v15725_v2, %v19581_v15 }
  0xa1   : > { %v15762_v27 = vsel %vm512_vm7, 1.0, %v19603_v51  ;;  %v15765_v28 = vsel %vm511_vm8, 1.0, %v19603_v51  ;;  %v689_v29 = vand.u32 4294901760, %v688_v23  ;;  %v19576_v30 = vand.u32 4294901760, %v15751_v17 }
  0xa2   : > { %19847 = vst [vmem:[#allocation8_spill] sm:$0xff] %v15762_v27  ;;  %19848 = vst [vmem:[#allocation9_spill] sm:$0xff] %v15765_v28  ;;  %v580_v31 = vsel %vm557_vm0, %v15762_v27, 0  ;;  %v577_v32 = vsel %vm557_vm0, %v15765_v28, 0  ;;  %v19575_v35 = vand.u32 4294901760, %v15749_v16  ;;  %v709_v50 = vand.u32 4294901760, %v708_v24 }
  0xa3   : > { %v15773_v40 = vsub.f32 %v580_v31, %v580_v31  ;;  %v15775_v41 = vsub.f32 %v577_v32, %v577_v32  ;;  %v486_v42 = vpop.permute.xlu1 %485  ;;  %12560 = vmatmul.mubr.f32.vlgmr.msra.gmra.mrb[0].mxu0 %v689_v29  ;;  %v483_v43 = vpop.permute.xlu0 %482  ;;  %v718_v49 = vsub.f32 %v15751_v17, %v19576_v30  ;;  %vm1851_vm7 = vcmask 130048  }
  0xa4   : > { %vm514_vm9 = vcmp.eq.s32.totalorder %v486_v42, %v15693_v48  ;;  %14236 = vmatpush3.bf16.msra.mxu0 %v15665_v33  ;;  %vm513_vm10 = vcmp.eq.s32.totalorder %v483_v43, %v15693_v48  ;;  %12562 = vmatprep.mubr.f32.mxu0 %v699_v34  ;;  %v728_v54 = vsub.f32 %v15749_v16, %v19575_v35 }
  0xa5   : > { %v15787_v55 = vsel %vm514_vm9, 1.0, %v19603_v51  ;;  %v15790_v57 = vsel %vm513_vm10, 1.0, %v19603_v51  ;;  %v719_v58 = vand.u32 4294901760, %v718_v49  ;;  %v19574_v63 = vand.u32 4294901760, %v15775_v41  ;;  %14238 = vmatprep.subr.bf16.mxu0 %v15682_v44 }
  0xa6   : > { %19849 = vst [vmem:[#allocation10_spill] sm:$0xff] %v15787_v55  ;;  %19850 = vst [vmem:[#allocation11_spill] sm:$0xff] %v15790_v57  ;;  %v586_v33 = vsel %vm557_vm0, %v15787_v55, 0  ;;  %v583_v0 = vsel %vm557_vm0, %v15790_v57, 0  ;;  %v19573_v4 = vand.u32 4294901760, %v15773_v40  ;;  %v729_v14 = vand.u32 4294901760, %v728_v54 }
  0xa7   : > { %v15799_v5 = vsub.f32 %v586_v33, %v586_v33  ;;  %v15801_v6 = vsub.f32 %v583_v0, %v583_v0  ;;  %v492_v9 = vpop.permute.xlu1 %491  ;;  %12563 = vmatmul.mubr.f32.gmra.mrb[2].mxu0 %v709_v50  ;;  %v489_v11 = vpop.permute.xlu0 %488  ;;  %v738_v12 = vsub.f32 %v15775_v41, %v19574_v63 }
  0xa8   : > { %vm516_vm11 = vcmp.eq.s32.totalorder %v492_v9, %v15693_v48  ;;  %vm515_vm12 = vcmp.eq.s32.totalorder %v489_v11, %v15693_v48  ;;  %12565 = vmatprep.mubr.f32.mxu0 %v719_v58  ;;  %v748_v19 = vsub.f32 %v15773_v40, %v19573_v4  ;;  %14240 = vmatpush3.bf16.msra.mxu0 %v15682_v44 }
  0xa9   : > { %v15813_v20 = vsel %vm516_vm11, 1.0, %v19603_v51  ;;  %v15816_v23 = vsel %vm515_vm12, 1.0, %v19603_v51  ;;  %v739_v24 = vand.u32 4294901760, %v738_v12  ;;  %v19572_v29 = vand.u32 4294901760, %v15801_v6  ;;  %14242 = vmatprep.subr.bf16.mxu0 %v15686_v45 }
  0xaa   : > { %19851 = vst [vmem:[#allocation12_spill] sm:$0xff] %v15813_v20  ;;  %19852 = vst [vmem:[#allocation13_spill] sm:$0xff] %v15816_v23  ;;  %v592_v31 = vsel %vm557_vm0, %v15813_v20, 0  ;;  %v589_v32 = vsel %vm557_vm0, %v15816_v23, 0  ;;  %v19569_v34 = vand.u32 4294901760, %v15799_v5  ;;  %v749_v54 = vand.u32 4294901760, %v748_v19 }
  0xab   : > { %v15825_v44 = vsub.f32 %v592_v31, %v592_v31  ;;  %v15827_v42 = vsub.f32 %v589_v32, %v589_v32  ;;  %v498_v43 = vpop.permute.xlu1 %497  ;;  %12566 = vmatmul.mubr.f32.gmra.mrb[4].mxu0 %v729_v14  ;;  %v495_v49 = vpop.permute.xlu0 %494  ;;  %v758_v50 = vsub.f32 %v15801_v6, %v19572_v29 }
  0xac   : > { %vm518_vm13 = vcmp.eq.s32.totalorder %v498_v43, %v15693_v48  ;;  %vm517_vm14 = vcmp.eq.s32.totalorder %v495_v49, %v15693_v48  ;;  %12568 = vmatprep.mubr.f32.mxu0 %v739_v24  ;;  %v768_v58 = vsub.f32 %v15799_v5, %v19569_v34 }
  0xad   : > { %v15838_v33 = vsel %vm518_vm13, 1.0, %v19603_v51  ;;  %v15841_v0 = vsel %vm517_vm14, 1.0, %v19603_v51  ;;  %v759_v9 = vand.u32 4294901760, %v758_v50  ;;  %v19570_v11 = vand.u32 4294901760, %v15827_v42 }
  0xae   : > { %19853 = vst [vmem:[#allocation14_spill] sm:$0xff] %v15838_v33  ;;  %19854 = vst [vmem:[#allocation15_spill] sm:$0xff] %v15841_v0  ;;  %v598_v12 = vsel %vm557_vm0, %v15838_v33, 0  ;;  %v595_v14 = vsel %vm557_vm0, %v15841_v0, 0  ;;  %v19571_v19 = vand.u32 4294901760, %v15825_v44  ;;  %v769_v50 = vand.u32 4294901760, %v768_v58 }
  0xaf   : > { %v15849_v24 = vsub.f32 %v598_v12, %v598_v12  ;;  %v15851_v31 = vsub.f32 %v595_v14, %v595_v14  ;;  %v504_v32 = vpop.permute.xlu1 %503  ;;  %12569 = vmatmul.mubr.f32.gmra.mrb[6].mxu0 %v749_v54  ;;  %v501_v43 = vpop.permute.xlu0 %500  ;;  %v778_v49 = vsub.f32 %v15827_v42, %v19570_v11 }
  0xb0   : > { %vm520_vm15 = vcmp.eq.s32.totalorder %v504_v32, %v15693_v48  ;;  %vm519_vm1 = vcmp.eq.s32.totalorder %v501_v43, %v15693_v48  ;;  %12571 = vmatprep.mubr.f32.mxu0 %v759_v9  ;;  %v788_v12 = vsub.f32 %v15825_v44, %v19571_v19 }
  0xb1   : > { %v15862_v14 = vsel %vm520_vm15, 1.0, %v19603_v51  ;;  %v15865_v54 = vsel %vm519_vm1, 1.0, %v19603_v51  ;;  %v779_v34 = vand.u32 4294901760, %v778_v49  ;;  %v19580_v11 = vand.u32 4294901760, %v15851_v31 }
  0xb2   : > { %19855 = vst [vmem:[#allocation16_spill] sm:$0xff] %v15862_v14  ;;  %19856 = vst [vmem:[#allocation17_spill] sm:$0xff] %v15865_v54  ;;  %v604_v32 = vsel %vm557_vm0, %v15862_v14, 0  ;;  %v601_v58 = vsel %vm557_vm0, %v15865_v54, 0  ;;  %v19579_v9 = vand.u32 4294901760, %v15849_v24  ;;  %v789_v49 = vand.u32 4294901760, %v788_v12 }
  0xb3   : > { %v15873_v43 = vsub.f32 %v604_v32, %v604_v32  ;;  %v15875_v19 = vsub.f32 %v601_v58, %v601_v58  ;;  %12572 = vmatmul.mubr.f32.gmra.mrb[8].mxu0 %v769_v50  ;;  %v798_v29 = vsub.f32 %v15851_v31, %v19580_v11  ;;  %v15902_v58 = vshrl.u32 %v455_v47, 7 }
  0xb4   : > { %12574 = vmatprep.mubr.f32.mxu0 %v779_v34  ;;  %v808_v63 = vsub.f32 %v15849_v24, %v19579_v9 }
  0xb5   : > { %v799_v4 = vand.u32 4294901760, %v798_v29  ;;  %v19578_v35 = vand.u32 4294901760, %v15875_v19  ;;  %v19577_v30 = vand.u32 4294901760, %v15873_v43  ;;  %19857 = vst [vmem:[#allocation18_spill] sm:$0xff] %v15902_v58  ;;  %v1740_v47 = vadd.s32 24, %v15902_v58 }
  0xb6   : > { %v809_v34 = vand.u32 4294901760, %v808_v63  ;;  %v1850_v63 = vld [vmem:[%s431_s23 + $0x8] sm:$0xff]  ;;  %v1742_v9 = vadd.s32 40, %v15902_v58  ;;  %v1746_v39 = vadd.s32 72, %v15902_v58  ;;  %v1747_v25 = vadd.s32 80, %v15902_v58 }
  0xb7   : > { %12575 = vmatmul.mubr.f32.gmra.mrb[10].mxu0 %v789_v49  ;;  %v818_v50 = vsub.f32 %v15875_v19, %v19578_v35  ;;  %v828_v29 = vsub.f32 %v15873_v43, %v19577_v30  ;;  %v15905_v49 = vmul.u32 8, %v15693_v48  ;;  %v1904_v30 = vand.u32 4294901760, %v1850_v63 }
  0xb8   : > { %12577 = vmatprep.mubr.f32.mxu0 %v799_v4  ;;  %v1849_v4 = vld [vmem:[%s431_s23] sm:$0xff] }
  0xb9   : > { %v819_v12 = vand.u32 4294901760, %v818_v50  ;;  %v829_v32 = vand.u32 4294901760, %v828_v29  ;;  %v1901_v50 = vand.u32 4294901760, %v1849_v4  ;;  %v15915_v35 = vsub.f32 %v1850_v63, %v1904_v30 }
  0xba   : > { %vm1757_vm5 = vcmp.ge.s32.totalorder %v1740_v47, %v15905_v49  ;;  %v1741_v63 = vadd.s32 32, %v15902_v58  ;;  %vm1759_vm12 = vcmp.ge.s32.totalorder %v1742_v9, %v15905_v49 }
  0xbb   : > { %12578 = vmatmul.mubr.f32.gmra.mrb[12].mxu0 %v809_v34  ;;  %v1739_v34 = vadd.s32 16, %v15902_v58  ;;  %v15913_v29 = vsub.f32 %v1849_v4, %v1901_v50  ;;  %v15949_v15 = vpack.c.bf16 %v1904_v30, %v1901_v50  ;;  %v1743_v30 = vadd.s32 48, %v15902_v58 }
  0xbc   : > { %12580 = vmatprep.mubr.f32.mxu0 %v819_v12  ;;  %v15909_v12 = vadd.s32 8, %v15905_v49  ;;  %vm1758_vm9 = vcmp.ge.s32.totalorder %v1741_v63, %v15905_v49 }
  0xbd   : > { %vm1756_vm2 = vcmp.ge.s32.totalorder %v1739_v34, %v15905_v49  ;;  %vm1760_vm15 = vcmp.ge.s32.totalorder %v1743_v30, %v15905_v49 }
  0xbe   : > { %vm1773_vm3 = vcmp.lt.s32.totalorder %v1739_v34, %v15909_v12  ;;  %vm1774_vm6 = vcmp.lt.s32.totalorder %v1740_v47, %v15909_v12  ;;  %vm1775_vm10 = vcmp.lt.s32.totalorder %v1741_v63, %v15909_v12  ;;  %vm1776_vm13 = vcmp.lt.s32.totalorder %v1742_v9, %v15909_v12 }
  0xbf   : > { %12581 = vmatmul.mubr.f32.gmra.mrb[14].mxu0 %v829_v32  ;;  %v15922_v32 = vpack.c.bf16 %v15915_v35, %v15913_v29  ;;  %vm1789_vm4 = vmand %vm1756_vm2, %vm1773_vm3  ;;  %v1744_v63 = vadd.s32 56, %v15902_v58  ;;  %vm1777_vm1 = vcmp.lt.s32.totalorder %v1743_v30, %v15909_v12  ;;  %v1745_v30 = vadd.s32 64, %v15902_v58 }
  0xc0   : > { %12591 = vmatprep.mubr.msk.f32.mxu0 %vm557_vm0, %v15701_v53  ;;  %v15929_v4 = vsel %vm1789_vm4, 1.0, %v19603_v51  ;;  %vm1790_vm8 = vmand %vm1757_vm5, %vm1774_vm6 }
  0xc1   : > { %19858 = vst [vmem:[#allocation19_spill] sm:$0xff] %v15922_v32  ;;  %v1859_v34 = vsel %vm1851_vm7, %v15929_v4, 0  ;;  %v15938_v47 = vsel %vm1790_vm8, 1.0, %v19603_v51  ;;  %14873 = vmatprep.subr.bf16.mxu1 %v15922_v32  ;;  %vm1791_vm11 = vmand %vm1758_vm9, %vm1775_vm10  ;;  %vm1761_vm3 = vcmp.ge.s32.totalorder %v1744_v63, %v15905_v49  ;;  %vm1778_vm4 = vcmp.lt.s32.totalorder %v1744_v63, %v15909_v12 }
  0xc2   : > { %v15943_v11 = vsub.f32 %v1859_v34, %v1859_v34  ;;  %14874 = vmatpush3.bf16.msra.mxu1 %v15922_v32  ;;  %v15960_v34 = vsel %vm1791_vm11, 1.0, %v19603_v51  ;;  %vm1792_vm14 = vmand %vm1759_vm12, %vm1776_vm13  ;;  %vm1762_vm6 = vcmp.ge.s32.totalorder %v1745_v30, %v15905_v49  ;;  %vm1779_vm8 = vcmp.lt.s32.totalorder %v1745_v30, %v15909_v12 }
  0xc3   : > { %12592 = vmatmul.mubr.msk.f32.vlgmr.msra.gmra.mrb[0].mxu0 %vm557_vm0, %v15717_v61  ;;  %v1865_v50 = vsel %vm1851_vm7, %v15960_v34, 0  ;;  %v15969_v9 = vsel %vm1792_vm14, 1.0, %v19603_v51  ;;  %vm1793_vm2 = vmand %vm1760_vm15, %vm1777_vm1  ;;  %14286 = vmatprep.subr.bf16.mxu1 %v15949_v15  ;;  %vm1763_vm10 = vcmp.ge.s32.totalorder %v1746_v39, %v15905_v49  ;;  %vm1780_vm11 = vcmp.lt.s32.totalorder %v1746_v39, %v15909_v12 }
  0xc4   : > { %14244 = vmatpush3.bf16.msra.mxu0 %v15686_v45  ;;  %12594 = vmatprep.mubr.msk.f32.mxu0 %vm557_vm0, %v15698_v52  ;;  %v1862_v45 = vsel %vm1851_vm7, %v15938_v47, 0  ;;  %v1868_v10 = vsel %vm1851_vm7, %v15969_v9, 0  ;;  %vm1794_vm5 = vmand %vm1761_vm3, %vm1778_vm4  ;;  %v1748_v39 = vadd.s32 88, %v15902_v58  ;;  %vm1764_vm13 = vcmp.ge.s32.totalorder %v1747_v25, %v15905_v49 }
  0xc5   : > { %14246 = vmatprep.subr.bf16.mxu0 %v15690_v46  ;;  %v15952_v1 = vsub.f32 %v1862_v45, %v1862_v45  ;;  %12806 = vmatprep.mubr.f32.mxu1 %v15943_v11  ;;  %v15974_v45 = vsub.f32 %v1865_v50, %v1865_v50  ;;  %v15989_v50 = vsel %vm1793_vm2, 1.0, %v19603_v51  ;;  %v15997_v63 = vsel %vm1794_vm5, 1.0, %v19603_v51  ;;  %vm1795_vm9 = vmand %vm1762_vm6, %vm1779_vm8 }
  0xc6   : > { %v1874_v62 = vsel %vm1851_vm7, %v15997_v63, 0  ;;  %vm1796_vm12 = vmand %vm1763_vm10, %vm1780_vm11  ;;  %vm1781_vm14 = vcmp.lt.s32.totalorder %v1747_v25, %v15909_v12  ;;  %vm1765_vm1 = vcmp.ge.s32.totalorder %v1748_v39, %v15905_v49  ;;  %vm1782_vm2 = vcmp.lt.s32.totalorder %v1748_v39, %v15909_v12 }
  0xc7   : > { %12595 = vmatmul.mubr.msk.f32.gmra.mrb[2].mxu0 %vm557_vm0, %v15714_v60  ;;  %12807 = vmatmul.mubr.f32.vlgmr.msra.gmra.mrb[0].mxu1 %v15952_v1  ;;  %v16008_v26 = vsub.f32 %v1874_v62, %v1874_v62  ;;  %v16024_v30 = vsel %vm1796_vm12, 1.0, %v19603_v51  ;;  %vm1797_vm15 = vmand %vm1764_vm13, %vm1781_vm14  ;;  %v1750_v39 = vadd.s32 104, %v15902_v58  ;;  %vm1754_vm11 = vcmp.ge.s32.totalorder %v15902_v58, %v15905_v49 }
  0xc8   : > { %12597 = vmatprep.mubr.msk.f32.mxu0 %vm557_vm0, %v15738_v8  ;;  %14248 = vmatpush3.bf16.msra.mxu0 %v15690_v46  ;;  %v15980_v46 = vsub.f32 %v1868_v10, %v1868_v10  ;;  %v1871_v10 = vsel %vm1851_vm7, %v15989_v50, 0  ;;  %v1880_v32 = vsel %vm1851_vm7, %v16024_v30, 0  ;;  %vm1798_vm3 = vmand %vm1765_vm1, %vm1782_vm2  ;;  %vm1771_vm12 = vcmp.lt.s32.totalorder %v15902_v58, %v15909_v12 }
  0xc9   : > { %14250 = vmatprep.subr.bf16.mxu0 %v15637_v13  ;;  %12809 = vmatprep.mubr.f32.mxu1 %v15974_v45  ;;  %v16002_v38 = vsub.f32 %v1871_v10, %v1871_v10  ;;  %v16016_v10 = vsel %vm1795_vm9, 1.0, %v19603_v51  ;;  %vm1767_vm8 = vcmp.ge.s32.totalorder %v1750_v39, %v15905_v49  ;;  %vm1784_vm9 = vcmp.lt.s32.totalorder %v1750_v39, %v15909_v12  ;;  %vm1787_vm13 = vmand %vm1754_vm11, %vm1771_vm12 }
  0xca   : > { %14288 = vmatpush3.bf16.msra.mxu1 %v15949_v15  ;;  %v1877_v62 = vsel %vm1851_vm7, %v16016_v10, 0  ;;  %vm1800_vm10 = vmand %vm1767_vm8, %vm1784_vm9  ;;  %vm5789_vm9 = vcmask 1043456  }
  0xcb   : > { %12598 = vmatmul.mubr.msk.f32.gmra.mrb[4].mxu0 %vm557_vm0, %v15735_v7  ;;  %12810 = vmatmul.mubr.f32.gmra.mrb[2].mxu1 %v15980_v46  ;;  %v16028_v48 = vsub.f32 %v1877_v62, %v1877_v62  ;;  %v16042_v62 = vsel %vm1797_vm15, 1.0, %v19603_v51 }
  0xcc   : > { %12600 = vmatprep.mubr.msk.f32.mxu0 %vm557_vm0, %v15765_v28  ;;  %12812 = vmatprep.mubr.f32.mxu1 %v16002_v38  ;;  %v1883_v25 = vsel %vm1851_vm7, %v16042_v62, 0 }
  0xcf   : > { %12601 = vmatmul.mubr.msk.f32.gmra.mrb[6].mxu0 %vm557_vm0, %v15762_v27  ;;  %12813 = vmatmul.mubr.f32.gmra.mrb[4].mxu1 %v16008_v26  ;;  %v1749_v27 = vadd.s32 96, %v15902_v58 }
  0xd0   : > { %12603 = vmatprep.mubr.msk.f32.mxu0 %vm557_vm0, %v15790_v57  ;;  %v16034_v57 = vsub.f32 %v1880_v32, %v1880_v32  ;;  %12815 = vmatprep.mubr.f32.mxu1 %v16028_v48  ;;  %v16050_v32 = vsel %vm1798_vm3, 1.0, %v19603_v51  ;;  %v16065_v51 = vadd.s32 8, %v15902_v58 }
  0xd1   : > { %v1886_v28 = vsel %vm1851_vm7, %v16050_v32, 0  ;;  %vm1766_vm4 = vcmp.ge.s32.totalorder %v1749_v27, %v15905_v49  ;;  %vm1783_vm5 = vcmp.lt.s32.totalorder %v1749_v27, %v15909_v12  ;;  %v1751_v27 = vadd.s32 112, %v15902_v58 }
  0xd2   : > { %vm1799_vm6 = vmand %vm1766_vm4, %vm1783_vm5  ;;  %19859 = vst [vmem:[#allocation20_spill] sm:$0xff] %v16065_v51  ;;  %vm1755_vm14 = vcmp.ge.s32.totalorder %v16065_v51, %v15905_v49 }
  0xd3   : > { %12604 = vmatmul.mubr.msk.f32.gmra.mrb[8].mxu0 %vm557_vm0, %v15787_v55  ;;  %12816 = vmatmul.mubr.f32.gmra.mrb[6].mxu1 %v16034_v57  ;;  %v16054_v55 = vsub.f32 %v1883_v25, %v1883_v25  ;;  %v19860_v25 = vmov 0.0   ;;  %vm1768_vm15 = vcmp.ge.s32.totalorder %v1751_v27, %v15905_v49  ;;  %vm1785_vm1 = vcmp.lt.s32.totalorder %v1751_v27, %v15909_v12 }
  0xd4   : > { %12606 = vmatprep.mubr.msk.f32.mxu0 %vm557_vm0, %v15816_v23  ;;  %v16060_v23 = vsub.f32 %v1886_v28, %v1886_v28  ;;  %v16071_v7 = vsel %vm1799_vm6, 1.0, %v19860_v25  ;;  %v16083_v39 = vsel %vm1800_vm10, 1.0, %v19860_v25  ;;  %vm1801_vm2 = vmand %vm1768_vm15, %vm1785_vm1  ;;  %vm1772_vm6 = vcmp.lt.s32.totalorder %v16065_v51, %v15909_v12 }
  0xd5   : > { %12818 = vmatprep.mubr.f32.mxu1 %v16054_v55  ;;  %v1889_v28 = vsel %vm1851_vm7, %v16071_v7, 0  ;;  %v1892_v60 = vsel %vm1851_vm7, %v16083_v39, 0  ;;  %vm1788_vm8 = vmand %vm1755_vm14, %vm1772_vm6  ;;  %v1989_v51 = vand.u32 4294901760, %v15943_v11 }
  0xd6   : > { %v16089_v8 = vsub.f32 %v1889_v28, %v1889_v28  ;;  %v16106_v28 = vsel %vm1801_vm2, 1.0, %v19860_v25 }
  0xd7   : > { %12607 = vmatmul.mubr.msk.f32.gmra.mrb[10].mxu0 %vm557_vm0, %v15813_v20  ;;  %v1752_v20 = vadd.s32 120, %v15902_v58  ;;  %12819 = vmatmul.mubr.f32.gmra.mrb[8].mxu1 %v16060_v23  ;;  %v16100_v58 = vsel %vm1787_vm13, 1.0, %v19860_v25 }
  0xd8   : > { %12609 = vmatprep.mubr.msk.f32.mxu0 %vm557_vm0, %v15841_v0  ;;  %v16095_v0 = vsub.f32 %v1892_v60, %v1892_v60  ;;  %12821 = vmatprep.mubr.f32.mxu1 %v16089_v8  ;;  %v1853_v60 = vsel %vm1851_vm7, %v16100_v58, 0 }
  0xd9   : > { %vm1769_vm3 = vcmp.ge.s32.totalorder %v1752_v20, %v15905_v49  ;;  %vm1786_vm4 = vcmp.lt.s32.totalorder %v1752_v20, %v15909_v12  ;;  %v1895_v20 = vsel %vm1851_vm7, %v16106_v28, 0 }
  0xda   : > { %vm1802_vm5 = vmand %vm1769_vm3, %vm1786_vm4  ;;  %v16125_v52 = vsub.f32 %v1895_v20, %v1895_v20 }
  0xdb   : > { %12610 = vmatmul.mubr.msk.f32.gmra.mrb[12].mxu0 %vm557_vm0, %v15838_v33  ;;  %v16117_v27 = vsel %vm1802_vm5, 1.0, %v19860_v25  ;;  %v16119_v33 = vsub.f32 %v1853_v60, %v1853_v60  ;;  %12822 = vmatmul.mubr.f32.gmra.mrb[10].mxu1 %v16095_v0 }
  0xdc   : > { %12612 = vmatprep.mubr.msk.f32.mxu0 %vm557_vm0, %v15865_v54  ;;  %19861 = vst [vmem:[#allocation21_spill] sm:$0xff] %v16117_v27  ;;  %v1898_v12 = vsel %vm1851_vm7, %v16117_v27, 0  ;;  %v16130_v54 = vsel %vm1788_vm8, 1.0, %v19860_v25  ;;  %12824 = vmatprep.mubr.f32.mxu1 %v16125_v52 }
  0xdd   : > { %19862 = vst [vmem:[#allocation22_spill] sm:$0xff] %v16119_v33  ;;  %v16132_v61 = vsub.f32 %v1898_v12, %v1898_v12  ;;  %v1856_v60 = vsel %vm1851_vm7, %v16130_v54, 0  ;;  %v19628_v20 = vand.u32 4294901760, %v16119_v33  ;;  %v1999_v12 = vand.u32 4294901760, %v15952_v1 }
  0xde   : > { %v16139_v49 = vsub.f32 %v1856_v60, %v1856_v60  ;;  %v16151_v60 = vsub.f32 %v15943_v11, %v1989_v51  ;;  %v19865_v33 = vand.u32 4294901760, %v15651_v22  ;;  %v2009_v11 = vand.u32 4294901760, %v15974_v45 }
  0xdf   : > { %12613 = vmatmul.mubr.msk.f32.gmra.mrb[14].mxu0 %vm557_vm0, %v15862_v14  ;;  %12825 = vmatmul.mubr.f32.gmra.mrb[12].mxu1 %v16132_v61  ;;  %v16156_v14 = vsub.f32 %v15952_v1, %v1999_v12  ;;  %v2029_v22 = vand.u32 4294901760, %v16002_v38 }
  0xe0   : > { %12623 = vmatprep.mubr.f32.mxu0 %v15709_v59  ;;  %12831 = vmatprep.mubr.f32.mxu1 %v19628_v20  ;;  %v19633_v25 = vand.u32 4294901760, %v16139_v49  ;;  %19863 = vst [vmem:[#allocation23_spill] sm:$0xff] %v16151_v60  ;;  %v19864_v20 = vand.u32 4294901760, %v15649_v21  ;;  %v2019_v60 = vand.u32 4294901760, %v15980_v46  ;;  %v16171_v1 = vsub.f32 %v15974_v45, %v2009_v11 }
  0xe2   : > { %v16163_v27 = vpack.c.bf16 %v19865_v33, %v19864_v20  ;;  %v16176_v21 = vsub.f32 %v15980_v46, %v2019_v60  ;;  %v16183_v33 = vsub.f32 %v16002_v38, %v2029_v22  ;;  %v2049_v46 = vand.u32 4294901760, %v16028_v48 }
  0xe3   : > { %12624 = vmatmul.mubr.f32.vlgmr.msra.gmra.mrb[0].mxu0 %v15727_v3  ;;  %12832 = vmatmul.mubr.f32.vlgmr.msra.gmra.mrb[14].mxu1 %v19633_v25  ;;  %v2059_v20 = vand.u32 4294901760, %v16034_v57 }
  0xe4   : > { %14252 = vmatpush3.bf16.msra.mxu0 %v15637_v13  ;;  %12626 = vmatprep.mubr.f32.mxu0 %v15707_v56 }
  0xe5   : > { %14254 = vmatprep.subr.bf16.mxu0 %v15642_v18  ;;  %12834 = vmatprep.mubr.f32.mxu1 %v1989_v51  ;;  %v2039_v51 = vand.u32 4294901760, %v16008_v26  ;;  %v16197_v38 = vsub.f32 %v16034_v57, %v2059_v20  ;;  %v2089_v57 = vand.u32 4294901760, %v16089_v8 }
  0xe7   : > { %12627 = vmatmul.mubr.f32.gmra.mrb[2].mxu0 %v15725_v2  ;;  %12835 = vmatmul.mubr.f32.gmra.mrb[0].mxu1 %v1999_v12  ;;  %v16187_v45 = vsub.f32 %v16008_v26, %v2039_v51  ;;  %v16193_v12 = vsub.f32 %v16028_v48, %v2049_v46  ;;  %v2069_v26 = vand.u32 4294901760, %v16054_v55 }
  0xe8   : > { %12629 = vmatprep.mubr.f32.mxu0 %v15751_v17  ;;  %14256 = vmatpush3.bf16.msra.mxu0 %v15642_v18 }
  0xe9   : > { %14258 = vmatprep.subr.bf16.mxu0 %v16163_v27  ;;  %12837 = vmatprep.mubr.f32.mxu1 %v2009_v11  ;;  %v16203_v11 = vsub.f32 %v16054_v55, %v2069_v26 }
  0xeb   : > { %12630 = vmatmul.mubr.f32.gmra.mrb[4].mxu0 %v15749_v16  ;;  %12838 = vmatmul.mubr.f32.gmra.mrb[2].mxu1 %v2019_v60  ;;  %v2079_v60 = vand.u32 4294901760, %v16060_v23 }
  0xec   : > { %12632 = vmatprep.mubr.f32.mxu0 %v15775_v41  ;;  %12840 = vmatprep.mubr.f32.mxu1 %v2029_v22  ;;  %v2099_v22 = vand.u32 4294901760, %v16095_v0 }
  0xed   : > { %v16207_v48 = vsub.f32 %v16060_v23, %v2079_v60  ;;  %v2137_v23 = vand.u32 4294901760, %v15915_v35 }
  0xee   : > { %v16217_v55 = vsub.f32 %v16095_v0, %v2099_v22 }
  0xef   : > { %12633 = vmatmul.mubr.f32.gmra.mrb[6].mxu0 %v15773_v40  ;;  %12841 = vmatmul.mubr.f32.gmra.mrb[4].mxu1 %v2039_v51  ;;  %19866 = vst [vmem:[#allocation24_spill] sm:$0xff] %v16207_v48  ;;  %v16213_v51 = vsub.f32 %v16089_v8, %v2089_v57  ;;  %v2138_v8 = vsub.f32 %v15915_v35, %v2137_v23  ;;  %v19870_v35 = vand.u32 4294901760, %v15709_v59  ;;  %v19874_v59 = vand.u32 4294901760, %v15707_v56 }
  0xf0   : > { %12635 = vmatprep.mubr.f32.mxu0 %v15801_v6  ;;  %12843 = vmatprep.mubr.f32.mxu1 %v2049_v46  ;;  %19868 = vst [vmem:[#allocation26_spill] sm:$0xff] %v16217_v55  ;;  %v2130_v46 = vand.u32 4294901760, %v15913_v29  ;;  %v19877_v56 = vand.u32 4294901760, %v15749_v16  ;;  %v19881_v16 = vand.u32 4294901760, %v15799_v5 }
  0xf1   : > { %19867 = vst [vmem:[#allocation25_spill] sm:$0xff] %v16213_v51  ;;  %v2139_v55 = vand.u32 4294901760, %v2138_v8 }
  0xf2   : > { %v2131_v25 = vsub.f32 %v15913_v29, %v2130_v46  ;;  %v14289_v48 = vpack.c.bf16 %v2137_v23, %v2130_v46  ;;  %v19872_v29 = vand.u32 4294901760, %v15672_v37  ;;  %v19876_v37 = vand.u32 4294901760, %v15751_v17  ;;  %v19900_v46 = vld [vmem:[#allocation15_spill] sm:$0xff]  ;;  %v19901_v23 = vld [vmem:[#allocation14_spill] sm:$0xff] }
  0xf3   : > { %12636 = vmatmul.mubr.f32.gmra.mrb[8].mxu0 %v15799_v5  ;;  %12844 = vmatmul.mubr.f32.gmra.mrb[6].mxu1 %v2059_v20  ;;  %v2109_v20 = vand.u32 4294901760, %v16125_v52  ;;  %v19880_v17 = vand.u32 4294901760, %v15801_v6  ;;  %v19884_v6 = vand.u32 4294901760, %v15851_v31  ;;  %v19885_v5 = vand.u32 4294901760, %v15849_v24 }
  0xf4   : > { %12638 = vmatprep.mubr.f32.mxu0 %v15827_v42  ;;  %12846 = vmatprep.mubr.f32.mxu1 %v2069_v26  ;;  %v2119_v26 = vand.u32 4294901760, %v16132_v61 }
  0xf5   : > { %v16227_v51 = vsub.f32 %v16125_v52, %v2109_v20  ;;  %14290 = vmatprep.subr.bf16.mxu1 %v14289_v48  ;;  %v19871_v52 = vand.u32 4294901760, %v15670_v36  ;;  %v19875_v36 = vand.u32 4294901760, %v15725_v2  ;;  %v19879_v2 = vand.u32 4294901760, %v15773_v40 }
  0xf6   : > { %v16231_v0 = vsub.f32 %v16132_v61, %v2119_v26  ;;  %14292 = vmatpush3.bf16.msra.mxu1 %v14289_v48  ;;  %v19873_v61 = vand.u32 4294901760, %v15727_v3  ;;  %v19878_v3 = vand.u32 4294901760, %v15775_v41  ;;  %v19882_v41 = vand.u32 4294901760, %v15827_v42  ;;  %v19896_v48 = vld [vmem:[#allocation11_spill] sm:$0xff] }
  0xf7   : > { %12639 = vmatmul.mubr.f32.gmra.mrb[10].mxu0 %v15825_v44  ;;  %12847 = vmatmul.mubr.f32.gmra.mrb[8].mxu1 %v2079_v60  ;;  %19869 = vst [vmem:[#allocation27_spill] sm:$0xff] %v16227_v51  ;;  %v2132_v60 = vand.u32 4294901760, %v2131_v25  ;;  %v14261_v51 = vpack.c.bf16 %v19872_v29, %v19871_v52  ;;  %v19883_v40 = vand.u32 4294901760, %v15825_v44  ;;  %v19886_v42 = vand.u32 4294901760, %v15875_v19  ;;  %v19892_v25 = vld [vmem:[#allocation7_spill] sm:$0xff] }
  0xf8   : > { %12641 = vmatprep.mubr.f32.mxu0 %v15851_v31  ;;  %12849 = vmatprep.mubr.f32.mxu1 %v2089_v57  ;;  %v19887_v44 = vand.u32 4294901760, %v15873_v43  ;;  %v19888_v31 = vld [vmem:[#allocation21_spill] sm:$0xff] }
  0xf9   : > { %v16233_v57 = vpack.c.bf16 %v2139_v55, %v2132_v60  ;;  %14294 = vmatprep.subr.bf16.mxu1 %v15949_v15  ;;  %v19899_v55 = vld [vmem:[#allocation12_spill] sm:$0xff]  ;;  %v19906_v60 = vand.u32 4294901760, %v16139_v49 }
  0xfb   : > { %12642 = vmatmul.mubr.f32.gmra.mrb[12].mxu0 %v15849_v24  ;;  %12850 = vmatmul.mubr.f32.gmra.mrb[10].mxu1 %v2099_v22  ;;  %v19890_v24 = vld [vmem:[#allocation3_spill] sm:$0xff]  ;;  %v19897_v22 = vld [vmem:[#allocation10_spill] sm:$0xff] }
  0xfc   : > { %12644 = vmatprep.mubr.f32.mxu0 %v15875_v19  ;;  %12852 = vmatprep.mubr.f32.mxu1 %v2109_v20  ;;  %v19889_v19 = vld [vmem:[#allocation5_spill] sm:$0xff] }
  0xfd   : > { %v19902_v20 = vld [vmem:[#allocation17_spill] sm:$0xff] }
  0xff   : > { %12645 = vmatmul.mubr.f32.gmra.mrb[14].mxu0 %v15873_v43  ;;  %12853 = vmatmul.mubr.f32.gmra.mrb[12].mxu1 %v2119_v26  ;;  %v19891_v43 = vld [vmem:[#allocation4_spill] sm:$0xff] }
 0x100   : > { %12655 = vmatprep.mubr.f32.mxu0 %v19870_v35  ;;  %12859 = vmatprep.mubr.msk.f32.mxu1 %vm1851_vm7, %v16100_v58  ;;  %v19903_v26 = vld [vmem:[#allocation16_spill] sm:$0xff]  ;;  %v1980_v35 = vsub.f32 %v16139_v49, %v19906_v60 }
 0x102   : > { %v1981_v29 = vand.u32 4294901760, %v1980_v35 }
 0x103   : > { %12656 = vmatmul.mubr.f32.vlgmr.msra.gmra.mrb[0].mxu0 %v19873_v61  ;;  %12860 = vmatmul.mubr.msk.f32.vlgmr.msra.gmra.mrb[14].mxu1 %vm1851_vm7, %v16130_v54  ;;  %v19907_v61 = vld [vmem:[#allocation23_spill] sm:$0xff] }
 0x104   : > { %14260 = vmatpush3.bf16.msra.mxu0 %v16163_v27  ;;  %12658 = vmatprep.mubr.f32.mxu0 %v19874_v59  ;;  %v19894_v27 = vld [vmem:[#allocation9_spill] sm:$0xff]  ;;  %v1991_v59 = vand.u32 4294901760, %v19907_v61 }
 0x105   : > { %14262 = vmatprep.subr.bf16.mxu0 %v14261_v51  ;;  %12862 = vmatprep.mubr.msk.f32.mxu1 %vm1851_vm7, %v15929_v4 }
 0x106   : > { %14296 = vmatpush3.bf16.msra.mxu1 %v15949_v15 }
 0x107   : > { %12659 = vmatmul.mubr.f32.gmra.mrb[2].mxu0 %v19875_v36  ;;  %12863 = vmatmul.mubr.msk.f32.gmra.mrb[0].mxu1 %vm1851_vm7, %v15938_v47  ;;  %v2001_v36 = vand.u32 4294901760, %v16156_v14  ;;  %v2061_v14 = vand.u32 4294901760, %v16197_v38 }
 0x108   : > { %12661 = vmatprep.mubr.f32.mxu0 %v19876_v37  ;;  %14264 = vmatpush3.bf16.msra.mxu0 %v14261_v51  ;;  %v19898_v51 = vld [vmem:[#allocation13_spill] sm:$0xff]  ;;  %v2011_v37 = vand.u32 4294901760, %v16171_v1  ;;  %v2071_v1 = vand.u32 4294901760, %v16203_v11 }
 0x109   : > { %14266 = vmatprep.subr.bf16.mxu0 %v15637_v13  ;;  %12865 = vmatprep.mubr.msk.f32.mxu1 %vm1851_vm7, %v15960_v34 }
 0x10b   : > { %12662 = vmatmul.mubr.f32.gmra.mrb[4].mxu0 %v19877_v56  ;;  %12866 = vmatmul.mubr.msk.f32.gmra.mrb[2].mxu1 %vm1851_vm7, %v15969_v9  ;;  %v19908_v56 = vld [vmem:[#allocation19_spill] sm:$0xff] }
 0x10c   : > { %12664 = vmatprep.mubr.f32.mxu0 %v19878_v3  ;;  %12868 = vmatprep.mubr.msk.f32.mxu1 %vm1851_vm7, %v15989_v50  ;;  %v2021_v3 = vand.u32 4294901760, %v16176_v21  ;;  %v19910_v21 = vld [vmem:[#allocation25_spill] sm:$0xff] }
 0x10f   : > { %12665 = vmatmul.mubr.f32.gmra.mrb[6].mxu0 %v19879_v2  ;;  %12869 = vmatmul.mubr.msk.f32.gmra.mrb[4].mxu1 %vm1851_vm7, %v15997_v63  ;;  %v2031_v2 = vand.u32 4294901760, %v16183_v33  ;;  %v19911_v33 = vld [vmem:[#allocation26_spill] sm:$0xff] }
 0x110   : > { %12667 = vmatprep.mubr.f32.mxu0 %v19880_v17  ;;  %12871 = vmatprep.mubr.msk.f32.mxu1 %vm1851_vm7, %v16016_v10  ;;  %v2041_v17 = vand.u32 4294901760, %v16187_v45  ;;  %v19912_v45 = vld [vmem:[#allocation27_spill] sm:$0xff] }
 0x113   : > { %12668 = vmatmul.mubr.f32.gmra.mrb[8].mxu0 %v19881_v16  ;;  %12872 = vmatmul.mubr.msk.f32.gmra.mrb[6].mxu1 %vm1851_vm7, %v16024_v30  ;;  %v2051_v16 = vand.u32 4294901760, %v16193_v12  ;;  %v2121_v12 = vand.u32 4294901760, %v16231_v0 }
 0x114   : > { %12670 = vmatprep.mubr.f32.mxu0 %v19882_v41  ;;  %12874 = vmatprep.mubr.msk.f32.mxu1 %vm1851_vm7, %v16042_v62 }
 0x117   : > { %12671 = vmatmul.mubr.f32.gmra.mrb[10].mxu0 %v19883_v40  ;;  %12875 = vmatmul.mubr.msk.f32.gmra.mrb[8].mxu1 %vm1851_vm7, %v16050_v32  ;;  %v2091_v40 = vand.u32 4294901760, %v19910_v21 }
 0x118   : > { %12673 = vmatprep.mubr.f32.mxu0 %v19884_v6  ;;  %12877 = vmatprep.mubr.msk.f32.mxu1 %vm1851_vm7, %v16071_v7  ;;  %v2101_v6 = vand.u32 4294901760, %v19911_v33 }
 0x11b   : > { %12674 = vmatmul.mubr.f32.gmra.mrb[12].mxu0 %v19885_v5  ;;  %12878 = vmatmul.mubr.msk.f32.gmra.mrb[10].mxu1 %vm1851_vm7, %v16083_v39  ;;  %v2111_v5 = vand.u32 4294901760, %v19912_v45 }
 0x11c   : > { %12676 = vmatprep.mubr.f32.mxu0 %v19886_v42  ;;  %12880 = vmatprep.mubr.msk.f32.mxu1 %vm1851_vm7, %v16106_v28 }
 0x11f   : > { %12677 = vmatmul.mubr.f32.gmra.mrb[14].mxu0 %v19887_v44  ;;  %12881 = vmatmul.mubr.msk.f32.gmra.mrb[12].mxu1 %vm1851_vm7, %v19888_v31 }
 0x120   : > { %12687 = vmatprep.mubr.msk.f32.mxu0 %vm557_vm0, %v15701_v53  ;;  %12887 = vmatprep.mubr.msk.f32.mxu1 %vm1851_vm7, %v16100_v58 }
 0x123   : > { %12688 = vmatmul.mubr.msk.f32.vlgmr.msra.gmra.mrb[0].mxu0 %vm557_vm0, %v19889_v19  ;;  %12888 = vmatmul.mubr.msk.f32.vlgmr.msra.gmra.mrb[14].mxu1 %vm1851_vm7, %v16130_v54 }
 0x124   : > { %14268 = vmatpush3.bf16.msra.mxu0 %v15637_v13  ;;  %12690 = vmatprep.mubr.msk.f32.mxu0 %vm557_vm0, %v19890_v24  ;;  %v19893_v13 = vld [vmem:[#allocation6_spill] sm:$0xff] }
 0x125   : > { %14270 = vmatprep.subr.bf16.mxu0 %v15642_v18  ;;  %12890 = vmatprep.mubr.msk.f32.mxu1 %vm1851_vm7, %v15929_v4 }
 0x127   : > { %12691 = vmatmul.mubr.msk.f32.gmra.mrb[2].mxu0 %vm557_vm0, %v19891_v43  ;;  %12891 = vmatmul.mubr.msk.f32.gmra.mrb[0].mxu1 %vm1851_vm7, %v15938_v47 }
 0x128   : > { %12693 = vmatprep.mubr.msk.f32.mxu0 %vm557_vm0, %v19892_v25  ;;  %14272 = vmatpush3.bf16.msra.mxu0 %v15642_v18  ;;  %v19895_v18 = vld [vmem:[#allocation8_spill] sm:$0xff] }
 0x129   : > { %14274 = vmatprep.subr.bf16.mxu0 %v15949_v15  ;;  %12893 = vmatprep.mubr.msk.f32.mxu1 %vm1851_vm7, %v15960_v34 }
 0x12b   : > { %12694 = vmatmul.mubr.msk.f32.gmra.mrb[4].mxu0 %vm557_vm0, %v19893_v13  ;;  %12894 = vmatmul.mubr.msk.f32.gmra.mrb[2].mxu1 %vm1851_vm7, %v15969_v9 }
 0x12c   : > { %12696 = vmatprep.mubr.msk.f32.mxu0 %vm557_vm0, %v19894_v27  ;;  %12896 = vmatprep.mubr.msk.f32.mxu1 %vm1851_vm7, %v15989_v50 }
 0x12f   : > { %12697 = vmatmul.mubr.msk.f32.gmra.mrb[6].mxu0 %vm557_vm0, %v19895_v18  ;;  %12897 = vmatmul.mubr.msk.f32.gmra.mrb[4].mxu1 %vm1851_vm7, %v15997_v63 }
 0x130   : > { %12699 = vmatprep.mubr.msk.f32.mxu0 %vm557_vm0, %v19896_v48  ;;  %12899 = vmatprep.mubr.msk.f32.mxu1 %vm1851_vm7, %v16016_v10 }
 0x133   : > { %12700 = vmatmul.mubr.msk.f32.gmra.mrb[8].mxu0 %vm557_vm0, %v19897_v22  ;;  %12900 = vmatmul.mubr.msk.f32.gmra.mrb[6].mxu1 %vm1851_vm7, %v16024_v30 }
 0x134   : > { %12702 = vmatprep.mubr.msk.f32.mxu0 %vm557_vm0, %v19898_v51  ;;  %12902 = vmatprep.mubr.msk.f32.mxu1 %vm1851_vm7, %v16042_v62 }
 0x137   : > { %12703 = vmatmul.mubr.msk.f32.gmra.mrb[10].mxu0 %vm557_vm0, %v19899_v55  ;;  %12903 = vmatmul.mubr.msk.f32.gmra.mrb[8].mxu1 %vm1851_vm7, %v16050_v32 }
 0x138   : > { %12705 = vmatprep.mubr.msk.f32.mxu0 %vm557_vm0, %v19900_v46  ;;  %12905 = vmatprep.mubr.msk.f32.mxu1 %vm1851_vm7, %v16071_v7 }
 0x13b   : > { %12706 = vmatmul.mubr.msk.f32.gmra.mrb[12].mxu0 %vm557_vm0, %v19901_v23  ;;  %12906 = vmatmul.mubr.msk.f32.gmra.mrb[10].mxu1 %vm1851_vm7, %v16083_v39 }
 0x13c   : > { %12708 = vmatprep.mubr.msk.f32.mxu0 %vm557_vm0, %v19902_v20  ;;  %12908 = vmatprep.mubr.msk.f32.mxu1 %vm1851_vm7, %v16106_v28 }
 0x13f   : > { %12709 = vmatmul.mubr.msk.f32.gmra.mrb[14].mxu0 %vm557_vm0, %v19903_v26  ;;  %12909 = vmatmul.mubr.msk.f32.gmra.mrb[12].mxu1 %vm1851_vm7, %v19888_v31 }
 0x140   : > { %12719 = vmatprep.mubr.msk.f32.mxu0 %vm557_vm0, %v15701_v53  ;;  %v19904_v53 = vld [vmem:[#allocation22_spill] sm:$0xff] }
 0x143   : > { %12720 = vmatmul.mubr.msk.f32.vlgmr.msra.gmra.mrb[0].mxu0 %vm557_vm0, %v19889_v19 }
 0x144   : > { %12722 = vmatprep.mubr.msk.f32.mxu0 %vm557_vm0, %v19890_v24  ;;  %14276 = vmatpush3.bf16.msra.mxu0 %v15949_v15  ;;  %v19905_v15 = vand.u32 4294901760, %v19904_v53 }
 0x145   : > { %14278 = vmatprep.subr.bf16.mxu0 %v16233_v57 }
 0x146   : > { %v1970_v8 = vsub.f32 %v19904_v53, %v19905_v15 }
 0x147   : > { %12723 = vmatmul.mubr.msk.f32.gmra.mrb[2].mxu0 %vm557_vm0, %v19891_v43 }
 0x148   : > { %12725 = vmatprep.mubr.msk.f32.mxu0 %vm557_vm0, %v19892_v25  ;;  %v1971_v52 = vand.u32 4294901760, %v1970_v8 }
 0x14b   : > { %12726 = vmatmul.mubr.msk.f32.gmra.mrb[4].mxu0 %vm557_vm0, %v19893_v13 }
 0x14c   : > { %12728 = vmatprep.mubr.msk.f32.mxu0 %vm557_vm0, %v19894_v27 }
 0x14f   : > { %12729 = vmatmul.mubr.msk.f32.gmra.mrb[6].mxu0 %vm557_vm0, %v19895_v18 }
 0x150   : > { %12731 = vmatprep.mubr.msk.f32.mxu0 %vm557_vm0, %v19896_v48 }
 0x153   : > { %12732 = vmatmul.mubr.msk.f32.gmra.mrb[8].mxu0 %vm557_vm0, %v19897_v22 }
 0x154   : > { %12734 = vmatprep.mubr.msk.f32.mxu0 %vm557_vm0, %v19898_v51 }
 0x157   : > { %12735 = vmatmul.mubr.msk.f32.gmra.mrb[10].mxu0 %vm557_vm0, %v19899_v55 }
 0x158   : > { %12737 = vmatprep.mubr.msk.f32.mxu0 %vm557_vm0, %v19900_v46 }
 0x15b   : > { %12738 = vmatmul.mubr.msk.f32.gmra.mrb[12].mxu0 %vm557_vm0, %v19901_v23 }
 0x15c   : > { %12740 = vmatprep.mubr.msk.f32.mxu0 %vm557_vm0, %v19902_v20 }
 0x15f   : > { %12741 = vmatmul.mubr.msk.f32.gmra.mrb[14].mxu0 %vm557_vm0, %v19903_v26  ;;  %vm3407_vm0 = vcmask 1042432  }
 0x160   : > { %12747 = vmatprep.mubr.f32.mxu0 %v1971_v52 }
 0x163   : > { %12748 = vmatmul.mubr.f32.vlgmr.msra.gmra.mrb[16].mxu0 %v1981_v29 }
 0x164   : > { %12750 = vmatprep.mubr.f32.mxu0 %v1991_v59  ;;  %14280 = vmatpush3.bf16.msra.mxu0 %v16233_v57  ;;  %v19909_v57 = vld [vmem:[#allocation24_spill] sm:$0xff] }
 0x165   : > { %14282 = vmatprep.subr.bf16.mxu0 %v19908_v56  ;;  %v2081_v41 = vand.u32 4294901760, %v19909_v57 }
 0x167   : > { %12751 = vmatmul.mubr.f32.gmra.mrb[18].mxu0 %v2001_v36 }
 0x168   : > { %12753 = vmatprep.mubr.f32.mxu0 %v2011_v37 }
 0x16b   : > { %12754 = vmatmul.mubr.f32.gmra.mrb[20].mxu0 %v2021_v3 }
 0x16c   : > { %12756 = vmatprep.mubr.f32.mxu0 %v2031_v2 }
 0x16f   : > { %12757 = vmatmul.mubr.f32.gmra.mrb[22].mxu0 %v2041_v17 }
 0x170   : > { %12759 = vmatprep.mubr.f32.mxu0 %v2051_v16 }
 0x173   : > { %12760 = vmatmul.mubr.f32.gmra.mrb[24].mxu0 %v2061_v14 }
 0x174   : > { %12762 = vmatprep.mubr.f32.mxu0 %v2071_v1 }
 0x177   : > { %12763 = vmatmul.mubr.f32.gmra.mrb[26].mxu0 %v2081_v41 }
 0x178   : > { %12765 = vmatprep.mubr.f32.mxu0 %v2091_v40 }
 0x17b   : > { %12766 = vmatmul.mubr.f32.gmra.mrb[28].mxu0 %v2101_v6 }
 0x17c   : > { %12768 = vmatprep.mubr.f32.mxu0 %v2111_v5 }
 0x17f   : > { %12769 = vmatmul.mubr.f32.gmra.mrb[30].mxu0 %v2121_v12 }
 0x180   : > { %12775 = vmatprep.mubr.msk.f32.mxu0 %vm1851_vm7, %v16100_v58 }
 0x183   : > { %12776 = vmatmul.mubr.msk.f32.vlgmr.msra.gmra.mrb[16].mxu0 %vm1851_vm7, %v16130_v54 }
 0x184   : > { %12778 = vmatprep.mubr.msk.f32.mxu0 %vm1851_vm7, %v15929_v4  ;;  %14284 = vmatpush3.bf16.msra.mxu0 %v19908_v56 }
 0x187   : > { %12779 = vmatmul.mubr.msk.f32.gmra.mrb[18].mxu0 %vm1851_vm7, %v15938_v47 }
 0x188   : > { %12781 = vmatprep.mubr.msk.f32.mxu0 %vm1851_vm7, %v15960_v34 }
 0x18b   : > { %12782 = vmatmul.mubr.msk.f32.gmra.mrb[20].mxu0 %vm1851_vm7, %v15969_v9  ;;  %v3326_v9 = vld [vmem:[%s19560_s4] sm:$0x7] }
 0x18c   : > { %12784 = vmatprep.mubr.msk.f32.mxu0 %vm1851_vm7, %v15989_v50  ;;  %v3409_v50 = vsel %vm3407_vm0, %v3326_v9, 0 }
 0x18f   : > { %12785 = vmatmul.mubr.msk.f32.gmra.mrb[22].mxu0 %vm1851_vm7, %v15997_v63  ;;  %v16475_v63 = vand.u32 4294901760, %v3409_v50 }
 0x190   : > { %12787 = vmatprep.mubr.msk.f32.mxu0 %vm1851_vm7, %v16016_v10 }
 0x191   : > { %12911 = vmatprep.subr.mxu1 %v16475_v63  ;;  %v16502_v24 = vsub.f32 %v3409_v50, %v16475_v63 }
 0x192   : > { %12912 = vmatpush3.msra.mxu1 %v16475_v63 }
 0x193   : > { %12788 = vmatmul.mubr.msk.f32.gmra.mrb[24].mxu0 %vm1851_vm7, %v16024_v30  ;;  %v16507_v43 = vand.u32 4294901760, %v16502_v24 }
 0x194   : > { %12790 = vmatprep.mubr.msk.f32.mxu0 %vm1851_vm7, %v16042_v62 }
 0x195   : > { %v3641_v27 = vsub.f32 %v16502_v24, %v16507_v43 }
 0x197   : > { %12791 = vmatmul.mubr.msk.f32.gmra.mrb[26].mxu0 %vm1851_vm7, %v16050_v32  ;;  %v16519_v18 = vand.u32 4294901760, %v3641_v27 }
 0x198   : > { %12793 = vmatprep.mubr.msk.f32.mxu0 %vm1851_vm7, %v16071_v7 }
 0x199   : > { %12937 = vmatprep.subr.mxu1 %v16519_v18 }
 0x19b   : > { %12794 = vmatmul.mubr.msk.f32.gmra.mrb[28].mxu0 %vm1851_vm7, %v16083_v39 }
 0x19c   : > { %12796 = vmatprep.mubr.msk.f32.mxu0 %vm1851_vm7, %v16106_v28 }
 0x19f   : > { %12797 = vmatmul.mubr.msk.f32.gmra.mrb[30].mxu0 %vm1851_vm7, %v19888_v31  ;;  %vm3164_vm7 = vcmask 23552  }
 0x1a0   : > { %12803 = vmatprep.mubr.f32.mxu0 %v19904_v53 }
 0x1a3   : > { %12804 = vmatmul.mubr.f32.vlgmr.msra.gmra.mrb[16].mxu0 %v16139_v49 }
 0x1f6   : > { %v16467_v54 = vpop.f32.mrb[14].mxu1 }
 0x1f7   : > { %v16469_v58 = vpop.f32.mrb[15].mxu1 }
 0x1fa   : > { %v12892_v4 = vpop.f32.mrb[0].mxu1 }
 0x1fb   : > { %v2922_v47 = vpop.f32.mrb[1].mxu1 }
 0x1fe   : > { %v12895_v7 = vpop.f32.mrb[2].mxu1 }
 0x1ff   : > { %v2934_v34 = vpop.f32.mrb[3].mxu1 }
 0x202   : > { %v12898_v10 = vpop.f32.mrb[4].mxu1 }
 0x203   : > { %v2946_v30 = vpop.f32.mrb[5].mxu1 }
 0x206   : > { %v12901_v62 = vpop.f32.mrb[6].mxu1 }
 0x207   : > { %v2958_v32 = vpop.f32.mrb[7].mxu1 }
 0x20a   : > { %v12904_v39 = vpop.f32.mrb[8].mxu1 }
 0x20b   : > { %v2970_v28 = vpop.f32.mrb[9].mxu1 }
 0x20e   : > { %v16479_v49 = vpop.f32.mrb[10].mxu1 }
 0x20f   : > { %v16481_v38 = vpop.f32.mrb[11].mxu1 }
 0x212   : > { %v16483_v11 = vpop.f32.mrb[12].mxu1 }
 0x213   : > { %v16485_v0 = vpop.f32.mrb[13].mxu1 }
 0x216   : > { %v16487_v42 = vpop.f32.mrb[0].mxu0 }
 0x217   : > { %3345 = vrot.lane.b32.xlu1 %v16487_v42, %s15536_s26  ;;  %v16491_v44 = vpop.f32.mrb[1].mxu0 }
 0x218   : > { %3343 = vrot.lane.b32.xlu0 %v16491_v44, %s15536_s26 }
 0x21a   : > { %v16495_v31 = vpop.f32.mrb[2].mxu0 }
 0x21b   : > { %3349 = vrot.lane.b32.xlu1 %v16495_v31, %s15536_s26  ;;  %v16499_v19 = vpop.f32.mrb[3].mxu0 }
 0x21c   : > { %3347 = vrot.lane.b32.xlu0 %v16499_v19, %s15536_s26 }
 0x21e   : > { %v16509_v25 = vpop.f32.mrb[4].mxu0 }
 0x21f   : > { %3353 = vrot.lane.b32.xlu1 %v16509_v25, %s15536_s26  ;;  %v16513_v13 = vpop.f32.mrb[5].mxu0 }
 0x220   : > { %3351 = vrot.lane.b32.xlu0 %v16513_v13, %s15536_s26 }
 0x222   : > { %v16521_v48 = vpop.f32.mrb[6].mxu0 }
 0x223   : > { %3357 = vrot.lane.b32.xlu1 %v16521_v48, %s15536_s26  ;;  %v16525_v22 = vpop.f32.mrb[7].mxu0 }
 0x224   : > { %3355 = vrot.lane.b32.xlu0 %v16525_v22, %s15536_s26 }
 0x226   : > { %v16530_v51 = vpop.f32.mrb[8].mxu0 }
 0x227   : > { %3361 = vrot.lane.b32.xlu1 %v16530_v51, %s15536_s26  ;;  %v16534_v55 = vpop.f32.mrb[9].mxu0 }
 0x228   : > { %3359 = vrot.lane.b32.xlu0 %v16534_v55, %s15536_s26 }
 0x22a   : > { %v16538_v46 = vpop.f32.mrb[10].mxu0 }
 0x22b   : > { %3365 = vrot.lane.b32.xlu1 %v16538_v46, %s15536_s26  ;;  %v16542_v23 = vpop.f32.mrb[11].mxu0 }
 0x22c   : > { %3363 = vrot.lane.b32.xlu0 %v16542_v23, %s15536_s26 }
 0x22e   : > { %v16546_v20 = vpop.f32.mrb[12].mxu0 }
 0x22f   : > { %19913 = vst [vmem:[#allocation21_spill] sm:$0xff] %v16546_v20  ;;  %3369 = vrot.lane.b32.xlu1 %v16546_v20, %s15536_s26  ;;  %v16550_v26 = vpop.f32.mrb[13].mxu0 }
 0x230   : > { %3367 = vrot.lane.b32.xlu0 %v16550_v26, %s15536_s26 }
 0x232   : > { %v16554_v53 = vpop.f32.mrb[14].mxu0 }
 0x233   : > { %19914 = vst [vmem:[#allocation5_spill] sm:$0xff] %v16554_v53  ;;  %3373 = vrot.lane.b32.xlu1 %v16554_v53, %s15536_s26  ;;  %v16558_v15 = vpop.f32.mrb[15].mxu0 }
 0x234   : > { %19915 = vst [vmem:[#allocation3_spill] sm:$0xff] %v16558_v15  ;;  %3371 = vrot.lane.b32.xlu0 %v16558_v15, %s15536_s26 }
 0x25a   : > { %v12780_v8 = vpop.f32.mrb[18].mxu0 }
 0x25b   : > { %v2216_v60 = vpop.f32.mrb[19].mxu0  ;;  %v16562_v35 = vadd.f32 %v12892_v4, %v12780_v8 }
 0x25c   : > { %v16564_v52 = vadd.f32 %v2922_v47, %v2216_v60 }
 0x25d   : > { %19916 = vst [vmem:[#allocation4_spill] sm:$0xff] %v16562_v35 }
 0x25e   : > { %19917 = vst [vmem:[#allocation7_spill] sm:$0xff] %v16564_v52  ;;  %v12783_v29 = vpop.f32.mrb[20].mxu0 }
 0x25f   : > { %v2228_v61 = vpop.f32.mrb[21].mxu0  ;;  %v16566_v59 = vadd.f32 %v12895_v7, %v12783_v29 }
 0x260   : > { %v16568_v36 = vadd.f32 %v2934_v34, %v2228_v61 }
 0x261   : > { %19918 = vst [vmem:[#allocation6_spill] sm:$0xff] %v16566_v59 }
 0x262   : > { %19919 = vst [vmem:[#allocation9_spill] sm:$0xff] %v16568_v36  ;;  %v12786_v37 = vpop.f32.mrb[22].mxu0 }
 0x263   : > { %v2240_v56 = vpop.f32.mrb[23].mxu0  ;;  %v16570_v3 = vadd.f32 %v12898_v10, %v12786_v37 }
 0x264   : > { %v16572_v2 = vadd.f32 %v2946_v30, %v2240_v56 }
 0x265   : > { %19920 = vst [vmem:[#allocation8_spill] sm:$0xff] %v16570_v3 }
 0x266   : > { %19921 = vst [vmem:[#allocation11_spill] sm:$0xff] %v16572_v2  ;;  %v12789_v17 = vpop.f32.mrb[24].mxu0 }
 0x267   : > { %v2252_v16 = vpop.f32.mrb[25].mxu0  ;;  %v16574_v14 = vadd.f32 %v12901_v62, %v12789_v17 }
 0x268   : > { %v16576_v1 = vadd.f32 %v2958_v32, %v2252_v16 }
 0x269   : > { %19922 = vst [vmem:[#allocation10_spill] sm:$0xff] %v16574_v14 }
 0x26a   : > { %19923 = vst [vmem:[#allocation13_spill] sm:$0xff] %v16576_v1  ;;  %v12792_v57 = vpop.f32.mrb[26].mxu0 }
 0x26b   : > { %v2264_v41 = vpop.f32.mrb[27].mxu0  ;;  %v16578_v21 = vadd.f32 %v12904_v39, %v12792_v57 }
 0x26c   : > { %v16580_v40 = vadd.f32 %v2970_v28, %v2264_v41 }
 0x26d   : > { %19924 = vst [vmem:[#allocation12_spill] sm:$0xff] %v16578_v21 }
 0x26e   : > { %19925 = vst [vmem:[#allocation15_spill] sm:$0xff] %v16580_v40  ;;  %v12795_v33 = vpop.f32.mrb[28].mxu0 }
 0x26f   : > { %v2276_v6 = vpop.f32.mrb[29].mxu0  ;;  %v16583_v45 = vadd.f32 %v16479_v49, %v12795_v33 }
 0x270   : > { %v16586_v5 = vadd.f32 %v16481_v38, %v2276_v6 }
 0x271   : > { %19926 = vst [vmem:[#allocation14_spill] sm:$0xff] %v16583_v45 }
 0x272   : > { %19927 = vst [vmem:[#allocation17_spill] sm:$0xff] %v16586_v5  ;;  %v12798_v12 = vpop.f32.mrb[30].mxu0 }
 0x273   : > { %v2288_v4 = vpop.f32.mrb[31].mxu0  ;;  %v16589_v47 = vadd.f32 %v16483_v11, %v12798_v12 }
 0x274   : > { %v16592_v7 = vadd.f32 %v16485_v0, %v2288_v4 }
 0x275   : > { %19928 = vst [vmem:[#allocation16_spill] sm:$0xff] %v16589_v47 }
 0x276   : > { %19929 = vst [vmem:[#allocation22_spill] sm:$0xff] %v16592_v7  ;;  %v12805_v34 = vpop.f32.mrb[16].mxu0 }
 0x277   : > { %v16595_v9 = vadd.f32 %v16467_v54, %v12805_v34  ;;  %v2370_v50 = vpop.f32.mrb[17].mxu0 }
 0x278   : > { %v16598_v10 = vadd.f32 %v16469_v58, %v2370_v50 }
 0x279   : > { %19930 = vst [vmem:[#allocation23_spill] sm:$0xff] %v16595_v9  ;;  %3022 = vrot.lane.b32.xlu1 %v16595_v9, %s15537_s27 }
 0x27a   : > { %3020 = vrot.lane.b32.xlu0 %v16598_v10, %s15537_s27 }
 0x27d   : > { %3026 = vrot.lane.b32.xlu1 %v16562_v35, %s15537_s27 }
 0x27e   : > { %3024 = vrot.lane.b32.xlu0 %v16564_v52, %s15537_s27 }
 0x281   : > { %3030 = vrot.lane.b32.xlu1 %v16566_v59, %s15537_s27 }
 0x282   : > { %3028 = vrot.lane.b32.xlu0 %v16568_v36, %s15537_s27 }
 0x285   : > { %3034 = vrot.lane.b32.xlu1 %v16570_v3, %s15537_s27 }
 0x286   : > { %3032 = vrot.lane.b32.xlu0 %v16572_v2, %s15537_s27 }
 0x289   : > { %v3346_v54 = vpop.permute.xlu1 %3345  ;;  %3038 = vrot.lane.b32.xlu1 %v16574_v14, %s15537_s27 }
 0x28a   : > { %v3377_v58 = vsel %vm3164_vm7, %v3346_v54, 0  ;;  %v3344_v30 = vpop.permute.xlu0 %3343  ;;  %3036 = vrot.lane.b32.xlu0 %v16576_v1, %s15537_s27 }
 0x28b   : > { %v16621_v62 = vand.u32 4294901760, %v3377_v58  ;;  %v3375_v32 = vsel %vm3164_vm7, %v3344_v30, 0 }
 0x28c   : > { %v16624_v39 = vand.u32 4294901760, %v3375_v32 }
 0x28d   : > { %v16627_v28 = vsub.f32 %v3377_v58, %v16621_v62  ;;  %v3350_v49 = vpop.permute.xlu1 %3349  ;;  %3042 = vrot.lane.b32.xlu1 %v16578_v21, %s15537_s27 }
 0x28e   : > { %v16632_v38 = vsub.f32 %v3375_v32, %v16624_v39  ;;  %v3381_v11 = vsel %vm3164_vm7, %v3350_v49, 0  ;;  %v3348_v0 = vpop.permute.xlu0 %3347  ;;  %3040 = vrot.lane.b32.xlu0 %v16580_v40, %s15537_s27 }
 0x28f   : > { %v19635_v27 = vand.u32 4294901760, %v16627_v28  ;;  %v16638_v8 = vand.u32 4294901760, %v3381_v11  ;;  %v3379_v60 = vsel %vm3164_vm7, %v3348_v0, 0 }
 0x290   : > { %v19637_v29 = vand.u32 4294901760, %v16632_v38  ;;  %v16642_v61 = vand.u32 4294901760, %v3379_v60 }
 0x291   : > { %v3490_v37 = vsub.f32 %v16627_v28, %v19635_v27  ;;  %v16648_v56 = vsub.f32 %v3381_v11, %v16638_v8  ;;  %v3354_v17 = vpop.permute.xlu1 %3353  ;;  %3046 = vrot.lane.b32.xlu1 %v16583_v45, %s15537_s27 }
 0x292   : > { %v16653_v16 = vsub.f32 %v3379_v60, %v16642_v61  ;;  %v3385_v57 = vsel %vm3164_vm7, %v3354_v17, 0  ;;  %v3352_v41 = vpop.permute.xlu0 %3351  ;;  %3044 = vrot.lane.b32.xlu0 %v16586_v5, %s15537_s27  ;;  %v3480_v33 = vsub.f32 %v16632_v38, %v19637_v29 }
 0x293   : > { %v19634_v6 = vand.u32 4294901760, %v16648_v56  ;;  %v16662_v12 = vand.u32 4294901760, %v3385_v57  ;;  %v3383_v4 = vsel %vm3164_vm7, %v3352_v41, 0  ;;  %v3491_v58 = vand.u32 4294901760, %v3490_v37 }
 0x294   : > { %v19636_v34 = vand.u32 4294901760, %v16653_v16  ;;  %v16666_v50 = vand.u32 4294901760, %v3383_v4  ;;  %v3481_v54 = vand.u32 4294901760, %v3480_v33 }
 0x295   : > { %v16669_v30 = vsub.f32 %v3385_v57, %v16662_v12  ;;  %v3358_v32 = vpop.permute.xlu1 %3357  ;;  %3050 = vrot.lane.b32.xlu1 %v16589_v47, %s15537_s27  ;;  %v3510_v49 = vsub.f32 %v16648_v56, %v19634_v6 }
 0x296   : > { %v16677_v11 = vsub.f32 %v3383_v4, %v16666_v50  ;;  %v3389_v0 = vsel %vm3164_vm7, %v3358_v32, 0  ;;  %12913 = vmatprep.mubr.f32.mxu1 %v3481_v54  ;;  %v3356_v60 = vpop.permute.xlu0 %3355  ;;  %3048 = vrot.lane.b32.xlu0 %v16592_v7, %s15537_s27  ;;  %v3500_v37 = vsub.f32 %v16653_v16, %v19636_v34 }
 0x297   : > { %v19638_v17 = vand.u32 4294901760, %v16669_v30  ;;  %v16686_v57 = vand.u32 4294901760, %v3389_v0  ;;  %v3387_v41 = vsel %vm3164_vm7, %v3356_v60, 0  ;;  %12914 = vmatmul.mubr.f32.vlgmr.msra.gmra.mrb[16].mxu1 %v3491_v58  ;;  %v3511_v27 = vand.u32 4294901760, %v3510_v49 }
 0x298   : > { %v19641_v33 = vand.u32 4294901760, %v16677_v11  ;;  %v16690_v4 = vand.u32 4294901760, %v3387_v41  ;;  %12938 = vmatpush3.msra.mxu1 %v16519_v18  ;;  %v3501_v54 = vand.u32 4294901760, %v3500_v37 }
 0x299   : > { %v16694_v32 = vsub.f32 %v3389_v0, %v16686_v57  ;;  %v3362_v6 = vpop.permute.xlu1 %3361  ;;  %v3530_v34 = vsub.f32 %v16669_v30, %v19638_v17  ;;  %12963 = vmatprep.subr.mxu1 %v16502_v24 }
 0x29a   : > { %v16701_v58 = vsub.f32 %v3387_v41, %v16690_v4  ;;  %v3393_v60 = vsel %vm3164_vm7, %v3362_v6, 0  ;;  %12916 = vmatprep.mubr.f32.mxu1 %v3501_v54  ;;  %v3360_v29 = vpop.permute.xlu0 %3359  ;;  %v3520_v18 = vsub.f32 %v16677_v11, %v19641_v33 }
 0x29b   : > { %v19644_v0 = vand.u32 4294901760, %v16694_v32  ;;  %v16708_v49 = vand.u32 4294901760, %v3393_v60  ;;  %v3391_v37 = vsel %vm3164_vm7, %v3360_v29, 0  ;;  %12917 = vmatmul.mubr.f32.gmra.mrb[18].mxu1 %v3511_v27  ;;  %v3531_v7 = vand.u32 4294901760, %v3530_v34 }
 0x29c   : > { %v19647_v17 = vand.u32 4294901760, %v16701_v58  ;;  %v16712_v47 = vand.u32 4294901760, %v3391_v37  ;;  %v3521_v41 = vand.u32 4294901760, %v3520_v18 }
 0x29d   : > { %v16715_v6 = vsub.f32 %v3393_v60, %v16708_v49  ;;  %v3366_v54 = vpop.permute.xlu1 %3365  ;;  %v3550_v33 = vsub.f32 %v16694_v32, %v19644_v0 }
 0x29e   : > { %v16721_v45 = vsub.f32 %v3391_v37, %v16712_v47  ;;  %v3397_v29 = vsel %vm3164_vm7, %v3366_v54, 0  ;;  %12919 = vmatprep.mubr.f32.mxu1 %v3521_v41  ;;  %v3364_v27 = vpop.permute.xlu0 %3363  ;;  %v3540_v18 = vsub.f32 %v16701_v58, %v19647_v17 }
 0x29f   : > { %v19650_v60 = vand.u32 4294901760, %v16715_v6  ;;  %v16728_v5 = vand.u32 4294901760, %v3397_v29  ;;  %v3395_v34 = vsel %vm3164_vm7, %v3364_v27, 0  ;;  %12920 = vmatmul.mubr.f32.gmra.mrb[20].mxu1 %v3531_v7  ;;  %v3551_v40 = vand.u32 4294901760, %v3550_v33 }
 0x2a0   : > { %v19653_v0 = vand.u32 4294901760, %v16721_v45  ;;  %v16732_v21 = vand.u32 4294901760, %v3395_v34  ;;  %v3541_v37 = vand.u32 4294901760, %v3540_v18 }
 0x2a1   : > { %v16735_v54 = vsub.f32 %v3397_v29, %v16728_v5  ;;  %v3370_v41 = vpop.permute.xlu1 %3369  ;;  %v3570_v17 = vsub.f32 %v16715_v6, %v19650_v60 }
 0x2a2   : > { %v16741_v14 = vsub.f32 %v3395_v34, %v16732_v21  ;;  %v3401_v27 = vsel %vm3164_vm7, %v3370_v41, 0  ;;  %12922 = vmatprep.mubr.f32.mxu1 %v3541_v37  ;;  %v3368_v7 = vpop.permute.xlu0 %3367  ;;  %v3560_v18 = vsub.f32 %v16721_v45, %v19653_v0 }
 0x2a3   : > { %v19656_v29 = vand.u32 4294901760, %v16735_v54  ;;  %v16748_v1 = vand.u32 4294901760, %v3401_v27  ;;  %v3399_v33 = vsel %vm3164_vm7, %v3368_v7, 0  ;;  %12923 = vmatmul.mubr.f32.gmra.mrb[22].mxu1 %v3551_v40  ;;  %v3571_v2 = vand.u32 4294901760, %v3570_v17 }
 0x2a4   : > { %v19658_v60 = vand.u32 4294901760, %v16741_v14  ;;  %v16752_v3 = vand.u32 4294901760, %v3399_v33  ;;  %v3561_v34 = vand.u32 4294901760, %v3560_v18 }
 0x2a5   : > { %v16755_v41 = vsub.f32 %v3401_v27, %v16748_v1  ;;  %v3374_v37 = vpop.permute.xlu1 %3373  ;;  %v3590_v0 = vsub.f32 %v16735_v54, %v19656_v29 }
 0x2a6   : > { %v16761_v59 = vsub.f32 %v3399_v33, %v16752_v3  ;;  %v3405_v7 = vsel %vm3164_vm7, %v3374_v37, 0  ;;  %12925 = vmatprep.mubr.f32.mxu1 %v3561_v34  ;;  %v3372_v40 = vpop.permute.xlu0 %3371  ;;  %v3580_v18 = vsub.f32 %v16741_v14, %v19658_v60 }
 0x2a7   : > { %v19661_v27 = vand.u32 4294901760, %v16755_v41  ;;  %v16768_v36 = vand.u32 4294901760, %v3405_v7  ;;  %v3403_v17 = vsel %vm3164_vm7, %v3372_v40, 0  ;;  %12926 = vmatmul.mubr.f32.gmra.mrb[24].mxu1 %v3571_v2  ;;  %v3591_v34 = vand.u32 4294901760, %v3590_v0 }
 0x2a8   : > { %v3599_v29 = vand.u32 4294901760, %v16761_v59  ;;  %v16772_v35 = vand.u32 4294901760, %v3403_v17  ;;  %v3581_v33 = vand.u32 4294901760, %v3580_v18 }
 0x2a9   : > { %v16775_v37 = vsub.f32 %v3405_v7, %v16768_v36  ;;  %v3610_v60 = vsub.f32 %v16755_v41, %v19661_v27 }
 0x2aa   : > { %v16781_v52 = vsub.f32 %v3403_v17, %v16772_v35  ;;  %12928 = vmatprep.mubr.f32.mxu1 %v3581_v33  ;;  %v3600_v2 = vsub.f32 %v16761_v59, %v3599_v29 }
 0x2ab   : > { %v19662_v40 = vand.u32 4294901760, %v16775_v37  ;;  %12929 = vmatmul.mubr.f32.gmra.mrb[26].mxu1 %v3591_v34  ;;  %v3611_v9 = vand.u32 4294901760, %v3610_v60 }
 0x2ac   : > { %v19663_v18 = vand.u32 4294901760, %v16781_v52  ;;  %v3601_v7 = vand.u32 4294901760, %v3600_v2 }
 0x2ad   : > { %v3630_v0 = vsub.f32 %v16775_v37, %v19662_v40 }
 0x2ae   : > { %12931 = vmatprep.mubr.f32.mxu1 %v3601_v7  ;;  %v3620_v17 = vsub.f32 %v16781_v52, %v19663_v18 }
 0x2af   : > { %12932 = vmatmul.mubr.f32.gmra.mrb[28].mxu1 %v3611_v9  ;;  %v3631_v27 = vand.u32 4294901760, %v3630_v0 }
 0x2b0   : > { %v3621_v33 = vand.u32 4294901760, %v3620_v17 }
 0x2b2   : > { %12934 = vmatprep.mubr.f32.mxu1 %v3621_v33 }
 0x2b3   : > { %12935 = vmatmul.mubr.f32.gmra.mrb[30].mxu1 %v3631_v27 }
 0x2b4   : > { %12939 = vmatprep.mubr.f32.mxu1 %v16624_v39 }
 0x2b7   : > { %12940 = vmatmul.mubr.f32.vlgmr.msra.gmra.mrb[16].mxu1 %v16621_v62 }
 0x2b8   : > { %12964 = vmatpush3.msra.mxu1 %v16502_v24  ;;  %12942 = vmatprep.mubr.f32.mxu1 %v16642_v61 }
 0x2b9   : > { %12989 = vmatprep.subr.mxu1 %v16475_v63 }
 0x2bb   : > { %12943 = vmatmul.mubr.f32.gmra.mrb[18].mxu1 %v16638_v8 }
 0x2bc   : > { %12945 = vmatprep.mubr.f32.mxu1 %v16666_v50 }
 0x2bf   : > { %12946 = vmatmul.mubr.f32.gmra.mrb[20].mxu1 %v16662_v12 }
 0x2c0   : > { %12948 = vmatprep.mubr.f32.mxu1 %v16690_v4 }
 0x2c3   : > { %12949 = vmatmul.mubr.f32.gmra.mrb[22].mxu1 %v16686_v57 }
 0x2c4   : > { %12951 = vmatprep.mubr.f32.mxu1 %v16712_v47 }
 0x2c7   : > { %12952 = vmatmul.mubr.f32.gmra.mrb[24].mxu1 %v16708_v49 }
 0x2c8   : > { %12954 = vmatprep.mubr.f32.mxu1 %v16732_v21 }
 0x2cb   : > { %12955 = vmatmul.mubr.f32.gmra.mrb[26].mxu1 %v16728_v5 }
 0x2cc   : > { %12957 = vmatprep.mubr.f32.mxu1 %v16752_v3 }
 0x2cf   : > { %12958 = vmatmul.mubr.f32.gmra.mrb[28].mxu1 %v16748_v1 }
 0x2d0   : > { %12960 = vmatprep.mubr.f32.mxu1 %v16772_v35 }
 0x2d3   : > { %12961 = vmatmul.mubr.f32.gmra.mrb[30].mxu1 %v16768_v36 }
 0x2d4   : > { %12965 = vmatprep.mubr.f32.mxu1 %v16632_v38 }
 0x2d7   : > { %12966 = vmatmul.mubr.f32.vlgmr.msra.gmra.mrb[16].mxu1 %v16627_v28 }
 0x2d8   : > { %12990 = vmatpush3.msra.mxu1 %v16475_v63  ;;  %12968 = vmatprep.mubr.f32.mxu1 %v16653_v16 }
 0x2d9   : > { %13015 = vmatprep.subr.mxu1 %v16507_v43 }
 0x2db   : > { %12969 = vmatmul.mubr.f32.gmra.mrb[18].mxu1 %v16648_v56 }
 0x2dc   : > { %12971 = vmatprep.mubr.f32.mxu1 %v16677_v11 }
 0x2df   : > { %12972 = vmatmul.mubr.f32.gmra.mrb[20].mxu1 %v16669_v30 }
 0x2e0   : > { %12974 = vmatprep.mubr.f32.mxu1 %v16701_v58 }
 0x2e3   : > { %12975 = vmatmul.mubr.f32.gmra.mrb[22].mxu1 %v16694_v32 }
 0x2e4   : > { %12977 = vmatprep.mubr.f32.mxu1 %v16721_v45 }
 0x2e7   : > { %12978 = vmatmul.mubr.f32.gmra.mrb[24].mxu1 %v16715_v6 }
 0x2e8   : > { %12980 = vmatprep.mubr.f32.mxu1 %v16741_v14 }
 0x2eb   : > { %12981 = vmatmul.mubr.f32.gmra.mrb[26].mxu1 %v16735_v54  ;;  %v3023_v24 = vpop.permute.xlu1 %3022 }
 0x2ec   : > { %v3069_v9 = vsub.f32 %v16487_v42, %v3023_v24  ;;  %12983 = vmatprep.mubr.f32.mxu1 %v16761_v59  ;;  %v3021_v60 = vpop.permute.xlu0 %3020 }
 0x2ed   : > { %v3068_v27 = vsub.f32 %v16491_v44, %v3021_v60 }
 0x2ee   : > { %v3085_v34 = vmul.f32 %v3069_v9, %v3069_v9 }
 0x2ef   : > { %v3084_v2 = vmul.f32 %v3068_v27, %v3068_v27  ;;  %12984 = vmatmul.mubr.f32.gmra.mrb[28].mxu1 %v16755_v41  ;;  %v3027_v7 = vpop.permute.xlu1 %3026  ;;  %v19931_v27 = vand.u32 4294901760, %v16632_v38  ;;  %v19933_v38 = vand.u32 4294901760, %v16653_v16  ;;  %v19935_v16 = vand.u32 4294901760, %v16677_v11 }
 0x2f0   : > { %v3071_v0 = vsub.f32 %v16495_v31, %v3027_v7  ;;  %12986 = vmatprep.mubr.f32.mxu1 %v16781_v52  ;;  %3118 = vrot.lane.b32.xlu1 %v3085_v34, %s15536_s26  ;;  %v3025_v17 = vpop.permute.xlu0 %3024 }
 0x2f1   : > { %v3070_v33 = vsub.f32 %v16499_v19, %v3025_v17  ;;  %3116 = vrot.lane.b32.xlu0 %v3084_v2, %s15536_s26  ;;  %v19932_v2 = vand.u32 4294901760, %v16627_v28 }
 0x2f2   : > { %v3087_v24 = vmul.f32 %v3071_v0, %v3071_v0 }
 0x2f3   : > { %v3086_v40 = vmul.f32 %v3070_v33, %v3070_v33  ;;  %12987 = vmatmul.mubr.f32.gmra.mrb[30].mxu1 %v16775_v37  ;;  %v3031_v9 = vpop.permute.xlu1 %3030 }
 0x2f4   : > { %v3073_v60 = vsub.f32 %v16509_v25, %v3031_v9  ;;  %12991 = vmatprep.mubr.f32.mxu1 %v19931_v27  ;;  %3122 = vrot.lane.b32.xlu1 %v3087_v24, %s15536_s26  ;;  %v3029_v7 = vpop.permute.xlu0 %3028 }
 0x2f5   : > { %v3072_v34 = vsub.f32 %v16513_v13, %v3029_v7  ;;  %3120 = vrot.lane.b32.xlu0 %v3086_v40, %s15536_s26 }
 0x2f6   : > { %v3089_v17 = vmul.f32 %v3073_v60, %v3073_v60  ;;  %v19934_v60 = vand.u32 4294901760, %v16648_v56 }
 0x2f7   : > { %v3088_v18 = vmul.f32 %v3072_v34, %v3072_v34  ;;  %12992 = vmatmul.mubr.f32.vlgmr.msra.gmra.mrb[16].mxu1 %v19932_v2  ;;  %v3035_v0 = vpop.permute.xlu1 %3034  ;;  %v19936_v2 = vand.u32 4294901760, %v16669_v30 }
 0x2f8   : > { %13016 = vmatpush3.msra.mxu1 %v16507_v43  ;;  %v3075_v33 = vsub.f32 %v16521_v48, %v3035_v0  ;;  %12994 = vmatprep.mubr.f32.mxu1 %v19933_v38  ;;  %v3033_v9 = vpop.permute.xlu0 %3032 }
 0x2f9   : > { %3126 = vrot.lane.b32.xlu1 %v3089_v17, %s15536_s26  ;;  %v3074_v24 = vsub.f32 %v16525_v22, %v3033_v9  ;;  %3124 = vrot.lane.b32.xlu0 %v3088_v18, %s15536_s26 }
 0x2fa   : > { %v3091_v40 = vmul.f32 %v3075_v33, %v3075_v33  ;;  %13041 = vmatprep.subr.mxu1 %v16475_v63  ;;  %v19937_v33 = vand.u32 4294901760, %v16701_v58 }
 0x2fb   : > { %v3090_v28 = vmul.f32 %v3074_v24, %v3074_v24  ;;  %12995 = vmatmul.mubr.f32.gmra.mrb[18].mxu1 %v19934_v60  ;;  %v3039_v43 = vpop.permute.xlu1 %3038  ;;  %v19939_v60 = vand.u32 4294901760, %v16721_v45 }
 0x2fc   : > { %v3077_v27 = vsub.f32 %v16530_v51, %v3039_v43  ;;  %12997 = vmatprep.mubr.f32.mxu1 %v19935_v16  ;;  %v3037_v7 = vpop.permute.xlu0 %3036 }
 0x2fd   : > { %3130 = vrot.lane.b32.xlu1 %v3091_v40, %s15536_s26  ;;  %v3076_v34 = vsub.f32 %v16534_v55, %v3037_v7  ;;  %3128 = vrot.lane.b32.xlu0 %v3090_v28, %s15536_s26  ;;  %v19938_v40 = vand.u32 4294901760, %v16694_v32  ;;  %v19940_v7 = vand.u32 4294901760, %v16715_v6  ;;  %v3325_v6 = vld [vmem:[%s19559_s3] sm:$0x7] }
 0x2fe   : > { %v3093_v18 = vmul.f32 %v3077_v27, %v3077_v27 }
 0x2ff   : > { %v3092_v17 = vmul.f32 %v3076_v34, %v3076_v34  ;;  %12998 = vmatmul.mubr.f32.gmra.mrb[20].mxu1 %v19936_v2  ;;  %v3043_v56 = vpop.permute.xlu1 %3042 }
 0x300   : > { %v3079_v0 = vsub.f32 %v16538_v46, %v3043_v56  ;;  %13000 = vmatprep.mubr.f32.mxu1 %v19937_v33  ;;  %v3041_v11 = vpop.permute.xlu0 %3040  ;;  %v19944_v33 = vand.u32 4294901760, %v16781_v52 }
 0x301   : > { %3134 = vrot.lane.b32.xlu1 %v3093_v18, %s15536_s26  ;;  %v3078_v38 = vsub.f32 %v16542_v23, %v3041_v11  ;;  %3132 = vrot.lane.b32.xlu0 %v3092_v17, %s15536_s26  ;;  %v19941_v18 = vand.u32 4294901760, %v16741_v14  ;;  %v19943_v14 = vand.u32 4294901760, %v16755_v41  ;;  %v19945_v11 = vand.u32 4294901760, %v16775_v37 }
 0x302   : > { %v3095_v9 = vmul.f32 %v3079_v0, %v3079_v0  ;;  %v19942_v0 = vand.u32 4294901760, %v16735_v54  ;;  %v4535_v54 = vsel %vm3407_vm0, %v3325_v6, 0  ;;  %v4502_v37 = vsel %vm3164_vm7, %v16598_v10, 0 }
 0x303   : > { %v3094_v24 = vmul.f32 %v3078_v38, %v3078_v38  ;;  %13001 = vmatmul.mubr.f32.gmra.mrb[22].mxu1 %v19938_v40  ;;  %v3047_v30 = vpop.permute.xlu1 %3046  ;;  %v16901_v59 = vand.u32 4294901760, %v4535_v54  ;;  %v16943_v38 = vand.u32 4294901760, %v4502_v37 }
 0x304   : > { %v3081_v28 = vsub.f32 %v16546_v20, %v3047_v30  ;;  %13003 = vmatprep.mubr.f32.mxu1 %v19939_v60  ;;  %v3045_v58 = vpop.permute.xlu0 %3044 }
 0x305   : > { %3138 = vrot.lane.b32.xlu1 %v3095_v9, %s15536_s26  ;;  %v3080_v43 = vsub.f32 %v16550_v26, %v3045_v58  ;;  %3136 = vrot.lane.b32.xlu0 %v3094_v24, %s15536_s26  ;;  %v19947_v9 = vld [vmem:[#allocation7_spill] sm:$0xff]  ;;  %v19949_v24 = vld [vmem:[#allocation9_spill] sm:$0xff] }
 0x306   : > { %v3097_v27 = vmul.f32 %v3081_v28, %v3081_v28  ;;  %v4510_v40 = vsel %vm3164_vm7, %v19949_v24, 0 }
 0x307   : > { %v3096_v16 = vmul.f32 %v3080_v43, %v3080_v43  ;;  %13004 = vmatmul.mubr.f32.gmra.mrb[24].mxu1 %v19940_v7  ;;  %v3051_v32 = vpop.permute.xlu1 %3050  ;;  %v16972_v58 = vand.u32 4294901760, %v4510_v40  ;;  %v19951_v43 = vld [vmem:[#allocation11_spill] sm:$0xff] }
 0x308   : > { %v3083_v34 = vsub.f32 %v16554_v53, %v3051_v32  ;;  %13006 = vmatprep.mubr.f32.mxu1 %v19941_v18  ;;  %v3049_v45 = vpop.permute.xlu0 %3048  ;;  %v19952_v32 = vld [vmem:[#allocation8_spill] sm:$0xff] }
 0x309   : > { %3142 = vrot.lane.b32.xlu1 %v3097_v27, %s15536_s26  ;;  %v3082_v17 = vsub.f32 %v16558_v15, %v3049_v45  ;;  %3140 = vrot.lane.b32.xlu0 %v3096_v16, %s15536_s26  ;;  %v4514_v27 = vsel %vm3164_vm7, %v19951_v43, 0  ;;  %v16990_v45 = vsub.f32 %v4510_v40, %v16972_v58 }
 0x30a   : > { %v3099_v2 = vmul.f32 %v3083_v34, %v3083_v34  ;;  %v4516_v34 = vsel %vm3164_vm7, %v19952_v32, 0  ;;  %v16987_v18 = vand.u32 4294901760, %v4514_v27 }
 0x30b   : > { %v3098_v56 = vmul.f32 %v3082_v17, %v3082_v17  ;;  %13007 = vmatmul.mubr.f32.gmra.mrb[26].mxu1 %v19942_v0  ;;  %v19953_v17 = vld [vmem:[#allocation13_spill] sm:$0xff]  ;;  %v17002_v0 = vand.u32 4294901760, %v4516_v34 }
 0x30c   : > { %13009 = vmatprep.mubr.f32.mxu1 %v3599_v29 }
 0x30d   : > { %3146 = vrot.lane.b32.xlu1 %v3099_v2, %s15536_s26  ;;  %3144 = vrot.lane.b32.xlu0 %v3098_v56, %s15536_s26 }
 0x30f   : > { %13010 = vmatmul.mubr.f32.gmra.mrb[28].mxu1 %v19943_v14 }
 0x310   : > { %13012 = vmatprep.mubr.f32.mxu1 %v19944_v33  ;;  %v17010_v33 = vsub.f32 %v4514_v27, %v16987_v18 }
 0x313   : > { %13013 = vmatmul.mubr.f32.gmra.mrb[30].mxu1 %v19945_v11 }
 0x314   : > { %13017 = vmatprep.mubr.f32.mxu1 %v16624_v39 }
 0x317   : > { %13018 = vmatmul.mubr.f32.vlgmr.msra.gmra.mrb[16].mxu1 %v16621_v62 }
 0x318   : > { %13042 = vmatpush3.msra.mxu1 %v16475_v63  ;;  %13020 = vmatprep.mubr.f32.mxu1 %v16642_v61  ;;  %v16916_v63 = vsub.f32 %v4535_v54, %v16901_v59  ;;  %v19954_v54 = vld [vmem:[#allocation10_spill] sm:$0xff] }
 0x319   : > { %13067 = vmatprep.subr.mxu1 %v16901_v59  ;;  %v4520_v11 = vsel %vm3164_vm7, %v19954_v54, 0 }
 0x31a   : > { %v16921_v52 = vand.u32 4294901760, %v16916_v63 }
 0x31b   : > { %13021 = vmatmul.mubr.f32.gmra.mrb[18].mxu1 %v16638_v8 }
 0x31c   : > { %13023 = vmatprep.mubr.f32.mxu1 %v16666_v50  ;;  %v4767_v29 = vsub.f32 %v16916_v63, %v16921_v52 }
 0x31e   : > { %v16929_v41 = vand.u32 4294901760, %v4767_v29 }
 0x31f   : > { %13024 = vmatmul.mubr.f32.gmra.mrb[20].mxu1 %v16662_v12 }
 0x320   : > { %13026 = vmatprep.mubr.f32.mxu1 %v16690_v4 }
 0x323   : > { %13027 = vmatmul.mubr.f32.gmra.mrb[22].mxu1 %v16686_v57 }
 0x324   : > { %13029 = vmatprep.mubr.f32.mxu1 %v16712_v47 }
 0x327   : > { %13030 = vmatmul.mubr.f32.gmra.mrb[24].mxu1 %v16708_v49 }
 0x328   : > { %13032 = vmatprep.mubr.f32.mxu1 %v16732_v21 }
 0x32b   : > { %13033 = vmatmul.mubr.f32.gmra.mrb[26].mxu1 %v16728_v5 }
 0x32c   : > { %13035 = vmatprep.mubr.f32.mxu1 %v16752_v3 }
 0x32f   : > { %13036 = vmatmul.mubr.f32.gmra.mrb[28].mxu1 %v16748_v1 }
 0x330   : > { %13038 = vmatprep.mubr.f32.mxu1 %v16772_v35 }
 0x333   : > { %13039 = vmatmul.mubr.f32.gmra.mrb[30].mxu1 %v16768_v36 }
 0x334   : > { %13043 = vmatprep.mubr.f32.mxu1 %v16624_v39  ;;  %v19946_v39 = vld [vmem:[#allocation23_spill] sm:$0xff] }
 0x337   : > { %13044 = vmatmul.mubr.f32.vlgmr.msra.gmra.mrb[16].mxu1 %v16621_v62  ;;  %v4504_v62 = vsel %vm3164_vm7, %v19946_v39, 0  ;;  %v19955_v39 = vld [vmem:[#allocation15_spill] sm:$0xff] }
 0x338   : > { %13068 = vmatpush3.msra.mxu1 %v16901_v59  ;;  %13046 = vmatprep.mubr.f32.mxu1 %v16642_v61  ;;  %v4506_v61 = vsel %vm3164_vm7, %v19947_v9, 0  ;;  %v17024_v9 = vsub.f32 %v4516_v34, %v17002_v0  ;;  %v19957_v34 = vld [vmem:[#allocation17_spill] sm:$0xff] }
 0x339   : > { %13093 = vmatprep.subr.mxu1 %v16929_v41 }
 0x33b   : > { %13047 = vmatmul.mubr.f32.gmra.mrb[18].mxu1 %v16638_v8  ;;  %v16949_v8 = vand.u32 4294901760, %v4504_v62 }
 0x33c   : > { %13049 = vmatprep.mubr.f32.mxu1 %v16666_v50  ;;  %v19948_v50 = vld [vmem:[#allocation4_spill] sm:$0xff] }
 0x33d   : > { %v4508_v10 = vsel %vm3164_vm7, %v19948_v50, 0 }
 0x33e   : > { %v16961_v30 = vand.u32 4294901760, %v4508_v10 }
 0x33f   : > { %13050 = vmatmul.mubr.f32.gmra.mrb[20].mxu1 %v16662_v12  ;;  %v16954_v12 = vsub.f32 %v4502_v37, %v16943_v38 }
 0x340   : > { %13052 = vmatprep.mubr.f32.mxu1 %v16690_v4  ;;  %v16956_v4 = vand.u32 4294901760, %v4506_v61 }
 0x342   : > { %v16970_v60 = vsub.f32 %v4506_v61, %v16956_v4  ;;  %v17026_v61 = vand.u32 4294901760, %v4520_v11 }
 0x343   : > { %13053 = vmatmul.mubr.f32.gmra.mrb[22].mxu1 %v16686_v57  ;;  %v19950_v57 = vld [vmem:[#allocation6_spill] sm:$0xff] }
 0x344   : > { %13055 = vmatprep.mubr.f32.mxu1 %v16712_v47  ;;  %v16965_v47 = vsub.f32 %v4504_v62, %v16949_v8  ;;  %v4512_v28 = vsel %vm3164_vm7, %v19950_v57, 0  ;;  %v19669_v56 = vand.u32 4294901760, %v16970_v60  ;;  %v4522_v62 = vsel %vm3164_vm7, %v19955_v39, 0  ;;  %v19956_v57 = vld [vmem:[#allocation12_spill] sm:$0xff] }
 0x345   : > { %v16981_v16 = vand.u32 4294901760, %v4512_v28  ;;  %v17038_v43 = vand.u32 4294901760, %v4522_v62  ;;  %v17053_v54 = vsub.f32 %v4520_v11, %v17026_v61  ;;  %v19959_v11 = vld [vmem:[#allocation22_spill] sm:$0xff] }
 0x346   : > { %v19671_v7 = vand.u32 4294901760, %v16965_v47  ;;  %v4626_v37 = vsub.f32 %v16970_v60, %v19669_v56 }
 0x347   : > { %13056 = vmatmul.mubr.f32.gmra.mrb[24].mxu1 %v16708_v49  ;;  %v19672_v49 = vand.u32 4294901760, %v16954_v12 }
 0x348   : > { %13058 = vmatprep.mubr.f32.mxu1 %v16732_v21  ;;  %v16979_v21 = vsub.f32 %v4508_v10, %v16961_v30  ;;  %v4616_v6 = vsub.f32 %v16965_v47, %v19671_v7  ;;  %v4627_v27 = vand.u32 4294901760, %v4626_v37 }
 0x349   : > { %v4606_v2 = vsub.f32 %v16954_v12, %v19672_v49 }
 0x34a   : > { %v19667_v14 = vand.u32 4294901760, %v16979_v21  ;;  %v4617_v24 = vand.u32 4294901760, %v4616_v6  ;;  %v19668_v6 = vand.u32 4294901760, %v17024_v9 }
 0x34b   : > { %13059 = vmatmul.mubr.f32.gmra.mrb[26].mxu1 %v16728_v5  ;;  %v4518_v5 = vsel %vm3164_vm7, %v19953_v17, 0  ;;  %v4607_v29 = vand.u32 4294901760, %v4606_v2  ;;  %v4526_v17 = vsel %vm3164_vm7, %v19957_v34, 0 }
 0x34c   : > { %13061 = vmatprep.mubr.f32.mxu1 %v16752_v3  ;;  %v17000_v3 = vsub.f32 %v4512_v28, %v16981_v16  ;;  %v4636_v50 = vsub.f32 %v16979_v21, %v19667_v14  ;;  %v4524_v28 = vsel %vm3164_vm7, %v19956_v57, 0 }
 0x34d   : > { %v17045_v2 = vand.u32 4294901760, %v4524_v28 }
 0x34e   : > { %v19664_v10 = vand.u32 4294901760, %v17000_v3 }
 0x34f   : > { %13062 = vmatmul.mubr.f32.gmra.mrb[28].mxu1 %v16748_v1  ;;  %v17014_v1 = vand.u32 4294901760, %v4518_v5 }
 0x350   : > { %13064 = vmatprep.mubr.f32.mxu1 %v16772_v35  ;;  %v19666_v35 = vand.u32 4294901760, %v16990_v45 }
 0x351   : > { %v17033_v40 = vsub.f32 %v4518_v5, %v17014_v1  ;;  %v4656_v5 = vsub.f32 %v17000_v3, %v19664_v10  ;;  %v17070_v10 = vsub.f32 %v4524_v28, %v17045_v2  ;;  %v19960_v28 = vld [vmem:[#allocation16_spill] sm:$0xff] }
 0x352   : > { %v4646_v32 = vsub.f32 %v16990_v45, %v19666_v35 }
 0x353   : > { %13065 = vmatmul.mubr.f32.gmra.mrb[30].mxu1 %v16768_v36  ;;  %v19665_v36 = vand.u32 4294901760, %v17010_v33  ;;  %v19670_v39 = vand.u32 4294901760, %v17033_v40 }
 0x354   : > { %13069 = vmatprep.mubr.f32.mxu1 %v4607_v29  ;;  %v4637_v29 = vand.u32 4294901760, %v4636_v50  ;;  %v4647_v34 = vand.u32 4294901760, %v4646_v32  ;;  %v4530_v50 = vsel %vm3164_vm7, %v19959_v11, 0 }
 0x355   : > { %v4666_v37 = vsub.f32 %v17010_v33, %v19665_v36  ;;  %v4657_v36 = vand.u32 4294901760, %v4656_v5  ;;  %v4686_v32 = vsub.f32 %v17033_v40, %v19670_v39  ;;  %v17086_v5 = vand.u32 4294901760, %v4530_v50 }
 0x357   : > { %13070 = vmatmul.mubr.f32.vlgmr.msra.gmra.mrb[16].mxu1 %v4617_v24  ;;  %v19958_v24 = vld [vmem:[#allocation14_spill] sm:$0xff]  ;;  %v4667_v14 = vand.u32 4294901760, %v4666_v37  ;;  %v4687_v49 = vand.u32 4294901760, %v4686_v32  ;;  %v19961_v32 = vand.u32 4294901760, %v17070_v10 }
 0x358   : > { %13094 = vmatpush3.msra.mxu1 %v16929_v41  ;;  %13072 = vmatprep.mubr.f32.mxu1 %v4627_v27  ;;  %v17061_v41 = vsub.f32 %v4522_v62, %v17038_v43  ;;  %v4528_v57 = vsel %vm3164_vm7, %v19958_v24, 0  ;;  %v17065_v27 = vand.u32 4294901760, %v4526_v17  ;;  %v4676_v62 = vsub.f32 %v17024_v9, %v19668_v6 }
 0x359   : > { %13119 = vmatprep.subr.mxu1 %v16916_v63  ;;  %v17075_v35 = vand.u32 4294901760, %v4528_v57  ;;  %v19673_v24 = vand.u32 4294901760, %v17053_v54  ;;  %v4716_v53 = vsub.f32 %v17070_v10, %v19961_v32 }
 0x35a   : > { %v19676_v11 = vand.u32 4294901760, %v17061_v41  ;;  %v4677_v6 = vand.u32 4294901760, %v4676_v62 }
 0x35b   : > { %13073 = vmatmul.mubr.f32.gmra.mrb[18].mxu1 %v4637_v29  ;;  %v17082_v29 = vsub.f32 %v4526_v17, %v17065_v27  ;;  %v17090_v37 = vsub.f32 %v4528_v57, %v17075_v35  ;;  %v4696_v17 = vsub.f32 %v17053_v54, %v19673_v24 }
 0x35c   : > { %13075 = vmatprep.mubr.f32.mxu1 %v4647_v34  ;;  %v4532_v34 = vsel %vm3164_vm7, %v19960_v28, 0  ;;  %v17099_v28 = vsub.f32 %v4530_v50, %v17086_v5 }
 0x35d   : > { %v17092_v56 = vand.u32 4294901760, %v4532_v34  ;;  %v4697_v50 = vand.u32 4294901760, %v4696_v17 }
 0x35f   : > { %13076 = vmatmul.mubr.f32.gmra.mrb[20].mxu1 %v4657_v36  ;;  %v17108_v39 = vsub.f32 %v4532_v34, %v17092_v56  ;;  %v4717_v34 = vand.u32 4294901760, %v4716_v53 }
 0x360   : > { %13078 = vmatprep.mubr.f32.mxu1 %v4667_v14  ;;  %v4706_v14 = vsub.f32 %v17061_v41, %v19676_v11  ;;  %v19681_v11 = vand.u32 4294901760, %v17090_v37 }
 0x362   : > { %v3119_v7 = vpop.permute.xlu1 %3118  ;;  %v4707_v15 = vand.u32 4294901760, %v4706_v14  ;;  %v4736_v17 = vsub.f32 %v17090_v37, %v19681_v11 }
 0x363   : > { %v3117_v57 = vpop.permute.xlu0 %3116  ;;  %13079 = vmatmul.mubr.f32.gmra.mrb[22].mxu1 %v4677_v6  ;;  %v3168_v62 = vsel %vm3164_vm7, %v3119_v7, 0.0  ;;  %v19962_v6 = vand.u32 4294901760, %v17082_v29 }
 0x364   : > { %3169 = vadd.xlane.f32.xlu1 %v3168_v62  ;;  %13081 = vmatprep.mubr.f32.mxu1 %v4687_v49  ;;  %v3165_v24 = vsel %vm3164_vm7, %v3117_v57, 0.0  ;;  %v19682_v49 = vand.u32 4294901760, %v17099_v28  ;;  %v4755_v62 = vand.u32 4294901760, %v17108_v39  ;;  %v4737_v53 = vand.u32 4294901760, %v4736_v17 }
 0x365   : > { %3166 = vadd.xlane.f32.xlu0 %v3165_v24  ;;  %v4726_v7 = vsub.f32 %v17082_v29, %v19962_v6 }
 0x366   : > { %v3123_v36 = vpop.permute.xlu1 %3122  ;;  %v4746_v32 = vsub.f32 %v17099_v28, %v19682_v49 }
 0x367   : > { %v3121_v57 = vpop.permute.xlu0 %3120  ;;  %13082 = vmatmul.mubr.f32.gmra.mrb[24].mxu1 %v4697_v50  ;;  %v4727_v14 = vand.u32 4294901760, %v4726_v7 }
 0x368   : > { %13084 = vmatprep.mubr.f32.mxu1 %v4707_v15  ;;  %v3171_v24 = vsel %vm3164_vm7, %v3121_v57, 0.0  ;;  %v3174_v15 = vsel %vm3164_vm7, %v3123_v36, 0.0  ;;  %v4756_v57 = vsub.f32 %v17108_v39, %v4755_v62  ;;  %v4747_v7 = vand.u32 4294901760, %v4746_v32 }
 0x369   : > { %3172 = vadd.xlane.f32.xlu0 %v3171_v24 }
 0x36a   : > { %v4757_v36 = vand.u32 4294901760, %v4756_v57 }
 0x36b   : > { %v3127_v6 = vpop.permute.xlu1 %3126  ;;  %v3125_v20 = vpop.permute.xlu0 %3124  ;;  %13085 = vmatmul.mubr.f32.gmra.mrb[26].mxu1 %v4717_v34 }
 0x36c   : > { %13087 = vmatprep.mubr.f32.mxu1 %v4727_v14  ;;  %v3177_v50 = vsel %vm3164_vm7, %v3125_v20, 0.0  ;;  %v3180_v49 = vsel %vm3164_vm7, %v3127_v6, 0.0 }
 0x36d   : > { %3175 = vadd.xlane.f32.xlu0 %v3174_v15  ;;  %3178 = vadd.xlane.f32.xlu1 %v3177_v50 }
 0x36f   : > { %v3131_v24 = vpop.permute.xlu1 %3130  ;;  %v3129_v11 = vpop.permute.xlu0 %3128  ;;  %13088 = vmatmul.mubr.f32.gmra.mrb[28].mxu1 %v4737_v53 }
 0x370   : > { %13090 = vmatprep.mubr.f32.mxu1 %v4747_v7  ;;  %v3183_v34 = vsel %vm3164_vm7, %v3129_v11, 0.0  ;;  %v3186_v17 = vsel %vm3164_vm7, %v3131_v24, 0.0 }
 0x371   : > { %3181 = vadd.xlane.f32.xlu0 %v3180_v49  ;;  %3184 = vadd.xlane.f32.xlu1 %v3183_v34 }
 0x373   : > { %v3135_v20 = vpop.permute.xlu1 %3134  ;;  %v3133_v14 = vpop.permute.xlu0 %3132  ;;  %13091 = vmatmul.mubr.f32.gmra.mrb[30].mxu1 %v4757_v36 }
 0x374   : > { %13095 = vmatprep.mubr.f32.mxu1 %v16943_v38  ;;  %v3189_v32 = vsel %vm3164_vm7, %v3133_v14, 0.0  ;;  %v3192_v11 = vsel %vm3164_vm7, %v3135_v20, 0.0  ;;  %v19963_v14 = vand.u32 4294901760, %v16954_v12 }
 0x375   : > { %3187 = vadd.xlane.f32.xlu0 %v3186_v17  ;;  %3190 = vadd.xlane.f32.xlu1 %v3189_v32  ;;  %v19964_v17 = vand.u32 4294901760, %v16965_v47  ;;  %v19965_v32 = vand.u32 4294901760, %v16970_v60 }
 0x377   : > { %v3139_v15 = vpop.permute.xlu1 %3138  ;;  %v3137_v50 = vpop.permute.xlu0 %3136  ;;  %13096 = vmatmul.mubr.f32.vlgmr.msra.gmra.mrb[16].mxu1 %v16949_v8 }
 0x378   : > { %13120 = vmatpush3.msra.mxu1 %v16916_v63  ;;  %13098 = vmatprep.mubr.f32.mxu1 %v16956_v4  ;;  %v3195_v49 = vsel %vm3164_vm7, %v3137_v50, 0.0  ;;  %v3198_v57 = vsel %vm3164_vm7, %v3139_v15, 0.0  ;;  %v19966_v15 = vand.u32 4294901760, %v16979_v21  ;;  %v19967_v50 = vand.u32 4294901760, %v16990_v45 }
 0x379   : > { %3193 = vadd.xlane.f32.xlu0 %v3192_v11  ;;  %3196 = vadd.xlane.f32.xlu1 %v3195_v49  ;;  %v19968_v11 = vand.u32 4294901760, %v17000_v3 }
 0x37a   : > { %13145 = vmatprep.subr.mxu1 %v16901_v59 }
 0x37b   : > { %v3143_v6 = vpop.permute.xlu1 %3142  ;;  %v3141_v53 = vpop.permute.xlu0 %3140  ;;  %13099 = vmatmul.mubr.f32.gmra.mrb[18].mxu1 %v16961_v30 }
 0x37c   : > { %13101 = vmatprep.mubr.f32.mxu1 %v16972_v58  ;;  %v3201_v63 = vsel %vm3164_vm7, %v3141_v53, 0.0  ;;  %v3204_v24 = vsel %vm3164_vm7, %v3143_v6, 0.0 }
 0x37d   : > { %3199 = vadd.xlane.f32.xlu0 %v3198_v57  ;;  %3202 = vadd.xlane.f32.xlu1 %v3201_v63 }
 0x37f   : > { %v3145_v7 = vpop.permute.xlu0 %3144  ;;  %13102 = vmatmul.mubr.f32.gmra.mrb[20].mxu1 %v16981_v16  ;;  %v3147_v36 = vpop.permute.xlu1 %3146 }
 0x380   : > { %13104 = vmatprep.mubr.f32.mxu1 %v16987_v18  ;;  %v3207_v34 = vsel %vm3164_vm7, %v3145_v7, 0.0  ;;  %v3210_v20 = vsel %vm3164_vm7, %v3147_v36, 0.0 }
 0x381   : > { %3205 = vadd.xlane.f32.xlu0 %v3204_v24  ;;  %3208 = vadd.xlane.f32.xlu1 %v3207_v34 }
 0x383   : > { %13105 = vmatmul.mubr.f32.gmra.mrb[22].mxu1 %v17002_v0 }
 0x384   : > { %13107 = vmatprep.mubr.f32.mxu1 %v17014_v1 }
 0x385   : > { %3211 = vadd.xlane.f32.xlu0 %v3210_v20 }
 0x387   : > { %13108 = vmatmul.mubr.f32.gmra.mrb[24].mxu1 %v17026_v61 }
 0x388   : > { %13110 = vmatprep.mubr.f32.mxu1 %v17038_v43 }
 0x38b   : > { %13111 = vmatmul.mubr.f32.gmra.mrb[26].mxu1 %v17045_v2 }
 0x38c   : > { %13113 = vmatprep.mubr.f32.mxu1 %v17065_v27 }
 0x38f   : > { %13114 = vmatmul.mubr.f32.gmra.mrb[28].mxu1 %v17075_v35 }
 0x390   : > { %13116 = vmatprep.mubr.f32.mxu1 %v17086_v5 }
 0x393   : > { %13117 = vmatmul.mubr.f32.gmra.mrb[30].mxu1 %v17092_v56 }
 0x394   : > { %13121 = vmatprep.mubr.f32.mxu1 %v16954_v12  ;;  %v19969_v12 = vand.u32 4294901760, %v17010_v33 }
 0x397   : > { %13122 = vmatmul.mubr.f32.vlgmr.msra.gmra.mrb[16].mxu1 %v16965_v47  ;;  %v19970_v47 = vand.u32 4294901760, %v17024_v9 }
 0x398   : > { %13146 = vmatpush3.msra.mxu1 %v16901_v59  ;;  %13124 = vmatprep.mubr.f32.mxu1 %v16970_v60  ;;  %v19972_v60 = vand.u32 4294901760, %v17053_v54 }
 0x399   : > { %13171 = vmatprep.subr.mxu1 %v16921_v52 }
 0x39b   : > { %13125 = vmatmul.mubr.f32.gmra.mrb[18].mxu1 %v16979_v21  ;;  %v19973_v21 = vand.u32 4294901760, %v17061_v41 }
 0x39c   : > { %13127 = vmatprep.mubr.f32.mxu1 %v16990_v45  ;;  %v19974_v45 = vand.u32 4294901760, %v17070_v10 }
 0x39f   : > { %13128 = vmatmul.mubr.f32.gmra.mrb[20].mxu1 %v17000_v3  ;;  %v19975_v3 = vand.u32 4294901760, %v17082_v29 }
 0x3a0   : > { %13130 = vmatprep.mubr.f32.mxu1 %v17010_v33  ;;  %v19976_v33 = vand.u32 4294901760, %v17090_v37 }
 0x3a3   : > { %13131 = vmatmul.mubr.f32.gmra.mrb[22].mxu1 %v17024_v9  ;;  %v19977_v9 = vand.u32 4294901760, %v17099_v28 }
 0x3a4   : > { %13133 = vmatprep.mubr.f32.mxu1 %v17033_v40 }
 0x3a7   : > { %13134 = vmatmul.mubr.f32.gmra.mrb[24].mxu1 %v17053_v54 }
 0x3a8   : > { %13136 = vmatprep.mubr.f32.mxu1 %v17061_v41 }
 0x3ab   : > { %13137 = vmatmul.mubr.f32.gmra.mrb[26].mxu1 %v17070_v10 }
 0x3ac   : > { %13139 = vmatprep.mubr.f32.mxu1 %v17082_v29 }
 0x3af   : > { %13140 = vmatmul.mubr.f32.gmra.mrb[28].mxu1 %v17090_v37 }
 0x3b0   : > { %13142 = vmatprep.mubr.f32.mxu1 %v17099_v28 }
 0x3b3   : > { %13143 = vmatmul.mubr.f32.gmra.mrb[30].mxu1 %v17108_v39 }
 0x3b4   : > { %13147 = vmatprep.mubr.f32.mxu1 %v19963_v14 }
 0x3b7   : > { %13148 = vmatmul.mubr.f32.vlgmr.msra.gmra.mrb[16].mxu1 %v19964_v17 }
 0x3b8   : > { %13172 = vmatpush3.msra.mxu1 %v16921_v52  ;;  %13150 = vmatprep.mubr.f32.mxu1 %v19965_v32  ;;  %v19971_v52 = vand.u32 4294901760, %v17033_v40  ;;  %v17311_v32 = vld [vmem:[%s19561_s5] ss:$0 sm:$0xff] }
 0x3b9   : > { %13197 = vmatprep.subr.mxu1 %v16901_v59 }
 0x3bb   : > { %13151 = vmatmul.mubr.f32.gmra.mrb[18].mxu1 %v19966_v15 }
 0x3bc   : > { %13153 = vmatprep.mubr.f32.mxu1 %v19967_v50 }
 0x3bf   : > { %13154 = vmatmul.mubr.f32.gmra.mrb[20].mxu1 %v19968_v11 }
 0x3c0   : > { %13156 = vmatprep.mubr.f32.mxu1 %v19969_v12 }
 0x3c3   : > { %13157 = vmatmul.mubr.f32.gmra.mrb[22].mxu1 %v19970_v47 }
 0x3c4   : > { %13159 = vmatprep.mubr.f32.mxu1 %v19971_v52 }
 0x3c7   : > { %13160 = vmatmul.mubr.f32.gmra.mrb[24].mxu1 %v19972_v60 }
 0x3c8   : > { %13162 = vmatprep.mubr.f32.mxu1 %v19973_v21 }
 0x3cb   : > { %13163 = vmatmul.mubr.f32.gmra.mrb[26].mxu1 %v19974_v45 }
 0x3cc   : > { %13165 = vmatprep.mubr.f32.mxu1 %v19975_v3 }
 0x3cf   : > { %13166 = vmatmul.mubr.f32.gmra.mrb[28].mxu1 %v19976_v33 }
 0x3d0   : > { %13168 = vmatprep.mubr.f32.mxu1 %v19977_v9 }
 0x3d3   : > { %13169 = vmatmul.mubr.f32.gmra.mrb[30].mxu1 %v4755_v62 }
 0x3d4   : > { %13173 = vmatprep.mubr.f32.mxu1 %v16943_v38 }
 0x3d7   : > { %13174 = vmatmul.mubr.f32.vlgmr.msra.gmra.mrb[16].mxu1 %v16949_v8 }
 0x3d8   : > { %13198 = vmatpush3.msra.mxu1 %v16901_v59  ;;  %13176 = vmatprep.mubr.f32.mxu1 %v16956_v4  ;;  %v5739_v59 = vld [vmem:[%s19564_s8] sm:$0xf] }
 0x3db   : > { %13177 = vmatmul.mubr.f32.gmra.mrb[18].mxu1 %v16961_v30 }
 0x3dc   : > { %13179 = vmatprep.mubr.f32.mxu1 %v16972_v58 }
 0x3df   : > { %13180 = vmatmul.mubr.f32.gmra.mrb[20].mxu1 %v16981_v16 }
 0x3e0   : > { %13182 = vmatprep.mubr.f32.mxu1 %v16987_v18 }
 0x3e3   : > { %13183 = vmatmul.mubr.f32.gmra.mrb[22].mxu1 %v17002_v0 }
 0x3e4   : > { %13185 = vmatprep.mubr.f32.mxu1 %v17014_v1 }
 0x3e7   : > { %13186 = vmatmul.mubr.f32.gmra.mrb[24].mxu1 %v17026_v61 }
 0x3e8   : > { %13188 = vmatprep.mubr.f32.mxu1 %v17038_v43 }
 0x3eb   : > { %13189 = vmatmul.mubr.f32.gmra.mrb[26].mxu1 %v17045_v2 }
 0x3ec   : > { %13191 = vmatprep.mubr.f32.mxu1 %v17065_v27 }
 0x3ef   : > { %13192 = vmatmul.mubr.f32.gmra.mrb[28].mxu1 %v17075_v35 }
 0x3f0   : > { %13194 = vmatprep.mubr.f32.mxu1 %v17086_v5 }
 0x3f3   : > { %13195 = vmatmul.mubr.f32.gmra.mrb[30].mxu1 %v17092_v56 }
 0x3f4   : > { %13199 = vmatprep.mubr.f32.mxu1 %v16943_v38  ;;  %v5791_v38 = vsel %vm5789_vm9, %v5739_v59, 0 }
 0x3f7   : > { %13200 = vmatmul.mubr.f32.vlgmr.msra.gmra.mrb[16].mxu1 %v16949_v8  ;;  %v17249_v8 = vand.u32 4294901760, %v5791_v38 }
 0x3f8   : > { %13202 = vmatprep.mubr.f32.mxu1 %v16956_v4 }
 0x3f9   : > { %13223 = vmatprep.subr.mxu0 %v17249_v8  ;;  %v17254_v4 = vsub.f32 %v5791_v38, %v17249_v8 }
 0x3fa   : > { %13224 = vmatpush3.msra.mxu0 %v17249_v8 }
 0x3fb   : > { %13203 = vmatmul.mubr.f32.gmra.mrb[18].mxu1 %v16961_v30  ;;  %v17257_v30 = vand.u32 4294901760, %v17254_v4 }
 0x3fc   : > { %13205 = vmatprep.mubr.f32.mxu1 %v16972_v58 }
 0x3fd   : > { %v6023_v58 = vsub.f32 %v17254_v4, %v17257_v30 }
 0x3ff   : > { %13206 = vmatmul.mubr.f32.gmra.mrb[20].mxu1 %v16981_v16  ;;  %v17261_v16 = vand.u32 4294901760, %v6023_v58 }
 0x400   : > { %13208 = vmatprep.mubr.f32.mxu1 %v16987_v18  ;;  %v3167_v18 = vpop.xlane.xlu0 %3166 }
 0x401   : > { %13249 = vmatprep.subr.mxu0 %v17261_v16  ;;  %vm3215_vm12 = vcmp.eq.f32.partialorder %v3167_v18, inf  ;;  %vm3217_vm13 = vcmp.eq.f32.partialorder %v3167_v18, 0.0  ;;  %v3218_v57 = vand.u32 2147483648, %v3167_v18 }
 0x403   : > { %13209 = vmatmul.mubr.f32.gmra.mrb[22].mxu1 %v17002_v0  ;;  %v3170_v0 = vpop.xlane.xlu1 %3169 }
 0x404   : > { %13211 = vmatprep.mubr.f32.mxu1 %v17014_v1  ;;  %15454 = vrsqrt.f32 %v3170_v0  ;;  %vm3222_vm10 = vcmp.eq.f32.partialorder %v3170_v0, inf  ;;  %vm3224_vm11 = vcmp.eq.f32.partialorder %v3170_v0, 0.0  ;;  %v3225_v49 = vand.u32 2147483648, %v3170_v0 }
 0x405   : > { %15456 = vrsqrt.f32 %v3167_v18 }
 0x407   : > { %13212 = vmatmul.mubr.f32.gmra.mrb[24].mxu1 %v17026_v61 }
 0x408   : > { %13214 = vmatprep.mubr.f32.mxu1 %v17038_v43 }
 0x40b   : > { %13215 = vmatmul.mubr.f32.gmra.mrb[26].mxu1 %v17045_v2 }
 0x40c   : > { %13217 = vmatprep.mubr.f32.mxu1 %v17065_v27 }
 0x40e   : > { %v15455_v39 = vpop.eup %15454 }
 0x40f   : > { %13218 = vmatmul.mubr.f32.gmra.mrb[28].mxu1 %v17075_v35  ;;  %v17268_v35 = vpop.xlane.xlu1 %3178  ;;  %v15457_v41 = vpop.eup %15456  ;;  %v3221_v29 = vmul.f32 %v15455_v39, %v3170_v0 }
 0x410   : > { %13220 = vmatprep.mubr.f32.mxu1 %v17086_v5  ;;  %v3214_v28 = vmul.f32 %v15457_v41, %v3167_v18  ;;  %vm3243_vm4 = vcmp.eq.f32.partialorder %v17268_v35, inf  ;;  %vm3245_vm5 = vcmp.eq.f32.partialorder %v17268_v35, 0.0  ;;  %v3246_v12 = vand.u32 2147483648, %v17268_v35 }
 0x411   : > { %v3223_v53 = vsel %vm3222_vm10, %v3170_v0, %v3221_v29 }
 0x412   : > { %v3216_v24 = vsel %vm3215_vm12, %v3167_v18, %v3214_v28  ;;  %v3226_v17 = vsel %vm3224_vm11, %v3225_v49, %v3223_v53 }
 0x413   : > { %13221 = vmatmul.mubr.f32.gmra.mrb[30].mxu1 %v17092_v56  ;;  %v17264_v56 = vpop.xlane.xlu0 %3172  ;;  %v17272_v10 = vpop.xlane.xlu1 %3184  ;;  %v3219_v47 = vsel %vm3217_vm13, %v3218_v57, %v3216_v24  ;;  %v17325_v60 = vmul.f32 %v17311_v32, %v3226_v17 }
 0x414   : > { %15458 = vrsqrt.f32 %v17264_v56  ;;  %vm3229_vm14 = vcmp.eq.f32.partialorder %v17264_v56, inf  ;;  %vm3231_vm15 = vcmp.eq.f32.partialorder %v17264_v56, 0.0  ;;  %v3232_v7 = vand.u32 2147483648, %v17264_v56 }
 0x415   : > { %15460 = vrsqrt.f32 %v17268_v35  ;;  %vm3257_vm8 = vcmp.eq.f32.partialorder %v17272_v10, inf  ;;  %v17340_v18 = vmul.f32 %v17311_v32, %v3219_v47  ;;  %vm3259_vm7 = vcmp.eq.f32.partialorder %v17272_v10, 0.0 }
 0x416   : > { %v3260_v0 = vand.u32 2147483648, %v17272_v10 }
 0x417   : > { %v17266_v1 = vpop.xlane.xlu0 %3175  ;;  %v17276_v43 = vpop.xlane.xlu1 %3190 }
 0x418   : > { %15462 = vrsqrt.f32 %v17266_v1  ;;  %vm3236_vm1 = vcmp.eq.f32.partialorder %v17266_v1, inf  ;;  %vm3238_vm2 = vcmp.eq.f32.partialorder %v17266_v1, 0.0  ;;  %v3239_v34 = vand.u32 2147483648, %v17266_v1 }
 0x419   : > { %15464 = vrsqrt.f32 %v17272_v10  ;;  %vm3271_vm11 = vcmp.eq.f32.partialorder %v17276_v43, inf  ;;  %vm3273_vm13 = vcmp.eq.f32.partialorder %v17276_v43, 0.0 }
 0x41b   : > { %v17270_v61 = vpop.xlane.xlu0 %3181  ;;  %v17283_v54 = vpop.xlane.xlu1 %3196 }
 0x41c   : > { %15466 = vrsqrt.f32 %v17270_v61  ;;  %vm3250_vm3 = vcmp.eq.f32.partialorder %v17270_v61, inf  ;;  %vm3252_vm6 = vcmp.eq.f32.partialorder %v17270_v61, 0.0  ;;  %v3253_v52 = vand.u32 2147483648, %v17270_v61 }
 0x41d   : > { %15468 = vrsqrt.f32 %v17276_v43  ;;  %v3288_v24 = vand.u32 2147483648, %v17283_v54 }
 0x41e   : > { %v15459_v37 = vpop.eup %15458 }
 0x41f   : > { %v17274_v40 = vpop.xlane.xlu0 %3187  ;;  %v17290_v5 = vpop.xlane.xlu1 %3202  ;;  %v3228_v36 = vmul.f32 %v15459_v37, %v17264_v56 }
 0x420   : > { %15470 = vrsqrt.f32 %v17274_v40  ;;  %v15461_v62 = vpop.eup %15460  ;;  %vm3264_vm0 = vcmp.eq.f32.partialorder %v17274_v40, inf  ;;  %vm3266_vm10 = vcmp.eq.f32.partialorder %v17274_v40, 0.0  ;;  %v3267_v41 = vand.u32 2147483648, %v17274_v40 }
 0x421   : > { %15472 = vrsqrt.f32 %v17283_v54  ;;  %v3242_v50 = vmul.f32 %v15461_v62, %v17268_v35  ;;  %v3230_v21 = vsel %vm3229_vm14, %v17264_v56, %v3228_v36 }
 0x422   : > { %v15463_v6 = vpop.eup %15462  ;;  %v3233_v39 = vsel %vm3231_vm15, %v3232_v7, %v3230_v21  ;;  %vm3285_vm15 = vcmp.eq.f32.partialorder %v17283_v54, inf }
 0x423   : > { %v17280_v2 = vpop.xlane.xlu0 %3193  ;;  %v15465_v20 = vpop.eup %15464  ;;  %v3235_v15 = vmul.f32 %v15463_v6, %v17266_v1  ;;  %v3244_v59 = vsel %vm3243_vm4, %v17268_v35, %v3242_v50  ;;  %v17365_v53 = vmul.f32 %v17311_v32, %v3233_v39  ;;  %v3274_v35 = vand.u32 2147483648, %v17276_v43 }
 0x424   : > { %15474 = vrsqrt.f32 %v17280_v2  ;;  %v17305_v14 = vpop.xlane.xlu1 %3208  ;;  %v3256_v38 = vmul.f32 %v15465_v20, %v17272_v10  ;;  %v3247_v37 = vsel %vm3245_vm5, %v3246_v12, %v3244_v59  ;;  %vm3278_vm12 = vcmp.eq.f32.partialorder %v17280_v2, inf }
 0x425   : > { %15476 = vrsqrt.f32 %v17290_v5  ;;  %v3237_v33 = vsel %vm3236_vm1, %v17266_v1, %v3235_v15  ;;  %vm3280_vm14 = vcmp.eq.f32.partialorder %v17280_v2, 0.0  ;;  %v3281_v7 = vand.u32 2147483648, %v17280_v2 }
 0x426   : > { %v15467_v11 = vpop.eup %15466  ;;  %v3240_v29 = vsel %vm3238_vm2, %v3239_v34, %v3237_v33  ;;  %v3258_v49 = vsel %vm3257_vm8, %v17272_v10, %v3256_v38  ;;  %vm3287_vm1 = vcmp.eq.f32.partialorder %v17283_v54, 0.0  ;;  %v17379_v20 = vmul.f32 %v17311_v32, %v3247_v37 }
 0x427   : > { %v17287_v27 = vpop.xlane.xlu0 %3199  ;;  %v15469_v45 = vpop.eup %15468  ;;  %v3249_v9 = vmul.f32 %v15467_v11, %v17270_v61  ;;  %v5638_v34 = vmul.f32 %v17311_v32, %v3240_v29  ;;  %v3261_v17 = vsel %vm3259_vm7, %v3260_v0, %v3258_v49  ;;  %vm3299_vm4 = vcmp.eq.f32.partialorder %v17290_v5, inf  ;;  %v17432_v49 = vld [vmem:[%s19562_s6] ss:$0 sm:$0xff] }
 0x428   : > { %15478 = vrsqrt.f32 %v17287_v27  ;;  %v3270_v6 = vmul.f32 %v15469_v45, %v17276_v43  ;;  %vm3292_vm2 = vcmp.eq.f32.partialorder %v17287_v27, inf  ;;  %v3295_v10 = vand.u32 2147483648, %v17287_v27 }
 0x429   : > { %15480 = vrsqrt.f32 %v17305_v14  ;;  %v3251_v56 = vsel %vm3250_vm3, %v17270_v61, %v3249_v9  ;;  %vm3294_vm3 = vcmp.eq.f32.partialorder %v17287_v27, 0.0  ;;  %v17396_v21 = vmul.f32 %v17311_v32, %v3261_v17 }
 0x42a   : > { %v15471_v58 = vpop.eup %15470  ;;  %v3254_v36 = vsel %vm3252_vm6, %v3253_v52, %v3251_v56  ;;  %v3272_v12 = vsel %vm3271_vm11, %v17276_v43, %v3270_v6  ;;  %vm3301_vm5 = vcmp.eq.f32.partialorder %v17290_v5, 0.0  ;;  %v3302_v45 = vand.u32 2147483648, %v17290_v5 }
 0x42b   : > { %v17296_v63 = vpop.xlane.xlu0 %3205  ;;  %v15473_v28 = vpop.eup %15472  ;;  %v3263_v62 = vmul.f32 %v15471_v58, %v17274_v40  ;;  %v17402_v33 = vmul.f32 %v17311_v32, %v3254_v36  ;;  %v3275_v59 = vsel %vm3273_vm13, %v3274_v35, %v3272_v12  ;;  %vm5740_vm7 = vcmask 31744  }
 0x42c   : > { %15482 = vrsqrt.f32 %v17296_v63  ;;  %v3284_v61 = vmul.f32 %v15473_v28, %v17283_v54  ;;  %vm3306_vm6 = vcmp.eq.f32.partialorder %v17296_v63, inf  ;;  %vm3308_vm8 = vcmp.eq.f32.partialorder %v17296_v63, 0.0 }
 0x42d   : > { %v3265_v50 = vsel %vm3264_vm0, %v17274_v40, %v3263_v62  ;;  %v3309_v43 = vand.u32 2147483648, %v17296_v63  ;;  %vm3313_vm0 = vcmp.eq.f32.partialorder %v17305_v14, inf  ;;  %v17425_v28 = vmul.f32 %v17311_v32, %v3275_v59 }
 0x42e   : > { %v15475_v1 = vpop.eup %15474  ;;  %v3268_v9 = vsel %vm3266_vm10, %v3267_v41, %v3265_v50  ;;  %v3286_v39 = vsel %vm3285_vm15, %v17283_v54, %v3284_v61  ;;  %vm3315_vm10 = vcmp.eq.f32.partialorder %v17305_v14, 0.0  ;;  %v3316_v56 = vand.u32 2147483648, %v17305_v14 }
 0x42f   : > { %v17331_v3 = vpop.xlane.xlu0 %3211  ;;  %v15477_v57 = vpop.eup %15476  ;;  %v3277_v11 = vmul.f32 %v15475_v1, %v17280_v2  ;;  %v17422_v37 = vmul.f32 %v17311_v32, %v3268_v9  ;;  %v3289_v35 = vsel %vm3287_vm1, %v3288_v24, %v3286_v39 }
 0x430   : > { %15484 = vrsqrt.f32 %v17331_v3  ;;  %v3298_v52 = vmul.f32 %v15477_v57, %v17290_v5  ;;  %vm3320_vm11 = vcmp.eq.f32.partialorder %v17331_v3, inf  ;;  %v3323_v54 = vand.u32 2147483648, %v17331_v3 }
 0x431   : > { %v3279_v0 = vsel %vm3278_vm12, %v17280_v2, %v3277_v11  ;;  %vm3322_vm12 = vcmp.eq.f32.partialorder %v17331_v3, 0.0  ;;  %v17460_v11 = vmul.f32 %v17311_v32, %v3289_v35 }
 0x432   : > { %v15479_v15 = vpop.eup %15478  ;;  %v3300_v41 = vsel %vm3299_vm4, %v17290_v5, %v3298_v52  ;;  %v3282_v6 = vsel %vm3280_vm14, %v3281_v7, %v3279_v0 }
 0x433   : > { %v15481_v47 = vpop.eup %15480  ;;  %v3291_v38 = vmul.f32 %v15479_v15, %v17287_v27  ;;  %v3303_v15 = vsel %vm3301_vm5, %v3302_v45, %v3300_v41  ;;  %v17455_v24 = vmul.f32 %v17311_v32, %v3282_v6 }
 0x434   : > { %v3312_v29 = vmul.f32 %v15481_v47, %v17305_v14  ;;  %v17467_v47 = vmul.f32 %v17311_v32, %v3303_v15 }
 0x435   : > { %v3293_v1 = vsel %vm3292_vm2, %v17287_v27, %v3291_v38 }
 0x436   : > { %v15483_v58 = vpop.eup %15482  ;;  %v3314_v2 = vsel %vm3313_vm0, %v17305_v14, %v3312_v29  ;;  %v3296_v5 = vsel %vm3294_vm3, %v3295_v10, %v3293_v1 }
 0x437   : > { %v3305_v57 = vmul.f32 %v15483_v58, %v17296_v63  ;;  %v3317_v52 = vsel %vm3315_vm10, %v3316_v56, %v3314_v2  ;;  %v17476_v58 = vmul.f32 %v17311_v32, %v3296_v5 }
 0x439   : > { %v3307_v61 = vsel %vm3306_vm6, %v17296_v63, %v3305_v57 }
 0x43a   : > { %v15485_v40 = vpop.eup %15484  ;;  %v3310_v14 = vsel %vm3308_vm8, %v3309_v43, %v3307_v61 }
 0x43b   : > { %v3319_v50 = vmul.f32 %v15485_v40, %v17331_v3 }
 0x43d   : > { %v3321_v10 = vsel %vm3320_vm11, %v17331_v3, %v3319_v50 }
 0x43e   : > { %v3324_v56 = vsel %vm3322_vm12, %v3323_v54, %v3321_v10 }
 0x4ca   : > { %v13201_v62 = vpop.f32.mrb[16].mxu1 }
 0x4cb   : > { %v5652_v36 = vadd.f32 %v13201_v62, %v17325_v60  ;;  %v5534_v17 = vpop.f32.mrb[17].mxu1 }
 0x4cc   : > { %v5651_v7 = vadd.f32 %v17340_v18, %v5534_v17  ;;  %v17501_v17 = vmul.f32 %v17311_v32, %v3310_v14 }
 0x4cd   : > { %v5675_v60 = vadd.f32 %v17432_v49, %v5652_v36 }
 0x4ce   : > { %v5674_v12 = vadd.f32 %v17432_v49, %v5651_v7  ;;  %v13204_v18 = vpop.f32.mrb[18].mxu1 }
 0x4cf   : > { %v5654_v45 = vadd.f32 %v13204_v18, %v5638_v34  ;;  %v5546_v9 = vpop.f32.mrb[19].mxu1  ;;  %vm5691_vm13 = vcmp.gt.f32.partialorder %v5675_v60, 0.0  ;;  %v5707_v27 = vmul.f32 0.2, %v5675_v60  ;;  %v17482_v34 = vmul.f32 %v17311_v32, %v3317_v52 }
 0x4d0   : > { %v5653_v59 = vadd.f32 %v17365_v53, %v5546_v9  ;;  %vm5690_vm14 = vcmp.gt.f32.partialorder %v5674_v12, 0.0  ;;  %v5706_v38 = vmul.f32 0.2, %v5674_v12 }
 0x4d1   : > { %v5677_v0 = vadd.f32 %v17432_v49, %v5654_v45  ;;  %v5723_v39 = vsel %vm5691_vm13, %v5675_v60, %v5707_v27 }
 0x4d2   : > { %v5676_v29 = vadd.f32 %v17432_v49, %v5653_v59  ;;  %9486 = vrot.lane.b32.xlu0 %v5723_v39, %s15537_s27  ;;  %v5745_v53 = vsel %vm5740_vm7, %v5723_v39, 0  ;;  %v13207_v40 = vpop.f32.mrb[20].mxu1  ;;  %v5722_v41 = vsel %vm5690_vm14, %v5674_v12, %v5706_v38 }
 0x4d3   : > { %v17489_v62 = vand.u32 4294901760, %v5745_v53  ;;  %v5656_v6 = vadd.f32 %v13207_v40, %v17402_v33  ;;  %9484 = vrot.lane.b32.xlu1 %v5722_v41, %s15537_s27  ;;  %v5742_v63 = vsel %vm5740_vm7, %v5722_v41, 0  ;;  %v5558_v43 = vpop.f32.mrb[21].mxu1  ;;  %vm5693_vm15 = vcmp.gt.f32.partialorder %v5677_v0, 0.0 }
 0x4d4   : > { %v17494_v1 = vand.u32 4294901760, %v5742_v63  ;;  %v5655_v35 = vadd.f32 %v17379_v20, %v5558_v43  ;;  %v5709_v57 = vmul.f32 0.2, %v5677_v0  ;;  %vm5692_vm1 = vcmp.gt.f32.partialorder %v5676_v29, 0.0 }
 0x4d5   : > { %v17498_v36 = vsub.f32 %v5745_v53, %v17489_v62  ;;  %v5708_v3 = vmul.f32 0.2, %v5676_v29  ;;  %v17504_v33 = vmul.f32 %v17311_v32, %v3324_v56  ;;  %v5679_v15 = vadd.f32 %v17432_v49, %v5656_v6 }
 0x4d6   : > { %v17508_v50 = vsub.f32 %v5742_v63, %v17494_v1  ;;  %v5678_v2 = vadd.f32 %v17432_v49, %v5655_v35  ;;  %v13210_v20 = vpop.f32.mrb[22].mxu1  ;;  %v5725_v7 = vsel %vm5693_vm15, %v5677_v0, %v5709_v57 }
 0x4d7   : > { %v5871_v54 = vand.u32 4294901760, %v17498_v36  ;;  %v5658_v60 = vadd.f32 %v13210_v20, %v17422_v37  ;;  %9490 = vrot.lane.b32.xlu1 %v5725_v7, %s15537_s27  ;;  %v5751_v5 = vsel %vm5740_vm7, %v5725_v7, 0  ;;  %v5570_v12 = vpop.f32.mrb[23].mxu1  ;;  %v5724_v32 = vsel %vm5692_vm1, %v5676_v29, %v5708_v3 }
 0x4d8   : > { %v17515_v18 = vand.u32 4294901760, %v5751_v5  ;;  %v5657_v61 = vadd.f32 %v17396_v21, %v5570_v12  ;;  %v5748_v52 = vsel %vm5740_vm7, %v5724_v32, 0  ;;  %vm5694_vm2 = vcmp.gt.f32.partialorder %v5678_v2, 0.0 }
 0x4d9   : > { %v17520_v45 = vadd.f32 %v17432_v49, %v5658_v60  ;;  %v17522_v9 = vand.u32 4294901760, %v5748_v52  ;;  %v5710_v27 = vmul.f32 0.2, %v5678_v2  ;;  %v5861_v37 = vand.u32 4294901760, %v17508_v50 }
 0x4da   : > { %v17526_v10 = vsub.f32 %v5751_v5, %v17515_v18  ;;  %v5680_v59 = vadd.f32 %v17432_v49, %v5657_v61  ;;  %v13213_v38 = vpop.f32.mrb[24].mxu1  ;;  %v5872_v21 = vsub.f32 %v17498_v36, %v5871_v54  ;;  %vm5695_vm3 = vcmp.gt.f32.partialorder %v5679_v15, 0.0 }
 0x4db   : > { %v5660_v0 = vadd.f32 %v13213_v38, %v17455_v24  ;;  %9488 = vrot.lane.b32.xlu1 %v5724_v32, %s15537_s27  ;;  %v17535_v39 = vsub.f32 %v5748_v52, %v17522_v9  ;;  %v5726_v14 = vsel %vm5694_vm2, %v5678_v2, %v5710_v27  ;;  %v5582_v29 = vpop.f32.mrb[25].mxu1  ;;  %v5862_v53 = vsub.f32 %v17508_v50, %v5861_v37 }
 0x4dc   : > { %9492 = vrot.lane.b32.xlu0 %v5726_v14, %s15537_s27  ;;  %v5754_v40 = vsel %vm5740_vm7, %v5726_v14, 0  ;;  %v5659_v41 = vadd.f32 %v17425_v28, %v5582_v29  ;;  %v5873_v56 = vand.u32 4294901760, %v5872_v21  ;;  %v5711_v6 = vmul.f32 0.2, %v5679_v15 }
 0x4dd   : > { %v17544_v24 = vadd.f32 %v17432_v49, %v5660_v0  ;;  %v17546_v63 = vand.u32 4294901760, %v5754_v40  ;;  %v5863_v43 = vand.u32 4294901760, %v5862_v53  ;;  %vm5696_vm4 = vcmp.gt.f32.partialorder %v5680_v59, 0.0 }
 0x4de   : > { %v5682_v35 = vadd.f32 %v17432_v49, %v5659_v41  ;;  %v13216_v57 = vpop.f32.mrb[26].mxu1  ;;  %v5727_v3 = vsel %vm5695_vm3, %v5679_v15, %v5711_v6  ;;  %v5712_v2 = vmul.f32 0.2, %v5680_v59  ;;  %v5881_v20 = vand.u32 4294901760, %v17535_v39 }
 0x4df   : > { %v17552_v7 = vsub.f32 %v5754_v40, %v17546_v63  ;;  %v5662_v28 = vadd.f32 %v13216_v57, %v17476_v58  ;;  %13225 = vmatprep.mubr.f32.mxu0 %v5863_v43  ;;  %9494 = vrot.lane.b32.xlu1 %v5727_v3, %s15537_s27  ;;  %v5757_v60 = vsel %vm5740_vm7, %v5727_v3, 0  ;;  %v5594_v5 = vpop.f32.mrb[27].mxu1  ;;  %v5891_v12 = vand.u32 4294901760, %v17526_v10 }
 0x4e0   : > { %13226 = vmatmul.mubr.f32.vlgmr.msra.gmra.mrb[32].mxu0 %v5873_v56  ;;  %v17558_v32 = vand.u32 4294901760, %v5757_v60  ;;  %v5728_v15 = vsel %vm5696_vm4, %v5680_v59, %v5712_v2  ;;  %v5661_v61 = vadd.f32 %v17460_v11, %v5594_v5  ;;  %v5882_v52 = vsub.f32 %v17535_v39, %v5881_v20 }
 0x4e1   : > { %v17565_v58 = vadd.f32 %v17432_v49, %v5662_v28  ;;  %13250 = vmatpush3.msra.mxu0 %v17261_v16  ;;  %9496 = vrot.lane.b32.xlu0 %v5728_v15, %s15537_s27  ;;  %v5760_v27 = vsel %vm5740_vm7, %v5728_v15, 0  ;;  %v5892_v38 = vsub.f32 %v17526_v10, %v5891_v12  ;;  %vm5697_vm5 = vcmp.gt.f32.partialorder %v17520_v45, 0.0 }
 0x4e2   : > { %v17575_v11 = vsub.f32 %v5757_v60, %v17558_v32  ;;  %v17577_v59 = vand.u32 4294901760, %v5760_v27  ;;  %v5684_v21 = vadd.f32 %v17432_v49, %v5661_v61  ;;  %v13219_v0 = vpop.f32.mrb[28].mxu1  ;;  %v5883_v14 = vand.u32 4294901760, %v5882_v52  ;;  %13275 = vmatprep.subr.mxu0 %v17254_v4 }
 0x4e3   : > { %v5664_v16 = vadd.f32 %v13219_v0, %v17501_v17  ;;  %v5893_v29 = vand.u32 4294901760, %v5892_v38  ;;  %v5713_v53 = vmul.f32 0.2, %v17520_v45  ;;  %vm5698_vm6 = vcmp.gt.f32.partialorder %v5682_v35, 0.0  ;;  %v5606_v40 = vpop.f32.mrb[29].mxu1 }
 0x4e4   : > { %v17584_v41 = vsub.f32 %v5760_v27, %v17577_v59  ;;  %13228 = vmatprep.mubr.f32.mxu0 %v5883_v14  ;;  %v5714_v56 = vmul.f32 0.2, %v5682_v35  ;;  %v5663_v6 = vadd.f32 %v17467_v47, %v5606_v40  ;;  %v5901_v43 = vand.u32 4294901760, %v17552_v7 }
 0x4e5   : > { %v17589_v57 = vadd.f32 %v17432_v49, %v5664_v16  ;;  %13229 = vmatmul.mubr.f32.gmra.mrb[34].mxu0 %v5893_v29  ;;  %v5729_v17 = vsel %vm5697_vm5, %v17520_v45, %v5713_v53  ;;  %v19689_v3 = vand.u32 4294901760, %v17575_v11  ;;  %vm5699_vm8 = vcmp.gt.f32.partialorder %v17544_v24, 0.0 }
 0x4e6   : > { %9498 = vrot.lane.b32.xlu1 %v5729_v17, %s15537_s27  ;;  %v5763_v2 = vsel %vm5740_vm7, %v5729_v17, 0  ;;  %v5730_v28 = vsel %vm5698_vm6, %v5682_v35, %v5714_v56  ;;  %v5686_v47 = vadd.f32 %v17432_v49, %v5663_v6  ;;  %v13222_v60 = vpop.f32.mrb[30].mxu1  ;;  %v5902_v5 = vsub.f32 %v17552_v7, %v5901_v43 }
 0x4e7   : > { %v17602_v15 = vand.u32 4294901760, %v5763_v2  ;;  %9500 = vrot.lane.b32.xlu0 %v5730_v28, %s15537_s27  ;;  %v5766_v45 = vsel %vm5740_vm7, %v5730_v28, 0  ;;  %v5666_v61 = vadd.f32 %v13222_v60, %v17504_v33  ;;  %v5912_v52 = vsub.f32 %v17575_v11, %v19689_v3  ;;  %v5618_v35 = vpop.f32.mrb[31].mxu1 }
 0x4e8   : > { %v17610_v27 = vand.u32 4294901760, %v5766_v45  ;;  %v5903_v38 = vand.u32 4294901760, %v5902_v5  ;;  %v5715_v0 = vmul.f32 0.2, %v17544_v24  ;;  %vm5700_vm0 = vcmp.gt.f32.partialorder %v5684_v21, 0.0 }
 0x4e9   : > { %v17614_v14 = vsub.f32 %v5763_v2, %v17602_v15  ;;  %v17617_v16 = vadd.f32 %v17432_v49, %v5666_v61  ;;  %v5913_v29 = vand.u32 4294901760, %v5912_v52  ;;  %v5716_v53 = vmul.f32 0.2, %v5684_v21 }
 0x4ea   : > { %v17620_v33 = vsub.f32 %v5766_v45, %v17610_v27  ;;  %13231 = vmatprep.mubr.f32.mxu0 %v5903_v38  ;;  %v5731_v40 = vsel %vm5699_vm8, %v17544_v24, %v5715_v0  ;;  %v5665_v56 = vadd.f32 %v17482_v34, %v5618_v35  ;;  %v19687_v6 = vand.u32 4294901760, %v17584_v41 }
 0x4eb   : > { %13232 = vmatmul.mubr.f32.gmra.mrb[36].mxu0 %v5913_v29  ;;  %9502 = vrot.lane.b32.xlu1 %v5731_v40, %s15537_s27  ;;  %v5769_v17 = vsel %vm5740_vm7, %v5731_v40, 0  ;;  %v5732_v2 = vsel %vm5700_vm0, %v5684_v21, %v5716_v53  ;;  %v19685_v28 = vand.u32 4294901760, %v17614_v14  ;;  %vm5701_vm10 = vcmp.gt.f32.partialorder %v17565_v58, 0.0 }
 0x4ec   : > { %v17631_v60 = vand.u32 4294901760, %v5769_v17  ;;  %9504 = vrot.lane.b32.xlu0 %v5732_v2, %s15537_s27  ;;  %v5772_v24 = vsel %vm5740_vm7, %v5732_v2, 0  ;;  %v5688_v34 = vadd.f32 %v17432_v49, %v5665_v56  ;;  %v5922_v5 = vsub.f32 %v17584_v41, %v19687_v6 }
 0x4ed   : > { %v17639_v45 = vand.u32 4294901760, %v5772_v24  ;;  %v5932_v21 = vsub.f32 %v17614_v14, %v19685_v28  ;;  %v5717_v61 = vmul.f32 0.2, %v17565_v58  ;;  %vm5702_vm11 = vcmp.gt.f32.partialorder %v5686_v47, 0.0 }
 0x4ee   : > { %v17646_v52 = vsub.f32 %v5769_v17, %v17631_v60  ;;  %v5923_v35 = vand.u32 4294901760, %v5922_v5  ;;  %v5718_v38 = vmul.f32 0.2, %v5686_v47  ;;  %v19684_v49 = vand.u32 4294901760, %v17620_v33 }
 0x4ef   : > { %v17650_v0 = vsub.f32 %v5772_v24, %v17639_v45  ;;  %v5933_v29 = vand.u32 4294901760, %v5932_v21  ;;  %v5733_v53 = vsel %vm5701_vm10, %v17565_v58, %v5717_v61  ;;  %vm5703_vm12 = vcmp.gt.f32.partialorder %v17589_v57, 0.0 }
 0x4f0   : > { %13234 = vmatprep.mubr.f32.mxu0 %v5923_v35  ;;  %9506 = vrot.lane.b32.xlu1 %v5733_v53, %s15537_s27  ;;  %v5775_v40 = vsel %vm5740_vm7, %v5733_v53, 0  ;;  %v5734_v56 = vsel %vm5702_vm11, %v5686_v47, %v5718_v38  ;;  %v5942_v17 = vsub.f32 %v17620_v33, %v19684_v49  ;;  %v19683_v2 = vand.u32 4294901760, %v17646_v52 }
 0x4f1   : > { %13235 = vmatmul.mubr.f32.gmra.mrb[38].mxu0 %v5933_v29  ;;  %v17662_v24 = vand.u32 4294901760, %v5775_v40  ;;  %9508 = vrot.lane.b32.xlu0 %v5734_v56, %s15537_s27  ;;  %v5778_v58 = vsel %vm5740_vm7, %v5734_v56, 0  ;;  %v5719_v5 = vmul.f32 0.2, %v17589_v57  ;;  %vm5704_vm13 = vcmp.gt.f32.partialorder %v5688_v34, 0.0 }
 0x4f2   : > { %v17667_v21 = vand.u32 4294901760, %v5778_v58  ;;  %v5943_v61 = vand.u32 4294901760, %v5942_v17  ;;  %v5952_v47 = vsub.f32 %v17646_v52, %v19683_v2  ;;  %v5720_v35 = vmul.f32 0.2, %v5688_v34 }
 0x4f3   : > { %v17673_v38 = vsub.f32 %v5775_v40, %v17662_v24  ;;  %v5735_v29 = vsel %vm5703_vm12, %v17589_v57, %v5719_v5  ;;  %v19686_v53 = vand.u32 4294901760, %v17650_v0  ;;  %vm5705_vm14 = vcmp.gt.f32.partialorder %v17617_v16, 0.0 }
 0x4f4   : > { %v17681_v56 = vsub.f32 %v5778_v58, %v17667_v21  ;;  %13237 = vmatprep.mubr.f32.mxu0 %v5943_v61  ;;  %v5953_v17 = vand.u32 4294901760, %v5952_v47  ;;  %9510 = vrot.lane.b32.xlu1 %v5735_v29, %s15537_s27  ;;  %v5781_v2 = vsel %vm5740_vm7, %v5735_v29, 0  ;;  %v5736_v49 = vsel %vm5704_vm13, %v5688_v34, %v5720_v35 }
 0x4f5   : > { %v17685_v40 = vand.u32 4294901760, %v5781_v2  ;;  %9512 = vrot.lane.b32.xlu0 %v5736_v49, %s15537_s27  ;;  %v5784_v57 = vsel %vm5740_vm7, %v5736_v49, 0  ;;  %v5962_v5 = vsub.f32 %v17650_v0, %v19686_v53  ;;  %v19688_v58 = vand.u32 4294901760, %v17673_v38 }
 0x4f6   : > { %13238 = vmatmul.mubr.f32.gmra.mrb[40].mxu0 %v5953_v17  ;;  %v17693_v61 = vand.u32 4294901760, %v5784_v57  ;;  %v5721_v47 = vmul.f32 0.2, %v17617_v16  ;;  %v19690_v29 = vand.u32 4294901760, %v17681_v56  ;;  %vm8010_vm3 = vcmask 64512  }
 0x4f7   : > { %v17698_v34 = vsub.f32 %v5781_v2, %v17685_v40  ;;  %v5963_v35 = vand.u32 4294901760, %v5962_v5  ;;  %v5972_v49 = vsub.f32 %v17673_v38, %v19688_v58 }
 0x4f8   : > { %v17704_v28 = vsub.f32 %v5784_v57, %v17693_v61  ;;  %v5737_v17 = vsel %vm5705_vm14, %v17617_v16, %v5721_v47  ;;  %v5982_v53 = vsub.f32 %v17681_v56, %v19690_v29 }
 0x4f9   : > { %13240 = vmatprep.mubr.f32.mxu0 %v5963_v35  ;;  %v5973_v6 = vand.u32 4294901760, %v5972_v49  ;;  %9514 = vrot.lane.b32.xlu1 %v5737_v17, %s15537_s27  ;;  %v5787_v2 = vsel %vm5740_vm7, %v5737_v17, 0  ;;  %v5991_v5 = vand.u32 4294901760, %v17698_v34 }
 0x4fa   : > { %v17715_v58 = vand.u32 4294901760, %v5787_v2  ;;  %v5983_v57 = vand.u32 4294901760, %v5982_v53  ;;  %v6001_v3 = vand.u32 4294901760, %v17704_v28 }
 0x4fb   : > { %13241 = vmatmul.mubr.f32.gmra.mrb[42].mxu0 %v5973_v6  ;;  %v5992_v16 = vsub.f32 %v17698_v34, %v5991_v5 }
 0x4fc   : > { %v17722_v47 = vsub.f32 %v5787_v2, %v17715_v58  ;;  %13243 = vmatprep.mubr.f32.mxu0 %v5983_v57  ;;  %v6002_v35 = vsub.f32 %v17704_v28, %v6001_v3 }
 0x4fd   : > { %v5993_v49 = vand.u32 4294901760, %v5992_v16 }
 0x4fe   : > { %v6003_v17 = vand.u32 4294901760, %v6002_v35  ;;  %v6011_v29 = vand.u32 4294901760, %v17722_v47 }
 0x4ff   : > { %13244 = vmatmul.mubr.f32.gmra.mrb[44].mxu0 %v5993_v49  ;;  %v6902_v49 = vsel %vm5740_vm7, %v16530_v51, 0 }
 0x500   : > { %13246 = vmatprep.mubr.f32.mxu0 %v6003_v17  ;;  %v6012_v6 = vsub.f32 %v17722_v47, %v6011_v29 }
 0x502   : > { %v6013_v53 = vand.u32 4294901760, %v6012_v6 }
 0x504   : > { %13247 = vmatmul.mubr.f32.gmra.mrb[46].mxu0 %v6013_v53 }
 0x505   : > { %13251 = vmatprep.mubr.f32.mxu0 %v17494_v1 }
 0x508   : > { %13252 = vmatmul.mubr.f32.vlgmr.msra.gmra.mrb[32].mxu0 %v17489_v62 }
 0x509   : > { %13276 = vmatpush3.msra.mxu0 %v17254_v4  ;;  %13254 = vmatprep.mubr.f32.mxu0 %v17522_v9  ;;  %v19978_v4 = vand.u32 4294901760, %v17575_v11 }
 0x50a   : > { %13301 = vmatprep.subr.mxu0 %v17249_v8 }
 0x50c   : > { %13255 = vmatmul.mubr.f32.gmra.mrb[34].mxu0 %v17515_v18 }
 0x50d   : > { %13257 = vmatprep.mubr.f32.mxu0 %v17546_v63 }
 0x510   : > { %13258 = vmatmul.mubr.f32.gmra.mrb[36].mxu0 %v17558_v32 }
 0x511   : > { %13260 = vmatprep.mubr.f32.mxu0 %v17577_v59 }
 0x514   : > { %13261 = vmatmul.mubr.f32.gmra.mrb[38].mxu0 %v17602_v15 }
 0x515   : > { %13263 = vmatprep.mubr.f32.mxu0 %v17610_v27 }
 0x518   : > { %13264 = vmatmul.mubr.f32.gmra.mrb[40].mxu0 %v17631_v60 }
 0x519   : > { %13266 = vmatprep.mubr.f32.mxu0 %v17639_v45 }
 0x51c   : > { %13267 = vmatmul.mubr.f32.gmra.mrb[42].mxu0 %v17662_v24 }
 0x51d   : > { %13269 = vmatprep.mubr.f32.mxu0 %v17667_v21 }
 0x520   : > { %13270 = vmatmul.mubr.f32.gmra.mrb[44].mxu0 %v17685_v40 }
 0x521   : > { %13272 = vmatprep.mubr.f32.mxu0 %v17693_v61 }
 0x524   : > { %13273 = vmatmul.mubr.f32.gmra.mrb[46].mxu0 %v17715_v58 }
 0x525   : > { %13277 = vmatprep.mubr.f32.mxu0 %v17508_v50  ;;  %v19979_v50 = vand.u32 4294901760, %v17584_v41 }
 0x528   : > { %13278 = vmatmul.mubr.f32.vlgmr.msra.gmra.mrb[32].mxu0 %v17498_v36  ;;  %v19980_v36 = vand.u32 4294901760, %v17614_v14 }
 0x529   : > { %13302 = vmatpush3.msra.mxu0 %v17249_v8  ;;  %13280 = vmatprep.mubr.f32.mxu0 %v17535_v39  ;;  %v19985_v39 = vand.u32 4294901760, %v17681_v56 }
 0x52a   : > { %13327 = vmatprep.subr.mxu0 %v17257_v30 }
 0x52c   : > { %13281 = vmatmul.mubr.f32.gmra.mrb[34].mxu0 %v17526_v10  ;;  %v19984_v10 = vand.u32 4294901760, %v17673_v38 }
 0x52d   : > { %13283 = vmatprep.mubr.f32.mxu0 %v17552_v7 }
 0x530   : > { %13284 = vmatmul.mubr.f32.gmra.mrb[36].mxu0 %v17575_v11 }
 0x531   : > { %13286 = vmatprep.mubr.f32.mxu0 %v17584_v41 }
 0x534   : > { %13287 = vmatmul.mubr.f32.gmra.mrb[38].mxu0 %v17614_v14  ;;  %v6892_v14 = vsel %vm5740_vm7, %v16513_v13, 0 }
 0x535   : > { %13289 = vmatprep.mubr.f32.mxu0 %v17620_v33 }
 0x538   : > { %13290 = vmatmul.mubr.f32.gmra.mrb[40].mxu0 %v17646_v52 }
 0x539   : > { %13292 = vmatprep.mubr.f32.mxu0 %v17650_v0 }
 0x53c   : > { %13293 = vmatmul.mubr.f32.gmra.mrb[42].mxu0 %v17673_v38 }
 0x53d   : > { %13295 = vmatprep.mubr.f32.mxu0 %v17681_v56 }
 0x540   : > { %13296 = vmatmul.mubr.f32.gmra.mrb[44].mxu0 %v17698_v34 }
 0x541   : > { %13298 = vmatprep.mubr.f32.mxu0 %v17704_v28 }
 0x544   : > { %13299 = vmatmul.mubr.f32.gmra.mrb[46].mxu0 %v17722_v47 }
 0x545   : > { %13303 = vmatprep.mubr.f32.mxu0 %v5861_v37  ;;  %v19983_v37 = vand.u32 4294901760, %v17650_v0  ;;  %v6896_v0 = vsel %vm5740_vm7, %v16525_v22, 0 }
 0x546   : > { %v17888_v34 = vand.u32 4294901760, %v6896_v0 }
 0x548   : > { %13304 = vmatmul.mubr.f32.vlgmr.msra.gmra.mrb[32].mxu0 %v5871_v54  ;;  %v19982_v54 = vand.u32 4294901760, %v17646_v52  ;;  %v17873_v52 = vand.u32 4294901760, %v6892_v14  ;;  %v17910_v35 = vsub.f32 %v6896_v0, %v17888_v34 }
 0x549   : > { %13328 = vmatpush3.msra.mxu0 %v17257_v30  ;;  %13306 = vmatprep.mubr.f32.mxu0 %v5881_v20  ;;  %v19981_v30 = vand.u32 4294901760, %v17620_v33  ;;  %v5738_v20 = vld [vmem:[%s19563_s7] sm:$0xf] }
 0x54a   : > { %13353 = vmatprep.subr.mxu0 %v17249_v8  ;;  %v6917_v7 = vsel %vm5789_vm9, %v5738_v20, 0  ;;  %v17891_v2 = vsub.f32 %v6892_v14, %v17873_v52 }
 0x54c   : > { %13307 = vmatmul.mubr.f32.gmra.mrb[34].mxu0 %v5891_v12  ;;  %v17802_v12 = vand.u32 4294901760, %v6917_v7 }
 0x54d   : > { %13309 = vmatprep.mubr.f32.mxu0 %v5901_v43 }
 0x550   : > { %13310 = vmatmul.mubr.f32.gmra.mrb[36].mxu0 %v19978_v4  ;;  %v19693_v4 = vand.u32 4294901760, %v17891_v2 }
 0x551   : > { %13312 = vmatprep.mubr.f32.mxu0 %v19979_v50 }
 0x554   : > { %13313 = vmatmul.mubr.f32.gmra.mrb[38].mxu0 %v19980_v36  ;;  %v17927_v36 = vand.u32 4294901760, %v6902_v49 }
 0x555   : > { %13315 = vmatprep.mubr.f32.mxu0 %v19981_v30 }
 0x558   : > { %13316 = vmatmul.mubr.f32.gmra.mrb[40].mxu0 %v19982_v54 }
 0x559   : > { %13318 = vmatprep.mubr.f32.mxu0 %v19983_v37 }
 0x55c   : > { %13319 = vmatmul.mubr.f32.gmra.mrb[42].mxu0 %v19984_v10 }
 0x55d   : > { %13321 = vmatprep.mubr.f32.mxu0 %v19985_v39  ;;  %v19691_v39 = vand.u32 4294901760, %v17910_v35 }
 0x55f   : > { %v7048_v0 = vsub.f32 %v17910_v35, %v19691_v39 }
 0x560   : > { %13322 = vmatmul.mubr.f32.gmra.mrb[44].mxu0 %v5991_v5 }
 0x561   : > { %13324 = vmatprep.mubr.f32.mxu0 %v6001_v3  ;;  %v6884_v3 = vsel %vm5740_vm7, %v16491_v44, 0 }
 0x564   : > { %13325 = vmatmul.mubr.f32.gmra.mrb[46].mxu0 %v6011_v29  ;;  %v6898_v29 = vsel %vm5740_vm7, %v16521_v48, 0 }
 0x565   : > { %13329 = vmatprep.mubr.f32.mxu0 %v17494_v1  ;;  %v17906_v47 = vand.u32 4294901760, %v6898_v29 }
 0x567   : > { %v17925_v50 = vsub.f32 %v6898_v29, %v17906_v47 }
 0x568   : > { %13330 = vmatmul.mubr.f32.vlgmr.msra.gmra.mrb[32].mxu0 %v17489_v62 }
 0x569   : > { %13354 = vmatpush3.msra.mxu0 %v17249_v8  ;;  %13332 = vmatprep.mubr.f32.mxu0 %v17522_v9  ;;  %v17817_v8 = vsub.f32 %v6917_v7, %v17802_v12 }
 0x56a   : > { %13379 = vmatprep.subr.mxu0 %v17802_v12 }
 0x56b   : > { %v17822_v11 = vand.u32 4294901760, %v17817_v8 }
 0x56c   : > { %13333 = vmatmul.mubr.f32.gmra.mrb[34].mxu0 %v17515_v18 }
 0x56d   : > { %13335 = vmatprep.mubr.f32.mxu0 %v17546_v63  ;;  %v7149_v41 = vsub.f32 %v17817_v8, %v17822_v11 }
 0x56f   : > { %v17830_v43 = vand.u32 4294901760, %v7149_v41  ;;  %v7028_v41 = vsub.f32 %v17891_v2, %v19693_v4 }
 0x570   : > { %13336 = vmatmul.mubr.f32.gmra.mrb[36].mxu0 %v17558_v32 }
 0x571   : > { %13338 = vmatprep.mubr.f32.mxu0 %v17577_v59 }
 0x574   : > { %13339 = vmatmul.mubr.f32.gmra.mrb[38].mxu0 %v17602_v15 }
 0x575   : > { %13341 = vmatprep.mubr.f32.mxu0 %v17610_v27 }
 0x578   : > { %13342 = vmatmul.mubr.f32.gmra.mrb[40].mxu0 %v17631_v60 }
 0x579   : > { %13344 = vmatprep.mubr.f32.mxu0 %v17639_v45 }
 0x57c   : > { %13345 = vmatmul.mubr.f32.gmra.mrb[42].mxu0 %v17662_v24 }
 0x57d   : > { %13347 = vmatprep.mubr.f32.mxu0 %v17667_v21 }
 0x580   : > { %13348 = vmatmul.mubr.f32.gmra.mrb[44].mxu0 %v17685_v40 }
 0x581   : > { %13350 = vmatprep.mubr.f32.mxu0 %v17693_v61 }
 0x584   : > { %13351 = vmatmul.mubr.f32.gmra.mrb[46].mxu0 %v17715_v58 }
 0x585   : > { %13355 = vmatprep.mubr.f32.mxu0 %v17494_v1  ;;  %v17844_v1 = vand.u32 4294901760, %v6884_v3 }
 0x588   : > { %13356 = vmatmul.mubr.f32.vlgmr.msra.gmra.mrb[32].mxu0 %v17489_v62  ;;  %v6886_v62 = vsel %vm5740_vm7, %v16487_v42, 0 }
 0x589   : > { %13380 = vmatpush3.msra.mxu0 %v17802_v12  ;;  %13358 = vmatprep.mubr.f32.mxu0 %v17522_v9  ;;  %v6888_v9 = vsel %vm5740_vm7, %v16499_v19, 0 }
 0x58a   : > { %13405 = vmatprep.subr.mxu0 %v17830_v43 }
 0x58c   : > { %13359 = vmatmul.mubr.f32.gmra.mrb[34].mxu0 %v17515_v18  ;;  %v17849_v18 = vand.u32 4294901760, %v6886_v62 }
 0x58d   : > { %13361 = vmatprep.mubr.f32.mxu0 %v17546_v63  ;;  %v17853_v63 = vsub.f32 %v6884_v3, %v17844_v1  ;;  %v6908_v3 = vsel %vm5740_vm7, %v16550_v26, 0 }
 0x58e   : > { %v17863_v33 = vsub.f32 %v6886_v62, %v17849_v18  ;;  %v17947_v62 = vsub.f32 %v6902_v49, %v17927_v36  ;;  %v7029_v49 = vand.u32 4294901760, %v7028_v41 }
 0x590   : > { %13362 = vmatmul.mubr.f32.gmra.mrb[36].mxu0 %v17558_v32  ;;  %v6890_v32 = vsel %vm5740_vm7, %v16495_v31, 0  ;;  %v19698_v38 = vand.u32 4294901760, %v17863_v33 }
 0x591   : > { %13364 = vmatprep.mubr.f32.mxu0 %v17577_v59  ;;  %v17857_v59 = vand.u32 4294901760, %v6888_v9 }
 0x592   : > { %v6998_v57 = vsub.f32 %v17863_v33, %v19698_v38 }
 0x593   : > { %v17871_v28 = vsub.f32 %v6888_v9, %v17857_v59 }
 0x594   : > { %13365 = vmatmul.mubr.f32.gmra.mrb[38].mxu0 %v17602_v15  ;;  %v17866_v15 = vand.u32 4294901760, %v6890_v32  ;;  %v6999_v54 = vand.u32 4294901760, %v6998_v57  ;;  %v17966_v57 = vand.u32 4294901760, %v6908_v3 }
 0x595   : > { %13367 = vmatprep.mubr.f32.mxu0 %v17610_v27  ;;  %v6894_v27 = vsel %vm5740_vm7, %v16509_v25, 0 }
 0x596   : > { %v17884_v56 = vsub.f32 %v6890_v32, %v17866_v15  ;;  %v19694_v32 = vand.u32 4294901760, %v17925_v50 }
 0x598   : > { %13368 = vmatmul.mubr.f32.gmra.mrb[40].mxu0 %v17631_v60  ;;  %v19700_v60 = vand.u32 4294901760, %v17853_v63 }
 0x599   : > { %13370 = vmatprep.mubr.f32.mxu0 %v17639_v45  ;;  %v17880_v45 = vand.u32 4294901760, %v6894_v27 }
 0x59a   : > { %v6988_v5 = vsub.f32 %v17853_v63, %v19700_v60 }
 0x59b   : > { %v17904_v16 = vsub.f32 %v6894_v27, %v17880_v45 }
 0x59c   : > { %13371 = vmatmul.mubr.f32.gmra.mrb[42].mxu0 %v17662_v24  ;;  %v6900_v24 = vsel %vm5740_vm7, %v16534_v55, 0  ;;  %v6989_v6 = vand.u32 4294901760, %v6988_v5 }
 0x59d   : > { %13373 = vmatprep.mubr.f32.mxu0 %v17667_v21  ;;  %v19697_v21 = vand.u32 4294901760, %v17871_v28  ;;  %v17914_v17 = vand.u32 4294901760, %v6900_v24  ;;  %v19692_v30 = vand.u32 4294901760, %v17904_v16 }
 0x59f   : > { %v7008_v53 = vsub.f32 %v17871_v28, %v19697_v21  ;;  %v17931_v37 = vsub.f32 %v6900_v24, %v17914_v17  ;;  %v7038_v9 = vsub.f32 %v17904_v16, %v19692_v30  ;;  %v19986_v24 = vld [vmem:[#allocation21_spill] sm:$0xff]  ;;  %v7049_v30 = vand.u32 4294901760, %v7048_v0 }
 0x5a0   : > { %13374 = vmatmul.mubr.f32.gmra.mrb[44].mxu0 %v17685_v40  ;;  %v19695_v40 = vand.u32 4294901760, %v17884_v56  ;;  %v6910_v5 = vsel %vm5740_vm7, %v19986_v24, 0 }
 0x5a1   : > { %13376 = vmatprep.mubr.f32.mxu0 %v17693_v61  ;;  %v6904_v61 = vsel %vm5740_vm7, %v16542_v23, 0  ;;  %v7009_v7 = vand.u32 4294901760, %v7008_v53  ;;  %v19696_v29 = vand.u32 4294901760, %v17931_v37  ;;  %v17977_v39 = vand.u32 4294901760, %v6910_v5 }
 0x5a2   : > { %v7018_v10 = vsub.f32 %v17884_v56, %v19695_v40  ;;  %v17939_v20 = vand.u32 4294901760, %v6904_v61 }
 0x5a3   : > { %v7068_v41 = vsub.f32 %v17931_v37, %v19696_v29  ;;  %v17991_v40 = vsub.f32 %v6910_v5, %v17977_v39 }
 0x5a4   : > { %13377 = vmatmul.mubr.f32.gmra.mrb[46].mxu0 %v17715_v58  ;;  %v6906_v58 = vsel %vm5740_vm7, %v16538_v46, 0  ;;  %v7019_v27 = vand.u32 4294901760, %v7018_v10  ;;  %v7058_v10 = vsub.f32 %v17925_v50, %v19694_v32 }
 0x5a5   : > { %13381 = vmatprep.mubr.f32.mxu0 %v6989_v6  ;;  %v17954_v14 = vand.u32 4294901760, %v6906_v58  ;;  %v19987_v6 = vld [vmem:[#allocation3_spill] sm:$0xff]  ;;  %v7069_v38 = vand.u32 4294901760, %v7068_v41 }
 0x5a6   : > { %v6912_v53 = vsel %vm5740_vm7, %v19987_v6, 0 }
 0x5a7   : > { %v17987_v4 = vand.u32 4294901760, %v6912_v53 }
 0x5a8   : > { %13382 = vmatmul.mubr.f32.vlgmr.msra.gmra.mrb[32].mxu0 %v6999_v54  ;;  %v7039_v54 = vand.u32 4294901760, %v7038_v9  ;;  %v19988_v9 = vld [vmem:[#allocation5_spill] sm:$0xff] }
 0x5a9   : > { %13406 = vmatpush3.msra.mxu0 %v17830_v43  ;;  %13384 = vmatprep.mubr.f32.mxu0 %v7009_v7  ;;  %v17962_v43 = vsub.f32 %v6904_v61, %v17939_v20  ;;  %v19699_v7 = vand.u32 4294901760, %v17947_v62  ;;  %v17975_v61 = vsub.f32 %v6906_v58, %v17954_v14  ;;  %v7059_v58 = vand.u32 4294901760, %v7058_v10 }
 0x5aa   : > { %13431 = vmatprep.subr.mxu0 %v17817_v8  ;;  %v18000_v21 = vsub.f32 %v6912_v53, %v17987_v4  ;;  %v7117_v53 = vand.u32 4294901760, %v17991_v40 }
 0x5ab   : > { %v19701_v32 = vand.u32 4294901760, %v17962_v43  ;;  %v19702_v29 = vand.u32 4294901760, %v17975_v61 }
 0x5ac   : > { %13385 = vmatmul.mubr.f32.gmra.mrb[34].mxu0 %v7019_v27  ;;  %v17983_v27 = vsub.f32 %v6908_v3, %v17966_v57  ;;  %v7078_v3 = vsub.f32 %v17947_v62, %v19699_v7 }
 0x5ad   : > { %13387 = vmatprep.mubr.f32.mxu0 %v7029_v49  ;;  %v6914_v49 = vsel %vm5740_vm7, %v19988_v9, 0  ;;  %v7098_v7 = vsub.f32 %v17975_v61, %v19702_v29 }
 0x5ae   : > { %v17993_v0 = vand.u32 4294901760, %v6914_v49  ;;  %v7079_v10 = vand.u32 4294901760, %v7078_v3 }
 0x5b0   : > { %13388 = vmatmul.mubr.f32.gmra.mrb[36].mxu0 %v7039_v54  ;;  %v7107_v54 = vand.u32 4294901760, %v17983_v27  ;;  %v18007_v5 = vsub.f32 %v6914_v49, %v17993_v0  ;;  %v7118_v49 = vsub.f32 %v17991_v40, %v7117_v53 }
 0x5b1   : > { %13390 = vmatprep.mubr.f32.mxu0 %v7049_v30  ;;  %v7088_v30 = vsub.f32 %v17962_v43, %v19701_v32  ;;  %v7127_v32 = vand.u32 4294901760, %v18000_v21 }
 0x5b2   : > { %v7108_v41 = vsub.f32 %v17983_v27, %v7107_v54  ;;  %v7119_v29 = vand.u32 4294901760, %v7118_v49  ;;  %v19993_v49 = vand.u32 4294901760, %v17891_v2 }
 0x5b3   : > { %v7089_v60 = vand.u32 4294901760, %v7088_v30  ;;  %v7128_v30 = vsub.f32 %v18000_v21, %v7127_v32 }
 0x5b4   : > { %13391 = vmatmul.mubr.f32.gmra.mrb[38].mxu0 %v7059_v58  ;;  %v7137_v58 = vand.u32 4294901760, %v18007_v5  ;;  %v7109_v3 = vand.u32 4294901760, %v7108_v41  ;;  %v19991_v41 = vand.u32 4294901760, %v17871_v28 }
 0x5b5   : > { %13393 = vmatprep.mubr.f32.mxu0 %v7069_v38  ;;  %v7099_v38 = vand.u32 4294901760, %v7098_v7 }
 0x5b8   : > { %13394 = vmatmul.mubr.f32.gmra.mrb[40].mxu0 %v7079_v10  ;;  %v7138_v10 = vsub.f32 %v18007_v5, %v7137_v58 }
 0x5b9   : > { %13396 = vmatprep.mubr.f32.mxu0 %v7089_v60  ;;  %v7129_v60 = vand.u32 4294901760, %v7128_v30 }
 0x5ba   : > { %v7139_v7 = vand.u32 4294901760, %v7138_v10 }
 0x5bc   : > { %13397 = vmatmul.mubr.f32.gmra.mrb[42].mxu0 %v7099_v38  ;;  %v19992_v38 = vand.u32 4294901760, %v17884_v56 }
 0x5bd   : > { %13399 = vmatprep.mubr.f32.mxu0 %v7109_v3  ;;  %v19994_v3 = vand.u32 4294901760, %v17904_v16 }
 0x5c0   : > { %13400 = vmatmul.mubr.f32.gmra.mrb[44].mxu0 %v7119_v29  ;;  %v19990_v29 = vand.u32 4294901760, %v17863_v33 }
 0x5c1   : > { %13402 = vmatprep.mubr.f32.mxu0 %v7129_v60 }
 0x5c4   : > { %13403 = vmatmul.mubr.f32.gmra.mrb[46].mxu0 %v7139_v7 }
 0x5c5   : > { %13407 = vmatprep.mubr.f32.mxu0 %v17844_v1 }
 0x5c8   : > { %13408 = vmatmul.mubr.f32.vlgmr.msra.gmra.mrb[32].mxu0 %v17849_v18 }
 0x5c9   : > { %13432 = vmatpush3.msra.mxu0 %v17817_v8  ;;  %13410 = vmatprep.mubr.f32.mxu0 %v17857_v59  ;;  %v19989_v8 = vand.u32 4294901760, %v17853_v63 }
 0x5ca   : > { %13457 = vmatprep.subr.mxu0 %v17802_v12 }
 0x5cc   : > { %13411 = vmatmul.mubr.f32.gmra.mrb[34].mxu0 %v17866_v15 }
 0x5cd   : > { %13413 = vmatprep.mubr.f32.mxu0 %v17873_v52 }
 0x5d0   : > { %13414 = vmatmul.mubr.f32.gmra.mrb[36].mxu0 %v17880_v45 }
 0x5d1   : > { %13416 = vmatprep.mubr.f32.mxu0 %v17888_v34 }
 0x5d4   : > { %13417 = vmatmul.mubr.f32.gmra.mrb[38].mxu0 %v17906_v47 }
 0x5d5   : > { %13419 = vmatprep.mubr.f32.mxu0 %v17914_v17 }
 0x5d8   : > { %13420 = vmatmul.mubr.f32.gmra.mrb[40].mxu0 %v17927_v36 }
 0x5d9   : > { %13422 = vmatprep.mubr.f32.mxu0 %v17939_v20 }
 0x5dc   : > { %13423 = vmatmul.mubr.f32.gmra.mrb[42].mxu0 %v17954_v14 }
 0x5dd   : > { %13425 = vmatprep.mubr.f32.mxu0 %v17966_v57 }
 0x5e0   : > { %13426 = vmatmul.mubr.f32.gmra.mrb[44].mxu0 %v17977_v39 }
 0x5e1   : > { %13428 = vmatprep.mubr.f32.mxu0 %v17987_v4 }
 0x5e4   : > { %13429 = vmatmul.mubr.f32.gmra.mrb[46].mxu0 %v17993_v0 }
 0x5e5   : > { %13433 = vmatprep.mubr.f32.mxu0 %v17853_v63  ;;  %v19995_v63 = vand.u32 4294901760, %v17910_v35 }
 0x5e8   : > { %13434 = vmatmul.mubr.f32.vlgmr.msra.gmra.mrb[32].mxu0 %v17863_v33  ;;  %v19996_v33 = vand.u32 4294901760, %v17925_v50 }
 0x5e9   : > { %13458 = vmatpush3.msra.mxu0 %v17802_v12  ;;  %13436 = vmatprep.mubr.f32.mxu0 %v17871_v28  ;;  %v19998_v28 = vand.u32 4294901760, %v17947_v62 }
 0x5ea   : > { %13483 = vmatprep.subr.mxu0 %v17822_v11 }
 0x5ec   : > { %13437 = vmatmul.mubr.f32.gmra.mrb[34].mxu0 %v17884_v56  ;;  %v19999_v56 = vand.u32 4294901760, %v17962_v43 }
 0x5ed   : > { %13439 = vmatprep.mubr.f32.mxu0 %v17891_v2  ;;  %v20000_v2 = vand.u32 4294901760, %v17975_v61 }
 0x5f0   : > { %13440 = vmatmul.mubr.f32.gmra.mrb[36].mxu0 %v17904_v16 }
 0x5f1   : > { %13442 = vmatprep.mubr.f32.mxu0 %v17910_v35 }
 0x5f4   : > { %13443 = vmatmul.mubr.f32.gmra.mrb[38].mxu0 %v17925_v50 }
 0x5f5   : > { %13445 = vmatprep.mubr.f32.mxu0 %v17931_v37 }
 0x5f8   : > { %13446 = vmatmul.mubr.f32.gmra.mrb[40].mxu0 %v17947_v62 }
 0x5f9   : > { %13448 = vmatprep.mubr.f32.mxu0 %v17962_v43 }
 0x5fc   : > { %13449 = vmatmul.mubr.f32.gmra.mrb[42].mxu0 %v17975_v61 }
 0x5fd   : > { %13451 = vmatprep.mubr.f32.mxu0 %v17983_v27 }
 0x600   : > { %13452 = vmatmul.mubr.f32.gmra.mrb[44].mxu0 %v17991_v40 }
 0x601   : > { %13454 = vmatprep.mubr.f32.mxu0 %v18000_v21 }
 0x604   : > { %13455 = vmatmul.mubr.f32.gmra.mrb[46].mxu0 %v18007_v5 }
 0x605   : > { %13459 = vmatprep.mubr.f32.mxu0 %v19989_v8 }
 0x608   : > { %13460 = vmatmul.mubr.f32.vlgmr.msra.gmra.mrb[32].mxu0 %v19990_v29 }
 0x609   : > { %13484 = vmatpush3.msra.mxu0 %v17822_v11  ;;  %13462 = vmatprep.mubr.f32.mxu0 %v19991_v41  ;;  %v19997_v11 = vand.u32 4294901760, %v17931_v37 }
 0x60a   : > { %13509 = vmatprep.subr.mxu0 %v17802_v12 }
 0x60c   : > { %13463 = vmatmul.mubr.f32.gmra.mrb[34].mxu0 %v19992_v38 }
 0x60d   : > { %13465 = vmatprep.mubr.f32.mxu0 %v19993_v49 }
 0x610   : > { %13466 = vmatmul.mubr.f32.gmra.mrb[36].mxu0 %v19994_v3 }
 0x611   : > { %13468 = vmatprep.mubr.f32.mxu0 %v19995_v63 }
 0x614   : > { %13469 = vmatmul.mubr.f32.gmra.mrb[38].mxu0 %v19996_v33 }
 0x615   : > { %13471 = vmatprep.mubr.f32.mxu0 %v19997_v11 }
 0x618   : > { %13472 = vmatmul.mubr.f32.gmra.mrb[40].mxu0 %v19998_v28 }
 0x619   : > { %13474 = vmatprep.mubr.f32.mxu0 %v19999_v56 }
 0x61c   : > { %13475 = vmatmul.mubr.f32.gmra.mrb[42].mxu0 %v20000_v2 }
 0x61d   : > { %13477 = vmatprep.mubr.f32.mxu0 %v7107_v54 }
 0x620   : > { %13478 = vmatmul.mubr.f32.gmra.mrb[44].mxu0 %v7117_v53 }
 0x621   : > { %13480 = vmatprep.mubr.f32.mxu0 %v7127_v32 }
 0x624   : > { %13481 = vmatmul.mubr.f32.gmra.mrb[46].mxu0 %v7137_v58 }
 0x625   : > { %13485 = vmatprep.mubr.f32.mxu0 %v17844_v1 }
 0x628   : > { %13486 = vmatmul.mubr.f32.vlgmr.msra.gmra.mrb[32].mxu0 %v17849_v18 }
 0x629   : > { %13510 = vmatpush3.msra.mxu0 %v17802_v12  ;;  %13488 = vmatprep.mubr.f32.mxu0 %v17857_v59  ;;  %v20001_v12 = vld [vmem:[#allocation18_spill] sm:$0xff] }
 0x62c   : > { %13489 = vmatmul.mubr.f32.gmra.mrb[34].mxu0 %v17866_v15 }
 0x62d   : > { %13491 = vmatprep.mubr.f32.mxu0 %v17873_v52 }
 0x630   : > { %13492 = vmatmul.mubr.f32.gmra.mrb[36].mxu0 %v17880_v45 }
 0x631   : > { %13494 = vmatprep.mubr.f32.mxu0 %v17888_v34 }
 0x634   : > { %13495 = vmatmul.mubr.f32.gmra.mrb[38].mxu0 %v17906_v47 }
 0x635   : > { %13497 = vmatprep.mubr.f32.mxu0 %v17914_v17 }
 0x638   : > { %13498 = vmatmul.mubr.f32.gmra.mrb[40].mxu0 %v17927_v36 }
 0x639   : > { %13500 = vmatprep.mubr.f32.mxu0 %v17939_v20 }
 0x63c   : > { %13501 = vmatmul.mubr.f32.gmra.mrb[42].mxu0 %v17954_v14 }
 0x63d   : > { %13503 = vmatprep.mubr.f32.mxu0 %v17966_v57 }
 0x640   : > { %13504 = vmatmul.mubr.f32.gmra.mrb[44].mxu0 %v17977_v39 }
 0x641   : > { %13506 = vmatprep.mubr.f32.mxu0 %v17987_v4 }
 0x644   : > { %13507 = vmatmul.mubr.f32.gmra.mrb[46].mxu0 %v17993_v0 }
 0x645   : > { %13511 = vmatprep.mubr.f32.mxu0 %v17844_v1  ;;  %v1835_v1 = vmul.u32 8, %v20001_v12 }
 0x648   : > { %13512 = vmatmul.mubr.f32.vlgmr.msra.gmra.mrb[32].mxu0 %v17849_v18  ;;  %v20002_v18 = vld [vmem:[#allocation2_spill] sm:$0xff] }
 0x649   : > { %13514 = vmatprep.mubr.f32.mxu0 %v17857_v59  ;;  %vm1837_vm15 = vcmp.ge.s32.totalorder %v20002_v18, %v1835_v1  ;;  %v1839_v59 = vadd.s32 8, %v1835_v1 }
 0x64b   : > { %vm1841_vm1 = vcmp.lt.s32.totalorder %v20002_v18, %v1839_v59  ;;  %v18209_v59 = vpop.permute.xlu0 %9486 }
 0x64c   : > { %13515 = vmatmul.mubr.f32.gmra.mrb[34].mxu0 %v17866_v15  ;;  %vm18133_vm2 = vmand %vm1837_vm15, %vm1841_vm1  ;;  %v20003_v15 = vmov 0 }
 0x64d   : > { %13517 = vmatprep.mubr.f32.mxu0 %v17873_v52  ;;  %v20004_v15 = vsel %vm18133_vm2, 4294967295, %v20003_v15  ;;  %v20006_v52 = vmov 0.0  }
 0x64e   : > { %20005 = vst [vmem:[#allocation19_spill] sm:$0xff] %v20004_v15 }
 0x650   : > { %13518 = vmatmul.mubr.f32.gmra.mrb[36].mxu0 %v17880_v45  ;;  %v11482_v45 = vsel %vm18133_vm2, 1.0, %v20006_v52 }
 0x651   : > { %13520 = vmatprep.mubr.f32.mxu0 %v17888_v34  ;;  %v18140_v34 = vsub.f32 %v11482_v45, %v11482_v45 }
 0x653   : > { %20007 = vst [vmem:[#allocation24_spill] sm:$0xff] %v18140_v34  ;;  %v18143_v21 = vand.u32 4294901760, %v18140_v34 }
 0x654   : > { %13521 = vmatmul.mubr.f32.gmra.mrb[38].mxu0 %v17906_v47 }
 0x655   : > { %13523 = vmatprep.mubr.f32.mxu0 %v17914_v17  ;;  %20008 = vst [vmem:[#allocation25_spill] sm:$0xff] %v18143_v21  ;;  %v8180_v16 = vsub.f32 %v18140_v34, %v18143_v21 }
 0x657   : > { %v18147_v47 = vand.u32 4294901760, %v8180_v16 }
 0x658   : > { %13524 = vmatmul.mubr.f32.gmra.mrb[40].mxu0 %v17927_v36 }
 0x659   : > { %13526 = vmatprep.mubr.f32.mxu0 %v17939_v20  ;;  %20009 = vst [vmem:[#allocation26_spill] sm:$0xff] %v18147_v47  ;;  %13567 = vmatprep.mubr.f32.mxu1 %v18147_v47 }
 0x65c   : > { %13527 = vmatmul.mubr.f32.gmra.mrb[42].mxu0 %v17954_v14 }
 0x65d   : > { %13529 = vmatprep.mubr.f32.mxu0 %v17966_v57 }
 0x660   : > { %13530 = vmatmul.mubr.f32.gmra.mrb[44].mxu0 %v17977_v39 }
 0x661   : > { %13532 = vmatprep.mubr.f32.mxu0 %v17987_v4 }
 0x664   : > { %13533 = vmatmul.mubr.f32.gmra.mrb[46].mxu0 %v17993_v0 }
 0x665   : > { %13777 = vmatprep.mubr.f32.mxu0 %v18147_v47 }
 0x71b   : > { %v18151_v35 = vpop.f32.mrb[32].mxu0 }
 0x71c   : > { %v18153_v17 = vpop.f32.mrb[33].mxu0  ;;  %v8012_v36 = vsel %vm8010_vm3, %v18151_v35, -inf }
 0x71d   : > { %v8011_v20 = vsel %vm8010_vm3, %v18153_v17, -inf }
 0x71f   : > { %v18155_v40 = vpop.f32.mrb[34].mxu0 }
 0x720   : > { %v18157_v4 = vpop.f32.mrb[35].mxu0  ;;  %v8014_v57 = vsel %vm8010_vm3, %v18155_v40, -inf }
 0x721   : > { %v8013_v0 = vsel %vm8010_vm3, %v18157_v4, -inf }
 0x723   : > { %v18159_v50 = vpop.f32.mrb[36].mxu0 }
 0x724   : > { %v8017_v37 = vsel %vm8010_vm3, %v18159_v50, -inf  ;;  %v18165_v39 = vpop.f32.mrb[37].mxu0 }
 0x725   : > { %v8018_v62 = vmax.f32 %v8012_v36, %v8017_v37  ;;  %v8015_v32 = vsel %vm8010_vm3, %v18165_v39, -inf }
 0x726   : > { %v8016_v14 = vmax.f32 %v8011_v20, %v8015_v32 }
 0x727   : > { %v18171_v43 = vpop.f32.mrb[38].mxu0 }
 0x728   : > { %v8021_v61 = vsel %vm8010_vm3, %v18171_v43, -inf  ;;  %v18177_v27 = vpop.f32.mrb[39].mxu0 }
 0x729   : > { %v8022_v54 = vmax.f32 %v8014_v57, %v8021_v61  ;;  %v8019_v5 = vsel %vm8010_vm3, %v18177_v27, -inf  ;;  %v18215_v57 = vpop.permute.xlu0 %9492 }
 0x72a   : > { %v8020_v53 = vmax.f32 %v8013_v0, %v8019_v5  ;;  %v18217_v5 = vpop.permute.xlu1 %9484 }
 0x72b   : > { %v18183_v58 = vpop.f32.mrb[40].mxu0 }
 0x72c   : > { %v8025_v30 = vsel %vm8010_vm3, %v18183_v58, -inf  ;;  %v18187_v10 = vpop.f32.mrb[41].mxu0 }
 0x72d   : > { %v8026_v60 = vmax.f32 %v8018_v62, %v8025_v30  ;;  %v8023_v7 = vsel %vm8010_vm3, %v18187_v10, -inf  ;;  %v20010_v62 = vld [vmem:[#allocation20_spill] sm:$0xff]  ;;  %v18221_v30 = vpop.permute.xlu0 %9496 }
 0x72e   : > { %v8024_v8 = vmax.f32 %v8016_v14, %v8023_v7  ;;  %v1836_v32 = vmul.u32 8, %v20010_v62 }
 0x72f   : > { %v18191_v29 = vpop.f32.mrb[42].mxu0 }
 0x730   : > { %v8029_v41 = vsel %vm8010_vm3, %v18191_v29, -inf  ;;  %v18195_v38 = vpop.f32.mrb[43].mxu0  ;;  %v1840_v0 = vadd.s32 8, %v1836_v32  ;;  %vm1838_vm4 = vcmp.ge.s32.totalorder %v20002_v18, %v1836_v32 }
 0x731   : > { %v8030_v49 = vmax.f32 %v8022_v54, %v8029_v41  ;;  %v8027_v3 = vsel %vm8010_vm3, %v18195_v38, -inf  ;;  %v18227_v41 = vpop.permute.xlu1 %9490 }
 0x732   : > { %v8028_v63 = vmax.f32 %v8020_v53, %v8027_v3  ;;  %vm1842_vm5 = vcmp.lt.s32.totalorder %v20002_v18, %v1840_v0  ;;  %v18229_v3 = vpop.permute.xlu0 %9500 }
 0x733   : > { %v18199_v33 = vpop.f32.mrb[44].mxu0  ;;  %vm18223_vm6 = vmand %vm1838_vm4, %vm1842_vm5 }
 0x734   : > { %v8033_v11 = vsel %vm8010_vm3, %v18199_v33, -inf  ;;  %v18203_v28 = vpop.f32.mrb[45].mxu0 }
 0x735   : > { %v8034_v56 = vmax.f32 %v8026_v60, %v8033_v11  ;;  %v8031_v2 = vsel %vm8010_vm3, %v18203_v28, -inf  ;;  %v11483_v11 = vsel %vm18223_vm6, 1.0, %v20006_v52  ;;  %v18234_v18 = vpop.permute.xlu1 %9488 }
 0x736   : > { %v8032_v12 = vmax.f32 %v8024_v8, %v8031_v2  ;;  %v20011_v8 = vmov 0  ;;  %v18236_v2 = vsub.f32 %v11483_v11, %v11483_v11 }
 0x737   : > { %v18207_v1 = vpop.f32.mrb[46].mxu0  ;;  %v20012_v8 = vsel %vm18223_vm6, 4294967295, %v20011_v8 }
 0x738   : > { %v8039_v45 = vmax.f32 %v8032_v12, %v8034_v56  ;;  %v8037_v16 = vsel %vm8010_vm3, %v18207_v1, -inf  ;;  %v8000_v36 = vpop.f32.mrb[47].mxu0  ;;  %20013 = vst [vmem:[#allocation27_spill] sm:$0xff] %v20012_v8  ;;  %20014 = vst [vmem:[#allocation23_spill] sm:$0xff] %v18236_v2 }
 0x739   : > { %v8038_v37 = vmax.f32 %v8030_v49, %v8037_v16  ;;  %v8035_v20 = vsel %vm8010_vm3, %v8000_v36, -inf }
 0x73a   : > { %v8036_v14 = vmax.f32 %v8028_v63, %v8035_v20 }
 0x73c   : > { %v8040_v61 = vmax.f32 %v8036_v14, %v8038_v37  ;;  %v18245_v14 = vpop.permute.xlu0 %9504 }
 0x73e   : > { %v8041_v54 = vmax.f32 %v8039_v45, %v8040_v61 }
 0x740   : > { %v8042_v53 = vrot.slane %v8041_v54, 4  ;;  %v18260_v11 = vpop.permute.xlu0 %9508 }
 0x742   : > { %v8043_v60 = vmax.f32 %v8041_v54, %v8042_v53 }
 0x744   : > { %v8044_v7 = vrot.slane %v8043_v60, 2 }
 0x746   : > { %v8045_v49 = vmax.f32 %v8043_v60, %v8044_v7 }
 0x748   : > { %v8046_v63 = vrot.slane %v8045_v49, 1 }
 0x74a   : > { %v8047_v56 = vmax.f32 %v8045_v49, %v8046_v63 }
 0x74c   : > { %v8062_v12 = vsub.f32 %v8000_v36, %v8047_v56  ;;  %v8049_v45 = vsub.f32 %v18151_v35, %v8047_v56  ;;  %v8048_v16 = vsub.f32 %v18153_v17, %v8047_v56  ;;  %v8051_v37 = vsub.f32 %v18155_v40, %v8047_v56 }
 0x74d   : > { %v8050_v20 = vsub.f32 %v18157_v4, %v8047_v56  ;;  %v8053_v62 = vsub.f32 %v18159_v50, %v8047_v56  ;;  %v8052_v32 = vsub.f32 %v18165_v39, %v8047_v56  ;;  %v8055_v52 = vsub.f32 %v18171_v43, %v8047_v56  ;;  %v18252_v50 = vpop.permute.xlu1 %9494 }
 0x74e   : > { %v8092_v61 = vmul.f32 1.442695, %v8062_v12  ;;  %v8066_v0 = vmul.f32 1.442695, %v8049_v45  ;;  %v8064_v54 = vmul.f32 1.442695, %v8048_v16  ;;  %v8054_v36 = vsub.f32 %v18177_v27, %v8047_v56 }
 0x74f   : > { %v8070_v35 = vmul.f32 1.442695, %v8051_v37  ;;  %v8057_v17 = vsub.f32 %v18183_v58, %v8047_v56  ;;  %v8068_v40 = vmul.f32 1.442695, %v8050_v20  ;;  %v8074_v53 = vmul.f32 1.442695, %v8053_v62 }
 0x750   : > { %15486 = vpow2.f32 %v8092_v61  ;;  %v18250_v4 = vand.u32 4294901760, %v18236_v2  ;;  %v8072_v39 = vmul.f32 1.442695, %v8052_v32  ;;  %v8056_v43 = vsub.f32 %v18187_v10, %v8047_v56 }
 0x751   : > { %15488 = vpow2.f32 %v8066_v0  ;;  %v8059_v60 = vsub.f32 %v18191_v29, %v8047_v56  ;;  %v8058_v27 = vsub.f32 %v18195_v38, %v8047_v56  ;;  %v8061_v7 = vsub.f32 %v18199_v33, %v8047_v56  ;;  %v9499_v38 = vpop.permute.xlu1 %9498 }
 0x752   : > { %20015 = vst [vmem:[#allocation7_spill] sm:$0xff] %v18250_v4  ;;  %15490 = vpow2.f32 %v8064_v54  ;;  %v8060_v58 = vsub.f32 %v18203_v28, %v8047_v56  ;;  %v8078_v49 = vmul.f32 1.442695, %v8055_v52  ;;  %v8063_v63 = vsub.f32 %v18207_v1, %v8047_v56  ;;  %v9513_v1 = vpop.permute.xlu0 %9512 }
 0x753   : > { %15492 = vpow2.f32 %v8070_v35  ;;  %v8076_v12 = vmul.f32 1.442695, %v8054_v36  ;;  %v8082_v45 = vmul.f32 1.442695, %v8057_v17  ;;  %v8080_v10 = vmul.f32 1.442695, %v8056_v43 }
 0x754   : > { %15494 = vpow2.f32 %v8068_v40  ;;  %v8190_v29 = vsub.f32 %v18236_v2, %v18250_v4  ;;  %v8086_v33 = vmul.f32 1.442695, %v8059_v60  ;;  %v8084_v28 = vmul.f32 1.442695, %v8058_v27 }
 0x755   : > { %15496 = vpow2.f32 %v8074_v53  ;;  %v8090_v16 = vmul.f32 1.442695, %v8061_v7  ;;  %v18266_v56 = vmul.f32 1.442695, %v8060_v58  ;;  %v18268_v20 = vmul.f32 1.442695, %v8063_v63  ;;  %v9503_v53 = vpop.permute.xlu1 %9502 }
 0x756   : > { %15498 = vpow2.f32 %v8072_v39  ;;  %v18270_v62 = vand.u32 4294901760, %v8190_v29 }
 0x757   : > { %15500 = vpow2.f32 %v8078_v49 }
 0x758   : > { %15502 = vpow2.f32 %v8076_v12  ;;  %20016 = vst [vmem:[#allocation4_spill] sm:$0xff] %v18270_v62 }
 0x759   : > { %15504 = vpow2.f32 %v8082_v45  ;;  %v9507_v61 = vpop.permute.xlu1 %9506 }
 0x75a   : > { %v18264_v37 = vpop.eup %15486  ;;  %15506 = vpow2.f32 %v8080_v10 }
 0x75b   : > { %v18272_v32 = vpop.eup %15488  ;;  %15508 = vpow2.f32 %v8086_v33  ;;  %v18275_v52 = vmul.f32 %v18264_v37, %v9513_v1  ;;  %v18280_v0 = vmul.f32 %v18264_v37, %v19987_v6 }
 0x75c   : > { %v18282_v54 = vpop.eup %15490  ;;  %v9533_v36 = vmul.f32 %v18272_v32, %v18209_v59  ;;  %v19713_v35 = vand.u32 4294901760, %v18272_v32  ;;  %v18289_v17 = vmul.f32 %v18272_v32, %v16487_v42  ;;  %15510 = vpow2.f32 %v8084_v28 }
 0x75d   : > { %v18291_v40 = vpop.eup %15492  ;;  %v9532_v39 = vmul.f32 %v18282_v54, %v18217_v5  ;;  %v19714_v6 = vand.u32 4294901760, %v18282_v54  ;;  %v18298_v43 = vmul.f32 %v18282_v54, %v16491_v44  ;;  %15512 = vpow2.f32 %v8090_v16 }
 0x75e   : > { %v18300_v59 = vpop.eup %15494  ;;  %9566 = vrot.lane.b32.xlu1 %v9533_v36, %s15536_s26  ;;  %v9535_v42 = vmul.f32 %v18291_v40, %v18227_v41  ;;  %v19703_v60 = vand.u32 4294901760, %v18291_v40  ;;  %v19707_v27 = vand.u32 4294901760, %v18289_v17  ;;  %v18309_v5 = vmul.f32 %v18291_v40, %v16495_v31 }
 0x75f   : > { %v18311_v7 = vpop.eup %15496  ;;  %9564 = vrot.lane.b32.xlu0 %v9532_v39, %s15536_s26  ;;  %v18318_v44 = vpack.c.bf16 %v19713_v35, %v19714_v6  ;;  %v9534_v41 = vmul.f32 %v18300_v59, %v18234_v18  ;;  %v19706_v58 = vand.u32 4294901760, %v18300_v59  ;;  %v19710_v49 = vand.u32 4294901760, %v18298_v43 }
 0x760   : > { %v18324_v63 = vpop.eup %15498  ;;  %v18328_v31 = vmul.f32 %v18300_v59, %v16499_v19  ;;  %v19708_v12 = vand.u32 4294901760, %v18309_v5  ;;  %v9537_v45 = vmul.f32 %v18311_v7, %v18252_v50  ;;  %v19704_v10 = vand.u32 4294901760, %v18311_v7 }
 0x761   : > { %20017 = vst [vmem:[#allocation9_spill] sm:$0xff] %v18318_v44  ;;  %v18334_v29 = vpop.eup %15500  ;;  %14298 = vmatprep.subr.bf16.mxu1 %v18318_v44  ;;  %v18341_v18 = vpack.c.bf16 %v19703_v60, %v19706_v58  ;;  %v18347_v19 = vpack.c.bf16 %v19707_v27, %v19710_v49  ;;  %v9536_v50 = vmul.f32 %v18324_v63, %v18215_v57  ;;  %v19705_v33 = vand.u32 4294901760, %v18324_v63 }
 0x762   : > { %v18352_v28 = vpop.eup %15502  ;;  %14300 = vmatpush3.bf16.msra.mxu1 %v18318_v44  ;;  %9570 = vrot.lane.b32.xlu1 %v9535_v42, %s15536_s26  ;;  %v19709_v16 = vand.u32 4294901760, %v18328_v31  ;;  %v18359_v1 = vmul.f32 %v18324_v63, %v16513_v13  ;;  %v18363_v36 = vmul.f32 %v18311_v7, %v16509_v25  ;;  %v9539_v57 = vmul.f32 %v18334_v29, %v9499_v38 }
 0x763   : > { %20018 = vst [vmem:[#allocation6_spill] sm:$0xff] %v18341_v18  ;;  %20019 = vst [vmem:[#allocation11_spill] sm:$0xff] %v18347_v19  ;;  %v18366_v39 = vpop.eup %15504  ;;  %9568 = vrot.lane.b32.xlu0 %v9534_v41, %s15536_s26  ;;  %14302 = vmatprep.subr.bf16.mxu1 %v18341_v18  ;;  %v18374_v42 = vpack.c.bf16 %v19704_v10, %v19705_v33  ;;  %v9538_v13 = vmul.f32 %v18352_v28, %v18221_v30  ;;  %v19712_v25 = vand.u32 4294901760, %v18352_v28 }
 0x764   : > { %v19711_v38 = vand.u32 4294901760, %v18334_v29  ;;  %v18380_v60 = vpop.eup %15506  ;;  %14490 = vmatprep.subr.bf16.mxu0 %v18347_v19  ;;  %v18387_v41 = vpack.c.bf16 %v19708_v12, %v19709_v16  ;;  %v19716_v10 = vand.u32 4294901760, %v18359_v1  ;;  %v19715_v33 = vand.u32 4294901760, %v18363_v36 }
 0x765   : > { %20020 = vst [vmem:[#allocation8_spill] sm:$0xff] %v18374_v42  ;;  %v18393_v30 = vmul.f32 %v18352_v28, %v16525_v22  ;;  %v18395_v58 = vpop.eup %15508  ;;  %14492 = vmatpush3.bf16.msra.mxu0 %v18347_v19  ;;  %v18406_v12 = vmul.f32 %v18334_v29, %v16521_v48  ;;  %v9541_v16 = vmul.f32 %v18366_v39, %v9503_v53  ;;  %v19720_v53 = vand.u32 4294901760, %v18366_v39  ;;  %v9511_v48 = vpop.permute.xlu1 %9510 }
 0x766   : > { %20021 = vst [vmem:[#allocation13_spill] sm:$0xff] %v18387_v41  ;;  %v18402_v27 = vpack.c.bf16 %v19711_v38, %v19712_v25  ;;  %v9540_v22 = vmul.f32 %v18380_v60, %v18229_v3  ;;  %v18411_v49 = vpop.eup %15510  ;;  %14494 = vmatprep.subr.bf16.mxu0 %v18387_v41  ;;  %14304 = vmatpush3.bf16.msra.mxu1 %v18341_v18  ;;  %v19721_v25 = vand.u32 4294901760, %v18380_v60  ;;  %v19722_v3 = vand.u32 4294901760, %v18395_v58 }
 0x767   : > { %v18419_v38 = vpack.c.bf16 %v19715_v33, %v19716_v10  ;;  %v18424_v35 = vpop.eup %15512  ;;  %9574 = vrot.lane.b32.xlu1 %v9537_v45, %s15536_s26  ;;  %9572 = vrot.lane.b32.xlu0 %v9536_v50, %s15536_s26  ;;  %v18431_v6 = vmul.f32 %v18380_v60, %v16534_v55  ;;  %v18435_v33 = vmul.f32 %v18366_v39, %v16530_v51  ;;  %v19723_v55 = vand.u32 4294901760, %v18411_v49 }
 0x768   : > { %20022 = vst [vmem:[#allocation10_spill] sm:$0xff] %v18402_v27  ;;  %v9543_v10 = vmul.f32 %v18395_v58, %v9507_v61  ;;  %14306 = vmatprep.subr.bf16.mxu1 %v18374_v42  ;;  %v18443_v45 = vpack.c.bf16 %v19720_v53, %v19721_v25  ;;  %v9542_v50 = vmul.f32 %v18411_v49, %v18245_v14  ;;  %v20025_v51 = vand.u32 4294901760, %v18393_v30 }
 0x769   : > { %20023 = vst [vmem:[#allocation15_spill] sm:$0xff] %v18419_v38  ;;  %14496 = vmatpush3.bf16.msra.mxu0 %v18387_v41  ;;  %v20026_v61 = vand.u32 4294901760, %v18406_v12  ;;  %v19725_v4 = vand.u32 4294901760, %v18431_v6  ;;  %v19724_v53 = vand.u32 4294901760, %v18435_v33  ;;  %v18460_v14 = vmul.f32 %v18411_v49, %v16542_v23 }
 0x76a   : > { %20024 = vst [vmem:[#allocation12_spill] sm:$0xff] %v18443_v45  ;;  %14498 = vmatprep.subr.bf16.mxu0 %v18419_v38  ;;  %14308 = vmatpush3.bf16.msra.mxu1 %v18374_v42  ;;  %v18468_v25 = vpack.c.bf16 %v19722_v3, %v19723_v55  ;;  %15514 = vpow2.f32 %v18266_v56 }
 0x76b   : > { %v18454_v47 = vpack.c.bf16 %v20026_v61, %v20025_v51  ;;  %v18472_v51 = vmul.f32 %v18395_v58, %v16538_v46  ;;  %v18475_v61 = vmul.f32 %v18424_v35, %v9511_v48  ;;  %9578 = vrot.lane.b32.xlu1 %v9539_v57, %s15536_s26  ;;  %9576 = vrot.lane.b32.xlu0 %v9538_v13, %s15536_s26  ;;  %v19726_v3 = vand.u32 4294901760, %v18460_v14 }
 0x76c   : > { %20028 = vst [vmem:[#allocation14_spill] sm:$0xff] %v18468_v25  ;;  %v18484_v23 = vpack.c.bf16 %v19724_v53, %v19725_v4  ;;  %v18490_v48 = vmul.f32 %v18424_v35, %v19986_v24  ;;  %14310 = vmatprep.subr.bf16.mxu1 %v18402_v27  ;;  %15516 = vpow2.f32 %v18268_v20  ;;  %v20030_v13 = vand.u32 4294901760, %v18282_v54 }
 0x76d   : > { %20027 = vst [vmem:[#allocation17_spill] sm:$0xff] %v18454_v47  ;;  %14500 = vmatpush3.bf16.msra.mxu0 %v18419_v38  ;;  %v20031_v24 = vand.u32 4294901760, %v18272_v32  ;;  %v20032_v46 = vand.u32 4294901760, %v18298_v43  ;;  %v20033_v57 = vand.u32 4294901760, %v18289_v17  ;;  %v20038_v53 = vand.u32 4294901760, %v18328_v31 }
 0x76e   : > { %20029 = vst [vmem:[#allocation22_spill] sm:$0xff] %v18484_v23  ;;  %v18499_v55 = vsub.f32 %v18282_v54, %v20030_v13  ;;  %14502 = vmatprep.subr.bf16.mxu0 %v18454_v47  ;;  %14312 = vmatpush3.bf16.msra.mxu1 %v18402_v27  ;;  %v20034_v54 = vand.u32 4294901760, %v18472_v51 }
 0x76f   : > { %v18506_v4 = vsub.f32 %v18272_v32, %v20031_v24  ;;  %v18511_v20 = vsub.f32 %v18298_v43, %v20032_v46  ;;  %v18516_v56 = vsub.f32 %v18289_v17, %v20033_v57  ;;  %v20036_v43 = vand.u32 4294901760, %v18300_v59  ;;  %9582 = vrot.lane.b32.xlu1 %v9541_v16, %s15536_s26  ;;  %9580 = vrot.lane.b32.xlu0 %v9540_v22, %s15536_s26 }
 0x770   : > { %v18524_v32 = vpack.c.bf16 %v20034_v54, %v19726_v3  ;;  %v19727_v13 = vand.u32 4294901760, %v18499_v55  ;;  %v20037_v17 = vand.u32 4294901760, %v18291_v40  ;;  %14314 = vmatprep.subr.bf16.mxu1 %v18443_v45  ;;  %v20077_v18 = vand.u32 4294901760, %v18499_v55 }
 0x771   : > { %v18530_v46 = vsub.f32 %v18300_v59, %v20036_v43  ;;  %v19728_v24 = vand.u32 4294901760, %v18506_v4  ;;  %v19731_v54 = vand.u32 4294901760, %v18511_v20  ;;  %v19732_v3 = vand.u32 4294901760, %v18516_v56  ;;  %14504 = vmatpush3.bf16.msra.mxu0 %v18454_v47 }
 0x772   : > { %20035 = vst [vmem:[#allocation16_spill] sm:$0xff] %v18524_v32  ;;  %v18535_v57 = vsub.f32 %v18291_v40, %v20037_v17  ;;  %v18545_v59 = vsub.f32 %v18328_v31, %v20038_v53  ;;  %v8201_v40 = vsub.f32 %v18499_v55, %v19727_v13  ;;  %v20039_v43 = vand.u32 4294901760, %v18309_v5  ;;  %14506 = vmatprep.subr.bf16.mxu0 %v18484_v23 }
 0x773   : > { %v19739_v16 = vand.u32 4294901760, %v18530_v46  ;;  %v8208_v31 = vsub.f32 %v18506_v4, %v19728_v24  ;;  %v8901_v53 = vsub.f32 %v18511_v20, %v19731_v54  ;;  %v8908_v13 = vsub.f32 %v18516_v56, %v19732_v3  ;;  %14316 = vmatpush3.bf16.msra.mxu1 %v18443_v45  ;;  %9586 = vrot.lane.b32.xlu1 %v9543_v10, %s15536_s26 }
 0x774   : > { %v18556_v17 = vsub.f32 %v18309_v5, %v20039_v43  ;;  %v8202_v5 = vand.u32 4294901760, %v8201_v40  ;;  %v20040_v24 = vand.u32 4294901760, %v18535_v57  ;;  %9584 = vrot.lane.b32.xlu0 %v9542_v50, %s15536_s26  ;;  %v20041_v45 = vand.u32 4294901760, %v18545_v59  ;;  %v18583_v38 = vpop.eup %15514  ;;  %14318 = vmatprep.subr.bf16.mxu1 %v18468_v25 }
 0x775   : > { %v8215_v43 = vsub.f32 %v18530_v46, %v19739_v16  ;;  %v8209_v3 = vand.u32 4294901760, %v8208_v31  ;;  %v8902_v22 = vand.u32 4294901760, %v8901_v53  ;;  %v8909_v27 = vand.u32 4294901760, %v8908_v13  ;;  %14508 = vmatpush3.bf16.msra.mxu0 %v18484_v23 }
 0x776   : > { %v8222_v47 = vsub.f32 %v18535_v57, %v20040_v24  ;;  %v19742_v54 = vand.u32 4294901760, %v18556_v17  ;;  %v8915_v40 = vsub.f32 %v18545_v59, %v20041_v45  ;;  %v20042_v10 = vand.u32 4294901760, %v18324_v63  ;;  %v18604_v53 = vpop.eup %15516  ;;  %14510 = vmatprep.subr.bf16.mxu0 %v18524_v32 }
 0x777   : > { %v8216_v16 = vand.u32 4294901760, %v8215_v43  ;;  %v9544_v45 = vmul.f32 %v18583_v38, %v18260_v11  ;;  %v19746_v13 = vand.u32 4294901760, %v18583_v38  ;;  %v18600_v31 = vmul.f32 %v18583_v38, %v16550_v26  ;;  %v9515_v43 = vpop.permute.xlu1 %9514  ;;  %14320 = vmatpush3.bf16.msra.mxu1 %v18468_v25  ;;  %9590 = vrot.lane.b32.xlu1 %v18475_v61, %s15536_s26 }
 0x778   : > { %v8223_v42 = vand.u32 4294901760, %v8222_v47  ;;  %v8922_v24 = vsub.f32 %v18556_v17, %v19742_v54  ;;  %v18592_v50 = vsub.f32 %v18324_v63, %v20042_v10  ;;  %v18602_v47 = vpack.c.bf16 %v8209_v3, %v8202_v5 }
 0x779   : > { %v18608_v63 = vpack.c.bf16 %v8909_v27, %v8902_v22  ;;  %v8916_v11 = vand.u32 4294901760, %v8915_v40  ;;  %9588 = vrot.lane.b32.xlu0 %v9544_v45, %s15536_s26  ;;  %v20043_v26 = vand.u32 4294901760, %v18424_v35  ;;  %v19743_v5 = vand.u32 4294901760, %v18600_v31  ;;  %14512 = vmatpush3.bf16.msra.mxu0 %v18524_v32 }
 0x77a   : > { %v18610_v10 = vpack.c.bf16 %v8223_v42, %v8216_v16  ;;  %v8923_v54 = vand.u32 4294901760, %v8922_v24  ;;  %v9547_v27 = vmul.f32 %v18604_v53, %v9515_v43  ;;  %v19744_v42 = vand.u32 4294901760, %v18604_v53 }
 0x77b   : > { %v18619_v3 = vpack.c.bf16 %v20043_v26, %v19746_v13  ;;  %v18626_v16 = vmul.f32 %v18604_v53, %v19988_v9  ;;  %v19745_v61 = vand.u32 4294901760, %v18592_v50  ;;  %v20045_v40 = vand.u32 4294901760, %v18311_v7 }
 0x77c   : > { %v18628_v22 = vpack.c.bf16 %v8923_v54, %v8916_v11  ;;  %v20046_v45 = vand.u32 4294901760, %v18490_v48  ;;  %v20048_v9 = vand.u32 4294901760, %v18264_v37  ;;  %v20050_v11 = vand.u32 4294901760, %v18359_v1  ;;  %9594 = vrot.lane.b32.xlu1 %v9547_v27, %s15536_s26 }
 0x77d   : > { %20044 = vst [vmem:[#allocation21_spill] sm:$0xff] %v18619_v3  ;;  %v18634_v24 = vsub.f32 %v18311_v7, %v20045_v40  ;;  %14322 = vmatprep.subr.bf16.mxu1 %v18619_v3  ;;  %v19747_v26 = vand.u32 4294901760, %v18626_v16  ;;  %v8229_v40 = vsub.f32 %v18592_v50, %v19745_v61  ;;  %v20053_v61 = vand.u32 4294901760, %v18334_v29  ;;  %9592 = vrot.lane.b32.xlu0 %v18275_v52, %s15536_s26 }
 0x77e   : > { %v18642_v43 = vpack.c.bf16 %v20046_v45, %v19743_v5  ;;  %v18648_v54 = vpack.c.bf16 %v19744_v42, %v20048_v9  ;;  %v18653_v7 = vsub.f32 %v18359_v1, %v20050_v11  ;;  %14324 = vmatpush3.bf16.msra.mxu1 %v18619_v3  ;;  %v20051_v5 = vand.u32 4294901760, %v18363_v36 }
 0x77f   : > { %v20052_v11 = vand.u32 4294901760, %v18352_v28  ;;  %v18677_v13 = vsub.f32 %v18334_v29, %v20053_v61  ;;  %v20054_v45 = vand.u32 4294901760, %v18393_v30  ;;  %v8230_v27 = vand.u32 4294901760, %v8229_v40 }
 0x780   : > { %20047 = vst [vmem:[#allocation3_spill] sm:$0xff] %v18642_v43  ;;  %20049 = vst [vmem:[#allocation5_spill] sm:$0xff] %v18648_v54  ;;  %v18664_v9 = vsub.f32 %v18363_v36, %v20051_v5  ;;  %14514 = vmatprep.subr.bf16.mxu0 %v18642_v43  ;;  %v19750_v1 = vand.u32 4294901760, %v18653_v7  ;;  %14326 = vmatprep.subr.bf16.mxu1 %v18648_v54  ;;  %v20055_v5 = vand.u32 4294901760, %v18280_v0  ;;  %v20057_v29 = vand.u32 4294901760, %v18634_v24 }
 0x781   : > { %v18672_v42 = vsub.f32 %v18352_v28, %v20052_v11  ;;  %v18682_v36 = vsub.f32 %v18393_v30, %v20054_v45  ;;  %14516 = vmatpush3.bf16.msra.mxu0 %v18642_v43  ;;  %v20062_v25 = vand.u32 4294901760, %v18366_v39  ;;  %v14369_v41 = vpack.c.bf16 %v18634_v24, %v18592_v50 }
 0x782   : > { %v18691_v28 = vpack.c.bf16 %v19747_v26, %v20055_v5  ;;  %v8236_v61 = vsub.f32 %v18634_v24, %v20057_v29  ;;  %v19753_v11 = vand.u32 4294901760, %v18664_v9  ;;  %v8929_v52 = vsub.f32 %v18653_v7, %v19750_v1  ;;  %14328 = vmatpush3.bf16.msra.mxu1 %v18648_v54 }
 0x783   : > { %v19758_v30 = vand.u32 4294901760, %v18672_v42  ;;  %v20058_v26 = vand.u32 4294901760, %v18406_v12  ;;  %v20059_v1 = vand.u32 4294901760, %v18380_v60  ;;  %14330 = vmatprep.subr.bf16.mxu1 %v18602_v47  ;;  %v20060_v54 = vand.u32 4294901760, %v18677_v13 }
 0x784   : > { %20056 = vst [vmem:[#allocation18_spill] sm:$0xff] %v18691_v28  ;;  %14518 = vmatprep.subr.bf16.mxu0 %v18691_v28  ;;  %v8237_v40 = vand.u32 4294901760, %v8236_v61  ;;  %v8936_v29 = vsub.f32 %v18664_v9, %v19753_v11  ;;  %v8930_v5 = vand.u32 4294901760, %v8929_v52  ;;  %v20061_v3 = vand.u32 4294901760, %v18682_v36 }
 0x785   : > { %v18712_v43 = vsub.f32 %v18406_v12, %v20058_v26  ;;  %v18717_v45 = vsub.f32 %v18380_v60, %v20059_v1  ;;  %v8243_v61 = vsub.f32 %v18672_v42, %v19758_v30  ;;  %v8250_v11 = vsub.f32 %v18677_v13, %v20060_v54  ;;  %14520 = vmatpush3.bf16.msra.mxu0 %v18691_v28 }
 0x786   : > { %v8943_v12 = vsub.f32 %v18682_v36, %v20061_v3  ;;  %v14337_v26 = vpack.c.bf16 %v8237_v40, %v8230_v27  ;;  %v8937_v32 = vand.u32 4294901760, %v8936_v29  ;;  %13568 = vmatmul.mubr.f32.vlgmr.msra.gmra.mrb[32].mxu1 %v18270_v62  ;;  %v18736_v54 = vsub.f32 %v18366_v39, %v20062_v25  ;;  %14522 = vmatprep.subr.bf16.mxu0 %v18608_v63 }
 0x787   : > { %v19767_v60 = vand.u32 4294901760, %v18712_v43  ;;  %v19761_v1 = vand.u32 4294901760, %v18717_v45  ;;  %v8244_v52 = vand.u32 4294901760, %v8243_v61  ;;  %v8251_v30 = vand.u32 4294901760, %v8250_v11  ;;  %14332 = vmatpush3.bf16.msra.mxu1 %v18602_v47 }
 0x788   : > { %v14529_v3 = vpack.c.bf16 %v8937_v32, %v8930_v5  ;;  %v8944_v27 = vand.u32 4294901760, %v8943_v12  ;;  %14334 = vmatprep.subr.bf16.mxu1 %v18610_v10  ;;  %v19762_v39 = vand.u32 4294901760, %v18736_v54  ;;  %v20063_v25 = vand.u32 4294901760, %v18431_v6  ;;  %13778 = vmatmul.mubr.f32.vlgmr.msra.gmra.mrb[48].mxu0 %v18270_v62 }
 0x789   : > { %v8950_v40 = vsub.f32 %v18712_v43, %v19767_v60  ;;  %v8257_v29 = vsub.f32 %v18717_v45, %v19761_v1  ;;  %v14341_v11 = vpack.c.bf16 %v8251_v30, %v8244_v52  ;;  %v20064_v32 = vand.u32 4294901760, %v18435_v33  ;;  %14524 = vmatpush3.bf16.msra.mxu0 %v18608_v63 }
 0x78a   : > { %v18751_v61 = vsub.f32 %v18431_v6, %v20063_v25  ;;  %v19763_v5 = vmov 1.0   ;;  %v20065_v52 = vand.u32 4294901760, %v18411_v49  ;;  %v20066_v6 = vand.u32 4294901760, %v18395_v58  ;;  %14526 = vmatprep.subr.bf16.mxu0 %v18628_v22 }
 0x78b   : > { %v18756_v47 = vsub.f32 %v18435_v33, %v20064_v32  ;;  %13602 = vmatprep.mubr.msk.f32.mxu1 %vm18133_vm2, %v19763_v5  ;;  %v8951_v30 = vand.u32 4294901760, %v8950_v40  ;;  %v8258_v12 = vand.u32 4294901760, %v8257_v29  ;;  %v8264_v33 = vsub.f32 %v18736_v54, %v19762_v39  ;;  %13812 = vmatprep.mubr.msk.f32.mxu0 %vm18133_vm2, %v19763_v5 }
 0x78c   : > { %v18765_v1 = vsub.f32 %v18411_v49, %v20065_v52  ;;  %v18770_v25 = vsub.f32 %v18395_v58, %v20066_v6  ;;  %v19766_v32 = vand.u32 4294901760, %v18751_v61  ;;  %v20067_v29 = vand.u32 4294901760, %v18460_v14  ;;  %14336 = vmatpush3.bf16.msra.mxu1 %v18610_v10 }
 0x78d   : > { %v19765_v40 = vand.u32 4294901760, %v18756_v47  ;;  %v14533_v58 = vpack.c.bf16 %v8951_v30, %v8944_v27  ;;  %v20068_v6 = vand.u32 4294901760, %v18472_v51  ;;  %14338 = vmatprep.subr.bf16.mxu1 %v14337_v26  ;;  %14528 = vmatpush3.bf16.msra.mxu0 %v18628_v22  ;;  %v14561_v21 = vpack.c.bf16 %v18664_v9, %v18653_v7 }
 0x78e   : > { %v18781_v49 = vsub.f32 %v18460_v14, %v20067_v29  ;;  %v19768_v63 = vand.u32 4294901760, %v18765_v1  ;;  %v19770_v52 = vand.u32 4294901760, %v18770_v25  ;;  %v8265_v14 = vand.u32 4294901760, %v8264_v33  ;;  %14530 = vmatprep.subr.bf16.mxu0 %v14529_v3 }
 0x78f   : > { %v18793_v39 = vsub.f32 %v18472_v51, %v20068_v6  ;;  %v8957_v29 = vsub.f32 %v18751_v61, %v19766_v32  ;;  %v8964_v10 = vsub.f32 %v18756_v47, %v19765_v40  ;;  %v20069_v6 = vand.u32 4294901760, %v18583_v38 }
 0x790   : > { %v19778_v27 = vand.u32 4294901760, %v18781_v49  ;;  %v8271_v30 = vsub.f32 %v18765_v1, %v19768_v63  ;;  %v8278_v51 = vsub.f32 %v18770_v25, %v19770_v52  ;;  %v14345_v40 = vpack.c.bf16 %v8265_v14, %v8258_v12  ;;  %14340 = vmatpush3.bf16.msra.mxu1 %v14337_v26 }
 0x791   : > { %v19773_v33 = vand.u32 4294901760, %v18793_v39  ;;  %v18812_v5 = vsub.f32 %v18583_v38, %v20069_v6  ;;  %v8958_v32 = vand.u32 4294901760, %v8957_v29  ;;  %v8965_v60 = vand.u32 4294901760, %v8964_v10  ;;  %14342 = vmatprep.subr.bf16.mxu1 %v14341_v11  ;;  %14532 = vmatpush3.bf16.msra.mxu0 %v14529_v3 }
 0x792   : > { %v8971_v63 = vsub.f32 %v18781_v49, %v19778_v27  ;;  %v8272_v62 = vand.u32 4294901760, %v8271_v30  ;;  %v8279_v52 = vand.u32 4294901760, %v8278_v51  ;;  %v20070_v12 = vand.u32 4294901760, %v18424_v35  ;;  %14534 = vmatprep.subr.bf16.mxu0 %v14533_v58 }
 0x793   : > { %v8978_v15 = vsub.f32 %v18793_v39, %v19773_v33  ;;  %v19777_v38 = vand.u32 4294901760, %v18812_v5  ;;  %v14537_v6 = vpack.c.bf16 %v8965_v60, %v8958_v32  ;;  %v20071_v29 = vand.u32 4294901760, %v18600_v31 }
 0x794   : > { %v8972_v22 = vand.u32 4294901760, %v8971_v63  ;;  %v18825_v14 = vsub.f32 %v18424_v35, %v20070_v12  ;;  %v14349_v10 = vpack.c.bf16 %v8279_v52, %v8272_v62  ;;  %v20072_v33 = vand.u32 4294901760, %v18490_v48  ;;  %14344 = vmatpush3.bf16.msra.mxu1 %v14341_v11 }
 0x795   : > { %v18830_v26 = vsub.f32 %v18600_v31, %v20071_v29  ;;  %v8979_v30 = vand.u32 4294901760, %v8978_v15  ;;  %v8285_v51 = vsub.f32 %v18812_v5, %v19777_v38  ;;  %v20073_v63 = vand.u32 4294901760, %v18264_v37  ;;  %14346 = vmatprep.subr.bf16.mxu1 %v14345_v40  ;;  %14536 = vmatpush3.bf16.msra.mxu0 %v14533_v58 }
 0x796   : > { %v18838_v60 = vsub.f32 %v18490_v48, %v20072_v33  ;;  %v19775_v35 = vand.u32 4294901760, %v18825_v14  ;;  %v20074_v15 = vand.u32 4294901760, %v18604_v53  ;;  %v20075_v33 = vand.u32 4294901760, %v18280_v0  ;;  %14538 = vmatprep.subr.bf16.mxu0 %v14537_v6 }
 0x797   : > { %v19774_v32 = vand.u32 4294901760, %v18830_v26  ;;  %v18845_v31 = vsub.f32 %v18264_v37, %v20073_v63  ;;  %v14541_v52 = vpack.c.bf16 %v8979_v30, %v8972_v22  ;;  %v8286_v48 = vand.u32 4294901760, %v8285_v51 }
 0x798   : > { %v18850_v62 = vsub.f32 %v18604_v53, %v20074_v15  ;;  %v19776_v3 = vand.u32 4294901760, %v18838_v60  ;;  %v18856_v12 = vsub.f32 %v18280_v0, %v20075_v33  ;;  %v8292_v37 = vsub.f32 %v18825_v14, %v19775_v35  ;;  %14348 = vmatpush3.bf16.msra.mxu1 %v14345_v40 }
 0x799   : > { %v8985_v53 = vsub.f32 %v18830_v26, %v19774_v32  ;;  %v19781_v11 = vand.u32 4294901760, %v18845_v31  ;;  %v20076_v30 = vand.u32 4294901760, %v18626_v16  ;;  %v18875_v63 = vpack.c.bf16 %v18506_v4, %v18499_v55  ;;  %14350 = vmatprep.subr.bf16.mxu1 %v14349_v10  ;;  %14540 = vmatpush3.bf16.msra.mxu0 %v14537_v6 }
 0x79a   : > { %v8305_v22 = vand.u32 4294901760, %v18850_v62  ;;  %v8992_v29 = vsub.f32 %v18838_v60, %v19776_v3  ;;  %v8998_v0 = vand.u32 4294901760, %v18856_v12  ;;  %v8293_v15 = vand.u32 4294901760, %v8292_v37  ;;  %14542 = vmatprep.subr.bf16.mxu0 %v14541_v52 }
 0x79b   : > { %v9004_v51 = vsub.f32 %v18626_v16, %v20076_v30  ;;  %v8986_v33 = vand.u32 4294901760, %v8985_v53  ;;  %v8299_v32 = vsub.f32 %v18845_v31, %v19781_v11  ;;  %v14553_v16 = vpack.c.bf16 %v18516_v56, %v18511_v20 }
 0x79c   : > { %v8306_v35 = vsub.f32 %v18850_v62, %v8305_v22  ;;  %v8993_v3 = vand.u32 4294901760, %v8992_v29  ;;  %v8999_v38 = vsub.f32 %v18856_v12, %v8998_v0  ;;  %v14353_v30 = vpack.c.bf16 %v8293_v15, %v8286_v48  ;;  %14352 = vmatpush3.bf16.msra.mxu1 %v14349_v10 }
 0x79d   : > { %v9005_v27 = vand.u32 4294901760, %v9004_v51  ;;  %v8300_v58 = vand.u32 4294901760, %v8299_v32  ;;  %v14365_v53 = vpack.c.bf16 %v18535_v57, %v18530_v46  ;;  %v14557_v40 = vpack.c.bf16 %v18556_v17, %v18545_v59  ;;  %14544 = vmatpush3.bf16.msra.mxu0 %v14541_v52 }
 0x79e   : > { %v8307_v37 = vand.u32 4294901760, %v8306_v35  ;;  %v14545_v28 = vpack.c.bf16 %v8993_v3, %v8986_v33  ;;  %v9000_v11 = vand.u32 4294901760, %v8999_v38  ;;  %v14373_v35 = vpack.c.bf16 %v18677_v13, %v18672_v42  ;;  %14354 = vmatprep.subr.bf16.mxu1 %v14353_v30 }
 0x79f   : > { %v9006_v23 = vsub.f32 %v9004_v51, %v9005_v27  ;;  %v14565_v38 = vpack.c.bf16 %v18712_v43, %v18682_v36  ;;  %v14377_v48 = vpack.c.bf16 %v18736_v54, %v18717_v45  ;;  %v14569_v6 = vpack.c.bf16 %v18756_v47, %v18751_v61 }
 0x7a0   : > { %v14357_v29 = vpack.c.bf16 %v8307_v37, %v8300_v58  ;;  %v14381_v3 = vpack.c.bf16 %v18770_v25, %v18765_v1  ;;  %v14573_v15 = vpack.c.bf16 %v18793_v39, %v18781_v49  ;;  %v14385_v10 = vpack.c.bf16 %v18825_v14, %v18812_v5  ;;  %14546 = vmatprep.subr.bf16.mxu0 %v14545_v28 }
 0x7a1   : > { %v9007_v32 = vand.u32 4294901760, %v9006_v23  ;;  %v14577_v23 = vpack.c.bf16 %v18838_v60, %v18830_v26  ;;  %v14389_v58 = vpack.c.bf16 %v18850_v62, %v18845_v31  ;;  %v14581_v37 = vpack.c.bf16 %v9004_v51, %v18856_v12  ;;  %14356 = vmatpush3.bf16.msra.mxu1 %v14353_v30  ;;  %14548 = vmatpush3.bf16.msra.mxu0 %v14545_v28  ;;  %v20111_v28 = vld [vmem:[#allocation11_spill] sm:$0xff] }
 0x7a2   : > { %v20078_v19 = vand.u32 4294901760, %v18506_v4  ;;  %v20079_v44 = vand.u32 4294901760, %v18511_v20  ;;  %v20080_v34 = vand.u32 4294901760, %v18516_v56  ;;  %v20083_v12 = vand.u32 4294901760, %v18545_v59  ;;  %14358 = vmatprep.subr.bf16.mxu1 %v14357_v29 }
 0x7a3   : > { %v14549_v33 = vpack.c.bf16 %v9007_v32, %v9000_v11  ;;  %v20081_v11 = vand.u32 4294901760, %v18530_v46  ;;  %v20082_v32 = vand.u32 4294901760, %v18535_v57  ;;  %v20084_v55 = vand.u32 4294901760, %v18556_v17 }
 0x7a4   : > { %v18915_v2 = vpack.c.bf16 %v20078_v19, %v20077_v18  ;;  %v18921_v8 = vpack.c.bf16 %v20080_v34, %v20079_v44  ;;  %v20085_v18 = vand.u32 4294901760, %v18592_v50  ;;  %v20086_v19 = vand.u32 4294901760, %v18634_v24 }
 0x7a5   : > { %v18927_v62 = vpack.c.bf16 %v20082_v32, %v20081_v11  ;;  %v18933_v4 = vpack.c.bf16 %v20084_v55, %v20083_v12  ;;  %v20087_v34 = vand.u32 4294901760, %v18653_v7  ;;  %v20088_v44 = vand.u32 4294901760, %v18664_v9  ;;  %14550 = vmatprep.subr.bf16.mxu0 %v14549_v33  ;;  %14360 = vmatpush3.bf16.msra.mxu1 %v14357_v29 }
 0x7a6   : > { %v18939_v20 = vpack.c.bf16 %v20086_v19, %v20085_v18  ;;  %v20089_v46 = vand.u32 4294901760, %v18672_v42  ;;  %v20090_v57 = vand.u32 4294901760, %v18677_v13  ;;  %v20091_v17 = vand.u32 4294901760, %v18682_v36  ;;  %14362 = vmatprep.subr.bf16.mxu1 %v18875_v63  ;;  %14552 = vmatpush3.bf16.msra.mxu0 %v14549_v33  ;;  %v20122_v19 = vld [vmem:[#allocation16_spill] sm:$0xff] }
 0x7a7   : > { %v18945_v56 = vpack.c.bf16 %v20088_v44, %v20087_v34  ;;  %v20092_v50 = vand.u32 4294901760, %v18712_v43  ;;  %v20093_v52 = vand.u32 4294901760, %v18717_v45  ;;  %v20094_v7 = vand.u32 4294901760, %v18736_v54  ;;  %14554 = vmatprep.subr.bf16.mxu0 %v14553_v16  ;;  %v20123_v44 = vld [vmem:[#allocation21_spill] sm:$0xff] }
 0x7a8   : > { %v18951_v59 = vpack.c.bf16 %v20090_v57, %v20089_v46  ;;  %v20095_v51 = vand.u32 4294901760, %v18751_v61  ;;  %v20096_v42 = vand.u32 4294901760, %v18756_v47  ;;  %v20097_v30 = vand.u32 4294901760, %v18765_v1 }
 0x7a9   : > { %v18957_v24 = vpack.c.bf16 %v20092_v50, %v20091_v17  ;;  %v18963_v9 = vpack.c.bf16 %v20094_v7, %v20093_v52  ;;  %v20098_v36 = vand.u32 4294901760, %v18770_v25  ;;  %v20099_v11 = vand.u32 4294901760, %v18781_v49 }
 0x7aa   : > { %v18969_v13 = vpack.c.bf16 %v20096_v42, %v20095_v51  ;;  %v20100_v45 = vand.u32 4294901760, %v18793_v39  ;;  %v20101_v54 = vand.u32 4294901760, %v18812_v5  ;;  %v20102_v61 = vand.u32 4294901760, %v18825_v14  ;;  %v20108_v14 = vld [vmem:[#allocation24_spill] sm:$0xff] }
 0x7ab   : > { %v18975_v43 = vpack.c.bf16 %v20098_v36, %v20097_v30  ;;  %v20103_v47 = vand.u32 4294901760, %v18830_v26  ;;  %v20104_v1 = vand.u32 4294901760, %v18838_v60  ;;  %v20105_v25 = vand.u32 4294901760, %v18845_v31  ;;  %v20113_v26 = vld [vmem:[#allocation25_spill] sm:$0xff]  ;;  %v20115_v31 = vld [vmem:[#allocation8_spill] sm:$0xff]  ;;  %v20125_v30 = vld [vmem:[#allocation3_spill] sm:$0xff] }
 0x7ac   : > { %v18981_v32 = vpack.c.bf16 %v20100_v45, %v20099_v11  ;;  %v18987_v12 = vpack.c.bf16 %v20102_v61, %v20101_v54  ;;  %v18999_v49 = vpack.c.bf16 %v9005_v27, %v8998_v0  ;;  %v20106_v39 = vmov 1.0   ;;  %v20112_v27 = vld [vmem:[#allocation6_spill] sm:$0xff]  ;;  %v20114_v60 = vld [vmem:[#allocation13_spill] sm:$0xff] }
 0x7ad   : > { %v18993_v55 = vpack.c.bf16 %v20104_v1, %v20103_v47  ;;  %v18997_v18 = vpack.c.bf16 %v8305_v22, %v20105_v25  ;;  %13603 = vmatmul.mubr.msk.f32.vlgmr.msra.gmra.mrb[32].mxu1 %vm18223_vm6, %v20106_v39  ;;  %13813 = vmatmul.mubr.msk.f32.vlgmr.msra.gmra.mrb[48].mxu0 %vm18223_vm6, %v20106_v39  ;;  %v20116_v22 = vld [vmem:[#allocation15_spill] sm:$0xff]  ;;  %v20117_v0 = vld [vmem:[#allocation10_spill] sm:$0xff]  ;;  %v20126_v36 = vld [vmem:[#allocation5_spill] sm:$0xff] }
 0x7ae   : > { %14364 = vmatpush3.bf16.msra.mxu1 %v18875_v63  ;;  %13637 = vmatprep.mubr.f32.mxu1 %v20108_v14  ;;  %v20118_v63 = vld [vmem:[#allocation17_spill] sm:$0xff] }
 0x7af   : > { %14366 = vmatprep.subr.bf16.mxu1 %v14365_v53  ;;  %14556 = vmatpush3.bf16.msra.mxu0 %v14553_v16  ;;  %v20119_v16 = vld [vmem:[#allocation12_spill] sm:$0xff] }
 0x7b0   : > { %13847 = vmatprep.mubr.f32.mxu0 %v20108_v14  ;;  %14558 = vmatprep.subr.bf16.mxu0 %v14557_v40 }
 0x7b2   : > { %14368 = vmatpush3.bf16.msra.mxu1 %v14365_v53 }
 0x7b3   : > { %14370 = vmatprep.subr.bf16.mxu1 %v14369_v41  ;;  %14560 = vmatpush3.bf16.msra.mxu0 %v14557_v40 }
 0x7b4   : > { %14562 = vmatprep.subr.bf16.mxu0 %v14561_v21 }
 0x7b6   : > { %14372 = vmatpush3.bf16.msra.mxu1 %v14369_v41  ;;  %v20109_v41 = vld [vmem:[#allocation9_spill] sm:$0xff] }
 0x7b7   : > { %14374 = vmatprep.subr.bf16.mxu1 %v14373_v35  ;;  %14564 = vmatpush3.bf16.msra.mxu0 %v14561_v21  ;;  %v20110_v21 = vld [vmem:[#allocation23_spill] sm:$0xff] }
 0x7b8   : > { %14566 = vmatprep.subr.bf16.mxu0 %v14565_v38 }
 0x7ba   : > { %14376 = vmatpush3.bf16.msra.mxu1 %v14373_v35 }
 0x7bb   : > { %14378 = vmatprep.subr.bf16.mxu1 %v14377_v48  ;;  %14568 = vmatpush3.bf16.msra.mxu0 %v14565_v38  ;;  %v20120_v38 = vld [vmem:[#allocation22_spill] sm:$0xff] }
 0x7bc   : > { %14570 = vmatprep.subr.bf16.mxu0 %v14569_v6 }
 0x7be   : > { %14380 = vmatpush3.bf16.msra.mxu1 %v14377_v48 }
 0x7bf   : > { %14382 = vmatprep.subr.bf16.mxu1 %v14381_v3  ;;  %14572 = vmatpush3.bf16.msra.mxu0 %v14569_v6  ;;  %v20121_v6 = vld [vmem:[#allocation14_spill] sm:$0xff] }
 0x7c0   : > { %14574 = vmatprep.subr.bf16.mxu0 %v14573_v15 }
 0x7c2   : > { %14384 = vmatpush3.bf16.msra.mxu1 %v14381_v3 }
 0x7c3   : > { %14386 = vmatprep.subr.bf16.mxu1 %v14385_v10  ;;  %14576 = vmatpush3.bf16.msra.mxu0 %v14573_v15 }
 0x7c4   : > { %14578 = vmatprep.subr.bf16.mxu0 %v14577_v23 }
 0x7c6   : > { %14388 = vmatpush3.bf16.msra.mxu1 %v14385_v10 }
 0x7c7   : > { %14390 = vmatprep.subr.bf16.mxu1 %v14389_v58  ;;  %14580 = vmatpush3.bf16.msra.mxu0 %v14577_v23 }
 0x7c8   : > { %14582 = vmatprep.subr.bf16.mxu0 %v14581_v37 }
 0x7ca   : > { %14392 = vmatpush3.bf16.msra.mxu1 %v14389_v58 }
 0x7cb   : > { %14394 = vmatprep.subr.bf16.mxu1 %v20109_v41  ;;  %14584 = vmatpush3.bf16.msra.mxu0 %v14581_v37 }
 0x7cc   : > { %14586 = vmatprep.subr.bf16.mxu0 %v20111_v28 }
 0x7cd   : > { %13638 = vmatmul.mubr.f32.vlgmr.msra.gmra.mrb[32].mxu1 %v20110_v21 }
 0x7ce   : > { %14396 = vmatpush3.bf16.msra.mxu1 %v20109_v41  ;;  %13672 = vmatprep.mubr.f32.mxu1 %v20113_v26 }
 0x7cf   : > { %14398 = vmatprep.subr.bf16.mxu1 %v20112_v27  ;;  %13848 = vmatmul.mubr.f32.vlgmr.msra.gmra.mrb[48].mxu0 %v20110_v21 }
 0x7d0   : > { %14588 = vmatpush3.bf16.msra.mxu0 %v20111_v28  ;;  %13882 = vmatprep.mubr.f32.mxu0 %v20113_v26  ;;  %v19031_v53 = vpop.permute.xlu1 %9566 }
 0x7d1   : > { %14590 = vmatprep.subr.bf16.mxu0 %v20114_v60  ;;  %v19808_v40 = vand.u32 4294901760, %v19031_v53  ;;  %v19035_v29 = vpop.permute.xlu0 %9564 }
 0x7d2   : > { %14400 = vmatpush3.bf16.msra.mxu1 %v20112_v27  ;;  %v19810_v35 = vand.u32 4294901760, %v19035_v29 }
 0x7d3   : > { %14402 = vmatprep.subr.bf16.mxu1 %v20115_v31  ;;  %v19043_v48 = vsub.f32 %v19031_v53, %v19808_v40 }
 0x7d4   : > { %14592 = vmatpush3.bf16.msra.mxu0 %v20114_v60  ;;  %v19049_v3 = vsub.f32 %v19035_v29, %v19810_v35  ;;  %v19051_v15 = vpop.permute.xlu1 %9570 }
 0x7d5   : > { %14594 = vmatprep.subr.bf16.mxu0 %v20116_v22  ;;  %v19801_v10 = vand.u32 4294901760, %v19043_v48  ;;  %v19806_v23 = vand.u32 4294901760, %v19051_v15  ;;  %v19056_v33 = vpop.permute.xlu0 %9568 }
 0x7d6   : > { %14404 = vmatpush3.bf16.msra.mxu1 %v20115_v31  ;;  %v19800_v58 = vand.u32 4294901760, %v19049_v3  ;;  %v19807_v37 = vand.u32 4294901760, %v19056_v33 }
 0x7d7   : > { %14406 = vmatprep.subr.bf16.mxu1 %v20117_v0  ;;  %v19065_v34 = vsub.f32 %v19051_v15, %v19806_v23 }
 0x7d8   : > { %14596 = vmatpush3.bf16.msra.mxu0 %v20116_v22  ;;  %v19071_v46 = vsub.f32 %v19056_v33, %v19807_v37  ;;  %v19077_v57 = vpack.c.bf16 %v19801_v10, %v19800_v58  ;;  %v20130_v37 = vld [vmem:[#allocation7_spill] sm:$0xff] }
 0x7d9   : > { %14598 = vmatprep.subr.bf16.mxu0 %v20118_v63  ;;  %v19805_v17 = vand.u32 4294901760, %v19065_v34  ;;  %v19081_v50 = vpop.permute.xlu1 %9574  ;;  %v19083_v52 = vpop.permute.xlu0 %9572 }
 0x7da   : > { %14408 = vmatpush3.bf16.msra.mxu1 %v20117_v0  ;;  %20124 = vst [vmem:[#allocation2_spill] sm:$0xff] %v19077_v57  ;;  %v19804_v7 = vand.u32 4294901760, %v19071_v46  ;;  %v19802_v51 = vand.u32 4294901760, %v19081_v50  ;;  %v19803_v42 = vand.u32 4294901760, %v19083_v52 }
 0x7db   : > { %14410 = vmatprep.subr.bf16.mxu1 %v20119_v16 }
 0x7dc   : > { %14600 = vmatpush3.bf16.msra.mxu0 %v20118_v63  ;;  %v19094_v11 = vsub.f32 %v19081_v50, %v19802_v51  ;;  %v19099_v45 = vsub.f32 %v19083_v52, %v19803_v42  ;;  %v19110_v47 = vpack.c.bf16 %v19805_v17, %v19804_v7  ;;  %v20128_v51 = vld [vmem:[#allocation18_spill] sm:$0xff] }
 0x7dd   : > { %14602 = vmatprep.subr.bf16.mxu0 %v20120_v38  ;;  %v19102_v54 = vpop.permute.xlu1 %9578  ;;  %v19104_v61 = vpop.permute.xlu0 %9576 }
 0x7de   : > { %14412 = vmatpush3.bf16.msra.mxu1 %v20119_v16  ;;  %20127 = vst [vmem:[#allocation20_spill] sm:$0xff] %v19110_v47  ;;  %v19815_v1 = vand.u32 4294901760, %v19094_v11  ;;  %v19814_v25 = vand.u32 4294901760, %v19099_v45  ;;  %v19809_v58 = vand.u32 4294901760, %v19102_v54  ;;  %v19811_v10 = vand.u32 4294901760, %v19104_v61 }
 0x7df   : > { %14414 = vmatprep.subr.bf16.mxu1 %v20121_v6 }
 0x7e0   : > { %14604 = vmatpush3.bf16.msra.mxu0 %v20120_v38  ;;  %v19122_v42 = vsub.f32 %v19102_v54, %v19809_v58  ;;  %v19127_v7 = vsub.f32 %v19104_v61, %v19811_v10  ;;  %v19139_v40 = vpack.c.bf16 %v19815_v1, %v19814_v25 }
 0x7e1   : > { %14606 = vmatprep.subr.bf16.mxu0 %v20122_v19  ;;  %v19130_v17 = vpop.permute.xlu1 %9582  ;;  %v19132_v23 = vpop.permute.xlu0 %9580 }
 0x7e2   : > { %14416 = vmatpush3.bf16.msra.mxu1 %v20121_v6  ;;  %20129 = vst [vmem:[#allocation27_spill] sm:$0xff] %v19127_v7  ;;  %20131 = vst [vmem:[#allocation9_spill] sm:$0xff] %v19139_v40  ;;  %v19816_v35 = vand.u32 4294901760, %v19130_v17  ;;  %v19818_v10 = vand.u32 4294901760, %v19132_v23  ;;  %v19822_v47 = vand.u32 4294901760, %v19127_v7 }
 0x7e3   : > { %14418 = vmatprep.subr.bf16.mxu1 %v20123_v44 }
 0x7e4   : > { %14608 = vmatpush3.bf16.msra.mxu0 %v20122_v19  ;;  %v19154_v25 = vsub.f32 %v19130_v17, %v19816_v35  ;;  %v19159_v1 = vsub.f32 %v19132_v23, %v19818_v10  ;;  %v20135_v35 = vand.u32 4294901760, %v19122_v42 }
 0x7e5   : > { %14610 = vmatprep.subr.bf16.mxu0 %v20125_v30 }
 0x7e6   : > { %14420 = vmatpush3.bf16.msra.mxu1 %v20123_v44  ;;  %20133 = vst [vmem:[#allocation11_spill] sm:$0xff] %v19154_v25  ;;  %20134 = vst [vmem:[#allocation6_spill] sm:$0xff] %v19159_v1  ;;  %v19165_v58 = vpop.permute.xlu0 %9584  ;;  %v19174_v40 = vpack.c.bf16 %v20135_v35, %v19822_v47 }
 0x7e7   : > { %14422 = vmatprep.subr.bf16.mxu1 %v20126_v36  ;;  %v19828_v26 = vand.u32 4294901760, %v19165_v58 }
 0x7e8   : > { %14612 = vmatpush3.bf16.msra.mxu0 %v20125_v30  ;;  %20136 = vst [vmem:[#allocation13_spill] sm:$0xff] %v19174_v40 }
 0x7e9   : > { %14614 = vmatprep.subr.bf16.mxu0 %v20128_v51  ;;  %v19191_v35 = vsub.f32 %v19165_v58, %v19828_v26 }
 0x7ea   : > { %14424 = vmatpush3.bf16.msra.mxu1 %v20126_v36 }
 0x7eb   : > { %14426 = vmatprep.subr.bf16.mxu1 %v18915_v2  ;;  %v19196_v10 = vpop.permute.xlu0 %9588 }
 0x7ec   : > { %14616 = vmatpush3.bf16.msra.mxu0 %v20128_v51  ;;  %v19838_v7 = vand.u32 4294901760, %v19196_v10 }
 0x7ed   : > { %13673 = vmatmul.mubr.f32.vlgmr.msra.gmra.mrb[32].mxu1 %v20130_v37  ;;  %14618 = vmatprep.subr.bf16.mxu0 %v18921_v8 }
 0x7ee   : > { %14428 = vmatpush3.bf16.msra.mxu1 %v18915_v2  ;;  %13707 = vmatprep.mubr.msk.f32.mxu1 %vm18133_vm2, %v20106_v39  ;;  %v19163_v2 = vpop.permute.xlu1 %9586 }
 0x7ef   : > { %14430 = vmatprep.subr.bf16.mxu1 %v18927_v62  ;;  %13883 = vmatmul.mubr.f32.vlgmr.msra.gmra.mrb[48].mxu0 %v20130_v37  ;;  %v19829_v37 = vand.u32 4294901760, %v19159_v1 }
 0x7f0   : > { %14620 = vmatpush3.bf16.msra.mxu0 %v18921_v8  ;;  %13917 = vmatprep.mubr.msk.f32.mxu0 %vm18133_vm2, %v20106_v39  ;;  %v19824_v8 = vand.u32 4294901760, %v19163_v2 }
 0x7f1   : > { %14622 = vmatprep.subr.bf16.mxu0 %v18933_v4 }
 0x7f2   : > { %14432 = vmatpush3.bf16.msra.mxu1 %v18927_v62  ;;  %v19186_v21 = vsub.f32 %v19163_v2, %v19824_v8  ;;  %v19194_v47 = vpop.permute.xlu1 %9590  ;;  %v20137_v62 = vand.u32 4294901760, %v19154_v25  ;;  %v19233_v25 = vpop.permute.xlu0 %9592 }
 0x7f3   : > { %14434 = vmatprep.subr.bf16.mxu1 %v18939_v20  ;;  %v19831_v14 = vand.u32 4294901760, %v19194_v47 }
 0x7f4   : > { %14624 = vmatpush3.bf16.msra.mxu0 %v18933_v4  ;;  %v19202_v40 = vpack.c.bf16 %v20137_v62, %v19829_v37  ;;  %v19837_v8 = vand.u32 4294901760, %v19186_v21  ;;  %v19836_v4 = vand.u32 4294901760, %v19191_v35  ;;  %v19219_v62 = vsub.f32 %v19196_v10, %v19838_v7 }
 0x7f5   : > { %14626 = vmatprep.subr.bf16.mxu0 %v18945_v56  ;;  %v19214_v26 = vsub.f32 %v19194_v47, %v19831_v14 }
 0x7f6   : > { %20138 = vst [vmem:[#allocation8_spill] sm:$0xff] %v19202_v40  ;;  %14436 = vmatpush3.bf16.msra.mxu1 %v18939_v20  ;;  %v19222_v37 = vpop.permute.xlu1 %9594  ;;  %v19228_v20 = vpack.c.bf16 %v19837_v8, %v19836_v4  ;;  %v19840_v14 = vand.u32 4294901760, %v19219_v62 }
 0x7f7   : > { %14438 = vmatprep.subr.bf16.mxu1 %v18951_v59  ;;  %v9807_v40 = vand.u32 4294901760, %v19214_v26  ;;  %v19839_v1 = vand.u32 4294901760, %v19222_v37 }
 0x7f8   : > { %14628 = vmatpush3.bf16.msra.mxu0 %v18945_v56  ;;  %v9655_v56 = vand.u32 4294901760, %v19233_v25 }
 0x7f9   : > { %14630 = vmatprep.subr.bf16.mxu0 %v18957_v24  ;;  %v19242_v4 = vsub.f32 %v19222_v37, %v19839_v1  ;;  %v19248_v8 = vpack.c.bf16 %v9807_v40, %v19840_v14 }
 0x7fa   : > { %14440 = vmatpush3.bf16.msra.mxu1 %v18951_v59  ;;  %v19253_v7 = vsub.f32 %v19233_v25, %v9655_v56 }
 0x7fb   : > { %14442 = vmatprep.subr.bf16.mxu1 %v18963_v9  ;;  %v9821_v59 = vand.u32 4294901760, %v19242_v4 }
 0x7fc   : > { %14632 = vmatpush3.bf16.msra.mxu0 %v18957_v24  ;;  %v9814_v1 = vand.u32 4294901760, %v19253_v7  ;;  %v20139_v24 = vand.u32 4294901760, %v19035_v29  ;;  %v20152_v29 = vand.u32 4294901760, %v19043_v48 }
 0x7fd   : > { %14634 = vmatprep.subr.bf16.mxu0 %v18969_v13 }
 0x7fe   : > { %14444 = vmatpush3.bf16.msra.mxu1 %v18963_v9  ;;  %v19266_v14 = vpack.c.bf16 %v9821_v59, %v9814_v1  ;;  %v20140_v9 = vand.u32 4294901760, %v19031_v53 }
 0x7ff   : > { %14446 = vmatprep.subr.bf16.mxu1 %v18975_v43 }
 0x800   : > { %14636 = vmatpush3.bf16.msra.mxu0 %v18969_v13  ;;  %v19323_v13 = vpack.c.bf16 %v20140_v9, %v20139_v24  ;;  %v20161_v9 = vand.u32 4294901760, %v19122_v42 }
 0x801   : > { %14638 = vmatprep.subr.bf16.mxu0 %v18981_v32 }
 0x802   : > { %14448 = vmatpush3.bf16.msra.mxu1 %v18975_v43  ;;  %v20141_v43 = vand.u32 4294901760, %v19056_v33  ;;  %v20155_v33 = vand.u32 4294901760, %v19194_v47 }
 0x803   : > { %14450 = vmatprep.subr.bf16.mxu1 %v18987_v12 }
 0x804   : > { %14640 = vmatpush3.bf16.msra.mxu0 %v18981_v32  ;;  %v20142_v32 = vand.u32 4294901760, %v19051_v15 }
 0x805   : > { %14642 = vmatprep.subr.bf16.mxu0 %v18993_v55 }
 0x806   : > { %14452 = vmatpush3.bf16.msra.mxu1 %v18987_v12  ;;  %v19333_v12 = vpack.c.bf16 %v20142_v32, %v20141_v43  ;;  %v9766_v43 = vsub.f32 %v19122_v42, %v20161_v9  ;;  %v20162_v32 = vld [vmem:[#allocation27_spill] sm:$0xff] }
 0x807   : > { %14454 = vmatprep.subr.bf16.mxu1 %v18997_v18 }
 0x808   : > { %14644 = vmatpush3.bf16.msra.mxu0 %v18993_v55  ;;  %v20143_v55 = vld [vmem:[#allocation26_spill] sm:$0xff] }
 0x809   : > { %14646 = vmatprep.subr.bf16.mxu0 %v18999_v49 }
 0x80a   : > { %14456 = vmatpush3.bf16.msra.mxu1 %v18997_v18  ;;  %v20144_v18 = vand.u32 4294901760, %v19083_v52 }
 0x80b   : > { %14458 = vmatprep.subr.bf16.mxu1 %v20109_v41 }
 0x80c   : > { %14648 = vmatpush3.bf16.msra.mxu0 %v18999_v49  ;;  %v20145_v49 = vand.u32 4294901760, %v19081_v50  ;;  %v20157_v50 = vand.u32 4294901760, %v19071_v46 }
 0x80d   : > { %13708 = vmatmul.mubr.msk.f32.vlgmr.msra.gmra.mrb[32].mxu1 %vm18223_vm6, %v20106_v39  ;;  %14650 = vmatprep.subr.bf16.mxu0 %v20111_v28 }
 0x80e   : > { %14460 = vmatpush3.bf16.msra.mxu1 %v20109_v41  ;;  %13742 = vmatprep.mubr.msk.f32.mxu1 %vm18133_vm2, %v20106_v39  ;;  %v19349_v41 = vpack.c.bf16 %v20145_v49, %v20144_v18  ;;  %v9731_v52 = vsub.f32 %v19071_v46, %v20157_v50  ;;  %v20164_v49 = vld [vmem:[#allocation4_spill] sm:$0xff] }
 0x80f   : > { %14462 = vmatprep.subr.bf16.mxu1 %v20112_v27  ;;  %13918 = vmatmul.mubr.msk.f32.vlgmr.msra.gmra.mrb[48].mxu0 %vm18223_vm6, %v20106_v39 }
 0x810   : > { %14652 = vmatpush3.bf16.msra.mxu0 %v20111_v28  ;;  %13952 = vmatprep.mubr.msk.f32.mxu0 %vm18133_vm2, %v20106_v39  ;;  %v20146_v28 = vand.u32 4294901760, %v19104_v61  ;;  %v20160_v61 = vand.u32 4294901760, %v19099_v45  ;;  %v9732_v24 = vand.u32 4294901760, %v9731_v52 }
 0x811   : > { %14654 = vmatprep.subr.bf16.mxu0 %v20114_v60 }
 0x812   : > { %14464 = vmatpush3.bf16.msra.mxu1 %v20112_v27  ;;  %v20147_v27 = vand.u32 4294901760, %v19102_v54  ;;  %v9745_v47 = vsub.f32 %v19099_v45, %v20160_v61 }
 0x813   : > { %14466 = vmatprep.subr.bf16.mxu1 %v20115_v31 }
 0x814   : > { %14656 = vmatpush3.bf16.msra.mxu0 %v20114_v60  ;;  %v19357_v60 = vpack.c.bf16 %v20147_v27, %v20146_v28 }
 0x815   : > { %14658 = vmatprep.subr.bf16.mxu0 %v20116_v22 }
 0x816   : > { %14468 = vmatpush3.bf16.msra.mxu1 %v20115_v31  ;;  %v20148_v31 = vand.u32 4294901760, %v19132_v23  ;;  %v20154_v23 = vand.u32 4294901760, %v19196_v10  ;;  %v20158_v10 = vand.u32 4294901760, %v19222_v37  ;;  %v9746_v37 = vand.u32 4294901760, %v9745_v47 }
 0x817   : > { %14470 = vmatprep.subr.bf16.mxu1 %v20117_v0 }
 0x818   : > { %14660 = vmatpush3.bf16.msra.mxu0 %v20116_v22  ;;  %v20149_v22 = vand.u32 4294901760, %v19130_v17 }
 0x819   : > { %14662 = vmatprep.subr.bf16.mxu0 %v20118_v63 }
 0x81a   : > { %14472 = vmatpush3.bf16.msra.mxu1 %v20117_v0  ;;  %v19365_v0 = vpack.c.bf16 %v20149_v22, %v20148_v31  ;;  %v20165_v31 = vld [vmem:[#allocation11_spill] sm:$0xff] }
 0x81b   : > { %14474 = vmatprep.subr.bf16.mxu1 %v20119_v16  ;;  %v20166_v22 = vand.u32 4294901760, %v20165_v31 }
 0x81c   : > { %14664 = vmatpush3.bf16.msra.mxu0 %v20118_v63  ;;  %v20150_v63 = vand.u32 4294901760, %v19165_v58  ;;  %v19387_v58 = vpack.c.bf16 %v20155_v33, %v20154_v23  ;;  %v20169_v23 = vand.u32 4294901760, %v19186_v21 }
 0x81d   : > { %14666 = vmatprep.subr.bf16.mxu0 %v20120_v38 }
 0x81e   : > { %14476 = vmatpush3.bf16.msra.mxu1 %v20119_v16  ;;  %v20151_v16 = vand.u32 4294901760, %v19163_v2  ;;  %v9794_v33 = vsub.f32 %v19186_v21, %v20169_v23 }
 0x81f   : > { %14478 = vmatprep.subr.bf16.mxu1 %v20121_v6 }
 0x820   : > { %14668 = vmatpush3.bf16.msra.mxu0 %v20120_v38  ;;  %v19373_v53 = vpack.c.bf16 %v20151_v16, %v20150_v63  ;;  %v9724_v38 = vsub.f32 %v19043_v48, %v20152_v29  ;;  %v9780_v63 = vsub.f32 %v20165_v31, %v20166_v22  ;;  %v20167_v16 = vld [vmem:[#allocation6_spill] sm:$0xff] }
 0x821   : > { %14670 = vmatprep.subr.bf16.mxu0 %v20122_v19  ;;  %v20168_v29 = vand.u32 4294901760, %v20167_v16 }
 0x822   : > { %14480 = vmatpush3.bf16.msra.mxu1 %v20121_v6  ;;  %v20153_v6 = vand.u32 4294901760, %v19049_v3  ;;  %v9781_v52 = vand.u32 4294901760, %v9780_v63 }
 0x823   : > { %14482 = vmatprep.subr.bf16.mxu1 %v20123_v44 }
 0x824   : > { %14672 = vmatpush3.bf16.msra.mxu0 %v20122_v19  ;;  %v9717_v15 = vsub.f32 %v19049_v3, %v20153_v6  ;;  %v9725_v19 = vand.u32 4294901760, %v9724_v38  ;;  %v9773_v38 = vsub.f32 %v20167_v16, %v20168_v29 }
 0x825   : > { %14674 = vmatprep.subr.bf16.mxu0 %v20125_v30 }
 0x826   : > { %14484 = vmatpush3.bf16.msra.mxu1 %v20123_v44  ;;  %v20156_v44 = vand.u32 4294901760, %v19065_v34  ;;  %v9774_v50 = vand.u32 4294901760, %v9773_v38 }
 0x827   : > { %14486 = vmatprep.subr.bf16.mxu1 %v20126_v36 }
 0x828   : > { %14676 = vmatpush3.bf16.msra.mxu0 %v20125_v30  ;;  %v9738_v17 = vsub.f32 %v19065_v34, %v20156_v44  ;;  %v9718_v30 = vand.u32 4294901760, %v9717_v15  ;;  %v9767_v15 = vand.u32 4294901760, %v9766_v43  ;;  %v14729_v47 = vpack.c.bf16 %v9781_v52, %v9774_v50 }
 0x829   : > { %14678 = vmatprep.subr.bf16.mxu0 %v20128_v51 }
 0x82a   : > { %14488 = vmatpush3.bf16.msra.mxu1 %v20126_v36  ;;  %v20159_v36 = vand.u32 4294901760, %v19094_v11  ;;  %v14713_v2 = vpack.c.bf16 %v9725_v19, %v9718_v30  ;;  %v9739_v25 = vand.u32 4294901760, %v9738_v17  ;;  %v20170_v19 = vand.u32 4294901760, %v19191_v35 }
 0x82b   : > { %14682 = vmatprep.subr.bf16.mxu1 %v19323_v13  ;;  %v9795_v30 = vand.u32 4294901760, %v9794_v33 }
 0x82c   : > { %14680 = vmatpush3.bf16.msra.mxu0 %v20128_v51  ;;  %v19401_v51 = vpack.c.bf16 %v20158_v10, %v9655_v56  ;;  %v9752_v54 = vsub.f32 %v19094_v11, %v20159_v36  ;;  %v14717_v28 = vpack.c.bf16 %v9739_v25, %v9732_v24  ;;  %v9787_v44 = vsub.f32 %v19191_v35, %v20170_v19 }
 0x82d   : > { %13743 = vmatmul.mubr.msk.f32.vlgmr.msra.gmra.mrb[32].mxu1 %vm18223_vm6, %v20106_v39  ;;  %v9808_v36 = vsub.f32 %v19214_v26, %v9807_v40  ;;  %v9822_v24 = vsub.f32 %v19242_v4, %v9821_v59  ;;  %v9815_v25 = vsub.f32 %v19253_v7, %v9814_v1  ;;  %v14749_v1 = vpack.c.bf16 %v19065_v34, %v19071_v46  ;;  %v20172_v59 = vld [vmem:[#allocation24_spill] sm:$0xff] }
 0x82e   : > { %14684 = vmatpush3.bf16.msra.mxu1 %v19323_v13  ;;  %13987 = vmatprep.mubr.f32.mxu1 %v20143_v55  ;;  %v9753_v56 = vand.u32 4294901760, %v9752_v54  ;;  %v20163_v55 = vand.u32 4294901760, %v20162_v32  ;;  %v9788_v10 = vand.u32 4294901760, %v9787_v44  ;;  %v20171_v54 = vand.u32 4294901760, %v19219_v62 }
 0x82f   : > { %14686 = vmatprep.subr.bf16.mxu1 %v19333_v12  ;;  %13953 = vmatmul.mubr.msk.f32.vlgmr.msra.gmra.mrb[48].mxu0 %vm18223_vm6, %v20106_v39  ;;  %v9816_v9 = vand.u32 4294901760, %v9815_v25  ;;  %v9823_v43 = vand.u32 4294901760, %v9822_v24  ;;  %v14765_v34 = vpack.c.bf16 %v19186_v21, %v19191_v35  ;;  %v14769_v46 = vpack.c.bf16 %v19214_v26, %v19219_v62  ;;  %v20174_v21 = vld [vmem:[#allocation25_spill] sm:$0xff]  ;;  %v20175_v26 = vld [vmem:[#allocation2_spill] sm:$0xff] }
 0x830   : > { %v9759_v18 = vsub.f32 %v20162_v32, %v20163_v55  ;;  %v14721_v27 = vpack.c.bf16 %v9753_v56, %v9746_v37  ;;  %v9801_v61 = vsub.f32 %v19219_v62, %v20171_v54  ;;  %v9809_v56 = vand.u32 4294901760, %v9808_v36  ;;  %v20178_v35 = vld [vmem:[#allocation9_spill] sm:$0xff]  ;;  %v20180_v62 = vld [vmem:[#allocation8_spill] sm:$0xff]  ;;  %v10308_v54 = vld [vmem:[%s19565_s9] sm:$0xf] }
 0x831   : > { %v14741_v55 = vpack.c.bf16 %v9823_v43, %v9816_v9 }
 0x832   : > { %14688 = vmatpush3.bf16.msra.mxu1 %v19333_v12  ;;  %v9760_v6 = vand.u32 4294901760, %v9759_v18  ;;  %v9802_v37 = vand.u32 4294901760, %v9801_v61  ;;  %v14745_v18 = vpack.c.bf16 %v19043_v48, %v19049_v3  ;;  %v14757_v48 = vpack.c.bf16 %v19122_v42, %v20162_v32 }
 0x833   : > { %14690 = vmatprep.subr.bf16.mxu1 %v19349_v41  ;;  %v14761_v3 = vpack.c.bf16 %v20165_v31, %v20167_v16  ;;  %v14773_v42 = vpack.c.bf16 %v19242_v4, %v19253_v7  ;;  %v20176_v7 = vld [vmem:[#allocation7_spill] sm:$0xff]  ;;  %v20179_v4 = vld [vmem:[#allocation13_spill] sm:$0xff]  ;;  %v10815_v61 = vsel %vm5789_vm9, %v10308_v54, 0 }
 0x834   : > { %v14725_v17 = vpack.c.bf16 %v9767_v15, %v9760_v6  ;;  %v14737_v40 = vpack.c.bf16 %v9809_v56, %v9802_v37 }
 0x836   : > { %14692 = vmatpush3.bf16.msra.mxu1 %v19349_v41 }
 0x837   : > { %14694 = vmatprep.subr.bf16.mxu1 %v19357_v60 }
 0x83a   : > { %14696 = vmatpush3.bf16.msra.mxu1 %v19357_v60 }
 0x83b   : > { %14698 = vmatprep.subr.bf16.mxu1 %v19365_v0 }
 0x83e   : > { %14700 = vmatpush3.bf16.msra.mxu1 %v19365_v0 }
 0x83f   : > { %14702 = vmatprep.subr.bf16.mxu1 %v19373_v53 }
 0x842   : > { %14704 = vmatpush3.bf16.msra.mxu1 %v19373_v53 }
 0x843   : > { %14706 = vmatprep.subr.bf16.mxu1 %v19387_v58 }
 0x846   : > { %14708 = vmatpush3.bf16.msra.mxu1 %v19387_v58 }
 0x847   : > { %14710 = vmatprep.subr.bf16.mxu1 %v19401_v51 }
 0x84a   : > { %14712 = vmatpush3.bf16.msra.mxu1 %v19401_v51 }
 0x84b   : > { %14714 = vmatprep.subr.bf16.mxu1 %v14713_v2 }
 0x84d   : > { %13988 = vmatmul.mubr.f32.vlgmr.msra.gmra.mrb[34].mxu1 %v20164_v49  ;;  %v14753_v49 = vpack.c.bf16 %v19094_v11, %v19099_v45  ;;  %v20173_v11 = vld [vmem:[#allocation23_spill] sm:$0xff]  ;;  %v20177_v45 = vld [vmem:[#allocation20_spill] sm:$0xff] }
 0x84e   : > { %14716 = vmatpush3.bf16.msra.mxu1 %v14713_v2  ;;  %14022 = vmatprep.mubr.msk.f32.mxu1 %vm18133_vm2, %v20106_v39  ;;  %v14733_v2 = vpack.c.bf16 %v9795_v30, %v9788_v10 }
 0x84f   : > { %14718 = vmatprep.subr.bf16.mxu1 %v14717_v28 }
 0x852   : > { %14720 = vmatpush3.bf16.msra.mxu1 %v14717_v28 }
 0x853   : > { %14722 = vmatprep.subr.bf16.mxu1 %v14721_v27 }
 0x856   : > { %14724 = vmatpush3.bf16.msra.mxu1 %v14721_v27 }
 0x857   : > { %14726 = vmatprep.subr.bf16.mxu1 %v14725_v17 }
 0x85a   : > { %14728 = vmatpush3.bf16.msra.mxu1 %v14725_v17 }
 0x85b   : > { %14730 = vmatprep.subr.bf16.mxu1 %v14729_v47 }
 0x85e   : > { %14732 = vmatpush3.bf16.msra.mxu1 %v14729_v47 }
 0x85f   : > { %14734 = vmatprep.subr.bf16.mxu1 %v14733_v2 }
 0x862   : > { %14736 = vmatpush3.bf16.msra.mxu1 %v14733_v2  ;;  %v10818_v2 = vand.u32 4294901760, %v10815_v61 }
 0x863   : > { %14738 = vmatprep.subr.bf16.mxu1 %v14737_v40 }
 0x864   : > { %v10905_v25 = vsub.f32 %v10815_v61, %v10818_v2 }
 0x866   : > { %14740 = vmatpush3.bf16.msra.mxu1 %v14737_v40  ;;  %v10906_v9 = vand.u32 4294901760, %v10905_v25 }
 0x867   : > { %14742 = vmatprep.subr.bf16.mxu1 %v14741_v55 }
 0x86a   : > { %14744 = vmatpush3.bf16.msra.mxu1 %v14741_v55 }
 0x86b   : > { %14746 = vmatprep.subr.bf16.mxu1 %v14745_v18 }
 0x86d   : > { %14023 = vmatmul.mubr.msk.f32.vlgmr.msra.gmra.mrb[34].mxu1 %vm18223_vm6, %v20106_v39 }
 0x86e   : > { %14748 = vmatpush3.bf16.msra.mxu1 %v14745_v18  ;;  %14057 = vmatprep.mubr.f32.mxu1 %v20172_v59  ;;  %v10907_v18 = vsub.f32 %v10905_v25, %v10906_v9 }
 0x86f   : > { %14750 = vmatprep.subr.bf16.mxu1 %v14749_v1 }
 0x872   : > { %14752 = vmatpush3.bf16.msra.mxu1 %v14749_v1 }
 0x873   : > { %14754 = vmatprep.subr.bf16.mxu1 %v14753_v49 }
 0x876   : > { %14756 = vmatpush3.bf16.msra.mxu1 %v14753_v49  ;;  %v10908_v49 = vand.u32 4294901760, %v10907_v18 }
 0x877   : > { %14758 = vmatprep.subr.bf16.mxu1 %v14757_v48 }
 0x87a   : > { %14760 = vmatpush3.bf16.msra.mxu1 %v14757_v48 }
 0x87b   : > { %14762 = vmatprep.subr.bf16.mxu1 %v14761_v3 }
 0x87e   : > { %14764 = vmatpush3.bf16.msra.mxu1 %v14761_v3 }
 0x87f   : > { %14766 = vmatprep.subr.bf16.mxu1 %v14765_v34 }
 0x882   : > { %14768 = vmatpush3.bf16.msra.mxu1 %v14765_v34 }
 0x883   : > { %14770 = vmatprep.subr.bf16.mxu1 %v14769_v46 }
 0x886   : > { %14772 = vmatpush3.bf16.msra.mxu1 %v14769_v46  ;;  %v11552_v46 = vld [vmem:[%s19567_s11] ss:$0 sm:$0xff] }
 0x887   : > { %14774 = vmatprep.subr.bf16.mxu1 %v14773_v42 }
 0x88a   : > { %14776 = vmatpush3.bf16.msra.mxu1 %v14773_v42 }
 0x88b   : > { %14778 = vmatprep.subr.bf16.mxu1 %v19323_v13 }
 0x88d   : > { %14058 = vmatmul.mubr.f32.vlgmr.msra.gmra.mrb[34].mxu1 %v20173_v11 }
 0x88e   : > { %14780 = vmatpush3.bf16.msra.mxu1 %v19323_v13  ;;  %14092 = vmatprep.mubr.f32.mxu1 %v20174_v21 }
 0x88f   : > { %14782 = vmatprep.subr.bf16.mxu1 %v19333_v12 }
 0x892   : > { %14784 = vmatpush3.bf16.msra.mxu1 %v19333_v12 }
 0x893   : > { %14786 = vmatprep.subr.bf16.mxu1 %v19349_v41 }
 0x896   : > { %14788 = vmatpush3.bf16.msra.mxu1 %v19349_v41 }
 0x897   : > { %14790 = vmatprep.subr.bf16.mxu1 %v19357_v60 }
 0x89a   : > { %14792 = vmatpush3.bf16.msra.mxu1 %v19357_v60 }
 0x89b   : > { %14794 = vmatprep.subr.bf16.mxu1 %v19365_v0 }
 0x89e   : > { %14796 = vmatpush3.bf16.msra.mxu1 %v19365_v0 }
 0x89f   : > { %14798 = vmatprep.subr.bf16.mxu1 %v19373_v53 }
 0x8a2   : > { %14800 = vmatpush3.bf16.msra.mxu1 %v19373_v53 }
 0x8a3   : > { %14802 = vmatprep.subr.bf16.mxu1 %v19387_v58 }
 0x8a6   : > { %14804 = vmatpush3.bf16.msra.mxu1 %v19387_v58 }
 0x8a7   : > { %14806 = vmatprep.subr.bf16.mxu1 %v19401_v51 }
 0x8aa   : > { %14808 = vmatpush3.bf16.msra.mxu1 %v19401_v51 }
 0x8ab   : > { %14810 = vmatprep.subr.bf16.mxu1 %v20175_v26 }
 0x8ad   : > { %14093 = vmatmul.mubr.f32.vlgmr.msra.gmra.mrb[34].mxu1 %v20176_v7 }
 0x8ae   : > { %14812 = vmatpush3.bf16.msra.mxu1 %v20175_v26  ;;  %14127 = vmatprep.mubr.msk.f32.mxu1 %vm18133_vm2, %v20106_v39 }
 0x8af   : > { %14814 = vmatprep.subr.bf16.mxu1 %v20177_v45 }
 0x8b2   : > { %14816 = vmatpush3.bf16.msra.mxu1 %v20177_v45 }
 0x8b3   : > { %14818 = vmatprep.subr.bf16.mxu1 %v20178_v35 }
 0x8b6   : > { %14820 = vmatpush3.bf16.msra.mxu1 %v20178_v35 }
 0x8b7   : > { %14822 = vmatprep.subr.bf16.mxu1 %v20179_v4 }
 0x8ba   : > { %14824 = vmatpush3.bf16.msra.mxu1 %v20179_v4 }
 0x8bb   : > { %14826 = vmatprep.subr.bf16.mxu1 %v20180_v62 }
 0x8be   : > { %14828 = vmatpush3.bf16.msra.mxu1 %v20180_v62 }
 0x8bf   : > { %14830 = vmatprep.subr.bf16.mxu1 %v19228_v20 }
 0x8c2   : > { %14832 = vmatpush3.bf16.msra.mxu1 %v19228_v20 }
 0x8c3   : > { %14834 = vmatprep.subr.bf16.mxu1 %v19248_v8 }
 0x8c6   : > { %14836 = vmatpush3.bf16.msra.mxu1 %v19248_v8 }
 0x8c7   : > { %14838 = vmatprep.subr.bf16.mxu1 %v19266_v14 }
 0x8ca   : > { %14840 = vmatpush3.bf16.msra.mxu1 %v19266_v14 }
 0x8cb   : > { %14842 = vmatprep.subr.bf16.mxu1 %v19323_v13 }
 0x8cd   : > { %14128 = vmatmul.mubr.msk.f32.vlgmr.msra.gmra.mrb[34].mxu1 %vm18223_vm6, %v20106_v39 }
 0x8ce   : > { %14844 = vmatpush3.bf16.msra.mxu1 %v19323_v13  ;;  %14162 = vmatprep.mubr.msk.f32.mxu1 %vm18133_vm2, %v20106_v39 }
 0x8cf   : > { %14846 = vmatprep.subr.bf16.mxu1 %v19333_v12 }
 0x8d2   : > { %14848 = vmatpush3.bf16.msra.mxu1 %v19333_v12 }
 0x8d3   : > { %14850 = vmatprep.subr.bf16.mxu1 %v19349_v41 }
 0x8d6   : > { %14852 = vmatpush3.bf16.msra.mxu1 %v19349_v41 }
 0x8d7   : > { %14854 = vmatprep.subr.bf16.mxu1 %v19357_v60 }
 0x8da   : > { %14856 = vmatpush3.bf16.msra.mxu1 %v19357_v60 }
 0x8db   : > { %14858 = vmatprep.subr.bf16.mxu1 %v19365_v0 }
 0x8de   : > { %14860 = vmatpush3.bf16.msra.mxu1 %v19365_v0  ;;  %v10309_v0 = vld [vmem:[%s19566_s10] sm:$0xf] }
 0x8df   : > { %14862 = vmatprep.subr.bf16.mxu1 %v19373_v53 }
 0x8e2   : > { %14864 = vmatpush3.bf16.msra.mxu1 %v19373_v53 }
 0x8e3   : > { %14866 = vmatprep.subr.bf16.mxu1 %v19387_v58 }
 0x8e6   : > { %14868 = vmatpush3.bf16.msra.mxu1 %v19387_v58 }
 0x8e7   : > { %14870 = vmatprep.subr.bf16.mxu1 %v19401_v51 }
 0x8ea   : > { %14872 = vmatpush3.bf16.msra.mxu1 %v19401_v51 }
 0x8ed   : > { %14163 = vmatmul.mubr.msk.f32.vlgmr.msra.gmra.mrb[34].mxu1 %vm18223_vm6, %v20106_v39  ;;  %v10317_v39 = vsel %vm5789_vm9, %v10309_v0, 0 }
 0x8ee   : > { %v10320_v5 = vand.u32 4294901760, %v10317_v39 }
 0x8f0   : > { %14165 = vmatprep.subr.mxu0 %v10320_v5  ;;  %v10407_v53 = vsub.f32 %v10317_v39, %v10320_v5 }
 0x8f1   : > { %14166 = vmatpush3.msra.mxu0 %v10320_v5 }
 0x8f2   : > { %v10408_v58 = vand.u32 4294901760, %v10407_v53 }
 0x8f4   : > { %v10409_v51 = vsub.f32 %v10407_v53, %v10408_v58 }
 0x8f6   : > { %v10410_v32 = vand.u32 4294901760, %v10409_v51 }
 0x8f8   : > { %14170 = vmatprep.subr.mxu0 %v10410_v32 }
 0x900   : > { %v13744_v14 = vpop.f32.mrb[32].mxu1 }
 0x901   : > { %15518 = vrcp.f32 %v13744_v14  ;;  %10300 = vrot.lane.b32.xlu1 %v13744_v14, %s15536_s26  ;;  %v8770_v57 = vpop.f32.mrb[33].mxu1 }
 0x902   : > { %15520 = vrcp.f32 %v8770_v57  ;;  %10298 = vrot.lane.b32.xlu0 %v8770_v57, %s15536_s26  ;;  %v13954_v8 = vpop.f32.mrb[48].mxu0 }
 0x903   : > { %v9470_v20 = vpop.f32.mrb[49].mxu0 }
 0x90b   : > { %v15519_v13 = vpop.eup %15518 }
 0x90c   : > { %v15521_v12 = vpop.eup %15520  ;;  %v9483_v41 = vmul.f32 %v15519_v13, %v13954_v8 }
 0x90d   : > { %v9481_v60 = vmul.f32 %v15521_v12, %v9470_v20 }
 0x90e   : > { %v10812_v37 = vsel %vm5740_vm7, %v9483_v41, 0 }
 0x90f   : > { %v10809_v47 = vsel %vm5740_vm7, %v9481_v60, 0  ;;  %v10893_v40 = vand.u32 4294901760, %v10812_v37 }
 0x910   : > { %v10883_v24 = vand.u32 4294901760, %v10809_v47 }
 0x911   : > { %v10894_v55 = vsub.f32 %v10812_v37, %v10893_v40 }
 0x912   : > { %v10884_v56 = vsub.f32 %v10809_v47, %v10883_v24 }
 0x913   : > { %v10895_v59 = vand.u32 4294901760, %v10894_v55 }
 0x914   : > { %v10885_v43 = vand.u32 4294901760, %v10884_v56 }
 0x915   : > { %v10896_v3 = vsub.f32 %v10894_v55, %v10895_v59 }
 0x916   : > { %v10886_v1 = vsub.f32 %v10884_v56, %v10885_v43 }
 0x917   : > { %v10897_v34 = vand.u32 4294901760, %v10896_v3 }
 0x918   : > { %v10887_v48 = vand.u32 4294901760, %v10886_v1 }
 0x973   : > { %v10301_v28 = vpop.permute.xlu1 %10300 }
 0x974   : > { %v10299_v27 = vpop.permute.xlu0 %10298  ;;  %15522 = vrcp.f32 %v10301_v28 }
 0x975   : > { %15524 = vrcp.f32 %v10299_v27 }
 0x97e   : > { %v15523_v31 = vpop.eup %15522 }
 0x97f   : > { %v15525_v63 = vpop.eup %15524 }
 0x9c0   : > { %v14164_v22 = vpop.f32.mrb[34].mxu1 }
 0x9c1   : > { %v10307_v16 = vmul.f32 %v15523_v31, %v14164_v22  ;;  %v10286_v29 = vpop.f32.mrb[35].mxu1 }
 0x9c2   : > { %v10305_v38 = vmul.f32 %v15525_v63, %v10286_v29 }
 0x9c3   : > { %v10314_v6 = vsel %vm5740_vm7, %v10307_v16, 0 }
 0x9c4   : > { %v10395_v15 = vand.u32 4294901760, %v10314_v6  ;;  %v10311_v23 = vsel %vm5740_vm7, %v10305_v38, 0 }
 0x9c5   : > { %v10385_v33 = vand.u32 4294901760, %v10311_v23 }
 0x9c6   : > { %v10396_v19 = vsub.f32 %v10314_v6, %v10395_v15 }
 0x9c7   : > { %v10386_v44 = vsub.f32 %v10311_v23, %v10385_v33 }
 0x9c8   : > { %v10397_v17 = vand.u32 4294901760, %v10396_v19 }
 0x9c9   : > { %v10387_v50 = vand.u32 4294901760, %v10386_v44 }
 0x9ca   : > { %v10398_v52 = vsub.f32 %v10396_v19, %v10397_v17 }
 0x9cb   : > { %v10388_v10 = vsub.f32 %v10386_v44, %v10387_v50 }
 0x9cc   : > { %v10399_v36 = vand.u32 4294901760, %v10398_v52 }
 0x9cd   : > { %v10389_v30 = vand.u32 4294901760, %v10388_v10 }
 0x9cf   : > { %14167 = vmatprep.mubr.f32.mxu0 %v10389_v30 }
 0x9d0   : > { %14168 = vmatmul.mubr.f32.vlgmr.msra.gmra.mrb[50].mxu0 %v10399_v36 }
 0x9d1   : > { %14171 = vmatpush3.msra.mxu0 %v10410_v32  ;;  %14172 = vmatprep.mubr.f32.mxu0 %v10385_v33 }
 0x9d2   : > { %14175 = vmatprep.subr.mxu0 %v10407_v53 }
 0x9d8   : > { %14173 = vmatmul.mubr.f32.vlgmr.msra.gmra.mrb[50].mxu0 %v10395_v15 }
 0x9d9   : > { %14176 = vmatpush3.msra.mxu0 %v10407_v53  ;;  %14177 = vmatprep.mubr.f32.mxu0 %v10386_v44 }
 0x9da   : > { %14180 = vmatprep.subr.mxu0 %v10320_v5 }
 0x9e0   : > { %14178 = vmatmul.mubr.f32.vlgmr.msra.gmra.mrb[50].mxu0 %v10396_v19 }
 0x9e1   : > { %14181 = vmatpush3.msra.mxu0 %v10320_v5  ;;  %14182 = vmatprep.mubr.f32.mxu0 %v10387_v50 }
 0x9e2   : > { %14185 = vmatprep.subr.mxu0 %v10408_v58 }
 0x9e8   : > { %14183 = vmatmul.mubr.f32.vlgmr.msra.gmra.mrb[50].mxu0 %v10397_v17 }
 0x9e9   : > { %14186 = vmatpush3.msra.mxu0 %v10408_v58  ;;  %14187 = vmatprep.mubr.f32.mxu0 %v10385_v33 }
 0x9ea   : > { %14190 = vmatprep.subr.mxu0 %v10320_v5 }
 0x9f0   : > { %14188 = vmatmul.mubr.f32.vlgmr.msra.gmra.mrb[50].mxu0 %v10395_v15 }
 0x9f1   : > { %14191 = vmatpush3.msra.mxu0 %v10320_v5  ;;  %14192 = vmatprep.mubr.f32.mxu0 %v10385_v33 }
 0x9f2   : > { %14195 = vmatprep.subr.mxu0 %v10818_v2 }
 0x9f8   : > { %14193 = vmatmul.mubr.f32.vlgmr.msra.gmra.mrb[50].mxu0 %v10395_v15 }
 0x9f9   : > { %14196 = vmatpush3.msra.mxu0 %v10818_v2  ;;  %14197 = vmatprep.mubr.f32.mxu0 %v10887_v48 }
 0x9fa   : > { %14200 = vmatprep.subr.mxu0 %v10908_v49 }
 0xa00   : > { %14198 = vmatmul.mubr.f32.vlgmr.msra.gmra.mrb[50].mxu0 %v10897_v34 }
 0xa01   : > { %14201 = vmatpush3.msra.mxu0 %v10908_v49  ;;  %14202 = vmatprep.mubr.f32.mxu0 %v10883_v24 }
 0xa02   : > { %14205 = vmatprep.subr.mxu0 %v10905_v25 }
 0xa08   : > { %14203 = vmatmul.mubr.f32.vlgmr.msra.gmra.mrb[50].mxu0 %v10893_v40 }
 0xa09   : > { %14206 = vmatpush3.msra.mxu0 %v10905_v25  ;;  %14207 = vmatprep.mubr.f32.mxu0 %v10884_v56 }
 0xa0a   : > { %14210 = vmatprep.subr.mxu0 %v10818_v2 }
 0xa10   : > { %14208 = vmatmul.mubr.f32.vlgmr.msra.gmra.mrb[50].mxu0 %v10894_v55 }
 0xa11   : > { %14211 = vmatpush3.msra.mxu0 %v10818_v2  ;;  %14212 = vmatprep.mubr.f32.mxu0 %v10885_v43 }
 0xa12   : > { %14215 = vmatprep.subr.mxu0 %v10906_v9 }
 0xa18   : > { %14213 = vmatmul.mubr.f32.vlgmr.msra.gmra.mrb[50].mxu0 %v10895_v59 }
 0xa19   : > { %14216 = vmatpush3.msra.mxu0 %v10906_v9  ;;  %14217 = vmatprep.mubr.f32.mxu0 %v10883_v24 }
 0xa1a   : > { %14220 = vmatprep.subr.mxu0 %v10818_v2 }
 0xa20   : > { %14218 = vmatmul.mubr.f32.vlgmr.msra.gmra.mrb[50].mxu0 %v10893_v40 }
 0xa21   : > { %14221 = vmatpush3.msra.mxu0 %v10818_v2  ;;  %14222 = vmatprep.mubr.f32.mxu0 %v10883_v24 }
 0xa28   : > { %14223 = vmatmul.mubr.f32.vlgmr.msra.gmra.mrb[50].mxu0 %v10893_v40 }
 0xafb   : > { %v14224_v42 = vpop.f32.mrb[50].mxu0 }
 0xafc   : > { %v11314_v11 = vadd.f32 %v14224_v42, %v11552_v46  ;;  %v11296_v21 = vpop.f32.mrb[51].mxu0 }
 0xafd   : > { %v11313_v26 = vadd.f32 %v11552_v46, %v11296_v21 }
 0xafe   : > { %v11318_v7 = vmul.f32 0.2, %v11314_v11  ;;  %vm11316_vm9 = vcmp.gt.f32.partialorder %v11314_v11, 0.0 }
 0xaff   : > { %vm11315_vm7 = vcmp.gt.f32.partialorder %v11313_v26, 0.0  ;;  %v11317_v45 = vmul.f32 0.2, %v11313_v26 }
 0xb00   : > { %v11320_v4 = vsel %vm11316_vm9, %v11314_v11, %v11318_v7 }
 0xb01   : > { %v11319_v35 = vsel %vm11315_vm7, %v11313_v26, %v11317_v45  ;;  %11322 = vst.msk [vmem:[%s437_s13 + $0x8] sm:$0xff] %vm8010_vm3, %v11320_v4 }
 0xb02   : > { %11321 = vst.msk [vmem:[%s437_s13] sm:$0xff] %vm8010_vm3, %v11319_v35 }
 0xb03 PF: > { %s22_s21 = sadd.s32 1, %s15532_s21  }
 0xb04   : > { %p19_p5 = scmp.ge.s32.totalorder %s22_s21, 4  }
 0xb06   :  { %21 = sbr.rel (!%p19_p5) target bundleno = 1 (0x1), region = 101 }

// kernel: forward.5
= control target key start
LH: loop header
LB: loop body
LE: loop exit
PB: predicated region body
PF: predicated region fallthrough
CT: control target
= control target key end

     0   :  { %s20547_s0 = inlined_call_operand.vmem [shape: s32[256,1], index: 0, kind: input, shape index: {}]   ;;  %s20548_s1 = inlined_call_operand.vmem [shape: f32[32,3], index: 1, kind: input, shape index: {}]   ;;  %s20549_s2 = inlined_call_operand.vmem [shape: f32[32,11], index: 2, kind: input, shape index: {}]   ;;  %s20550_s3 = inlined_call_operand.vmem [shape: f32[3,8], index: 3, kind: input, shape index: {}]   ;;  %s20551_s4 = inlined_call_operand.vmem [shape: f32[3,8], index: 4, kind: input, shape index: {}]   ;;  %s20552_s5 = inlined_call_operand.vmem [shape: f32[1,8], index: 5, kind: input, shape index: {}]   ;;  %s20553_s6 = inlined_call_operand.vmem [shape: f32[1,8], index: 6, kind: input, shape index: {}]   ;;  %s20554_s7 = inlined_call_operand.vmem [shape: f32[8,16], index: 7, kind: input, shape index: {}]   ;;  %s20555_s8 = inlined_call_operand.vmem [shape: f32[8,16], index: 8, kind: input, shape index: {}]   ;;  %s20556_s9 = inlined_call_operand.vmem [shape: f32[8,16], index: 9, kind: input, shape index: {}]   ;;  %s20557_s10 = inlined_call_operand.vmem [shape: f32[8,16], index: 10, kind: input, shape index: {}]   ;;  %s20558_s11 = inlined_call_operand.vmem [shape: f32[1,16], index: 11, kind: input, shape index: {}]   ;;  %s20559_s12 = inlined_call_operand.vmem [shape: f32[16,32], index: 12, kind: input, shape index: {}]   ;;  %s20560_s13 = inlined_call_operand.vmem [shape: f32[1,32], index: 13, kind: input, shape index: {}]   ;;  %s20561_s14 = inlined_call_operand.vmem [shape: f32[32,32], index: 14, kind: input, shape index: {}]   ;;  %s20562_s15 = inlined_call_operand.hbm [shape: f32[32,32], index: 15, kind: output, shape index: {}]  }
   0x1   :  { %20832 = sst [smem:[#allocation31_spill]] %s20547_s0 }
   0x2   :  { %20833 = sst [smem:[#allocation32_spill]] %s20548_s1 }
   0x3   :  { %20834 = sst [smem:[#allocation33_spill]] %s20549_s2 }
   0x4   :  { %20 = vsyncpa [#allocation3], 0 }
   0x5   :  { %22 = vsyncpa [#allocation3 + $0x1], 0  ;;  %s16462_s18 = smov 0   ;;  %s16464_s19 = smov 0  }
   0x6   :  { %s16466_s20 = smov 0   ;;  %s16468_s21 = smov 0  }
   0x7 LB: > { %20835 = sst [smem:[#allocation5_spill]] %s16369_s20  ;;  %s16483_s22 = sadd.s32 4294967295, %s16373_s21   ;;  %s16373_s21 = sphi %s16468_s21, %s21178_s21   ;;  %s16369_s20 = sphi %s16466_s20, %s21175_s20   ;;  %s16365_s19 = sphi %s16464_s19, %s21177_s19   ;;  %s16361_s18 = sphi %s16462_s18, %s21176_s18  }
   0x8   : > { %s12037_s23 = sadd.s32 4294967294, %s16373_s21   ;;  %s16487_s24 = sadd.s32 1, %s16373_s21  }
   0x9   : > { %s365_s25 = sadd.s32 1, %s16369_s20  ;;  %s362_s26 = ssub.s32 %s16373_s21, %s16487_s24 }
   0xa   : > { %p375_p0 = scmp.ne.s32.totalorder %s16369_s20, %s16365_s19  ;;  %p363_p1 = scmp.eq.s32.totalorder %s362_s26, 0 }
   0xb   : > { %p376_p2 = scmp.eq.s32.totalorder %s16483_s22, 1  ;;  %p381_p3 = scmp.ne.s32.totalorder %s16365_s19, %s16361_s18 }
   0xc   : > { %p382_p4 = scmp.eq.s32.totalorder %s12037_s23, 1  ;;  %p12040_p7 = scmp.ge.s32.totalorder %s16373_s21, 1 }
   0xd   : > { %s16498_s27 = scalar_select %p363_p1, %s16369_s20, %s365_s25  }
   0xe   : > { %p16500_p5 = por %p376_p2, %p375_p0  ;;  %p16504_p6 = por %p382_p4, %p381_p3 }
   0xf   : > { %20836 = sst [smem:[#allocation6_spill]] %s16498_s27  ;;  %p463_p8 = scmp.lt.s32.totalorder %s16373_s21, 3 }
  0x11   : > { %p464_p9 = pnand %p12040_p7, %p463_p8 }
  0x13   : > { %467 = sbr.rel (%p464_p9) target bundleno = 3119 (0xc2f), region = 80 }
  0x1a   : > { %s12042_s30 = sshll.u32 %s16483_s22, 4  ;;  %v16375_v0 = vmov 0   ;;  %s20839_s0 = sld [smem:[#allocation31_spill]]  ;;  %v556_v47 = vlaneseq  ;;  %vm658_vm0 = vcmask 261120   ;;  %v20619_v59 = vmov 0.0  }
  0x1b   : > { %16238 = vset.pattern.permute.xlu1 %v16375_v0  ;;  %16237 = vset.pattern.permute.xlu0 %v16375_v0  ;;  %p522_p10 = scmp.lt.s32.totalorder %s12042_s30, 31  ;;  %s20840_s2 = sld [smem:[#allocation33_spill]]  ;;  %vm1952_vm14 = vcmask 130048  }
  0x1c   : > { %s20843_s1 = sld [smem:[#allocation32_spill]]  ;;  %v16602_v50 = vand.u32 127, %v556_v47  ;;  %s16377_s17 = smov 120  }
  0x1d   : > { %s21180_s30 = smov (!%p522_p10, %s12042_s30), 31  ;;  %s20831_s23 = smov 8  }
  0x1e   : > { %s12043_s16 = sshll.u32 %s21180_s30, 3  ;;  %20844 = vst [vmem:[#allocation9_spill] sm:$0xff] %v16602_v50  ;;  %s518_s30 = sand.u32 1, %s16365_s19  }
  0x20   : > { %s16514_s25 = scalar_lea.vmem %s20839_s0, %s12043_s16  ;;  %s12044_s0 = sshll.u32 %s16483_s22, 1 }
  0x21   : > { %v542_v1 = vld [vmem:[%s16514_s25 + $0x10] sm:$0xff]  ;;  %v540_v2 = vld [vmem:[%s16514_s25] sm:$0xff]  ;;  %v543_v3 = vld [vmem:[%s16514_s25 + $0x18] sm:$0xff]  ;;  %p528_p11 = scmp.lt.s32.totalorder %s12044_s0, 3 }
  0x22   : > { %565 = vperm.xlu1 %16238, %v542_v1   ;;  %559 = vperm.xlu0 %16237, %v540_v2   ;;  %v541_v4 = vld [vmem:[%s16514_s25 + $0x8] sm:$0xff]  ;;  %v654_v5 = vld [vmem:[%s20840_s2] sm:$0xff]  ;;  %v656_v11 = vld [vmem:[%s20840_s2 + $0x10] sm:$0xff] }
  0x23   : > { %v655_v6 = vld [vmem:[%s20840_s2 + $0x8] sm:$0xff]  ;;  %v544_v8 = vld [vmem:[%s16514_s25 + $0x20] sm:$0xff]  ;;  %v708_v9 = vand.u32 4294901760, %v654_v5  ;;  %v657_v12 = vld [vmem:[%s20840_s2 + $0x18] sm:$0xff]  ;;  %v714_v14 = vand.u32 4294901760, %v656_v11  ;;  %s21182_s0 = smov (!%p528_p11, %s12044_s0), 3 }
  0x24   : > { %v545_v7 = vld [vmem:[%s16514_s25 + $0x28] sm:$0xff]  ;;  %v711_v10 = vand.u32 4294901760, %v655_v6  ;;  %v717_v15 = vand.u32 4294901760, %v657_v12  ;;  %v547_v16 = vld [vmem:[%s16514_s25 + $0x38] sm:$0xff]  ;;  %v546_v17 = vld [vmem:[%s16514_s25 + $0x30] sm:$0xff]  ;;  %s12045_s20 = sshll.u32 %s21182_s0, 3 }
  0x25   : > { %v549_v19 = vld [vmem:[%s16514_s25 + $0x48] sm:$0xff]  ;;  %v548_v20 = vld [vmem:[%s16514_s25 + $0x40] sm:$0xff]  ;;  %v16546_v21 = vsub.f32 %v654_v5, %v708_v9  ;;  %v551_v23 = vld [vmem:[%s16514_s25 + $0x58] sm:$0xff]  ;;  %v16567_v36 = vsub.f32 %v656_v11, %v714_v14  ;;  %s531_s26 = scalar_lea.vmem %s20843_s1, %s12045_s20  ;;  %s12205_s1 = sshll.u32 %s16483_s22, 8 }
  0x26   : > { %568 = vperm.xlu1 %16238, %v543_v3   ;;  %562 = vperm.xlu0 %16237, %v541_v4   ;;  %v16534_v13 = vpack.c.bf16 %v711_v10, %v708_v9  ;;  %v16539_v18 = vpack.c.bf16 %v717_v15, %v714_v14  ;;  %v16548_v22 = vsub.f32 %v655_v6, %v711_v10  ;;  %v550_v24 = vld [vmem:[%s16514_s25 + $0x50] sm:$0xff]  ;;  %v553_v29 = vld [vmem:[%s16514_s25 + $0x68] sm:$0xff]  ;;  %v552_v30 = vld [vmem:[%s16514_s25 + $0x60] sm:$0xff]  ;;  %s20505_s22 = scalar_lea.sflag [#allocation3], %s518_s30 }
  0x27   : > { %v20579_v25 = vand.u32 4294901760, %v16546_v21  ;;  %v555_v34 = vld [vmem:[%s16514_s25 + $0x78] sm:$0xff]  ;;  %v554_v35 = vld [vmem:[%s16514_s25 + $0x70] sm:$0xff]  ;;  %20841 = vst [vmem:[#allocation7_spill] sm:$0xff] %v16567_v36  ;;  %v16569_v37 = vsub.f32 %v657_v12, %v717_v15  ;;  %v20574_v38 = vand.u32 4294901760, %v16567_v36  ;;  %v16598_v48 = vld [vmem:[%s531_s26] sm:$0xff]  ;;  %s537_s25 = scalar_lea.vmem %s20561_s14, %s12045_s20 }
  0x28   : > { %14943 = vmatprep.subr.bf16.mxu0 %v16534_v13  ;;  %v20576_v26 = vand.u32 4294901760, %v16548_v22  ;;  %v16583_v45 = vpack.c.bf16 %v16548_v22, %v16546_v21  ;;  %v16600_v49 = vld [vmem:[%s531_s26 + $0x8] sm:$0xff]  ;;  %v20583_v51 = vand.u32 4294901760, %v16598_v48 }
  0x29   : > { %14945 = vmatpush3.bf16.msra.mxu0 %v16534_v13  ;;  %v940_v27 = vsub.f32 %v16546_v21, %v20579_v25  ;;  %20842 = vst [vmem:[#allocation8_spill] sm:$0xff] %v16569_v37  ;;  %v20573_v39 = vand.u32 4294901760, %v16569_v37  ;;  %v954_v40 = vsub.f32 %v16567_v36, %v20574_v38  ;;  %v16587_v46 = vpack.c.bf16 %v16569_v37, %v16567_v36 }
  0x2a   : > { %574 = vperm.xlu1 %16238, %v545_v7   ;;  %571 = vperm.xlu0 %16237, %v544_v8   ;;  %v947_v28 = vsub.f32 %v16548_v22, %v20576_v26  ;;  %v20582_v52 = vand.u32 4294901760, %v16600_v49  ;;  %v16609_v53 = vsub.f32 %v16598_v48, %v20583_v51 }
  0x2b   : > { %14947 = vmatprep.subr.bf16.mxu0 %v16539_v18  ;;  %v941_v31 = vand.u32 4294901760, %v940_v27  ;;  %v961_v41 = vsub.f32 %v16569_v37, %v20573_v39  ;;  %v955_v42 = vand.u32 4294901760, %v954_v40 }
  0x2c   : > { %v948_v32 = vand.u32 4294901760, %v947_v28  ;;  %v16614_v54 = vsub.f32 %v16600_v49, %v20582_v52  ;;  %v20581_v57 = vand.u32 4294901760, %v16609_v53 }
  0x2d   : > { %14949 = vmatpush3.bf16.msra.mxu0 %v16539_v18  ;;  %v962_v43 = vand.u32 4294901760, %v961_v41 }
  0x2e   : > { %580 = vperm.xlu1 %16238, %v547_v16   ;;  %577 = vperm.xlu0 %16237, %v546_v17   ;;  %v16562_v33 = vpack.c.bf16 %v948_v32, %v941_v31  ;;  %v20580_v58 = vand.u32 4294901760, %v16614_v54  ;;  %v2232_v0 = vsub.f32 %v16609_v53, %v20581_v57  ;;  %v16656_v16 = vshrl.u32 %v556_v47, 7 }
  0x2f   : > { %v16579_v44 = vpack.c.bf16 %v962_v43, %v955_v42  ;;  %v14998_v52 = vpack.c.bf16 %v16614_v54, %v16609_v53 }
  0x30   : > { %14951 = vmatprep.subr.bf16.mxu0 %v16562_v33  ;;  %v2239_v1 = vsub.f32 %v16614_v54, %v20580_v58  ;;  %v2233_v6 = vand.u32 4294901760, %v2232_v0  ;;  %20850 = vst [vmem:[#allocation15_spill] sm:$0xff] %v16656_v16  ;;  %v1852_v28 = vadd.s32 112, %v16656_v16 }
  0x32   : > { %586 = vperm.xlu1 %16238, %v549_v19   ;;  %583 = vperm.xlu0 %16237, %v548_v20   ;;  %v2240_v7 = vand.u32 4294901760, %v2239_v1 }
  0x34   : > { %v16654_v15 = vpack.c.bf16 %v2240_v7, %v2233_v6 }
  0x36   : > { %592 = vperm.xlu1 %16238, %v551_v23   ;;  %589 = vperm.xlu0 %16237, %v550_v24   ;;  %20849 = vst [vmem:[#allocation14_spill] sm:$0xff] %v16654_v15 }
  0x37   : > { %15614 = vmatprep.subr.bf16.mxu1 %v16654_v15 }
  0x38   : > { %15615 = vmatpush3.bf16.msra.mxu1 %v16654_v15 }
  0x39   : > { %14999 = vmatprep.subr.bf16.mxu1 %v14998_v52 }
  0x3a   : > { %598 = vperm.xlu1 %16238, %v553_v29   ;;  %595 = vperm.xlu0 %16237, %v552_v30   ;;  %v16673_v29 = vmul.u32 8, %v16602_v50 }
  0x3c   : > { %vm1869_vm7 = vcmp.ge.s32.totalorder %v1852_v28, %v16673_v29  ;;  %v16702_v0 = vadd.s32 8, %v16673_v29 }
  0x3e   : > { %604 = vperm.xlu1 %16238, %v555_v34   ;;  %601 = vperm.xlu0 %16237, %v554_v35   ;;  %vm1886_vm10 = vcmp.lt.s32.totalorder %v1852_v28, %v16702_v0 }
  0x3f   : > { %vm16732_vm13 = vmand %vm1869_vm7, %vm1886_vm10  ;;  %vm1872_vm10 = vcmp.lt.s32.totalorder %v16656_v16, %v16702_v0 }
  0xa1   : > { %v566_v55 = vpop.permute.xlu1 %565  ;;  %v560_v56 = vpop.permute.xlu0 %559 }
  0xa2   : > { %vm608_vm1 = vcmp.eq.s32.totalorder %v566_v55, %v16602_v50  ;;  %vm606_vm2 = vcmp.eq.s32.totalorder %v560_v56, %v16602_v50 }
  0xa3   : > { %v16621_v60 = vsel %vm608_vm1, 1.0, %v20619_v59  ;;  %v16624_v61 = vsel %vm606_vm2, 1.0, %v20619_v59 }
  0xa4   : > { %20845 = vst [vmem:[#allocation10_spill] sm:$0xff] %v16621_v60  ;;  %20846 = vst [vmem:[#allocation11_spill] sm:$0xff] %v16624_v61  ;;  %v666_v62 = vsel %vm658_vm0, %v16621_v60, 0  ;;  %v660_v63 = vsel %vm658_vm0, %v16624_v61, 0 }
  0xa5   : > { %v16636_v2 = vsub.f32 %v666_v62, %v666_v62  ;;  %v569_v3 = vpop.permute.xlu1 %568  ;;  %v563_v4 = vpop.permute.xlu0 %562  ;;  %v16638_v5 = vsub.f32 %v660_v63, %v660_v63 }
  0xa6   : > { %vm609_vm3 = vcmp.eq.s32.totalorder %v569_v3, %v16602_v50  ;;  %vm607_vm4 = vcmp.eq.s32.totalorder %v563_v4, %v16602_v50 }
  0xa7   : > { %v16643_v8 = vsel %vm609_vm3, 1.0, %v20619_v59  ;;  %v16646_v9 = vsel %vm607_vm4, 1.0, %v20619_v59  ;;  %v20575_v10 = vand.u32 4294901760, %v16638_v5  ;;  %v20569_v11 = vand.u32 4294901760, %v16636_v2 }
  0xa8   : > { %20847 = vst [vmem:[#allocation12_spill] sm:$0xff] %v16643_v8  ;;  %20848 = vst [vmem:[#allocation13_spill] sm:$0xff] %v16646_v9  ;;  %v669_v12 = vsel %vm658_vm0, %v16643_v8, 0  ;;  %v663_v14 = vsel %vm658_vm0, %v16646_v9, 0 }
  0xa9   : > { %v16658_v17 = vsub.f32 %v669_v12, %v669_v12  ;;  %v16660_v19 = vsub.f32 %v663_v14, %v663_v14  ;;  %v575_v20 = vpop.permute.xlu1 %574  ;;  %v572_v23 = vpop.permute.xlu0 %571  ;;  %v779_v24 = vsub.f32 %v16638_v5, %v20575_v10  ;;  %v799_v27 = vsub.f32 %v16636_v2, %v20569_v11 }
  0xaa   : > { %vm611_vm5 = vcmp.eq.s32.totalorder %v575_v20, %v16602_v50  ;;  %vm610_vm6 = vcmp.eq.s32.totalorder %v572_v23, %v16602_v50 }
  0xab   : > { %v16676_v30 = vsel %vm611_vm5, 1.0, %v20619_v59  ;;  %v16679_v31 = vsel %vm610_vm6, 1.0, %v20619_v59  ;;  %v780_v32 = vand.u32 4294901760, %v779_v24  ;;  %v20570_v34 = vand.u32 4294901760, %v16660_v19 }
  0xac   : > { %20851 = vst [vmem:[#allocation16_spill] sm:$0xff] %v16676_v30  ;;  %20852 = vst [vmem:[#allocation17_spill] sm:$0xff] %v16679_v31  ;;  %v675_v35 = vsel %vm658_vm0, %v16676_v30, 0  ;;  %v672_v40 = vsel %vm658_vm0, %v16679_v31, 0  ;;  %v800_v41 = vand.u32 4294901760, %v799_v27  ;;  %v20568_v42 = vand.u32 4294901760, %v16658_v17 }
  0xad   : > { %v16688_v43 = vsub.f32 %v675_v35, %v675_v35  ;;  %v16690_v47 = vsub.f32 %v672_v40, %v672_v40  ;;  %v581_v55 = vpop.permute.xlu1 %580  ;;  %13234 = vmatprep.mubr.f32.mxu0 %v780_v32  ;;  %v578_v56 = vpop.permute.xlu0 %577  ;;  %v789_v62 = vsub.f32 %v16660_v19, %v20570_v34 }
  0xae   : > { %vm613_vm8 = vcmp.eq.s32.totalorder %v581_v55, %v16602_v50  ;;  %vm612_vm9 = vcmp.eq.s32.totalorder %v578_v56, %v16602_v50  ;;  %v809_v63 = vsub.f32 %v16658_v17, %v20568_v42 }
  0xaf   : > { %v16705_v1 = vsel %vm613_vm8, 1.0, %v20619_v59  ;;  %v16708_v3 = vsel %vm612_vm9, 1.0, %v20619_v59  ;;  %v790_v4 = vand.u32 4294901760, %v789_v62  ;;  %v20565_v6 = vand.u32 4294901760, %v16690_v47 }
  0xb0   : > { %20853 = vst [vmem:[#allocation18_spill] sm:$0xff] %v16708_v3  ;;  %v681_v7 = vsel %vm658_vm0, %v16705_v1, 0  ;;  %v678_v12 = vsel %vm658_vm0, %v16708_v3, 0  ;;  %v810_v14 = vand.u32 4294901760, %v809_v63  ;;  %v20564_v20 = vand.u32 4294901760, %v16688_v43 }
  0xb1   : > { %v16716_v23 = vsub.f32 %v681_v7, %v681_v7  ;;  %v16718_v24 = vsub.f32 %v678_v12, %v678_v12  ;;  %v587_v27 = vpop.permute.xlu1 %586  ;;  %13235 = vmatmul.mubr.f32.vlgmr.msra.gmra.mrb[0].mxu0 %v790_v4  ;;  %v584_v32 = vpop.permute.xlu0 %583  ;;  %v819_v35 = vsub.f32 %v16690_v47, %v20565_v6  ;;  %v16759_v6 = vsel %vm16732_vm13, 1.0, %v20619_v59 }
  0xb2   : > { %vm615_vm11 = vcmp.eq.s32.totalorder %v587_v27, %v16602_v50  ;;  %14953 = vmatpush3.bf16.msra.mxu0 %v16562_v33  ;;  %vm614_vm12 = vcmp.eq.s32.totalorder %v584_v32, %v16602_v50  ;;  %13237 = vmatprep.mubr.f32.mxu0 %v800_v41  ;;  %v829_v40 = vsub.f32 %v16688_v43, %v20564_v20 }
  0xb3   : > { %v16737_v56 = vsel %vm615_vm11, 1.0, %v20619_v59  ;;  %v16740_v62 = vsel %vm614_vm12, 1.0, %v20619_v59  ;;  %v820_v33 = vand.u32 4294901760, %v819_v35  ;;  %v20567_v41 = vand.u32 4294901760, %v16718_v24  ;;  %14955 = vmatprep.subr.bf16.mxu0 %v16579_v44  ;;  %13471 = vmatprep.mubr.msk.f32.mxu1 %vm1952_vm14, %v16759_v6 }
  0xb4   : > { %20856 = vst [vmem:[#allocation19_spill] sm:$0xff] %v16737_v56  ;;  %v687_v63 = vsel %vm658_vm0, %v16737_v56, 0  ;;  %v684_v28 = vsel %vm658_vm0, %v16740_v62, 0  ;;  %v830_v4 = vand.u32 4294901760, %v829_v40  ;;  %v20566_v7 = vand.u32 4294901760, %v16716_v23 }
  0xb5   : > { %v16749_v12 = vsub.f32 %v687_v63, %v687_v63  ;;  %v16751_v27 = vsub.f32 %v684_v28, %v684_v28  ;;  %v593_v32 = vpop.permute.xlu1 %592  ;;  %13238 = vmatmul.mubr.f32.gmra.mrb[2].mxu0 %v810_v14  ;;  %v590_v35 = vpop.permute.xlu0 %589  ;;  %v839_v20 = vsub.f32 %v16718_v24, %v20567_v41  ;;  %v1853_v14 = vadd.s32 120, %v16656_v16 }
  0xb6   : > { %vm617_vm15 = vcmp.eq.s32.totalorder %v593_v32, %v16602_v50  ;;  %vm616_vm1 = vcmp.eq.s32.totalorder %v590_v35, %v16602_v50  ;;  %13240 = vmatprep.mubr.f32.mxu0 %v820_v33  ;;  %v849_v40 = vsub.f32 %v16716_v23, %v20566_v7  ;;  %14957 = vmatpush3.bf16.msra.mxu0 %v16579_v44 }
  0xb7   : > { %v16769_v63 = vsel %vm617_vm15, 1.0, %v20619_v59  ;;  %v16772_v55 = vsel %vm616_vm1, 1.0, %v20619_v59  ;;  %v840_v28 = vand.u32 4294901760, %v839_v20  ;;  %v20571_v32 = vand.u32 4294901760, %v16751_v27  ;;  %14959 = vmatprep.subr.bf16.mxu0 %v16583_v45 }
  0xb8   : > { %20857 = vst [vmem:[#allocation20_spill] sm:$0xff] %v16769_v63  ;;  %20858 = vst [vmem:[#allocation21_spill] sm:$0xff] %v16772_v55  ;;  %v693_v33 = vsel %vm658_vm0, %v16769_v63, 0  ;;  %v690_v44 = vsel %vm658_vm0, %v16772_v55, 0  ;;  %v850_v35 = vand.u32 4294901760, %v849_v40  ;;  %v20572_v7 = vand.u32 4294901760, %v16749_v12 }
  0xb9   : > { %v16783_v41 = vsub.f32 %v693_v33, %v693_v33  ;;  %v16785_v42 = vsub.f32 %v690_v44, %v690_v44  ;;  %v599_v20 = vpop.permute.xlu1 %598  ;;  %13241 = vmatmul.mubr.f32.gmra.mrb[4].mxu0 %v830_v4  ;;  %v596_v11 = vpop.permute.xlu0 %595  ;;  %v859_v34 = vsub.f32 %v16751_v27, %v20571_v32  ;;  %vm1870_vm2 = vcmp.ge.s32.totalorder %v1853_v14, %v16673_v29 }
  0xba   : > { %vm619_vm3 = vcmp.eq.s32.totalorder %v599_v20, %v16602_v50  ;;  %vm618_vm4 = vcmp.eq.s32.totalorder %v596_v11, %v16602_v50  ;;  %13243 = vmatprep.mubr.f32.mxu0 %v840_v28  ;;  %v869_v40 = vsub.f32 %v16749_v12, %v20572_v7  ;;  %vm1887_vm5 = vcmp.lt.s32.totalorder %v1853_v14, %v16702_v0 }
  0xbb   : > { %v16798_v4 = vsel %vm619_vm3, 1.0, %v20619_v59  ;;  %v16801_v33 = vsel %vm618_vm4, 1.0, %v20619_v59  ;;  %v860_v44 = vand.u32 4294901760, %v859_v34  ;;  %v20578_v32 = vand.u32 4294901760, %v16785_v42  ;;  %vm1903_vm6 = vmand %vm1870_vm2, %vm1887_vm5 }
  0xbc   : > { %20859 = vst [vmem:[#allocation22_spill] sm:$0xff] %v16798_v4  ;;  %20860 = vst [vmem:[#allocation23_spill] sm:$0xff] %v16801_v33  ;;  %v699_v11 = vsel %vm658_vm0, %v16798_v4, 0  ;;  %v696_v28 = vsel %vm658_vm0, %v16801_v33, 0  ;;  %v870_v20 = vand.u32 4294901760, %v869_v40  ;;  %v20577_v7 = vand.u32 4294901760, %v16783_v41 }
  0xbd   : > { %v16809_v14 = vsub.f32 %v699_v11, %v699_v11  ;;  %v16811_v39 = vsub.f32 %v696_v28, %v696_v28  ;;  %v605_v38 = vpop.permute.xlu1 %604  ;;  %13244 = vmatmul.mubr.f32.gmra.mrb[6].mxu0 %v850_v35  ;;  %v602_v10 = vpop.permute.xlu0 %601  ;;  %v879_v34 = vsub.f32 %v16785_v42, %v20578_v32  ;;  %v16817_v26 = vsel %vm1903_vm6, 1.0, %v20619_v59 }
  0xbe   : > { %vm621_vm7 = vcmp.eq.s32.totalorder %v605_v38, %v16602_v50  ;;  %vm620_vm8 = vcmp.eq.s32.totalorder %v602_v10, %v16602_v50  ;;  %13246 = vmatprep.mubr.f32.mxu0 %v860_v44  ;;  %v889_v40 = vsub.f32 %v16783_v41, %v20577_v7  ;;  %13472 = vmatmul.mubr.msk.f32.vlgmr.msra.gmra.mrb[0].mxu1 %vm1952_vm14, %v16817_v26  ;;  %v16827_v35 = vadd.s32 8, %v16656_v16 }
  0xbf   : > { %v16830_v11 = vsel %vm621_vm7, 1.0, %v20619_v59  ;;  %v16833_v28 = vsel %vm620_vm8, 1.0, %v20619_v59  ;;  %v880_v38 = vand.u32 4294901760, %v879_v34  ;;  %v20585_v10 = vand.u32 4294901760, %v16811_v39  ;;  %15001 = vmatpush3.bf16.msra.mxu1 %v14998_v52 }
  0xc0   : > { %20861 = vst [vmem:[#allocation24_spill] sm:$0xff] %v16827_v35  ;;  %v705_v44 = vsel %vm658_vm0, %v16830_v11, 0  ;;  %v702_v7 = vsel %vm658_vm0, %v16833_v28, 0  ;;  %v890_v32 = vand.u32 4294901760, %v889_v40  ;;  %v20584_v25 = vand.u32 4294901760, %v16809_v14 }
  0xc1   : > { %v16841_v58 = vsub.f32 %v705_v44, %v705_v44  ;;  %v16843_v57 = vsub.f32 %v702_v7, %v702_v7  ;;  %13247 = vmatmul.mubr.f32.gmra.mrb[8].mxu0 %v870_v20  ;;  %v899_v34 = vsub.f32 %v16811_v39, %v20585_v10  ;;  %vm1855_vm9 = vcmp.ge.s32.totalorder %v16656_v16, %v16673_v29 }
  0xc2   : > { %13249 = vmatprep.mubr.f32.mxu0 %v880_v38  ;;  %v909_v51 = vsub.f32 %v16809_v14, %v20584_v25  ;;  %vm1856_vm11 = vcmp.ge.s32.totalorder %v16827_v35, %v16673_v29  ;;  %vm1888_vm12 = vmand %vm1855_vm9, %vm1872_vm10  ;;  %vm1873_vm13 = vcmp.lt.s32.totalorder %v16827_v35, %v16702_v0  ;;  %v1840_v44 = vadd.s32 16, %v16656_v16 }
  0xc3   : > { %v900_v7 = vand.u32 4294901760, %v899_v34  ;;  %v20592_v20 = vand.u32 4294901760, %v16843_v57  ;;  %v20593_v40 = vand.u32 4294901760, %v16841_v58  ;;  %v16864_v38 = vsel %vm1888_vm12, 1.0, %v20619_v59  ;;  %vm1889_vm15 = vmand %vm1856_vm11, %vm1873_vm13 }
  0xc4   : > { %v1954_v10 = vsel %vm1952_vm14, %v16864_v38, 0  ;;  %v16876_v52 = vsel %vm1889_vm15, 1.0, %v20619_v59  ;;  %v910_v50 = vand.u32 4294901760, %v909_v51  ;;  %vm1857_vm1 = vcmp.ge.s32.totalorder %v1840_v44, %v16673_v29 }
  0xc5   : > { %13250 = vmatmul.mubr.f32.gmra.mrb[10].mxu0 %v890_v32  ;;  %v919_v34 = vsub.f32 %v16843_v57, %v20592_v20  ;;  %v929_v25 = vsub.f32 %v16841_v58, %v20593_v40  ;;  %v16878_v35 = vsub.f32 %v1954_v10, %v1954_v10  ;;  %v1957_v32 = vsel %vm1952_vm14, %v16876_v52, 0 }
  0xc6   : > { %13252 = vmatprep.mubr.f32.mxu0 %v900_v7  ;;  %v16882_v37 = vsub.f32 %v1957_v32, %v1957_v32  ;;  %vm1874_vm2 = vcmp.lt.s32.totalorder %v1840_v44, %v16702_v0  ;;  %v1841_v40 = vadd.s32 24, %v16656_v16  ;;  %v1842_v7 = vadd.s32 32, %v16656_v16 }
  0xc7   : > { %v920_v15 = vand.u32 4294901760, %v919_v34  ;;  %v930_v20 = vand.u32 4294901760, %v929_v25  ;;  %13478 = vmatprep.mubr.f32.mxu1 %v16878_v35  ;;  %v1843_v51 = vadd.s32 40, %v16656_v16  ;;  %v1844_v34 = vadd.s32 48, %v16656_v16  ;;  %vm1890_vm3 = vmand %vm1857_vm1, %vm1874_vm2 }
  0xc8   : > { %v20594_v10 = vand.u32 4294901760, %v16882_v37  ;;  %13479 = vmatmul.mubr.f32.vlgmr.msra.gmra.mrb[2].mxu1 %v16882_v37  ;;  %v1845_v32 = vadd.s32 56, %v16656_v16  ;;  %vm1858_vm4 = vcmp.ge.s32.totalorder %v1841_v40, %v16673_v29  ;;  %vm1875_vm5 = vcmp.lt.s32.totalorder %v1841_v40, %v16702_v0 }
  0xc9   : > { %13253 = vmatmul.mubr.f32.gmra.mrb[12].mxu0 %v910_v50  ;;  %vm1859_vm6 = vcmp.ge.s32.totalorder %v1842_v7, %v16673_v29  ;;  %vm1876_vm7 = vcmp.lt.s32.totalorder %v1842_v7, %v16702_v0  ;;  %v16904_v50 = vsel %vm1890_vm3, 1.0, %v20619_v59  ;;  %vm1891_vm8 = vmand %vm1858_vm4, %vm1875_vm5  ;;  %vm1860_vm9 = vcmp.ge.s32.totalorder %v1843_v51, %v16673_v29 }
  0xca   : > { %13255 = vmatprep.mubr.f32.mxu0 %v920_v15  ;;  %v16901_v25 = vsub.f32 %v16882_v37, %v20594_v10  ;;  %vm1877_vm10 = vcmp.lt.s32.totalorder %v1843_v51, %v16702_v0  ;;  %v1960_v15 = vsel %vm1952_vm14, %v16904_v50, 0  ;;  %v16911_v40 = vsel %vm1891_vm8, 1.0, %v20619_v59  ;;  %vm1892_vm11 = vmand %vm1859_vm6, %vm1876_vm7 }
  0xcb   : > { %20863 = vst [vmem:[#allocation26_spill] sm:$0xff] %v16911_v40  ;;  %vm1861_vm12 = vcmp.ge.s32.totalorder %v1844_v34, %v16673_v29  ;;  %vm1878_vm13 = vcmp.lt.s32.totalorder %v1844_v34, %v16702_v0  ;;  %v16915_v44 = vsub.f32 %v1960_v15, %v1960_v15  ;;  %v1963_v7 = vsel %vm1952_vm14, %v16911_v40, 0  ;;  %vm1893_vm15 = vmand %vm1860_vm9, %vm1877_vm10 }
  0xcc   : > { %20862 = vst [vmem:[#allocation25_spill] sm:$0xff] %v16901_v25  ;;  %v16920_v10 = vsel %vm1892_vm11, 1.0, %v20619_v59  ;;  %vm1862_vm1 = vcmp.ge.s32.totalorder %v1845_v32, %v16673_v29  ;;  %v16925_v51 = vsub.f32 %v1963_v7, %v1963_v7  ;;  %vm1894_vm2 = vmand %vm1861_vm12, %vm1878_vm13  ;;  %vm1879_vm3 = vcmp.lt.s32.totalorder %v1845_v32, %v16702_v0 }
  0xcd   : > { %13256 = vmatmul.mubr.f32.gmra.mrb[14].mxu0 %v930_v20  ;;  %20864 = vst [vmem:[#allocation27_spill] sm:$0xff] %v16920_v10  ;;  %v1966_v34 = vsel %vm1952_vm14, %v16920_v10, 0  ;;  %v16930_v20 = vsel %vm1893_vm15, 1.0, %v20619_v59  ;;  %13481 = vmatprep.mubr.f32.mxu1 %v16915_v44  ;;  %vm1895_vm4 = vmand %vm1862_vm1, %vm1879_vm3  ;;  %v1846_v7 = vadd.s32 64, %v16656_v16 }
  0xce   : > { %13266 = vmatprep.mubr.msk.f32.mxu0 %vm658_vm0, %v16624_v61  ;;  %20865 = vst [vmem:[#allocation28_spill] sm:$0xff] %v16930_v20  ;;  %v16934_v15 = vsub.f32 %v1966_v34, %v1966_v34  ;;  %v1969_v25 = vsel %vm1952_vm14, %v16930_v20, 0  ;;  %v16939_v61 = vsel %vm1894_vm2, 1.0, %v20619_v59  ;;  %13482 = vmatmul.mubr.f32.gmra.mrb[4].mxu1 %v16925_v51  ;;  %v16948_v40 = vsel %vm1895_vm4, 1.0, %v20619_v59 }
  0xcf   : > { %v16943_v10 = vsub.f32 %v1969_v25, %v1969_v25  ;;  %v1972_v32 = vsel %vm1952_vm14, %v16939_v61, 0  ;;  %20866 = vst [vmem:[#allocation29_spill] sm:$0xff] %v16948_v40  ;;  %v1847_v34 = vadd.s32 72, %v16656_v16  ;;  %v1975_v36 = vsel %vm1952_vm14, %v16948_v40, 0 }
  0xd0   : > { %13484 = vmatprep.mubr.f32.mxu1 %v16934_v15  ;;  %v16954_v20 = vsub.f32 %v1972_v32, %v1972_v32  ;;  %vm1863_vm5 = vcmp.ge.s32.totalorder %v1846_v7, %v16673_v29  ;;  %vm1880_vm6 = vcmp.lt.s32.totalorder %v1846_v7, %v16702_v0  ;;  %v16963_v25 = vsub.f32 %v1975_v36, %v1975_v36 }
  0xd1   : > { %13267 = vmatmul.mubr.msk.f32.vlgmr.msra.gmra.mrb[0].mxu0 %vm658_vm0, %v16646_v9  ;;  %vm1896_vm7 = vmand %vm1863_vm5, %vm1880_vm6  ;;  %vm1864_vm8 = vcmp.ge.s32.totalorder %v1847_v34, %v16673_v29  ;;  %vm1881_vm9 = vcmp.lt.s32.totalorder %v1847_v34, %v16702_v0  ;;  %v1848_v32 = vadd.s32 80, %v16656_v16  ;;  %v1850_v7 = vadd.s32 96, %v16656_v16 }
  0xd2   : > { %14961 = vmatpush3.bf16.msra.mxu0 %v16583_v45  ;;  %13269 = vmatprep.mubr.msk.f32.mxu0 %vm658_vm0, %v16621_v60  ;;  %v16970_v9 = vsel %vm1896_vm7, 1.0, %v20619_v59  ;;  %vm1897_vm10 = vmand %vm1864_vm8, %vm1881_vm9  ;;  %v1849_v45 = vadd.s32 88, %v16656_v16  ;;  %v1851_v36 = vadd.s32 104, %v16656_v16  ;;  %vm3508_vm9 = vcmask 1042432  }
  0xd3   : > { %14963 = vmatprep.subr.bf16.mxu0 %v16587_v46  ;;  %13485 = vmatmul.mubr.f32.gmra.mrb[6].mxu1 %v16943_v10  ;;  %v1978_v60 = vsel %vm1952_vm14, %v16970_v9, 0  ;;  %v16979_v34 = vsel %vm1897_vm10, 1.0, %v20619_v59  ;;  %vm1865_vm11 = vcmp.ge.s32.totalorder %v1848_v32, %v16673_v29  ;;  %vm1882_vm12 = vcmp.lt.s32.totalorder %v1848_v32, %v16702_v0 }
  0xd4   : > { %13487 = vmatprep.mubr.f32.mxu1 %v16954_v20  ;;  %v16986_v40 = vsub.f32 %v1978_v60, %v1978_v60  ;;  %v1981_v16 = vsel %vm1952_vm14, %v16979_v34, 0  ;;  %vm1898_vm13 = vmand %vm1865_vm11, %vm1882_vm12  ;;  %vm1866_vm15 = vcmp.ge.s32.totalorder %v1849_v45, %v16673_v29  ;;  %vm1883_vm1 = vcmp.lt.s32.totalorder %v1849_v45, %v16702_v0 }
  0xd5   : > { %13270 = vmatmul.mubr.msk.f32.gmra.mrb[2].mxu0 %vm658_vm0, %v16643_v8  ;;  %v16996_v32 = vsel %vm1898_vm13, 1.0, %v20619_v59  ;;  %vm1899_vm2 = vmand %vm1866_vm15, %vm1883_vm1  ;;  %vm1867_vm3 = vcmp.ge.s32.totalorder %v1850_v7, %v16673_v29  ;;  %vm1884_vm4 = vcmp.lt.s32.totalorder %v1850_v7, %v16702_v0  ;;  %vm1868_vm6 = vcmp.ge.s32.totalorder %v1851_v36, %v16673_v29 }
  0xd6   : > { %13272 = vmatprep.mubr.msk.f32.mxu0 %vm658_vm0, %v16679_v31  ;;  %14965 = vmatpush3.bf16.msra.mxu0 %v16587_v46  ;;  %v1984_v60 = vsel %vm1952_vm14, %v16996_v32, 0  ;;  %v17004_v45 = vsel %vm1899_vm2, 1.0, %v20619_v59  ;;  %vm1900_vm5 = vmand %vm1867_vm3, %vm1884_vm4  ;;  %vm1885_vm7 = vcmp.lt.s32.totalorder %v1851_v36, %v16702_v0  ;;  %v17009_v46 = vsub.f32 %v1981_v16, %v1981_v16 }
  0xd7   : > { %14967 = vmatprep.subr.bf16.mxu0 %v16534_v13  ;;  %13488 = vmatmul.mubr.f32.gmra.mrb[8].mxu1 %v16963_v25  ;;  %v17012_v31 = vsel %vm1900_vm5, 1.0, %v20619_v59  ;;  %vm1901_vm8 = vmand %vm1868_vm6, %vm1885_vm7  ;;  %v17017_v7 = vsub.f32 %v1984_v60, %v1984_v60  ;;  %v1987_v29 = vsel %vm1952_vm14, %v17004_v45, 0  ;;  %v20867_v36 = vand.u32 4294901760, %v16598_v48 }
  0xd8   : > { %13490 = vmatprep.mubr.f32.mxu1 %v16986_v40  ;;  %v1990_v16 = vsel %vm1952_vm14, %v17012_v31, 0  ;;  %v17026_v0 = vsel %vm1901_vm8, 1.0, %v20619_v59  ;;  %v17035_v60 = vsub.f32 %v1987_v29, %v1987_v29  ;;  %v2100_v59 = vand.u32 4294901760, %v16925_v51 }
  0xd9   : > { %13273 = vmatmul.mubr.msk.f32.gmra.mrb[4].mxu0 %vm658_vm0, %v16676_v30  ;;  %v20868_v30 = vand.u32 4294901760, %v16600_v49  ;;  %v1993_v48 = vsel %vm1952_vm14, %v17026_v0, 0  ;;  %v1996_v49 = vsel %vm1952_vm14, %v16759_v6, 0  ;;  %vm3265_vm10 = vcmask 23552  }
  0xda   : > { %13275 = vmatprep.mubr.msk.f32.mxu0 %vm658_vm0, %v16708_v3  ;;  %v17041_v3 = vsub.f32 %v1990_v16, %v1990_v16  ;;  %v17056_v29 = vsub.f32 %v1996_v49, %v1996_v49  ;;  %v1999_v16 = vsel %vm1952_vm14, %v16817_v26, 0  ;;  %v2090_v49 = vand.u32 4294901760, %v16915_v44 }
  0xdb   : > { %v17032_v8 = vpack.c.bf16 %v20868_v30, %v20867_v36  ;;  %13491 = vmatmul.mubr.f32.gmra.mrb[10].mxu1 %v17009_v46  ;;  %v17051_v30 = vsub.f32 %v1993_v48, %v1993_v48  ;;  %v17063_v36 = vsub.f32 %v1999_v16, %v1999_v16  ;;  %v2070_v48 = vand.u32 4294901760, %v16878_v35 }
  0xdc   : > { %13493 = vmatprep.mubr.f32.mxu1 %v17017_v7  ;;  %v20869_v16 = vand.u32 4294901760, %v16882_v37  ;;  %v2120_v37 = vand.u32 4294901760, %v16943_v10 }
  0xdd   : > { %15003 = vmatprep.subr.bf16.mxu1 %v17032_v8  ;;  %13276 = vmatmul.mubr.msk.f32.gmra.mrb[6].mxu0 %vm658_vm0, %v16705_v1 }
  0xde   : > { %13278 = vmatprep.mubr.msk.f32.mxu0 %vm658_vm0, %v16740_v62  ;;  %15005 = vmatpush3.bf16.msra.mxu1 %v17032_v8 }
  0xdf   : > { %13494 = vmatmul.mubr.f32.gmra.mrb[12].mxu1 %v17035_v60 }
  0xe0   : > { %13496 = vmatprep.mubr.f32.mxu1 %v17041_v3 }
  0xe1   : > { %13279 = vmatmul.mubr.msk.f32.gmra.mrb[8].mxu0 %vm658_vm0, %v16737_v56  ;;  %v17088_v56 = vsub.f32 %v16878_v35, %v2070_v48 }
  0xe2   : > { %13281 = vmatprep.mubr.msk.f32.mxu0 %vm658_vm0, %v16772_v55 }
  0xe3   : > { %13497 = vmatmul.mubr.f32.gmra.mrb[14].mxu1 %v17051_v30 }
  0xe4   : > { %13499 = vmatprep.mubr.f32.mxu1 %v17056_v29 }
  0xe5   : > { %13282 = vmatmul.mubr.msk.f32.gmra.mrb[10].mxu0 %vm658_vm0, %v16769_v63  ;;  %v20870_v63 = vand.u32 4294901760, %v16609_v53  ;;  %v2130_v53 = vand.u32 4294901760, %v16954_v20 }
  0xe6   : > { %13284 = vmatprep.mubr.msk.f32.mxu0 %vm658_vm0, %v16801_v33  ;;  %v20871_v33 = vand.u32 4294901760, %v16614_v54  ;;  %v17096_v54 = vsub.f32 %v16915_v44, %v2090_v49  ;;  %v2150_v44 = vand.u32 4294901760, %v16986_v40 }
  0xe7   : > { %13500 = vmatmul.mubr.f32.gmra.mrb[0].mxu1 %v17063_v36 }
  0xe8   : > { %13506 = vmatprep.mubr.f32.mxu1 %v2070_v48  ;;  %v15006_v55 = vpack.c.bf16 %v20871_v33, %v20870_v63  ;;  %v17101_v63 = vsub.f32 %v16925_v51, %v2100_v59  ;;  %v20873_v33 = vand.u32 4294901760, %v16548_v22  ;;  %v2140_v48 = vand.u32 4294901760, %v16963_v25 }
  0xe9   : > { %13285 = vmatmul.mubr.msk.f32.gmra.mrb[12].mxu0 %vm658_vm0, %v16798_v4  ;;  %v2110_v4 = vand.u32 4294901760, %v16934_v15  ;;  %v2160_v22 = vand.u32 4294901760, %v17009_v46  ;;  %v17123_v51 = vsub.f32 %v16954_v20, %v2130_v53 }
  0xea   : > { %13287 = vmatprep.mubr.msk.f32.mxu0 %vm658_vm0, %v16833_v28  ;;  %15007 = vmatprep.subr.bf16.mxu1 %v15006_v55 }
  0xeb   : > { %13507 = vmatmul.mubr.f32.vlgmr.msra.gmra.mrb[2].mxu1 %v20869_v16  ;;  %v17133_v16 = vsub.f32 %v16986_v40, %v2150_v44  ;;  %v17137_v20 = vsub.f32 %v17009_v46, %v2160_v22  ;;  %v2220_v46 = vand.u32 4294901760, %v17063_v36 }
  0xec   : > { %13509 = vmatprep.mubr.f32.mxu1 %v2090_v49  ;;  %15009 = vmatpush3.bf16.msra.mxu1 %v15006_v55  ;;  %v20872_v55 = vand.u32 4294901760, %v16546_v21  ;;  %v17112_v49 = vsub.f32 %v16934_v15, %v2110_v4  ;;  %v17117_v21 = vsub.f32 %v16943_v10, %v2120_v37  ;;  %v2180_v10 = vand.u32 4294901760, %v17035_v60 }
  0xed   : > { %13288 = vmatmul.mubr.msk.f32.gmra.mrb[14].mxu0 %vm658_vm0, %v16830_v11  ;;  %15011 = vmatprep.subr.bf16.mxu1 %v17032_v8  ;;  %v2190_v15 = vand.u32 4294901760, %v17041_v3 }
  0xee   : > { %13298 = vmatprep.mubr.f32.mxu0 %v16638_v5  ;;  %v14974_v35 = vpack.c.bf16 %v20873_v33, %v20872_v55  ;;  %v17147_v40 = vsub.f32 %v17035_v60, %v2180_v10  ;;  %v17166_v60 = vsub.f32 %v17063_v36, %v2220_v46  ;;  %v20879_v36 = vld [vmem:[#allocation26_spill] sm:$0xff] }
  0xef   : > { %13510 = vmatmul.mubr.f32.gmra.mrb[4].mxu1 %v2100_v59  ;;  %v2170_v59 = vand.u32 4294901760, %v17017_v7  ;;  %v17152_v55 = vsub.f32 %v17041_v3, %v2190_v15  ;;  %v20874_v3 = vand.u32 4294901760, %v16638_v5  ;;  %v20882_v5 = vand.u32 4294901760, %v16636_v2 }
  0xf0   : > { %13512 = vmatprep.mubr.f32.mxu1 %v2110_v4  ;;  %v17127_v4 = vsub.f32 %v16963_v25, %v2140_v48  ;;  %v2200_v25 = vand.u32 4294901760, %v17051_v30 }
  0xf1   : > { %13299 = vmatmul.mubr.f32.vlgmr.msra.gmra.mrb[0].mxu0 %v16660_v19 }
  0xf2   : > { %14969 = vmatpush3.bf16.msra.mxu0 %v16534_v13  ;;  %13301 = vmatprep.mubr.f32.mxu0 %v16636_v2  ;;  %v17156_v33 = vsub.f32 %v17051_v30, %v2200_v25  ;;  %v20875_v30 = vld [vmem:[#allocation7_spill] sm:$0xff]  ;;  %v20887_v2 = vand.u32 4294901760, %v16688_v43 }
  0xf3   : > { %14971 = vmatprep.subr.bf16.mxu0 %v16539_v18  ;;  %13513 = vmatmul.mubr.f32.gmra.mrb[6].mxu1 %v2120_v37  ;;  %v2210_v37 = vand.u32 4294901760, %v17056_v29 }
  0xf4   : > { %13515 = vmatprep.mubr.f32.mxu1 %v2130_v53  ;;  %v17143_v53 = vsub.f32 %v17017_v7, %v2170_v59 }
  0xf5   : > { %13302 = vmatmul.mubr.f32.gmra.mrb[2].mxu0 %v16658_v17  ;;  %v17162_v7 = vsub.f32 %v17056_v29, %v2210_v37  ;;  %v20876_v29 = vand.u32 4294901760, %v20875_v30  ;;  %v20906_v30 = vld [vmem:[#allocation21_spill] sm:$0xff] }
  0xf6   : > { %13304 = vmatprep.mubr.f32.mxu0 %v16690_v47  ;;  %14973 = vmatpush3.bf16.msra.mxu0 %v16539_v18 }
  0xf7   : > { %14975 = vmatprep.subr.bf16.mxu0 %v14974_v35  ;;  %13516 = vmatmul.mubr.f32.gmra.mrb[8].mxu1 %v2140_v48  ;;  %v20877_v48 = vld [vmem:[#allocation8_spill] sm:$0xff] }
  0xf8   : > { %13518 = vmatprep.mubr.f32.mxu1 %v2150_v44  ;;  %v20878_v44 = vand.u32 4294901760, %v20877_v48  ;;  %v20908_v48 = vld [vmem:[#allocation23_spill] sm:$0xff] }
  0xf9   : > { %13305 = vmatmul.mubr.f32.gmra.mrb[4].mxu0 %v16688_v43  ;;  %v20891_v43 = vand.u32 4294901760, %v16749_v12 }
  0xfa   : > { %13307 = vmatprep.mubr.f32.mxu0 %v16718_v24 }
  0xfb   : > { %13519 = vmatmul.mubr.f32.gmra.mrb[10].mxu1 %v2160_v22  ;;  %v14978_v22 = vpack.c.bf16 %v20878_v44, %v20876_v29  ;;  %v20907_v29 = vld [vmem:[#allocation20_spill] sm:$0xff]  ;;  %v20909_v44 = vld [vmem:[#allocation22_spill] sm:$0xff] }
  0xfc   : > { %13521 = vmatprep.mubr.f32.mxu1 %v2170_v59  ;;  %v20880_v59 = vand.u32 4294901760, %v16660_v19  ;;  %v20885_v19 = vand.u32 4294901760, %v16690_v47  ;;  %v20889_v47 = vand.u32 4294901760, %v16716_v23 }
  0xfd   : > { %13308 = vmatmul.mubr.f32.gmra.mrb[6].mxu0 %v16716_v23  ;;  %v20893_v23 = vand.u32 4294901760, %v16783_v41 }
  0xfe   : > { %13310 = vmatprep.mubr.f32.mxu0 %v16751_v27 }
  0xff   : > { %13522 = vmatmul.mubr.f32.gmra.mrb[12].mxu1 %v2180_v10  ;;  %v20881_v10 = vld [vmem:[#allocation27_spill] sm:$0xff] }
 0x100   : > { %13524 = vmatprep.mubr.f32.mxu1 %v2190_v15  ;;  %v20883_v15 = vld [vmem:[#allocation28_spill] sm:$0xff] }
 0x101   : > { %13311 = vmatmul.mubr.f32.gmra.mrb[8].mxu0 %v16749_v12  ;;  %v20895_v12 = vand.u32 4294901760, %v16809_v14 }
 0x102   : > { %13313 = vmatprep.mubr.f32.mxu0 %v16785_v42 }
 0x103   : > { %13525 = vmatmul.mubr.f32.gmra.mrb[14].mxu1 %v2200_v25  ;;  %v20884_v25 = vand.u32 4294901760, %v16658_v17  ;;  %v20888_v17 = vand.u32 4294901760, %v16718_v24  ;;  %v20892_v24 = vand.u32 4294901760, %v16785_v42  ;;  %v20896_v42 = vand.u32 4294901760, %v16843_v57 }
 0x104   : > { %13527 = vmatprep.mubr.f32.mxu1 %v2210_v37  ;;  %v20890_v37 = vand.u32 4294901760, %v16751_v27  ;;  %v20894_v27 = vand.u32 4294901760, %v16811_v39 }
 0x105   : > { %13314 = vmatmul.mubr.f32.gmra.mrb[10].mxu0 %v16783_v41  ;;  %v20897_v41 = vand.u32 4294901760, %v16841_v58 }
 0x106   : > { %13316 = vmatprep.mubr.f32.mxu0 %v16811_v39  ;;  %v20898_v39 = vld [vmem:[#allocation11_spill] sm:$0xff] }
 0x107   : > { %13528 = vmatmul.mubr.f32.gmra.mrb[0].mxu1 %v2220_v46  ;;  %v20902_v46 = vld [vmem:[#allocation17_spill] sm:$0xff] }
 0x108   : > { %13534 = vmatprep.mubr.msk.f32.mxu1 %vm1952_vm14, %v16864_v38 }
 0x109   : > { %13317 = vmatmul.mubr.f32.gmra.mrb[12].mxu0 %v16809_v14  ;;  %v20899_v14 = vld [vmem:[#allocation13_spill] sm:$0xff] }
 0x10a   : > { %13319 = vmatprep.mubr.f32.mxu0 %v16843_v57  ;;  %v20900_v57 = vld [vmem:[#allocation10_spill] sm:$0xff] }
 0x10b   : > { %13535 = vmatmul.mubr.msk.f32.vlgmr.msra.gmra.mrb[2].mxu1 %vm1952_vm14, %v16876_v52 }
 0x10c   : > { %13537 = vmatprep.mubr.msk.f32.mxu1 %vm1952_vm14, %v16904_v50  ;;  %15013 = vmatpush3.bf16.msra.mxu1 %v17032_v8 }
 0x10d   : > { %13320 = vmatmul.mubr.f32.gmra.mrb[14].mxu0 %v16841_v58  ;;  %v20901_v58 = vld [vmem:[#allocation12_spill] sm:$0xff] }
 0x10e   : > { %13330 = vmatprep.mubr.f32.mxu0 %v20874_v3  ;;  %v20904_v3 = vld [vmem:[#allocation18_spill] sm:$0xff] }
 0x10f   : > { %13538 = vmatmul.mubr.msk.f32.gmra.mrb[4].mxu1 %vm1952_vm14, %v20879_v36 }
 0x110   : > { %13540 = vmatprep.mubr.msk.f32.mxu1 %vm1952_vm14, %v20881_v10 }
 0x111   : > { %13331 = vmatmul.mubr.f32.vlgmr.msra.gmra.mrb[0].mxu0 %v20880_v59  ;;  %v2112_v59 = vand.u32 4294901760, %v17112_v49  ;;  %v2172_v49 = vand.u32 4294901760, %v17143_v53 }
 0x112   : > { %14977 = vmatpush3.bf16.msra.mxu0 %v14974_v35  ;;  %13333 = vmatprep.mubr.f32.mxu0 %v20882_v5  ;;  %v20886_v35 = vld [vmem:[#allocation29_spill] sm:$0xff]  ;;  %v2182_v5 = vand.u32 4294901760, %v17147_v40 }
 0x113   : > { %14979 = vmatprep.subr.bf16.mxu0 %v14978_v22  ;;  %13541 = vmatmul.mubr.msk.f32.gmra.mrb[6].mxu1 %vm1952_vm14, %v20883_v15 }
 0x114   : > { %13543 = vmatprep.mubr.msk.f32.mxu1 %vm1952_vm14, %v16939_v61 }
 0x115   : > { %13334 = vmatmul.mubr.f32.gmra.mrb[2].mxu0 %v20884_v25 }
 0x116   : > { %13336 = vmatprep.mubr.f32.mxu0 %v20885_v19  ;;  %14981 = vmatpush3.bf16.msra.mxu0 %v14978_v22  ;;  %v2102_v22 = vand.u32 4294901760, %v17101_v63  ;;  %v2162_v63 = vand.u32 4294901760, %v17137_v20 }
 0x117   : > { %14983 = vmatprep.subr.bf16.mxu0 %v16534_v13  ;;  %13544 = vmatmul.mubr.msk.f32.gmra.mrb[8].mxu1 %vm1952_vm14, %v20886_v35 }
 0x118   : > { %13546 = vmatprep.mubr.msk.f32.mxu1 %vm1952_vm14, %v16970_v9 }
 0x119   : > { %13337 = vmatmul.mubr.f32.gmra.mrb[4].mxu0 %v20887_v2 }
 0x11a   : > { %13339 = vmatprep.mubr.f32.mxu0 %v20888_v17 }
 0x11b   : > { %13547 = vmatmul.mubr.msk.f32.gmra.mrb[10].mxu1 %vm1952_vm14, %v16979_v34 }
 0x11c   : > { %13549 = vmatprep.mubr.msk.f32.mxu1 %vm1952_vm14, %v16996_v32 }
 0x11d   : > { %13340 = vmatmul.mubr.f32.gmra.mrb[6].mxu0 %v20889_v47 }
 0x11e   : > { %13342 = vmatprep.mubr.f32.mxu0 %v20890_v37 }
 0x11f   : > { %13550 = vmatmul.mubr.msk.f32.gmra.mrb[12].mxu1 %vm1952_vm14, %v17004_v45 }
 0x120   : > { %13552 = vmatprep.mubr.msk.f32.mxu1 %vm1952_vm14, %v17012_v31 }
 0x121   : > { %13343 = vmatmul.mubr.f32.gmra.mrb[8].mxu0 %v20891_v43 }
 0x122   : > { %13345 = vmatprep.mubr.f32.mxu0 %v20892_v24 }
 0x123   : > { %13553 = vmatmul.mubr.msk.f32.gmra.mrb[14].mxu1 %vm1952_vm14, %v17026_v0 }
 0x124   : > { %13555 = vmatprep.mubr.msk.f32.mxu1 %vm1952_vm14, %v16759_v6 }
 0x125   : > { %13346 = vmatmul.mubr.f32.gmra.mrb[10].mxu0 %v20893_v23 }
 0x126   : > { %13348 = vmatprep.mubr.f32.mxu0 %v20894_v27 }
 0x127   : > { %13556 = vmatmul.mubr.msk.f32.gmra.mrb[0].mxu1 %vm1952_vm14, %v16817_v26 }
 0x128   : > { %13562 = vmatprep.mubr.msk.f32.mxu1 %vm1952_vm14, %v16864_v38 }
 0x129   : > { %13349 = vmatmul.mubr.f32.gmra.mrb[12].mxu0 %v20895_v12 }
 0x12a   : > { %13351 = vmatprep.mubr.f32.mxu0 %v20896_v42 }
 0x12b   : > { %13563 = vmatmul.mubr.msk.f32.vlgmr.msra.gmra.mrb[2].mxu1 %vm1952_vm14, %v16876_v52 }
 0x12c   : > { %13565 = vmatprep.mubr.msk.f32.mxu1 %vm1952_vm14, %v16904_v50 }
 0x12d   : > { %13352 = vmatmul.mubr.f32.gmra.mrb[14].mxu0 %v20897_v41 }
 0x12e   : > { %13362 = vmatprep.mubr.msk.f32.mxu0 %vm658_vm0, %v20898_v39 }
 0x12f   : > { %13566 = vmatmul.mubr.msk.f32.gmra.mrb[4].mxu1 %vm1952_vm14, %v20879_v36 }
 0x130   : > { %13568 = vmatprep.mubr.msk.f32.mxu1 %vm1952_vm14, %v20881_v10 }
 0x131   : > { %13363 = vmatmul.mubr.msk.f32.vlgmr.msra.gmra.mrb[0].mxu0 %vm658_vm0, %v20899_v14 }
 0x132   : > { %14985 = vmatpush3.bf16.msra.mxu0 %v16534_v13  ;;  %13365 = vmatprep.mubr.msk.f32.mxu0 %vm658_vm0, %v20900_v57  ;;  %v20903_v13 = vld [vmem:[#allocation16_spill] sm:$0xff] }
 0x133   : > { %14987 = vmatprep.subr.bf16.mxu0 %v16539_v18  ;;  %13569 = vmatmul.mubr.msk.f32.gmra.mrb[6].mxu1 %vm1952_vm14, %v20883_v15 }
 0x134   : > { %13571 = vmatprep.mubr.msk.f32.mxu1 %vm1952_vm14, %v16939_v61 }
 0x135   : > { %13366 = vmatmul.mubr.msk.f32.gmra.mrb[2].mxu0 %vm658_vm0, %v20901_v58 }
 0x136   : > { %13368 = vmatprep.mubr.msk.f32.mxu0 %vm658_vm0, %v20902_v46  ;;  %14989 = vmatpush3.bf16.msra.mxu0 %v16539_v18  ;;  %v20905_v18 = vld [vmem:[#allocation19_spill] sm:$0xff] }
 0x137   : > { %14991 = vmatprep.subr.bf16.mxu0 %v17032_v8  ;;  %13572 = vmatmul.mubr.msk.f32.gmra.mrb[8].mxu1 %vm1952_vm14, %v20886_v35 }
 0x138   : > { %13574 = vmatprep.mubr.msk.f32.mxu1 %vm1952_vm14, %v16970_v9 }
 0x139   : > { %13369 = vmatmul.mubr.msk.f32.gmra.mrb[4].mxu0 %vm658_vm0, %v20903_v13 }
 0x13a   : > { %13371 = vmatprep.mubr.msk.f32.mxu0 %vm658_vm0, %v20904_v3 }
 0x13b   : > { %13575 = vmatmul.mubr.msk.f32.gmra.mrb[10].mxu1 %vm1952_vm14, %v16979_v34 }
 0x13c   : > { %13577 = vmatprep.mubr.msk.f32.mxu1 %vm1952_vm14, %v16996_v32 }
 0x13d   : > { %13372 = vmatmul.mubr.msk.f32.gmra.mrb[6].mxu0 %vm658_vm0, %v16705_v1 }
 0x13e   : > { %13374 = vmatprep.mubr.msk.f32.mxu0 %vm658_vm0, %v16740_v62 }
 0x13f   : > { %13578 = vmatmul.mubr.msk.f32.gmra.mrb[12].mxu1 %vm1952_vm14, %v17004_v45 }
 0x140   : > { %13580 = vmatprep.mubr.msk.f32.mxu1 %vm1952_vm14, %v17012_v31 }
 0x141   : > { %13375 = vmatmul.mubr.msk.f32.gmra.mrb[8].mxu0 %vm658_vm0, %v20905_v18 }
 0x142   : > { %13377 = vmatprep.mubr.msk.f32.mxu0 %vm658_vm0, %v20906_v30 }
 0x143   : > { %13581 = vmatmul.mubr.msk.f32.gmra.mrb[14].mxu1 %vm1952_vm14, %v17026_v0 }
 0x144   : > { %13583 = vmatprep.mubr.msk.f32.mxu1 %vm1952_vm14, %v16759_v6 }
 0x145   : > { %13378 = vmatmul.mubr.msk.f32.gmra.mrb[10].mxu0 %vm658_vm0, %v20907_v29 }
 0x146   : > { %13380 = vmatprep.mubr.msk.f32.mxu0 %vm658_vm0, %v20908_v48 }
 0x147   : > { %13584 = vmatmul.mubr.msk.f32.gmra.mrb[0].mxu1 %vm1952_vm14, %v16817_v26  ;;  %v20910_v26 = vld [vmem:[#allocation14_spill] sm:$0xff] }
 0x149   : > { %13381 = vmatmul.mubr.msk.f32.gmra.mrb[12].mxu0 %vm658_vm0, %v20909_v44 }
 0x14a   : > { %13383 = vmatprep.mubr.msk.f32.mxu0 %vm658_vm0, %v16833_v28 }
 0x14d   : > { %13384 = vmatmul.mubr.msk.f32.gmra.mrb[14].mxu0 %vm658_vm0, %v16830_v11 }
 0x14e   : > { %13394 = vmatprep.mubr.msk.f32.mxu0 %vm658_vm0, %v20898_v39 }
 0x151   : > { %13395 = vmatmul.mubr.msk.f32.vlgmr.msra.gmra.mrb[0].mxu0 %vm658_vm0, %v20899_v14 }
 0x152   : > { %13397 = vmatprep.mubr.msk.f32.mxu0 %vm658_vm0, %v20900_v57  ;;  %14993 = vmatpush3.bf16.msra.mxu0 %v17032_v8  ;;  %v2072_v8 = vand.u32 4294901760, %v17088_v56  ;;  %v2132_v56 = vand.u32 4294901760, %v17123_v51  ;;  %v2202_v51 = vand.u32 4294901760, %v17156_v33 }
 0x153   : > { %14995 = vmatprep.subr.bf16.mxu0 %v20910_v26 }
 0x155   : > { %13398 = vmatmul.mubr.msk.f32.gmra.mrb[2].mxu0 %vm658_vm0, %v20901_v58 }
 0x156   : > { %13400 = vmatprep.mubr.msk.f32.mxu0 %vm658_vm0, %v20902_v46 }
 0x159   : > { %13401 = vmatmul.mubr.msk.f32.gmra.mrb[4].mxu0 %vm658_vm0, %v20903_v13 }
 0x15a   : > { %13403 = vmatprep.mubr.msk.f32.mxu0 %vm658_vm0, %v20904_v3 }
 0x15d   : > { %13404 = vmatmul.mubr.msk.f32.gmra.mrb[6].mxu0 %vm658_vm0, %v16705_v1  ;;  %v20911_v1 = vld [vmem:[#allocation25_spill] sm:$0xff] }
 0x15e   : > { %13406 = vmatprep.mubr.msk.f32.mxu0 %vm658_vm0, %v16740_v62  ;;  %v2082_v6 = vand.u32 4294901760, %v20911_v1  ;;  %v2092_v62 = vand.u32 4294901760, %v17096_v54  ;;  %v2152_v54 = vand.u32 4294901760, %v17133_v16  ;;  %v2222_v16 = vand.u32 4294901760, %v17166_v60 }
 0x161   : > { %13407 = vmatmul.mubr.msk.f32.gmra.mrb[8].mxu0 %vm658_vm0, %v20905_v18 }
 0x162   : > { %13409 = vmatprep.mubr.msk.f32.mxu0 %vm658_vm0, %v20906_v30 }
 0x165   : > { %13410 = vmatmul.mubr.msk.f32.gmra.mrb[10].mxu0 %vm658_vm0, %v20907_v29 }
 0x166   : > { %13412 = vmatprep.mubr.msk.f32.mxu0 %vm658_vm0, %v20908_v48 }
 0x169   : > { %13413 = vmatmul.mubr.msk.f32.gmra.mrb[12].mxu0 %vm658_vm0, %v20909_v44 }
 0x16a   : > { %13415 = vmatprep.mubr.msk.f32.mxu0 %vm658_vm0, %v16833_v28  ;;  %v2122_v28 = vand.u32 4294901760, %v17117_v21  ;;  %v2192_v21 = vand.u32 4294901760, %v17152_v55 }
 0x16d   : > { %13416 = vmatmul.mubr.msk.f32.gmra.mrb[14].mxu0 %vm658_vm0, %v16830_v11  ;;  %v2142_v11 = vand.u32 4294901760, %v17127_v4  ;;  %v2212_v4 = vand.u32 4294901760, %v17162_v7 }
 0x16e   : > { %13422 = vmatprep.mubr.f32.mxu0 %v2072_v8 }
 0x171   : > { %13423 = vmatmul.mubr.f32.vlgmr.msra.gmra.mrb[16].mxu0 %v2082_v6 }
 0x172   : > { %13425 = vmatprep.mubr.f32.mxu0 %v2092_v62  ;;  %14997 = vmatpush3.bf16.msra.mxu0 %v20910_v26 }
 0x175   : > { %13426 = vmatmul.mubr.f32.gmra.mrb[18].mxu0 %v2102_v22 }
 0x176   : > { %13428 = vmatprep.mubr.f32.mxu0 %v2112_v59 }
 0x179   : > { %13429 = vmatmul.mubr.f32.gmra.mrb[20].mxu0 %v2122_v28 }
 0x17a   : > { %13431 = vmatprep.mubr.f32.mxu0 %v2132_v56 }
 0x17d   : > { %13432 = vmatmul.mubr.f32.gmra.mrb[22].mxu0 %v2142_v11 }
 0x17e   : > { %13434 = vmatprep.mubr.f32.mxu0 %v2152_v54 }
 0x181   : > { %13435 = vmatmul.mubr.f32.gmra.mrb[24].mxu0 %v2162_v63 }
 0x182   : > { %13437 = vmatprep.mubr.f32.mxu0 %v2172_v49 }
 0x185   : > { %13438 = vmatmul.mubr.f32.gmra.mrb[26].mxu0 %v2182_v5 }
 0x186   : > { %13440 = vmatprep.mubr.f32.mxu0 %v2192_v21 }
 0x189   : > { %13441 = vmatmul.mubr.f32.gmra.mrb[28].mxu0 %v2202_v51 }
 0x18a   : > { %13443 = vmatprep.mubr.f32.mxu0 %v2212_v4 }
 0x18d   : > { %13444 = vmatmul.mubr.f32.gmra.mrb[30].mxu0 %v2222_v16 }
 0x18e   : > { %13450 = vmatprep.mubr.msk.f32.mxu0 %vm1952_vm14, %v16864_v38 }
 0x191   : > { %13451 = vmatmul.mubr.msk.f32.vlgmr.msra.gmra.mrb[16].mxu0 %vm1952_vm14, %v16876_v52  ;;  %v3427_v52 = vld [vmem:[%s20551_s4] sm:$0x7] }
 0x192   : > { %13453 = vmatprep.mubr.msk.f32.mxu0 %vm1952_vm14, %v16904_v50 }
 0x195   : > { %13454 = vmatmul.mubr.msk.f32.gmra.mrb[18].mxu0 %vm1952_vm14, %v20879_v36 }
 0x196   : > { %13456 = vmatprep.mubr.msk.f32.mxu0 %vm1952_vm14, %v20881_v10 }
 0x199   : > { %13457 = vmatmul.mubr.msk.f32.gmra.mrb[20].mxu0 %vm1952_vm14, %v20883_v15 }
 0x19a   : > { %13459 = vmatprep.mubr.msk.f32.mxu0 %vm1952_vm14, %v16939_v61 }
 0x19d   : > { %13460 = vmatmul.mubr.msk.f32.gmra.mrb[22].mxu0 %vm1952_vm14, %v20886_v35 }
 0x19e   : > { %13462 = vmatprep.mubr.msk.f32.mxu0 %vm1952_vm14, %v16970_v9 }
 0x1a1   : > { %13463 = vmatmul.mubr.msk.f32.gmra.mrb[24].mxu0 %vm1952_vm14, %v16979_v34  ;;  %v3510_v34 = vsel %vm3508_vm9, %v3427_v52, 0 }
 0x1a2   : > { %13465 = vmatprep.mubr.msk.f32.mxu0 %vm1952_vm14, %v16996_v32  ;;  %v17396_v32 = vand.u32 4294901760, %v3510_v34 }
 0x1a4   : > { %13586 = vmatprep.subr.mxu1 %v17396_v32  ;;  %v17435_v2 = vsub.f32 %v3510_v34, %v17396_v32 }
 0x1a5   : > { %13466 = vmatmul.mubr.msk.f32.gmra.mrb[26].mxu0 %vm1952_vm14, %v17004_v45  ;;  %13587 = vmatpush3.msra.mxu1 %v17396_v32 }
 0x1a6   : > { %13468 = vmatprep.mubr.msk.f32.mxu0 %vm1952_vm14, %v17012_v31  ;;  %v17440_v17 = vand.u32 4294901760, %v17435_v2 }
 0x1a8   : > { %v3742_v43 = vsub.f32 %v17435_v2, %v17440_v17 }
 0x1a9   : > { %13469 = vmatmul.mubr.msk.f32.gmra.mrb[28].mxu0 %vm1952_vm14, %v17026_v0 }
 0x1aa   : > { %v17452_v24 = vand.u32 4294901760, %v3742_v43 }
 0x1ac   : > { %13612 = vmatprep.subr.mxu1 %v17452_v24 }
 0x1fe   : > { %v17384_v61 = vpop.f32.mrb[2].mxu1 }
 0x1ff   : > { %v17386_v38 = vpop.f32.mrb[3].mxu1 }
 0x202   : > { %v17388_v9 = vpop.f32.mrb[4].mxu1 }
 0x203   : > { %v17393_v50 = vpop.f32.mrb[5].mxu1 }
 0x206   : > { %v17398_v31 = vpop.f32.mrb[6].mxu1 }
 0x207   : > { %v17401_v45 = vpop.f32.mrb[7].mxu1 }
 0x20a   : > { %v17404_v0 = vpop.f32.mrb[8].mxu1 }
 0x20b   : > { %v17406_v20 = vpop.f32.mrb[9].mxu1 }
 0x20e   : > { %v17408_v53 = vpop.f32.mrb[10].mxu1 }
 0x20f   : > { %v17410_v40 = vpop.f32.mrb[11].mxu1 }
 0x212   : > { %v17412_v55 = vpop.f32.mrb[12].mxu1 }
 0x213   : > { %v17414_v33 = vpop.f32.mrb[13].mxu1 }
 0x216   : > { %v17416_v7 = vpop.f32.mrb[14].mxu1 }
 0x217   : > { %v17418_v60 = vpop.f32.mrb[15].mxu1 }
 0x21a   : > { %v13585_v36 = vpop.f32.mrb[0].mxu1 }
 0x21b   : > { %v3095_v10 = vpop.f32.mrb[1].mxu1 }
 0x224   : > { %v17420_v15 = vpop.f32.mrb[0].mxu0 }
 0x225   : > { %3446 = vrot.lane.b32.xlu1 %v17420_v15, %s16377_s17  ;;  %v17424_v25 = vpop.f32.mrb[1].mxu0 }
 0x226   : > { %3444 = vrot.lane.b32.xlu0 %v17424_v25, %s16377_s17 }
 0x228   : > { %v17428_v19 = vpop.f32.mrb[2].mxu0 }
 0x229   : > { %3450 = vrot.lane.b32.xlu1 %v17428_v19, %s16377_s17  ;;  %v17432_v35 = vpop.f32.mrb[3].mxu0 }
 0x22a   : > { %3448 = vrot.lane.b32.xlu0 %v17432_v35, %s16377_s17 }
 0x22c   : > { %v17442_v47 = vpop.f32.mrb[4].mxu0 }
 0x22d   : > { %3454 = vrot.lane.b32.xlu1 %v17442_v47, %s16377_s17  ;;  %v17446_v37 = vpop.f32.mrb[5].mxu0 }
 0x22e   : > { %3452 = vrot.lane.b32.xlu0 %v17446_v37, %s16377_s17 }
 0x230   : > { %v17454_v23 = vpop.f32.mrb[6].mxu0 }
 0x231   : > { %3458 = vrot.lane.b32.xlu1 %v17454_v23, %s16377_s17  ;;  %v17458_v27 = vpop.f32.mrb[7].mxu0 }
 0x232   : > { %3456 = vrot.lane.b32.xlu0 %v17458_v27, %s16377_s17 }
 0x234   : > { %v17463_v12 = vpop.f32.mrb[8].mxu0 }
 0x235   : > { %3462 = vrot.lane.b32.xlu1 %v17463_v12, %s16377_s17  ;;  %v17467_v42 = vpop.f32.mrb[9].mxu0 }
 0x236   : > { %3460 = vrot.lane.b32.xlu0 %v17467_v42, %s16377_s17 }
 0x238   : > { %v17471_v41 = vpop.f32.mrb[10].mxu0 }
 0x239   : > { %3466 = vrot.lane.b32.xlu1 %v17471_v41, %s16377_s17  ;;  %v17475_v39 = vpop.f32.mrb[11].mxu0 }
 0x23a   : > { %3464 = vrot.lane.b32.xlu0 %v17475_v39, %s16377_s17 }
 0x23c   : > { %v17479_v14 = vpop.f32.mrb[12].mxu0 }
 0x23d   : > { %3470 = vrot.lane.b32.xlu1 %v17479_v14, %s16377_s17  ;;  %v17483_v57 = vpop.f32.mrb[13].mxu0 }
 0x23e   : > { %3468 = vrot.lane.b32.xlu0 %v17483_v57, %s16377_s17 }
 0x240   : > { %v17487_v58 = vpop.f32.mrb[14].mxu0 }
 0x241   : > { %20912 = vst [vmem:[#allocation7_spill] sm:$0xff] %v17487_v58  ;;  %3474 = vrot.lane.b32.xlu1 %v17487_v58, %s16377_s17  ;;  %v17491_v46 = vpop.f32.mrb[15].mxu0 }
 0x242   : > { %3472 = vrot.lane.b32.xlu0 %v17491_v46, %s16377_s17 }
 0x260   : > { %v13445_v13 = vpop.f32.mrb[30].mxu0 }
 0x261   : > { %v2214_v3 = vpop.f32.mrb[31].mxu0  ;;  %v17495_v18 = vadd.f32 %v13585_v36, %v13445_v13 }
 0x262   : > { %v17497_v30 = vadd.f32 %v3095_v10, %v2214_v3 }
 0x263   : > { %20913 = vst [vmem:[#allocation8_spill] sm:$0xff] %v17495_v18 }
 0x264   : > { %20914 = vst [vmem:[#allocation26_spill] sm:$0xff] %v17497_v30  ;;  %v13452_v29 = vpop.f32.mrb[16].mxu0 }
 0x265   : > { %v17500_v48 = vadd.f32 %v17384_v61, %v13452_v29  ;;  %v2305_v44 = vpop.f32.mrb[17].mxu0 }
 0x266   : > { %v17503_v26 = vadd.f32 %v17386_v38, %v2305_v44 }
 0x267   : > { %20915 = vst [vmem:[#allocation27_spill] sm:$0xff] %v17500_v48  ;;  %3123 = vrot.lane.b32.xlu1 %v17500_v48, %s20831_s23 }
 0x268   : > { %3121 = vrot.lane.b32.xlu0 %v17503_v26, %s20831_s23  ;;  %v13455_v8 = vpop.f32.mrb[18].mxu0 }
 0x269   : > { %v17510_v1 = vadd.f32 %v17388_v9, %v13455_v8  ;;  %v2317_v6 = vpop.f32.mrb[19].mxu0 }
 0x26a   : > { %v17513_v62 = vadd.f32 %v17393_v50, %v2317_v6 }
 0x26b   : > { %20916 = vst [vmem:[#allocation28_spill] sm:$0xff] %v17510_v1  ;;  %3127 = vrot.lane.b32.xlu1 %v17510_v1, %s20831_s23 }
 0x26c   : > { %20917 = vst [vmem:[#allocation29_spill] sm:$0xff] %v17513_v62  ;;  %3125 = vrot.lane.b32.xlu0 %v17513_v62, %s20831_s23  ;;  %v13458_v22 = vpop.f32.mrb[20].mxu0 }
 0x26d   : > { %v17520_v59 = vadd.f32 %v17398_v31, %v13458_v22  ;;  %v2329_v28 = vpop.f32.mrb[21].mxu0 }
 0x26e   : > { %v17523_v56 = vadd.f32 %v17401_v45, %v2329_v28 }
 0x26f   : > { %20918 = vst [vmem:[#allocation11_spill] sm:$0xff] %v17520_v59  ;;  %3131 = vrot.lane.b32.xlu1 %v17520_v59, %s20831_s23 }
 0x270   : > { %20919 = vst [vmem:[#allocation13_spill] sm:$0xff] %v17523_v56  ;;  %3129 = vrot.lane.b32.xlu0 %v17523_v56, %s20831_s23  ;;  %v13461_v11 = vpop.f32.mrb[22].mxu0 }
 0x271   : > { %v17530_v54 = vadd.f32 %v17404_v0, %v13461_v11  ;;  %v2341_v63 = vpop.f32.mrb[23].mxu0 }
 0x272   : > { %v17533_v49 = vadd.f32 %v17406_v20, %v2341_v63 }
 0x273   : > { %20920 = vst [vmem:[#allocation10_spill] sm:$0xff] %v17530_v54  ;;  %3135 = vrot.lane.b32.xlu1 %v17530_v54, %s20831_s23 }
 0x274   : > { %20921 = vst [vmem:[#allocation12_spill] sm:$0xff] %v17533_v49  ;;  %3133 = vrot.lane.b32.xlu0 %v17533_v49, %s20831_s23  ;;  %v13464_v5 = vpop.f32.mrb[24].mxu0 }
 0x275   : > { %v17540_v21 = vadd.f32 %v17408_v53, %v13464_v5  ;;  %v2353_v51 = vpop.f32.mrb[25].mxu0 }
 0x276   : > { %v17543_v4 = vadd.f32 %v17410_v40, %v2353_v51 }
 0x277   : > { %20922 = vst [vmem:[#allocation17_spill] sm:$0xff] %v17540_v21  ;;  %3139 = vrot.lane.b32.xlu1 %v17540_v21, %s20831_s23 }
 0x278   : > { %20923 = vst [vmem:[#allocation16_spill] sm:$0xff] %v17543_v4  ;;  %3137 = vrot.lane.b32.xlu0 %v17543_v4, %s20831_s23  ;;  %v13467_v16 = vpop.f32.mrb[26].mxu0 }
 0x279   : > { %v17550_v61 = vadd.f32 %v17412_v55, %v13467_v16  ;;  %v2365_v38 = vpop.f32.mrb[27].mxu0 }
 0x27a   : > { %v17553_v9 = vadd.f32 %v17414_v33, %v2365_v38 }
 0x27b   : > { %20924 = vst [vmem:[#allocation18_spill] sm:$0xff] %v17550_v61  ;;  %3143 = vrot.lane.b32.xlu1 %v17550_v61, %s20831_s23 }
 0x27c   : > { %20925 = vst [vmem:[#allocation19_spill] sm:$0xff] %v17553_v9  ;;  %3141 = vrot.lane.b32.xlu0 %v17553_v9, %s20831_s23  ;;  %v13470_v52 = vpop.f32.mrb[28].mxu0 }
 0x27d   : > { %v17560_v50 = vadd.f32 %v17416_v7, %v13470_v52  ;;  %v2377_v34 = vpop.f32.mrb[29].mxu0 }
 0x27e   : > { %v17563_v31 = vadd.f32 %v17418_v60, %v2377_v34 }
 0x27f   : > { %20926 = vst [vmem:[#allocation21_spill] sm:$0xff] %v17560_v50  ;;  %3147 = vrot.lane.b32.xlu1 %v17560_v50, %s20831_s23 }
 0x280   : > { %20927 = vst [vmem:[#allocation20_spill] sm:$0xff] %v17563_v31  ;;  %3145 = vrot.lane.b32.xlu0 %v17563_v31, %s20831_s23 }
 0x283   : > { %3151 = vrot.lane.b32.xlu1 %v17495_v18, %s20831_s23 }
 0x284   : > { %3149 = vrot.lane.b32.xlu0 %v17497_v30, %s20831_s23 }
 0x297   : > { %v3447_v45 = vpop.permute.xlu1 %3446 }
 0x298   : > { %v3478_v0 = vsel %vm3265_vm10, %v3447_v45, 0  ;;  %v3445_v20 = vpop.permute.xlu0 %3444 }
 0x299   : > { %v17574_v53 = vand.u32 4294901760, %v3478_v0  ;;  %v3476_v40 = vsel %vm3265_vm10, %v3445_v20, 0 }
 0x29a   : > { %v17577_v55 = vand.u32 4294901760, %v3476_v40 }
 0x29b   : > { %v17580_v33 = vsub.f32 %v3478_v0, %v17574_v53  ;;  %v3451_v7 = vpop.permute.xlu1 %3450 }
 0x29c   : > { %v17583_v60 = vsub.f32 %v3476_v40, %v17577_v55  ;;  %v3482_v36 = vsel %vm3265_vm10, %v3451_v7, 0  ;;  %v3449_v10 = vpop.permute.xlu0 %3448 }
 0x29d   : > { %v20632_v43 = vand.u32 4294901760, %v17580_v33  ;;  %v17587_v13 = vand.u32 4294901760, %v3482_v36  ;;  %v3480_v3 = vsel %vm3265_vm10, %v3449_v10, 0 }
 0x29e   : > { %v20634_v29 = vand.u32 4294901760, %v17583_v60  ;;  %v17591_v44 = vand.u32 4294901760, %v3480_v3 }
 0x29f   : > { %v3591_v8 = vsub.f32 %v17580_v33, %v20632_v43  ;;  %v17597_v6 = vsub.f32 %v3482_v36, %v17587_v13  ;;  %v3455_v22 = vpop.permute.xlu1 %3454 }
 0x2a0   : > { %v17600_v28 = vsub.f32 %v3480_v3, %v17591_v44  ;;  %v3486_v11 = vsel %vm3265_vm10, %v3455_v22, 0  ;;  %v3453_v63 = vpop.permute.xlu0 %3452  ;;  %v3581_v5 = vsub.f32 %v17583_v60, %v20634_v29 }
 0x2a1   : > { %v20631_v51 = vand.u32 4294901760, %v17597_v6  ;;  %v17607_v16 = vand.u32 4294901760, %v3486_v11  ;;  %v3484_v38 = vsel %vm3265_vm10, %v3453_v63, 0  ;;  %v3592_v0 = vand.u32 4294901760, %v3591_v8 }
 0x2a2   : > { %v20633_v52 = vand.u32 4294901760, %v17600_v28  ;;  %v17611_v34 = vand.u32 4294901760, %v3484_v38  ;;  %v3582_v45 = vand.u32 4294901760, %v3581_v5 }
 0x2a3   : > { %v17614_v20 = vsub.f32 %v3486_v11, %v17607_v16  ;;  %v3459_v40 = vpop.permute.xlu1 %3458  ;;  %v3611_v7 = vsub.f32 %v17597_v6, %v20631_v51 }
 0x2a4   : > { %v17620_v36 = vsub.f32 %v3484_v38, %v17611_v34  ;;  %v3490_v10 = vsel %vm3265_vm10, %v3459_v40, 0  ;;  %13588 = vmatprep.mubr.f32.mxu1 %v3582_v45  ;;  %v3457_v3 = vpop.permute.xlu0 %3456  ;;  %v3601_v22 = vsub.f32 %v17600_v28, %v20633_v52 }
 0x2a5   : > { %v20635_v8 = vand.u32 4294901760, %v17614_v20  ;;  %v17627_v11 = vand.u32 4294901760, %v3490_v10  ;;  %v3488_v63 = vsel %vm3265_vm10, %v3457_v3, 0  ;;  %13589 = vmatmul.mubr.f32.vlgmr.msra.gmra.mrb[16].mxu1 %v3592_v0  ;;  %v3612_v43 = vand.u32 4294901760, %v3611_v7 }
 0x2a6   : > { %v20638_v5 = vand.u32 4294901760, %v17620_v36  ;;  %v17631_v51 = vand.u32 4294901760, %v3488_v63  ;;  %13613 = vmatpush3.msra.mxu1 %v17452_v24  ;;  %v3602_v38 = vand.u32 4294901760, %v3601_v22 }
 0x2a7   : > { %v17635_v45 = vsub.f32 %v3490_v10, %v17627_v11  ;;  %v3463_v40 = vpop.permute.xlu1 %3462  ;;  %v3631_v52 = vsub.f32 %v17614_v20, %v20635_v8  ;;  %13638 = vmatprep.subr.mxu1 %v17435_v2 }
 0x2a8   : > { %v17642_v0 = vsub.f32 %v3488_v63, %v17631_v51  ;;  %v3494_v3 = vsel %vm3265_vm10, %v3463_v40, 0  ;;  %13591 = vmatprep.mubr.f32.mxu1 %v3602_v38  ;;  %v3461_v29 = vpop.permute.xlu0 %3460  ;;  %v3621_v24 = vsub.f32 %v17620_v36, %v20638_v5 }
 0x2a9   : > { %v20641_v10 = vand.u32 4294901760, %v17635_v45  ;;  %v17649_v7 = vand.u32 4294901760, %v3494_v3  ;;  %v3492_v22 = vsel %vm3265_vm10, %v3461_v29, 0  ;;  %13592 = vmatmul.mubr.f32.gmra.mrb[18].mxu1 %v3612_v43  ;;  %v3632_v50 = vand.u32 4294901760, %v3631_v52 }
 0x2aa   : > { %v20644_v8 = vand.u32 4294901760, %v17642_v0  ;;  %v17653_v18 = vand.u32 4294901760, %v3492_v22  ;;  %v3622_v63 = vand.u32 4294901760, %v3621_v24 }
 0x2ab   : > { %v17656_v40 = vsub.f32 %v3494_v3, %v17649_v7  ;;  %v3467_v38 = vpop.permute.xlu1 %3466  ;;  %v3651_v5 = vsub.f32 %v17635_v45, %v20641_v10 }
 0x2ac   : > { %v17662_v30 = vsub.f32 %v3492_v22, %v17653_v18  ;;  %v3498_v29 = vsel %vm3265_vm10, %v3467_v38, 0  ;;  %13594 = vmatprep.mubr.f32.mxu1 %v3622_v63  ;;  %v3465_v43 = vpop.permute.xlu0 %3464  ;;  %v3641_v24 = vsub.f32 %v17642_v0, %v20644_v8 }
 0x2ad   : > { %v20647_v3 = vand.u32 4294901760, %v17656_v40  ;;  %v17669_v31 = vand.u32 4294901760, %v3498_v29  ;;  %v3496_v52 = vsel %vm3265_vm10, %v3465_v43, 0  ;;  %13595 = vmatmul.mubr.f32.gmra.mrb[20].mxu1 %v3632_v50  ;;  %v3652_v9 = vand.u32 4294901760, %v3651_v5 }
 0x2ae   : > { %v20650_v10 = vand.u32 4294901760, %v17662_v30  ;;  %v17673_v61 = vand.u32 4294901760, %v3496_v52  ;;  %v3642_v22 = vand.u32 4294901760, %v3641_v24 }
 0x2af   : > { %v17676_v38 = vsub.f32 %v3498_v29, %v17669_v31  ;;  %v3471_v63 = vpop.permute.xlu1 %3470  ;;  %v3671_v8 = vsub.f32 %v17656_v40, %v20647_v3 }
 0x2b0   : > { %v17682_v21 = vsub.f32 %v3496_v52, %v17673_v61  ;;  %v3502_v43 = vsel %vm3265_vm10, %v3471_v63, 0  ;;  %13597 = vmatprep.mubr.f32.mxu1 %v3642_v22  ;;  %v3469_v50 = vpop.permute.xlu0 %3468  ;;  %v3661_v24 = vsub.f32 %v17662_v30, %v20650_v10 }
 0x2b1   : > { %v20653_v29 = vand.u32 4294901760, %v17676_v38  ;;  %v17689_v4 = vand.u32 4294901760, %v3502_v43  ;;  %v3500_v5 = vsel %vm3265_vm10, %v3469_v50, 0  ;;  %13598 = vmatmul.mubr.f32.gmra.mrb[22].mxu1 %v3652_v9  ;;  %v3672_v49 = vand.u32 4294901760, %v3671_v8 }
 0x2b2   : > { %v20655_v3 = vand.u32 4294901760, %v17682_v21  ;;  %v17693_v54 = vand.u32 4294901760, %v3500_v5  ;;  %v3662_v52 = vand.u32 4294901760, %v3661_v24 }
 0x2b3   : > { %v17696_v63 = vsub.f32 %v3502_v43, %v17689_v4  ;;  %v3475_v22 = vpop.permute.xlu1 %3474  ;;  %v3691_v10 = vsub.f32 %v17676_v38, %v20653_v29 }
 0x2b4   : > { %v17702_v59 = vsub.f32 %v3500_v5, %v17693_v54  ;;  %v3506_v50 = vsel %vm3265_vm10, %v3475_v22, 0  ;;  %13600 = vmatprep.mubr.f32.mxu1 %v3662_v52  ;;  %v3473_v9 = vpop.permute.xlu0 %3472  ;;  %v3681_v24 = vsub.f32 %v17682_v21, %v20655_v3 }
 0x2b5   : > { %v20658_v43 = vand.u32 4294901760, %v17696_v63  ;;  %v17709_v56 = vand.u32 4294901760, %v3506_v50  ;;  %v3504_v8 = vsel %vm3265_vm10, %v3473_v9, 0  ;;  %13601 = vmatmul.mubr.f32.gmra.mrb[24].mxu1 %v3672_v49  ;;  %v3692_v52 = vand.u32 4294901760, %v3691_v10 }
 0x2b6   : > { %v3700_v29 = vand.u32 4294901760, %v17702_v59  ;;  %v17713_v1 = vand.u32 4294901760, %v3504_v8  ;;  %v3682_v5 = vand.u32 4294901760, %v3681_v24 }
 0x2b7   : > { %v17716_v22 = vsub.f32 %v3506_v50, %v17709_v56  ;;  %v3711_v3 = vsub.f32 %v17696_v63, %v20658_v43 }
 0x2b8   : > { %v17722_v62 = vsub.f32 %v3504_v8, %v17713_v1  ;;  %13603 = vmatprep.mubr.f32.mxu1 %v3682_v5  ;;  %v3701_v49 = vsub.f32 %v17702_v59, %v3700_v29 }
 0x2b9   : > { %v20659_v9 = vand.u32 4294901760, %v17716_v22  ;;  %13604 = vmatmul.mubr.f32.gmra.mrb[26].mxu1 %v3692_v52  ;;  %v3712_v48 = vand.u32 4294901760, %v3711_v3 }
 0x2ba   : > { %v3720_v24 = vand.u32 4294901760, %v17722_v62  ;;  %v3702_v50 = vand.u32 4294901760, %v3701_v49 }
 0x2bb   : > { %v3731_v10 = vsub.f32 %v17716_v22, %v20659_v9 }
 0x2bc   : > { %13606 = vmatprep.mubr.f32.mxu1 %v3702_v50  ;;  %v3721_v8 = vsub.f32 %v17722_v62, %v3720_v24 }
 0x2bd   : > { %13607 = vmatmul.mubr.f32.gmra.mrb[28].mxu1 %v3712_v48  ;;  %v3732_v43 = vand.u32 4294901760, %v3731_v10 }
 0x2be   : > { %v3722_v5 = vand.u32 4294901760, %v3721_v8 }
 0x2c0   : > { %13609 = vmatprep.mubr.f32.mxu1 %v3722_v5 }
 0x2c1   : > { %13610 = vmatmul.mubr.f32.gmra.mrb[30].mxu1 %v3732_v43 }
 0x2c2   : > { %13614 = vmatprep.mubr.f32.mxu1 %v17577_v55 }
 0x2c5   : > { %13615 = vmatmul.mubr.f32.vlgmr.msra.gmra.mrb[16].mxu1 %v17574_v53 }
 0x2c6   : > { %13639 = vmatpush3.msra.mxu1 %v17435_v2  ;;  %13617 = vmatprep.mubr.f32.mxu1 %v17591_v44 }
 0x2c7   : > { %13664 = vmatprep.subr.mxu1 %v17396_v32 }
 0x2c9   : > { %13618 = vmatmul.mubr.f32.gmra.mrb[18].mxu1 %v17587_v13 }
 0x2ca   : > { %13620 = vmatprep.mubr.f32.mxu1 %v17611_v34 }
 0x2cd   : > { %13621 = vmatmul.mubr.f32.gmra.mrb[20].mxu1 %v17607_v16 }
 0x2ce   : > { %13623 = vmatprep.mubr.f32.mxu1 %v17631_v51 }
 0x2d1   : > { %13624 = vmatmul.mubr.f32.gmra.mrb[22].mxu1 %v17627_v11 }
 0x2d2   : > { %13626 = vmatprep.mubr.f32.mxu1 %v17653_v18 }
 0x2d5   : > { %13627 = vmatmul.mubr.f32.gmra.mrb[24].mxu1 %v17649_v7 }
 0x2d6   : > { %13629 = vmatprep.mubr.f32.mxu1 %v17673_v61 }
 0x2d9   : > { %13630 = vmatmul.mubr.f32.gmra.mrb[26].mxu1 %v17669_v31  ;;  %v3124_v2 = vpop.permute.xlu1 %3123 }
 0x2da   : > { %v3170_v48 = vsub.f32 %v17420_v15, %v3124_v2  ;;  %13632 = vmatprep.mubr.f32.mxu1 %v17693_v54  ;;  %v3122_v3 = vpop.permute.xlu0 %3121 }
 0x2db   : > { %v3169_v43 = vsub.f32 %v17424_v25, %v3122_v3 }
 0x2dc   : > { %v3186_v52 = vmul.f32 %v3170_v48, %v3170_v48 }
 0x2dd   : > { %v3185_v49 = vmul.f32 %v3169_v43, %v3169_v43  ;;  %13633 = vmatmul.mubr.f32.gmra.mrb[28].mxu1 %v17689_v4  ;;  %v3128_v50 = vpop.permute.xlu1 %3127 }
 0x2de   : > { %v3172_v10 = vsub.f32 %v17428_v19, %v3128_v50  ;;  %13635 = vmatprep.mubr.f32.mxu1 %v17713_v1  ;;  %v3126_v8 = vpop.permute.xlu0 %3125  ;;  %3219 = vrot.lane.b32.xlu1 %v3186_v52, %s16377_s17 }
 0x2df   : > { %v3171_v5 = vsub.f32 %v17432_v35, %v3126_v8  ;;  %3217 = vrot.lane.b32.xlu0 %v3185_v49, %s16377_s17 }
 0x2e0   : > { %v3188_v2 = vmul.f32 %v3172_v10, %v3172_v10 }
 0x2e1   : > { %v3187_v9 = vmul.f32 %v3171_v5, %v3171_v5  ;;  %13636 = vmatmul.mubr.f32.gmra.mrb[30].mxu1 %v17709_v56  ;;  %v3132_v48 = vpop.permute.xlu1 %3131 }
 0x2e2   : > { %v3174_v3 = vsub.f32 %v17442_v47, %v3132_v48  ;;  %13640 = vmatprep.mubr.f32.mxu1 %v17583_v60  ;;  %v3130_v43 = vpop.permute.xlu0 %3129  ;;  %3223 = vrot.lane.b32.xlu1 %v3188_v2, %s16377_s17 }
 0x2e3   : > { %v3173_v50 = vsub.f32 %v17446_v37, %v3130_v43  ;;  %3221 = vrot.lane.b32.xlu0 %v3187_v9, %s16377_s17 }
 0x2e4   : > { %v3190_v52 = vmul.f32 %v3174_v3, %v3174_v3 }
 0x2e5   : > { %v3189_v8 = vmul.f32 %v3173_v50, %v3173_v50  ;;  %13641 = vmatmul.mubr.f32.vlgmr.msra.gmra.mrb[16].mxu1 %v17580_v33  ;;  %v3136_v49 = vpop.permute.xlu1 %3135 }
 0x2e6   : > { %13665 = vmatpush3.msra.mxu1 %v17396_v32  ;;  %v3176_v10 = vsub.f32 %v17454_v23, %v3136_v49  ;;  %13643 = vmatprep.mubr.f32.mxu1 %v17600_v28  ;;  %v3134_v5 = vpop.permute.xlu0 %3133 }
 0x2e7   : > { %v3175_v48 = vsub.f32 %v17458_v27, %v3134_v5  ;;  %3227 = vrot.lane.b32.xlu1 %v3190_v52, %s16377_s17  ;;  %3225 = vrot.lane.b32.xlu0 %v3189_v8, %s16377_s17 }
 0x2e8   : > { %v3192_v2 = vmul.f32 %v3176_v10, %v3176_v10  ;;  %13690 = vmatprep.subr.mxu1 %v17440_v17 }
 0x2e9   : > { %v3191_v9 = vmul.f32 %v3175_v48, %v3175_v48  ;;  %13644 = vmatmul.mubr.f32.gmra.mrb[18].mxu1 %v17597_v6  ;;  %v3140_v3 = vpop.permute.xlu1 %3139 }
 0x2ea   : > { %v3178_v43 = vsub.f32 %v17463_v12, %v3140_v3  ;;  %13646 = vmatprep.mubr.f32.mxu1 %v17620_v36  ;;  %v3138_v50 = vpop.permute.xlu0 %3137 }
 0x2eb   : > { %v3177_v49 = vsub.f32 %v17467_v42, %v3138_v50  ;;  %3231 = vrot.lane.b32.xlu1 %v3192_v2, %s16377_s17  ;;  %3229 = vrot.lane.b32.xlu0 %v3191_v9, %s16377_s17 }
 0x2ec   : > { %v3194_v52 = vmul.f32 %v3178_v43, %v3178_v43 }
 0x2ed   : > { %v3193_v8 = vmul.f32 %v3177_v49, %v3177_v49  ;;  %13647 = vmatmul.mubr.f32.gmra.mrb[20].mxu1 %v17614_v20  ;;  %v3144_v10 = vpop.permute.xlu1 %3143 }
 0x2ee   : > { %v3180_v5 = vsub.f32 %v17471_v41, %v3144_v10  ;;  %13649 = vmatprep.mubr.f32.mxu1 %v17642_v0  ;;  %v3142_v48 = vpop.permute.xlu0 %3141 }
 0x2ef   : > { %v3179_v3 = vsub.f32 %v17475_v39, %v3142_v48  ;;  %3235 = vrot.lane.b32.xlu1 %v3194_v52, %s16377_s17  ;;  %3233 = vrot.lane.b32.xlu0 %v3193_v8, %s16377_s17 }
 0x2f0   : > { %v3196_v50 = vmul.f32 %v3180_v5, %v3180_v5 }
 0x2f1   : > { %v3195_v2 = vmul.f32 %v3179_v3, %v3179_v3  ;;  %13650 = vmatmul.mubr.f32.gmra.mrb[22].mxu1 %v17635_v45  ;;  %v3148_v9 = vpop.permute.xlu1 %3147 }
 0x2f2   : > { %v3182_v43 = vsub.f32 %v17479_v14, %v3148_v9  ;;  %13652 = vmatprep.mubr.f32.mxu1 %v17662_v30  ;;  %v3146_v49 = vpop.permute.xlu0 %3145 }
 0x2f3   : > { %3239 = vrot.lane.b32.xlu1 %v3196_v50, %s16377_s17  ;;  %v3181_v10 = vsub.f32 %v17483_v57, %v3146_v49  ;;  %3237 = vrot.lane.b32.xlu0 %v3195_v2, %s16377_s17  ;;  %v20928_v2 = vand.u32 4294901760, %v17583_v60  ;;  %v20934_v60 = vand.u32 4294901760, %v17642_v0 }
 0x2f4   : > { %v3198_v48 = vmul.f32 %v3182_v43, %v3182_v43  ;;  %v20929_v43 = vand.u32 4294901760, %v17580_v33  ;;  %v20935_v33 = vand.u32 4294901760, %v17635_v45 }
 0x2f5   : > { %v3197_v52 = vmul.f32 %v3181_v10, %v3181_v10  ;;  %13653 = vmatmul.mubr.f32.gmra.mrb[24].mxu1 %v17656_v40  ;;  %v3152_v8 = vpop.permute.xlu1 %3151  ;;  %v20930_v10 = vand.u32 4294901760, %v17600_v28  ;;  %v20937_v28 = vand.u32 4294901760, %v17656_v40 }
 0x2f6   : > { %v3184_v5 = vsub.f32 %v17487_v58, %v3152_v8  ;;  %13655 = vmatprep.mubr.f32.mxu1 %v17682_v21  ;;  %v3150_v3 = vpop.permute.xlu0 %3149  ;;  %v20933_v8 = vand.u32 4294901760, %v17614_v20  ;;  %v20940_v20 = vand.u32 4294901760, %v17696_v63 }
 0x2f7   : > { %3243 = vrot.lane.b32.xlu1 %v3198_v48, %s16377_s17  ;;  %v3183_v9 = vsub.f32 %v17491_v46, %v3150_v3  ;;  %3241 = vrot.lane.b32.xlu0 %v3197_v52, %s16377_s17  ;;  %v20931_v48 = vand.u32 4294901760, %v17597_v6  ;;  %v20932_v52 = vand.u32 4294901760, %v17620_v36  ;;  %v20938_v6 = vand.u32 4294901760, %v17682_v21 }
 0x2f8   : > { %v3200_v50 = vmul.f32 %v3184_v5, %v3184_v5  ;;  %v20939_v36 = vand.u32 4294901760, %v17676_v38  ;;  %v20941_v21 = vand.u32 4294901760, %v17716_v22 }
 0x2f9   : > { %v3199_v49 = vmul.f32 %v3183_v9, %v3183_v9  ;;  %13656 = vmatmul.mubr.f32.gmra.mrb[26].mxu1 %v17676_v38  ;;  %v4603_v38 = vsel %vm3265_vm10, %v17503_v26, 0  ;;  %v20944_v26 = vld [vmem:[#allocation28_spill] sm:$0xff] }
 0x2fa   : > { %13658 = vmatprep.mubr.f32.mxu1 %v17702_v59 }
 0x2fb   : > { %3247 = vrot.lane.b32.xlu1 %v3200_v50, %s16377_s17  ;;  %3245 = vrot.lane.b32.xlu0 %v3199_v49, %s16377_s17 }
 0x2fd   : > { %13659 = vmatmul.mubr.f32.gmra.mrb[28].mxu1 %v17696_v63 }
 0x2fe   : > { %13661 = vmatprep.mubr.f32.mxu1 %v17722_v62 }
 0x301   : > { %13662 = vmatmul.mubr.f32.gmra.mrb[30].mxu1 %v17716_v22 }
 0x302   : > { %13666 = vmatprep.mubr.f32.mxu1 %v20928_v2 }
 0x305   : > { %13667 = vmatmul.mubr.f32.vlgmr.msra.gmra.mrb[16].mxu1 %v20929_v43 }
 0x306   : > { %13691 = vmatpush3.msra.mxu1 %v17440_v17  ;;  %13669 = vmatprep.mubr.f32.mxu1 %v20930_v10  ;;  %v20936_v17 = vand.u32 4294901760, %v17662_v30  ;;  %v3426_v30 = vld [vmem:[%s20550_s3] sm:$0x7] }
 0x307   : > { %13716 = vmatprep.subr.mxu1 %v17396_v32  ;;  %v4636_v45 = vsel %vm3508_vm9, %v3426_v30, 0  ;;  %v20946_v10 = vld [vmem:[#allocation11_spill] sm:$0xff] }
 0x308   : > { %v17842_v0 = vand.u32 4294901760, %v4636_v45 }
 0x309   : > { %13670 = vmatmul.mubr.f32.gmra.mrb[18].mxu1 %v20931_v48  ;;  %v4613_v48 = vsel %vm3265_vm10, %v20946_v10, 0  ;;  %v20951_v10 = vld [vmem:[#allocation19_spill] sm:$0xff] }
 0x30a   : > { %13672 = vmatprep.mubr.f32.mxu1 %v20932_v52 }
 0x30d   : > { %13673 = vmatmul.mubr.f32.gmra.mrb[20].mxu1 %v20933_v8 }
 0x30e   : > { %13675 = vmatprep.mubr.f32.mxu1 %v20934_v60  ;;  %v20947_v60 = vld [vmem:[#allocation12_spill] sm:$0xff] }
 0x311   : > { %13676 = vmatmul.mubr.f32.gmra.mrb[22].mxu1 %v20935_v33 }
 0x312   : > { %13678 = vmatprep.mubr.f32.mxu1 %v20936_v17 }
 0x315   : > { %13679 = vmatmul.mubr.f32.gmra.mrb[24].mxu1 %v20937_v28 }
 0x316   : > { %13681 = vmatprep.mubr.f32.mxu1 %v20938_v6 }
 0x319   : > { %13682 = vmatmul.mubr.f32.gmra.mrb[26].mxu1 %v20939_v36  ;;  %v17926_v36 = vand.u32 4294901760, %v4613_v48 }
 0x31a   : > { %13684 = vmatprep.mubr.f32.mxu1 %v3700_v29  ;;  %v17884_v29 = vand.u32 4294901760, %v4603_v38 }
 0x31c   : > { %v17897_v5 = vsub.f32 %v4603_v38, %v17884_v29 }
 0x31d   : > { %13685 = vmatmul.mubr.f32.gmra.mrb[28].mxu1 %v20940_v20 }
 0x31e   : > { %13687 = vmatprep.mubr.f32.mxu1 %v3720_v24  ;;  %v20666_v33 = vand.u32 4294901760, %v17897_v5 }
 0x320   : > { %v4707_v38 = vsub.f32 %v17897_v5, %v20666_v33 }
 0x321   : > { %13688 = vmatmul.mubr.f32.gmra.mrb[30].mxu1 %v20941_v21 }
 0x322   : > { %13692 = vmatprep.mubr.f32.mxu1 %v17577_v55 }
 0x325   : > { %13693 = vmatmul.mubr.f32.vlgmr.msra.gmra.mrb[16].mxu1 %v17574_v53 }
 0x326   : > { %13717 = vmatpush3.msra.mxu1 %v17396_v32  ;;  %13695 = vmatprep.mubr.f32.mxu1 %v17591_v44  ;;  %v17857_v32 = vsub.f32 %v4636_v45, %v17842_v0 }
 0x327   : > { %13742 = vmatprep.subr.mxu1 %v17842_v0 }
 0x328   : > { %v17862_v62 = vand.u32 4294901760, %v17857_v32 }
 0x329   : > { %13696 = vmatmul.mubr.f32.gmra.mrb[18].mxu1 %v17587_v13 }
 0x32a   : > { %13698 = vmatprep.mubr.f32.mxu1 %v17611_v34  ;;  %v4868_v59 = vsub.f32 %v17857_v32, %v17862_v62 }
 0x32c   : > { %v17870_v40 = vand.u32 4294901760, %v4868_v59  ;;  %v20948_v59 = vld [vmem:[#allocation10_spill] sm:$0xff] }
 0x32d   : > { %13699 = vmatmul.mubr.f32.gmra.mrb[20].mxu1 %v17607_v16 }
 0x32e   : > { %13701 = vmatprep.mubr.f32.mxu1 %v17631_v51 }
 0x331   : > { %13702 = vmatmul.mubr.f32.gmra.mrb[22].mxu1 %v17627_v11 }
 0x332   : > { %13704 = vmatprep.mubr.f32.mxu1 %v17653_v18 }
 0x335   : > { %13705 = vmatmul.mubr.f32.gmra.mrb[24].mxu1 %v17649_v7 }
 0x336   : > { %13707 = vmatprep.mubr.f32.mxu1 %v17673_v61 }
 0x339   : > { %13708 = vmatmul.mubr.f32.gmra.mrb[26].mxu1 %v17669_v31 }
 0x33a   : > { %13710 = vmatprep.mubr.f32.mxu1 %v17693_v54 }
 0x33d   : > { %13711 = vmatmul.mubr.f32.gmra.mrb[28].mxu1 %v17689_v4 }
 0x33e   : > { %13713 = vmatprep.mubr.f32.mxu1 %v17713_v1 }
 0x341   : > { %13714 = vmatmul.mubr.f32.gmra.mrb[30].mxu1 %v17709_v56 }
 0x342   : > { %13718 = vmatprep.mubr.f32.mxu1 %v17577_v55  ;;  %v20942_v55 = vld [vmem:[#allocation27_spill] sm:$0xff] }
 0x345   : > { %13719 = vmatmul.mubr.f32.vlgmr.msra.gmra.mrb[16].mxu1 %v17574_v53  ;;  %v4605_v53 = vsel %vm3265_vm10, %v20942_v55, 0  ;;  %v20949_v55 = vld [vmem:[#allocation16_spill] sm:$0xff] }
 0x346   : > { %13743 = vmatpush3.msra.mxu1 %v17842_v0  ;;  %13721 = vmatprep.mubr.f32.mxu1 %v17591_v44  ;;  %v20943_v44 = vld [vmem:[#allocation29_spill] sm:$0xff]  ;;  %v17890_v24 = vand.u32 4294901760, %v4605_v53 }
 0x347   : > { %13768 = vmatprep.subr.mxu1 %v17870_v40  ;;  %v4607_v22 = vsel %vm3265_vm10, %v20943_v44, 0 }
 0x348   : > { %v17899_v3 = vand.u32 4294901760, %v4607_v22 }
 0x349   : > { %13722 = vmatmul.mubr.f32.gmra.mrb[18].mxu1 %v17587_v13 }
 0x34a   : > { %13724 = vmatprep.mubr.f32.mxu1 %v17611_v34  ;;  %v17916_v8 = vsub.f32 %v4607_v22, %v17899_v3 }
 0x34d   : > { %13725 = vmatmul.mubr.f32.gmra.mrb[20].mxu1 %v17607_v16  ;;  %v4609_v16 = vsel %vm3265_vm10, %v20944_v26, 0 }
 0x34e   : > { %13727 = vmatprep.mubr.f32.mxu1 %v17631_v51  ;;  %v17903_v49 = vand.u32 4294901760, %v4609_v16 }
 0x350   : > { %v3220_v63 = vpop.permute.xlu1 %3219  ;;  %v17922_v17 = vsub.f32 %v4609_v16, %v17903_v49 }
 0x351   : > { %13728 = vmatmul.mubr.f32.gmra.mrb[22].mxu1 %v17627_v11  ;;  %v3218_v13 = vpop.permute.xlu0 %3217  ;;  %v3269_v34 = vsel %vm3265_vm10, %v3220_v63, 0.0  ;;  %v20945_v11 = vld [vmem:[#allocation13_spill] sm:$0xff] }
 0x352   : > { %13730 = vmatprep.mubr.f32.mxu1 %v17653_v18  ;;  %3270 = vadd.xlane.f32.xlu1 %v3269_v34  ;;  %v3266_v51 = vsel %vm3265_vm10, %v3218_v13, 0.0  ;;  %v4611_v9 = vsel %vm3265_vm10, %v20945_v11, 0  ;;  %v17907_v18 = vsub.f32 %v4605_v53, %v17890_v24  ;;  %v4619_v53 = vsel %vm3265_vm10, %v20949_v55, 0  ;;  %v20950_v11 = vld [vmem:[#allocation17_spill] sm:$0xff] }
 0x353   : > { %3267 = vadd.xlane.f32.xlu0 %v3266_v51  ;;  %v17913_v52 = vand.u32 4294901760, %v4611_v9  ;;  %v20661_v22 = vand.u32 4294901760, %v17922_v17  ;;  %v17950_v34 = vsub.f32 %v4613_v48, %v17926_v36  ;;  %v4623_v48 = vsel %vm3265_vm10, %v20951_v10, 0  ;;  %v20954_v10 = vld [vmem:[#allocation26_spill] sm:$0xff] }
 0x354   : > { %v3224_v50 = vpop.permute.xlu1 %3223  ;;  %v20665_v6 = vand.u32 4294901760, %v17907_v18 }
 0x355   : > { %13731 = vmatmul.mubr.f32.gmra.mrb[24].mxu1 %v17649_v7  ;;  %v3222_v2 = vpop.permute.xlu0 %3221  ;;  %v4615_v7 = vsel %vm3265_vm10, %v20947_v60, 0  ;;  %v3275_v20 = vsel %vm3265_vm10, %v3224_v50, 0.0  ;;  %v17932_v45 = vsub.f32 %v4611_v9, %v17913_v52  ;;  %v4621_v9 = vsel %vm3265_vm10, %v20950_v11, 0 }
 0x356   : > { %13733 = vmatprep.mubr.f32.mxu1 %v17673_v61  ;;  %v3272_v43 = vsel %vm3265_vm10, %v3222_v2, 0.0  ;;  %v17934_v21 = vand.u32 4294901760, %v4615_v7  ;;  %v4717_v13 = vsub.f32 %v17907_v18, %v20665_v6  ;;  %v17963_v2 = vand.u32 4294901760, %v4619_v53 }
 0x357   : > { %3273 = vadd.xlane.f32.xlu0 %v3272_v43  ;;  %v20660_v50 = vand.u32 4294901760, %v17932_v45  ;;  %v4708_v43 = vand.u32 4294901760, %v4707_v38  ;;  %v17991_v11 = vand.u32 4294901760, %v4623_v48 }
 0x358   : > { %v4718_v38 = vand.u32 4294901760, %v4717_v13 }
 0x359   : > { %v3228_v61 = vpop.permute.xlu1 %3227  ;;  %13734 = vmatmul.mubr.f32.gmra.mrb[26].mxu1 %v17669_v31  ;;  %v3226_v28 = vpop.permute.xlu0 %3225  ;;  %v4617_v31 = vsel %vm3265_vm10, %v20948_v59, 0  ;;  %v20663_v59 = vand.u32 4294901760, %v17950_v34 }
 0x35a   : > { %13736 = vmatprep.mubr.f32.mxu1 %v17693_v54  ;;  %v3278_v30 = vsel %vm3265_vm10, %v3226_v28, 0.0  ;;  %v20664_v54 = vand.u32 4294901760, %v17916_v8  ;;  %v3281_v26 = vsel %vm3265_vm10, %v3228_v61, 0.0  ;;  %v17955_v51 = vand.u32 4294901760, %v4617_v31 }
 0x35b   : > { %3276 = vadd.xlane.f32.xlu0 %v3275_v20  ;;  %3279 = vadd.xlane.f32.xlu1 %v3278_v30  ;;  %v4737_v61 = vsub.f32 %v17922_v17, %v20661_v22  ;;  %v17974_v28 = vand.u32 4294901760, %v4621_v9 }
 0x35c   : > { %v17980_v55 = vsub.f32 %v4617_v31, %v17955_v51 }
 0x35d   : > { %v3232_v63 = vpop.permute.xlu1 %3231  ;;  %13737 = vmatmul.mubr.f32.gmra.mrb[28].mxu1 %v17689_v4  ;;  %v3230_v44 = vpop.permute.xlu0 %3229  ;;  %v17958_v4 = vsub.f32 %v4615_v7, %v17934_v21  ;;  %v17998_v22 = vsub.f32 %v4621_v9, %v17974_v28 }
 0x35e   : > { %13739 = vmatprep.mubr.f32.mxu1 %v17713_v1  ;;  %v3284_v16 = vsel %vm3265_vm10, %v3230_v44, 0.0  ;;  %v4727_v1 = vsub.f32 %v17916_v8, %v20664_v54  ;;  %v3287_v20 = vsel %vm3265_vm10, %v3232_v63, 0.0  ;;  %v20952_v63 = vld [vmem:[#allocation18_spill] sm:$0xff] }
 0x35f   : > { %3282 = vadd.xlane.f32.xlu0 %v3281_v26  ;;  %3285 = vadd.xlane.f32.xlu1 %v3284_v16  ;;  %v20662_v44 = vand.u32 4294901760, %v17958_v4  ;;  %v17987_v26 = vsub.f32 %v4619_v53, %v17963_v2  ;;  %v4625_v16 = vsel %vm3265_vm10, %v20952_v63, 0  ;;  %v4757_v63 = vsub.f32 %v17950_v34, %v20663_v59 }
 0x360   : > { %v4728_v13 = vand.u32 4294901760, %v4727_v1 }
 0x361   : > { %v3236_v60 = vpop.permute.xlu1 %3235  ;;  %13740 = vmatmul.mubr.f32.gmra.mrb[30].mxu1 %v17709_v56  ;;  %v3234_v7 = vpop.permute.xlu0 %3233  ;;  %v4747_v56 = vsub.f32 %v17932_v45, %v20660_v50  ;;  %v4738_v50 = vand.u32 4294901760, %v4737_v61  ;;  %v4767_v9 = vsub.f32 %v17958_v4, %v20662_v44  ;;  %v18013_v61 = vsub.f32 %v4623_v48, %v17991_v11 }
 0x362   : > { %13744 = vmatprep.mubr.f32.mxu1 %v4708_v43  ;;  %v3290_v30 = vsel %vm3265_vm10, %v3234_v7, 0.0  ;;  %v20953_v43 = vld [vmem:[#allocation20_spill] sm:$0xff]  ;;  %v4631_v7 = vsel %vm3265_vm10, %v20954_v10, 0  ;;  %v3293_v53 = vsel %vm3265_vm10, %v3236_v60, 0.0  ;;  %v20955_v60 = vld [vmem:[#allocation21_spill] sm:$0xff] }
 0x363   : > { %3288 = vadd.xlane.f32.xlu0 %v3287_v20  ;;  %3291 = vadd.xlane.f32.xlu1 %v3290_v30  ;;  %v4627_v31 = vsel %vm3265_vm10, %v20953_v43, 0  ;;  %v18006_v43 = vand.u32 4294901760, %v4625_v16  ;;  %v18023_v59 = vand.u32 4294901760, %v4631_v7 }
 0x364   : > { %v18017_v10 = vand.u32 4294901760, %v4627_v31 }
 0x365   : > { %v3240_v20 = vpop.permute.xlu1 %3239  ;;  %13745 = vmatmul.mubr.f32.vlgmr.msra.gmra.mrb[16].mxu1 %v4718_v38  ;;  %v3238_v30 = vpop.permute.xlu0 %3237  ;;  %v4748_v38 = vand.u32 4294901760, %v4747_v56  ;;  %v18028_v6 = vsub.f32 %v4625_v16, %v18006_v43  ;;  %v18055_v58 = vsub.f32 %v4631_v7, %v18023_v59 }
 0x366   : > { %13769 = vmatpush3.msra.mxu1 %v17870_v40  ;;  %13747 = vmatprep.mubr.f32.mxu1 %v4728_v13  ;;  %v3296_v1 = vsel %vm3265_vm10, %v3238_v30, 0.0  ;;  %v20667_v40 = vand.u32 4294901760, %v17980_v55  ;;  %v4629_v13 = vsel %vm3265_vm10, %v20955_v60, 0  ;;  %v20668_v30 = vand.u32 4294901760, %v17987_v26 }
 0x367   : > { %3294 = vadd.xlane.f32.xlu0 %v3293_v53  ;;  %3297 = vadd.xlane.f32.xlu1 %v3296_v1  ;;  %v20956_v53 = vld [vmem:[#allocation8_spill] sm:$0xff]  ;;  %v3299_v48 = vsel %vm3265_vm10, %v3240_v20, 0.0  ;;  %v4758_v60 = vand.u32 4294901760, %v4757_v63  ;;  %v18030_v33 = vand.u32 4294901760, %v4629_v13  ;;  %v4768_v20 = vand.u32 4294901760, %v4767_v9 }
 0x368   : > { %13794 = vmatprep.subr.mxu1 %v17857_v32  ;;  %v4633_v56 = vsel %vm3265_vm10, %v20956_v53, 0 }
 0x369   : > { %v3244_v1 = vpop.permute.xlu1 %3243  ;;  %13748 = vmatmul.mubr.f32.gmra.mrb[18].mxu1 %v4738_v50  ;;  %v3242_v44 = vpop.permute.xlu0 %3241  ;;  %v4777_v50 = vsub.f32 %v17980_v55, %v20667_v40  ;;  %v18048_v53 = vsub.f32 %v4629_v13, %v18030_v33 }
 0x36a   : > { %13750 = vmatprep.mubr.f32.mxu1 %v4748_v38  ;;  %v3302_v54 = vsel %vm3265_vm10, %v3242_v44, 0.0  ;;  %v18037_v38 = vsub.f32 %v4627_v31, %v18017_v10  ;;  %v4787_v44 = vsub.f32 %v17987_v26, %v20668_v30  ;;  %v20957_v30 = vand.u32 4294901760, %v17998_v22 }
 0x36b   : > { %3300 = vadd.xlane.f32.xlu0 %v3299_v48  ;;  %3303 = vadd.xlane.f32.xlu1 %v3302_v54  ;;  %v18043_v48 = vand.u32 4294901760, %v4633_v56  ;;  %v3305_v54 = vsel %vm3265_vm10, %v3244_v1, 0.0  ;;  %v4778_v9 = vand.u32 4294901760, %v4777_v50  ;;  %v20958_v1 = vand.u32 4294901760, %v18013_v61 }
 0x36c   : > { %v4797_v16 = vsub.f32 %v17998_v22, %v20957_v30  ;;  %v4826_v13 = vand.u32 4294901760, %v18037_v38 }
 0x36d   : > { %13751 = vmatmul.mubr.f32.gmra.mrb[20].mxu1 %v4758_v60  ;;  %v3246_v63 = vpop.permute.xlu0 %3245  ;;  %v3248_v31 = vpop.permute.xlu1 %3247  ;;  %v4816_v60 = vand.u32 4294901760, %v18028_v6  ;;  %v18063_v50 = vsub.f32 %v4633_v56, %v18043_v48 }
 0x36e   : > { %13753 = vmatprep.mubr.f32.mxu1 %v4768_v20  ;;  %v3308_v40 = vsel %vm3265_vm10, %v3246_v63, 0.0  ;;  %v4788_v20 = vand.u32 4294901760, %v4787_v44  ;;  %v4807_v63 = vsub.f32 %v18013_v61, %v20958_v1  ;;  %v4798_v30 = vand.u32 4294901760, %v4797_v16 }
 0x36f   : > { %3306 = vadd.xlane.f32.xlu0 %v3305_v54  ;;  %3309 = vadd.xlane.f32.xlu1 %v3308_v40  ;;  %v3311_v40 = vsel %vm3265_vm10, %v3248_v31, 0.0  ;;  %v4817_v7 = vsub.f32 %v18028_v6, %v4816_v60  ;;  %v4836_v44 = vand.u32 4294901760, %v18048_v53  ;;  %v4827_v1 = vsub.f32 %v18037_v38, %v4826_v13 }
 0x370   : > { %v4808_v54 = vand.u32 4294901760, %v4807_v63  ;;  %v4856_v16 = vand.u32 4294901760, %v18063_v50 }
 0x371   : > { %13754 = vmatmul.mubr.f32.gmra.mrb[22].mxu1 %v4778_v9  ;;  %v4846_v9 = vand.u32 4294901760, %v18055_v58  ;;  %v4818_v31 = vand.u32 4294901760, %v4817_v7  ;;  %v4837_v56 = vsub.f32 %v18048_v53, %v4836_v44 }
 0x372   : > { %13756 = vmatprep.mubr.f32.mxu1 %v4788_v20  ;;  %v4828_v20 = vand.u32 4294901760, %v4827_v1 }
 0x373   : > { %3312 = vadd.xlane.f32.xlu0 %v3311_v40  ;;  %v4847_v63 = vsub.f32 %v18055_v58, %v4846_v9  ;;  %v4838_v40 = vand.u32 4294901760, %v4837_v56  ;;  %v20960_v56 = vand.u32 4294901760, %v17907_v18 }
 0x375   : > { %13757 = vmatmul.mubr.f32.gmra.mrb[24].mxu1 %v4798_v30  ;;  %v4857_v30 = vsub.f32 %v18063_v50, %v4856_v16 }
 0x376   : > { %13759 = vmatprep.mubr.f32.mxu1 %v4808_v54  ;;  %v4848_v54 = vand.u32 4294901760, %v4847_v63  ;;  %v20962_v63 = vand.u32 4294901760, %v17922_v17 }
 0x377   : > { %v4858_v7 = vand.u32 4294901760, %v4857_v30  ;;  %v20964_v30 = vand.u32 4294901760, %v17950_v34 }
 0x379   : > { %13760 = vmatmul.mubr.f32.gmra.mrb[26].mxu1 %v4818_v31  ;;  %v20959_v31 = vand.u32 4294901760, %v17897_v5 }
 0x37a   : > { %13762 = vmatprep.mubr.f32.mxu1 %v4828_v20  ;;  %v20961_v20 = vand.u32 4294901760, %v17916_v8 }
 0x37d   : > { %13763 = vmatmul.mubr.f32.gmra.mrb[28].mxu1 %v4838_v40  ;;  %v20963_v40 = vand.u32 4294901760, %v17932_v45 }
 0x37e   : > { %13765 = vmatprep.mubr.f32.mxu1 %v4848_v54 }
 0x381   : > { %13766 = vmatmul.mubr.f32.gmra.mrb[30].mxu1 %v4858_v7  ;;  %v18255_v7 = vld [vmem:[%s20552_s5] ss:$0 sm:$0xff] }
 0x382   : > { %13770 = vmatprep.mubr.f32.mxu1 %v17884_v29 }
 0x385   : > { %13771 = vmatmul.mubr.f32.vlgmr.msra.gmra.mrb[16].mxu1 %v17890_v24 }
 0x386   : > { %13795 = vmatpush3.msra.mxu1 %v17857_v32  ;;  %13773 = vmatprep.mubr.f32.mxu1 %v17899_v3  ;;  %v18104_v32 = vld [vmem:[%s20555_s8] sm:$0xff] }
 0x387   : > { %13820 = vmatprep.subr.mxu1 %v17842_v0  ;;  %v18108_v1 = vand.u32 4294901760, %v18104_v32 }
 0x389   : > { %13774 = vmatmul.mubr.f32.gmra.mrb[18].mxu1 %v17903_v49  ;;  %13898 = vmatprep.subr.mxu0 %v18108_v1 }
 0x38a   : > { %13776 = vmatprep.mubr.f32.mxu1 %v17913_v52  ;;  %13899 = vmatpush3.msra.mxu0 %v18108_v1 }
 0x38d   : > { %13777 = vmatmul.mubr.f32.gmra.mrb[20].mxu1 %v17926_v36 }
 0x38e   : > { %13779 = vmatprep.mubr.f32.mxu1 %v17934_v21 }
 0x391   : > { %13780 = vmatmul.mubr.f32.gmra.mrb[22].mxu1 %v17955_v51 }
 0x392   : > { %13782 = vmatprep.mubr.f32.mxu1 %v17963_v2 }
 0x395   : > { %13783 = vmatmul.mubr.f32.gmra.mrb[24].mxu1 %v17974_v28 }
 0x396   : > { %13785 = vmatprep.mubr.f32.mxu1 %v17991_v11 }
 0x399   : > { %13786 = vmatmul.mubr.f32.gmra.mrb[26].mxu1 %v18006_v43 }
 0x39a   : > { %13788 = vmatprep.mubr.f32.mxu1 %v18017_v10 }
 0x39d   : > { %13789 = vmatmul.mubr.f32.gmra.mrb[28].mxu1 %v18030_v33 }
 0x39e   : > { %13791 = vmatprep.mubr.f32.mxu1 %v18023_v59 }
 0x3a1   : > { %13792 = vmatmul.mubr.f32.gmra.mrb[30].mxu1 %v18043_v48 }
 0x3a2   : > { %13796 = vmatprep.mubr.f32.mxu1 %v17897_v5  ;;  %v20965_v5 = vand.u32 4294901760, %v17958_v4 }
 0x3a5   : > { %13797 = vmatmul.mubr.f32.vlgmr.msra.gmra.mrb[16].mxu1 %v17907_v18  ;;  %v20966_v18 = vand.u32 4294901760, %v17980_v55 }
 0x3a6   : > { %13821 = vmatpush3.msra.mxu1 %v17842_v0  ;;  %13799 = vmatprep.mubr.f32.mxu1 %v17916_v8  ;;  %v20968_v8 = vand.u32 4294901760, %v17998_v22 }
 0x3a7   : > { %13846 = vmatprep.subr.mxu1 %v17862_v62 }
 0x3a9   : > { %13800 = vmatmul.mubr.f32.gmra.mrb[18].mxu1 %v17922_v17  ;;  %v20969_v17 = vand.u32 4294901760, %v18013_v61 }
 0x3aa   : > { %13802 = vmatprep.mubr.f32.mxu1 %v17932_v45 }
 0x3ad   : > { %13803 = vmatmul.mubr.f32.gmra.mrb[20].mxu1 %v17950_v34 }
 0x3ae   : > { %13805 = vmatprep.mubr.f32.mxu1 %v17958_v4 }
 0x3b1   : > { %13806 = vmatmul.mubr.f32.gmra.mrb[22].mxu1 %v17980_v55 }
 0x3b2   : > { %13808 = vmatprep.mubr.f32.mxu1 %v17987_v26 }
 0x3b5   : > { %13809 = vmatmul.mubr.f32.gmra.mrb[24].mxu1 %v17998_v22 }
 0x3b6   : > { %13811 = vmatprep.mubr.f32.mxu1 %v18013_v61 }
 0x3b9   : > { %13812 = vmatmul.mubr.f32.gmra.mrb[26].mxu1 %v18028_v6 }
 0x3ba   : > { %13814 = vmatprep.mubr.f32.mxu1 %v18037_v38 }
 0x3bd   : > { %13815 = vmatmul.mubr.f32.gmra.mrb[28].mxu1 %v18048_v53 }
 0x3be   : > { %13817 = vmatprep.mubr.f32.mxu1 %v18055_v58  ;;  %v18198_v58 = vsub.f32 %v18104_v32, %v18108_v1 }
 0x3c1   : > { %13818 = vmatmul.mubr.f32.gmra.mrb[30].mxu1 %v18063_v50 }
 0x3c2   : > { %13822 = vmatprep.mubr.f32.mxu1 %v20959_v31 }
 0x3c5   : > { %13823 = vmatmul.mubr.f32.vlgmr.msra.gmra.mrb[16].mxu1 %v20960_v56 }
 0x3c6   : > { %13847 = vmatpush3.msra.mxu1 %v17862_v62  ;;  %13825 = vmatprep.mubr.f32.mxu1 %v20961_v20  ;;  %v20967_v62 = vand.u32 4294901760, %v17987_v26 }
 0x3c7   : > { %13872 = vmatprep.subr.mxu1 %v17842_v0 }
 0x3c9   : > { %13826 = vmatmul.mubr.f32.gmra.mrb[18].mxu1 %v20962_v63 }
 0x3ca   : > { %13828 = vmatprep.mubr.f32.mxu1 %v20963_v40 }
 0x3cd   : > { %13829 = vmatmul.mubr.f32.gmra.mrb[20].mxu1 %v20964_v30 }
 0x3ce   : > { %13831 = vmatprep.mubr.f32.mxu1 %v20965_v5 }
 0x3d1   : > { %13832 = vmatmul.mubr.f32.gmra.mrb[22].mxu1 %v20966_v18 }
 0x3d2   : > { %13834 = vmatprep.mubr.f32.mxu1 %v20967_v62 }
 0x3d5   : > { %13835 = vmatmul.mubr.f32.gmra.mrb[24].mxu1 %v20968_v8 }
 0x3d6   : > { %13837 = vmatprep.mubr.f32.mxu1 %v20969_v17 }
 0x3d9   : > { %13838 = vmatmul.mubr.f32.gmra.mrb[26].mxu1 %v4816_v60 }
 0x3da   : > { %13840 = vmatprep.mubr.f32.mxu1 %v4826_v13 }
 0x3dd   : > { %13841 = vmatmul.mubr.f32.gmra.mrb[28].mxu1 %v4836_v44 }
 0x3de   : > { %13843 = vmatprep.mubr.f32.mxu1 %v4846_v9 }
 0x3e1   : > { %13844 = vmatmul.mubr.f32.gmra.mrb[30].mxu1 %v4856_v16 }
 0x3e2   : > { %13848 = vmatprep.mubr.f32.mxu1 %v17884_v29 }
 0x3e5   : > { %13849 = vmatmul.mubr.f32.vlgmr.msra.gmra.mrb[16].mxu1 %v17890_v24 }
 0x3e6   : > { %13873 = vmatpush3.msra.mxu1 %v17842_v0  ;;  %13851 = vmatprep.mubr.f32.mxu1 %v17899_v3  ;;  %v18201_v0 = vand.u32 4294901760, %v18198_v58 }
 0x3e9   : > { %13852 = vmatmul.mubr.f32.gmra.mrb[18].mxu1 %v17903_v49 }
 0x3ea   : > { %13854 = vmatprep.mubr.f32.mxu1 %v17913_v52 }
 0x3ed   : > { %13855 = vmatmul.mubr.f32.gmra.mrb[20].mxu1 %v17926_v36 }
 0x3ee   : > { %13857 = vmatprep.mubr.f32.mxu1 %v17934_v21 }
 0x3f1   : > { %13858 = vmatmul.mubr.f32.gmra.mrb[22].mxu1 %v17955_v51 }
 0x3f2   : > { %13860 = vmatprep.mubr.f32.mxu1 %v17963_v2 }
 0x3f5   : > { %13861 = vmatmul.mubr.f32.gmra.mrb[24].mxu1 %v17974_v28 }
 0x3f6   : > { %13863 = vmatprep.mubr.f32.mxu1 %v17991_v11 }
 0x3f9   : > { %13864 = vmatmul.mubr.f32.gmra.mrb[26].mxu1 %v18006_v43 }
 0x3fa   : > { %13866 = vmatprep.mubr.f32.mxu1 %v18017_v10 }
 0x3fd   : > { %13867 = vmatmul.mubr.f32.gmra.mrb[28].mxu1 %v18030_v33 }
 0x3fe   : > { %13869 = vmatprep.mubr.f32.mxu1 %v18023_v59 }
 0x401   : > { %13870 = vmatmul.mubr.f32.gmra.mrb[30].mxu1 %v18043_v48 }
 0x402   : > { %13874 = vmatprep.mubr.f32.mxu1 %v17884_v29  ;;  %v6120_v29 = vsub.f32 %v18198_v58, %v18201_v0 }
 0x405   : > { %13875 = vmatmul.mubr.f32.vlgmr.msra.gmra.mrb[16].mxu1 %v17890_v24  ;;  %v18205_v24 = vand.u32 4294901760, %v6120_v29 }
 0x406   : > { %13877 = vmatprep.mubr.f32.mxu1 %v17899_v3  ;;  %v3268_v3 = vpop.xlane.xlu0 %3267 }
 0x407   : > { %13924 = vmatprep.subr.mxu0 %v18205_v24  ;;  %vm3316_vm13 = vcmp.eq.f32.partialorder %v3268_v3, inf  ;;  %vm3318_vm15 = vcmp.eq.f32.partialorder %v3268_v3, 0.0  ;;  %v3319_v38 = vand.u32 2147483648, %v3268_v3 }
 0x409   : > { %13878 = vmatmul.mubr.f32.gmra.mrb[18].mxu1 %v17903_v49 }
 0x40a   : > { %13880 = vmatprep.mubr.f32.mxu1 %v17913_v52  ;;  %v18208_v49 = vpop.xlane.xlu0 %3273  ;;  %v3271_v52 = vpop.xlane.xlu1 %3270 }
 0x40b   : > { %16239 = vrsqrt.f32 %v3271_v52  ;;  %vm3323_vm11 = vcmp.eq.f32.partialorder %v3271_v52, inf  ;;  %vm3325_vm12 = vcmp.eq.f32.partialorder %v3271_v52, 0.0  ;;  %v3326_v61 = vand.u32 2147483648, %v3271_v52 }
 0x40c   : > { %16241 = vrsqrt.f32 %v3268_v3  ;;  %vm3330_vm1 = vcmp.eq.f32.partialorder %v18208_v49, inf  ;;  %vm3332_vm2 = vcmp.eq.f32.partialorder %v18208_v49, 0.0  ;;  %v3333_v60 = vand.u32 2147483648, %v18208_v49 }
 0x40d   : > { %13881 = vmatmul.mubr.f32.gmra.mrb[20].mxu1 %v17926_v36  ;;  %16243 = vrsqrt.f32 %v18208_v49 }
 0x40e   : > { %13883 = vmatprep.mubr.f32.mxu1 %v17934_v21  ;;  %v18212_v6 = vpop.xlane.xlu1 %3279 }
 0x40f   : > { %16245 = vrsqrt.f32 %v18212_v6  ;;  %vm3344_vm6 = vcmp.eq.f32.partialorder %v18212_v6, inf  ;;  %vm3346_vm7 = vcmp.eq.f32.partialorder %v18212_v6, 0.0  ;;  %v3347_v20 = vand.u32 2147483648, %v18212_v6 }
 0x411   : > { %13884 = vmatmul.mubr.f32.gmra.mrb[22].mxu1 %v17955_v51 }
 0x412   : > { %13886 = vmatprep.mubr.f32.mxu1 %v17963_v2  ;;  %v18216_v45 = vpop.xlane.xlu1 %3285 }
 0x413   : > { %vm3358_vm9 = vcmp.eq.f32.partialorder %v18216_v45, inf }
 0x415   : > { %13887 = vmatmul.mubr.f32.gmra.mrb[24].mxu1 %v17974_v28  ;;  %v16240_v4 = vpop.eup %16239 }
 0x416   : > { %13889 = vmatprep.mubr.f32.mxu1 %v17991_v11  ;;  %v18220_v22 = vpop.xlane.xlu1 %3291  ;;  %v16242_v2 = vpop.eup %16241 }
 0x417   : > { %v16244_v26 = vpop.eup %16243  ;;  %v3315_v11 = vmul.f32 %v16242_v2, %v3268_v3  ;;  %v3361_v2 = vand.u32 2147483648, %v18216_v45 }
 0x418   : > { %v3329_v44 = vmul.f32 %v16244_v26, %v18208_v49 }
 0x419   : > { %13890 = vmatmul.mubr.f32.gmra.mrb[26].mxu1 %v18006_v43  ;;  %v16246_v43 = vpop.eup %16245  ;;  %v3317_v13 = vsel %vm3316_vm13, %v3268_v3, %v3315_v11  ;;  %vm3372_vm13 = vcmp.eq.f32.partialorder %v18220_v22, inf }
 0x41a   : > { %13892 = vmatprep.mubr.f32.mxu1 %v18017_v10  ;;  %v18227_v51 = vpop.xlane.xlu1 %3297  ;;  %v3343_v31 = vmul.f32 %v16246_v43, %v18212_v6  ;;  %v3320_v63 = vsel %vm3318_vm15, %v3319_v38, %v3317_v13  ;;  %v3331_v5 = vsel %vm3330_vm1, %v18208_v49, %v3329_v44  ;;  %vm3374_vm1 = vcmp.eq.f32.partialorder %v18220_v22, 0.0 }
 0x41b   : > { %v3389_v44 = vand.u32 2147483648, %v18227_v51 }
 0x41c   : > { %v3345_v29 = vsel %vm3344_vm6, %v18212_v6, %v3343_v31  ;;  %v3375_v6 = vand.u32 2147483648, %v18220_v22 }
 0x41d   : > { %13893 = vmatmul.mubr.f32.gmra.mrb[28].mxu1 %v18030_v33  ;;  %v18210_v33 = vpop.xlane.xlu0 %3276  ;;  %v3348_v43 = vsel %vm3346_vm7, %v3347_v20, %v3345_v29 }
 0x41e   : > { %13895 = vmatprep.mubr.f32.mxu1 %v18023_v59  ;;  %16247 = vrsqrt.f32 %v18210_v33  ;;  %v3322_v59 = vmul.f32 %v16240_v4, %v3271_v52  ;;  %v18234_v55 = vpop.xlane.xlu1 %3303  ;;  %vm3337_vm3 = vcmp.eq.f32.partialorder %v18210_v33, inf  ;;  %vm3339_vm4 = vcmp.eq.f32.partialorder %v18210_v33, 0.0 }
 0x41f   : > { %16249 = vrsqrt.f32 %v18216_v45  ;;  %v3340_v50 = vand.u32 2147483648, %v18210_v33  ;;  %v18284_v4 = vmul.f32 %v18255_v7, %v3320_v63  ;;  %vm3400_vm7 = vcmp.eq.f32.partialorder %v18234_v55, inf }
 0x420   : > { %v3324_v53 = vsel %vm3323_vm11, %v3271_v52, %v3322_v59  ;;  %vm3360_vm11 = vcmp.eq.f32.partialorder %v18216_v45, 0.0  ;;  %v3334_v59 = vsel %vm3332_vm2, %v3333_v60, %v3331_v5 }
 0x421   : > { %13896 = vmatmul.mubr.f32.gmra.mrb[30].mxu1 %v18043_v48  ;;  %v18214_v36 = vpop.xlane.xlu0 %3282  ;;  %v3327_v54 = vsel %vm3325_vm12, %v3326_v61, %v3324_v53  ;;  %v18309_v60 = vmul.f32 %v18255_v7, %v3334_v59 }
 0x422   : > { %16251 = vrsqrt.f32 %v18214_v36  ;;  %v18249_v16 = vpop.xlane.xlu1 %3309  ;;  %vm3351_vm5 = vcmp.eq.f32.partialorder %v18214_v36, inf  ;;  %vm3353_vm8 = vcmp.eq.f32.partialorder %v18214_v36, 0.0  ;;  %v3354_v40 = vand.u32 2147483648, %v18214_v36 }
 0x423   : > { %16253 = vrsqrt.f32 %v18220_v22  ;;  %v18269_v30 = vmul.f32 %v18255_v7, %v3327_v54 }
 0x425   : > { %v18218_v21 = vpop.xlane.xlu0 %3288 }
 0x426   : > { %16255 = vrsqrt.f32 %v18218_v21  ;;  %vm3365_vm10 = vcmp.eq.f32.partialorder %v18218_v21, inf  ;;  %vm3367_vm12 = vcmp.eq.f32.partialorder %v18218_v21, 0.0  ;;  %v3368_v26 = vand.u32 2147483648, %v18218_v21 }
 0x427   : > { %16257 = vrsqrt.f32 %v18227_v51 }
 0x428   : > { %v16248_v10 = vpop.eup %16247 }
 0x429   : > { %v18224_v34 = vpop.xlane.xlu0 %3294  ;;  %v16250_v9 = vpop.eup %16249  ;;  %v3336_v32 = vmul.f32 %v16248_v10, %v18210_v33 }
 0x42a   : > { %16259 = vrsqrt.f32 %v18224_v34  ;;  %v3357_v3 = vmul.f32 %v16250_v9, %v18216_v45  ;;  %vm3379_vm15 = vcmp.eq.f32.partialorder %v18224_v34, inf  ;;  %vm3381_vm2 = vcmp.eq.f32.partialorder %v18224_v34, 0.0 }
 0x42b   : > { %16261 = vrsqrt.f32 %v18234_v55  ;;  %v3338_v8 = vsel %vm3337_vm3, %v18210_v33, %v3336_v32  ;;  %vm3386_vm3 = vcmp.eq.f32.partialorder %v18227_v51, inf  ;;  %v18323_v32 = vmul.f32 %v18255_v7, %v3348_v43 }
 0x42c   : > { %v16252_v56 = vpop.eup %16251  ;;  %v3341_v11 = vsel %vm3339_vm4, %v3340_v50, %v3338_v8  ;;  %v3359_v53 = vsel %vm3358_vm9, %v18216_v45, %v3357_v3  ;;  %v3382_v50 = vand.u32 2147483648, %v18224_v34  ;;  %vm3388_vm4 = vcmp.eq.f32.partialorder %v18227_v51, 0.0 }
 0x42d   : > { %v18231_v28 = vpop.xlane.xlu0 %3300  ;;  %v16254_v18 = vpop.eup %16253  ;;  %v3350_v17 = vmul.f32 %v16252_v56, %v18214_v36  ;;  %v5739_v9 = vmul.f32 %v18255_v7, %v3341_v11  ;;  %v3362_v31 = vsel %vm3360_vm11, %v3361_v2, %v3359_v53  ;;  %vm3414_vm11 = vcmp.eq.f32.partialorder %v18249_v16, inf }
 0x42e   : > { %16263 = vrsqrt.f32 %v18231_v28  ;;  %v3371_v38 = vmul.f32 %v16254_v18, %v18220_v22  ;;  %vm3395_vm6 = vcmp.eq.f32.partialorder %v18231_v28, 0.0  ;;  %v3396_v45 = vand.u32 2147483648, %v18231_v28 }
 0x42f   : > { %16265 = vrsqrt.f32 %v18249_v16  ;;  %v3352_v49 = vsel %vm3351_vm5, %v18214_v36, %v3350_v17  ;;  %vm3393_vm5 = vcmp.eq.f32.partialorder %v18231_v28, inf  ;;  %v18340_v8 = vmul.f32 %v18255_v7, %v3362_v31 }
 0x430   : > { %v16256_v52 = vpop.eup %16255  ;;  %v3355_v54 = vsel %vm3353_vm8, %v3354_v40, %v3352_v49  ;;  %v3373_v5 = vsel %vm3372_vm13, %v18220_v22, %v3371_v38  ;;  %vm3402_vm8 = vcmp.eq.f32.partialorder %v18234_v55, 0.0  ;;  %v3403_v17 = vand.u32 2147483648, %v18234_v55 }
 0x431   : > { %v18240_v48 = vpop.xlane.xlu0 %3306  ;;  %v16258_v61 = vpop.eup %16257  ;;  %v3364_v10 = vmul.f32 %v16256_v52, %v18218_v21  ;;  %v18346_v29 = vmul.f32 %v18255_v7, %v3355_v54  ;;  %v3376_v52 = vsel %vm3374_vm1, %v3375_v6, %v3373_v5  ;;  %vm3416_vm13 = vcmp.eq.f32.partialorder %v18249_v16, 0.0 }
 0x432   : > { %16267 = vrsqrt.f32 %v18240_v48  ;;  %v3385_v36 = vmul.f32 %v16258_v61, %v18227_v51  ;;  %vm3407_vm9 = vcmp.eq.f32.partialorder %v18240_v48, inf  ;;  %v3410_v22 = vand.u32 2147483648, %v18240_v48 }
 0x433   : > { %v3366_v20 = vsel %vm3365_vm10, %v18218_v21, %v3364_v10  ;;  %vm3409_vm10 = vcmp.eq.f32.partialorder %v18240_v48, 0.0  ;;  %v18369_v10 = vmul.f32 %v18255_v7, %v3376_v52  ;;  %v3417_v53 = vand.u32 2147483648, %v18249_v16 }
 0x434   : > { %v16260_v33 = vpop.eup %16259  ;;  %v3369_v3 = vsel %vm3367_vm12, %v3368_v26, %v3366_v20  ;;  %v3387_v43 = vsel %vm3386_vm3, %v18227_v51, %v3385_v36  ;;  %vm5841_vm12 = vcmask 64512  }
 0x435   : > { %v18275_v62 = vpop.xlane.xlu0 %3312  ;;  %v16262_v13 = vpop.eup %16261  ;;  %v3378_v63 = vmul.f32 %v16260_v33, %v18224_v34  ;;  %v18366_v49 = vmul.f32 %v18255_v7, %v3369_v3  ;;  %v18376_v33 = vld [vmem:[%s20553_s6] ss:$0 sm:$0xff]  ;;  %v3390_v54 = vsel %vm3388_vm4, %v3389_v44, %v3387_v43 }
 0x436   : > { %16269 = vrsqrt.f32 %v18275_v62  ;;  %v3399_v18 = vmul.f32 %v16262_v13, %v18234_v55  ;;  %vm3423_vm1 = vcmp.eq.f32.partialorder %v18275_v62, 0.0  ;;  %v3424_v51 = vand.u32 2147483648, %v18275_v62 }
 0x437   : > { %v3380_v11 = vsel %vm3379_vm15, %v18224_v34, %v3378_v63  ;;  %vm3421_vm15 = vcmp.eq.f32.partialorder %v18275_v62, inf  ;;  %v18404_v36 = vmul.f32 %v18255_v7, %v3390_v54 }
 0x438   : > { %v16264_v56 = vpop.eup %16263  ;;  %v3401_v26 = vsel %vm3400_vm7, %v18234_v55, %v3399_v18  ;;  %v3383_v6 = vsel %vm3381_vm2, %v3382_v50, %v3380_v11 }
 0x439   : > { %v16266_v40 = vpop.eup %16265  ;;  %v3392_v2 = vmul.f32 %v16264_v56, %v18231_v28  ;;  %v3404_v63 = vsel %vm3402_vm8, %v3403_v17, %v3401_v26  ;;  %v18399_v44 = vmul.f32 %v18255_v7, %v3383_v6 }
 0x43a   : > { %v3413_v61 = vmul.f32 %v16266_v40, %v18249_v16  ;;  %v18411_v17 = vmul.f32 %v18255_v7, %v3404_v63 }
 0x43b   : > { %v3394_v13 = vsel %vm3393_vm5, %v18231_v28, %v3392_v2 }
 0x43c   : > { %v16268_v59 = vpop.eup %16267  ;;  %v3415_v34 = vsel %vm3414_vm11, %v18249_v16, %v3413_v61  ;;  %v3397_v55 = vsel %vm3395_vm6, %v3396_v45, %v3394_v13 }
 0x43d   : > { %v3406_v31 = vmul.f32 %v16268_v59, %v18240_v48  ;;  %v3418_v3 = vsel %vm3416_vm13, %v3417_v53, %v3415_v34  ;;  %v18420_v43 = vmul.f32 %v18255_v7, %v3397_v55 }
 0x43f   : > { %v3408_v18 = vsel %vm3407_vm9, %v18240_v48, %v3406_v31 }
 0x440   : > { %v16270_v21 = vpop.eup %16269  ;;  %v3411_v16 = vsel %vm3409_vm10, %v3410_v22, %v3408_v18 }
 0x441   : > { %v3420_v5 = vmul.f32 %v16270_v21, %v18275_v62 }
 0x443   : > { %v3422_v45 = vsel %vm3421_vm15, %v18275_v62, %v3420_v5  ;;  %v18445_v5 = vmul.f32 %v18255_v7, %v3411_v16 }
 0x444   : > { %v3425_v6 = vsel %vm3423_vm1, %v3424_v51, %v3422_v45 }
 0x4d8   : > { %v13876_v38 = vpop.f32.mrb[16].mxu1 }
 0x4d9   : > { %v5753_v56 = vadd.f32 %v13876_v38, %v18269_v30  ;;  %v5635_v20 = vpop.f32.mrb[17].mxu1 }
 0x4da   : > { %v5752_v50 = vadd.f32 %v18284_v4, %v5635_v20 }
 0x4db   : > { %v5776_v30 = vadd.f32 %v18376_v33, %v5753_v56 }
 0x4dc   : > { %v5775_v40 = vadd.f32 %v18376_v33, %v5752_v50  ;;  %v13879_v4 = vpop.f32.mrb[18].mxu1 }
 0x4dd   : > { %v5755_v52 = vadd.f32 %v13879_v4, %v5739_v9  ;;  %v5647_v2 = vpop.f32.mrb[19].mxu1  ;;  %vm5792_vm2 = vcmp.gt.f32.partialorder %v5776_v30, 0.0  ;;  %v5808_v28 = vmul.f32 0.2, %v5776_v30  ;;  %v18426_v9 = vmul.f32 %v18255_v7, %v3418_v3 }
 0x4de   : > { %v5754_v59 = vadd.f32 %v18309_v60, %v5647_v2  ;;  %vm5791_vm3 = vcmp.gt.f32.partialorder %v5775_v40, 0.0  ;;  %v5807_v11 = vmul.f32 0.2, %v5775_v40 }
 0x4df   : > { %v5778_v61 = vadd.f32 %v18376_v33, %v5755_v52  ;;  %v5824_v21 = vsel %vm5792_vm2, %v5776_v30, %v5808_v28 }
 0x4e0   : > { %v5777_v26 = vadd.f32 %v18376_v33, %v5754_v59  ;;  %9579 = vrot.lane.b32.xlu0 %v5824_v21, %s20831_s23  ;;  %v5846_v60 = vsel %vm5841_vm12, %v5824_v21, 0  ;;  %v13882_v53 = vpop.f32.mrb[20].mxu1  ;;  %v5823_v38 = vsel %vm5791_vm3, %v5775_v40, %v5807_v11 }
 0x4e1   : > { %v18433_v13 = vand.u32 4294901760, %v5846_v60  ;;  %v5757_v54 = vadd.f32 %v13882_v53, %v18346_v29  ;;  %9577 = vrot.lane.b32.xlu1 %v5823_v38, %s20831_s23  ;;  %v5843_v48 = vsel %vm5841_vm12, %v5823_v38, 0  ;;  %v5659_v22 = vpop.f32.mrb[21].mxu1  ;;  %vm5794_vm4 = vcmp.gt.f32.partialorder %v5778_v61, 0.0 }
 0x4e2   : > { %v18438_v31 = vand.u32 4294901760, %v5843_v48  ;;  %v5756_v56 = vadd.f32 %v18323_v32, %v5659_v22  ;;  %v5810_v20 = vmul.f32 0.2, %v5778_v61  ;;  %vm5793_vm5 = vcmp.gt.f32.partialorder %v5777_v26, 0.0 }
 0x4e3   : > { %v18442_v63 = vsub.f32 %v5846_v60, %v18433_v13  ;;  %v5809_v62 = vmul.f32 0.2, %v5777_v26  ;;  %v18448_v29 = vmul.f32 %v18255_v7, %v3425_v6  ;;  %v5780_v34 = vadd.f32 %v18376_v33, %v5757_v54 }
 0x4e4   : > { %v18452_v50 = vsub.f32 %v5843_v48, %v18438_v31  ;;  %v5779_v51 = vadd.f32 %v18376_v33, %v5756_v56  ;;  %v13885_v32 = vpop.f32.mrb[22].mxu1  ;;  %v5826_v30 = vsel %vm5794_vm4, %v5778_v61, %v5810_v20 }
 0x4e5   : > { %v5968_v55 = vand.u32 4294901760, %v18442_v63  ;;  %v5759_v40 = vadd.f32 %v13885_v32, %v18366_v49  ;;  %9583 = vrot.lane.b32.xlu1 %v5826_v30, %s20831_s23  ;;  %v5852_v4 = vsel %vm5841_vm12, %v5826_v30, 0  ;;  %v5671_v18 = vpop.f32.mrb[23].mxu1  ;;  %v5825_v7 = vsel %vm5793_vm5, %v5777_v26, %v5809_v62 }
 0x4e6   : > { %v18459_v3 = vand.u32 4294901760, %v5852_v4  ;;  %v5758_v52 = vadd.f32 %v18340_v8, %v5671_v18  ;;  %v5849_v2 = vsel %vm5841_vm12, %v5825_v7, 0  ;;  %vm5795_vm6 = vcmp.gt.f32.partialorder %v5779_v51, 0.0 }
 0x4e7   : > { %v5969_v28 = vsub.f32 %v18442_v63, %v5968_v55  ;;  %v5782_v45 = vadd.f32 %v18376_v33, %v5759_v40  ;;  %v18467_v49 = vand.u32 4294901760, %v5849_v2  ;;  %v5811_v59 = vmul.f32 0.2, %v5779_v51 }
 0x4e8   : > { %v18470_v11 = vsub.f32 %v5852_v4, %v18459_v3  ;;  %v5781_v61 = vadd.f32 %v18376_v33, %v5758_v52  ;;  %v13888_v21 = vpop.f32.mrb[24].mxu1  ;;  %v5958_v8 = vand.u32 4294901760, %v18452_v50  ;;  %vm5796_vm7 = vcmp.gt.f32.partialorder %v5780_v34, 0.0 }
 0x4e9   : > { %v5970_v16 = vand.u32 4294901760, %v5969_v28  ;;  %v5761_v26 = vadd.f32 %v13888_v21, %v18399_v44  ;;  %9581 = vrot.lane.b32.xlu1 %v5825_v7, %s20831_s23  ;;  %v18477_v60 = vsub.f32 %v5849_v2, %v18467_v49  ;;  %v5827_v53 = vsel %vm5795_vm6, %v5779_v51, %v5811_v59  ;;  %v5683_v38 = vpop.f32.mrb[25].mxu1 }
 0x4ea   : > { %9585 = vrot.lane.b32.xlu0 %v5827_v53, %s20831_s23  ;;  %v5855_v6 = vsel %vm5841_vm12, %v5827_v53, 0  ;;  %v5760_v54 = vadd.f32 %v18369_v10, %v5683_v38  ;;  %v5959_v48 = vsub.f32 %v18452_v50, %v5958_v8  ;;  %v5812_v22 = vmul.f32 0.2, %v5780_v34 }
 0x4eb   : > { %v18486_v44 = vadd.f32 %v18376_v33, %v5761_v26  ;;  %v18488_v56 = vand.u32 4294901760, %v5855_v6  ;;  %vm5797_vm8 = vcmp.gt.f32.partialorder %v5781_v61, 0.0  ;;  %v5813_v20 = vmul.f32 0.2, %v5781_v61 }
 0x4ec   : > { %v5783_v62 = vadd.f32 %v18376_v33, %v5760_v54  ;;  %v13891_v51 = vpop.f32.mrb[26].mxu1  ;;  %v5960_v32 = vand.u32 4294901760, %v5959_v48  ;;  %v5828_v30 = vsel %vm5796_vm7, %v5780_v34, %v5812_v22  ;;  %v5978_v10 = vand.u32 4294901760, %v18477_v60 }
 0x4ed   : > { %v18494_v40 = vsub.f32 %v5855_v6, %v18488_v56  ;;  %v5763_v4 = vadd.f32 %v13891_v51, %v18420_v43  ;;  %9587 = vrot.lane.b32.xlu1 %v5828_v30, %s20831_s23  ;;  %v5858_v18 = vsel %vm5841_vm12, %v5828_v30, 0  ;;  %v5829_v7 = vsel %vm5797_vm8, %v5781_v61, %v5813_v20  ;;  %v5695_v52 = vpop.f32.mrb[27].mxu1 }
 0x4ee   : > { %13900 = vmatprep.mubr.f32.mxu0 %v5960_v32  ;;  %v18499_v2 = vand.u32 4294901760, %v5858_v18  ;;  %9589 = vrot.lane.b32.xlu0 %v5829_v7, %s20831_s23  ;;  %v5861_v34 = vsel %vm5841_vm12, %v5829_v7, 0  ;;  %v5762_v28 = vadd.f32 %v18404_v36, %v5695_v52  ;;  %v5979_v59 = vsub.f32 %v18477_v60, %v5978_v10 }
 0x4ef   : > { %v18508_v43 = vadd.f32 %v18376_v33, %v5763_v4  ;;  %13901 = vmatmul.mubr.f32.vlgmr.msra.gmra.mrb[32].mxu0 %v5970_v16  ;;  %v18510_v21 = vand.u32 4294901760, %v5861_v34  ;;  %v20679_v61 = vand.u32 4294901760, %v18470_v11  ;;  %vm5798_vm9 = vcmp.gt.f32.partialorder %v5782_v45, 0.0 }
 0x4f0   : > { %13925 = vmatpush3.msra.mxu0 %v18205_v24  ;;  %v18515_v26 = vsub.f32 %v5858_v18, %v18499_v2  ;;  %v5785_v36 = vadd.f32 %v18376_v33, %v5762_v28  ;;  %v13894_v53 = vpop.f32.mrb[28].mxu1  ;;  %v5980_v38 = vand.u32 4294901760, %v5979_v59  ;;  %v5814_v6 = vmul.f32 0.2, %v5782_v45 }
 0x4f1   : > { %v18519_v54 = vsub.f32 %v5861_v34, %v18510_v21  ;;  %v5765_v16 = vadd.f32 %v13894_v53, %v18445_v5  ;;  %v5989_v48 = vsub.f32 %v18470_v11, %v20679_v61  ;;  %vm5799_vm10 = vcmp.gt.f32.partialorder %v5783_v62, 0.0  ;;  %v5707_v22 = vpop.f32.mrb[29].mxu1  ;;  %13950 = vmatprep.subr.mxu0 %v18198_v58 }
 0x4f2   : > { %13903 = vmatprep.mubr.f32.mxu0 %v5980_v38  ;;  %v5830_v24 = vsel %vm5798_vm9, %v5782_v45, %v5814_v6  ;;  %v5815_v20 = vmul.f32 0.2, %v5783_v62  ;;  %v5764_v51 = vadd.f32 %v18411_v17, %v5707_v22  ;;  %v20677_v32 = vand.u32 4294901760, %v18494_v40 }
 0x4f3   : > { %v18529_v30 = vadd.f32 %v18376_v33, %v5765_v16  ;;  %v5990_v4 = vand.u32 4294901760, %v5989_v48  ;;  %9591 = vrot.lane.b32.xlu1 %v5830_v24, %s20831_s23  ;;  %v5864_v5 = vsel %vm5841_vm12, %v5830_v24, 0  ;;  %v20675_v18 = vand.u32 4294901760, %v18515_v26 }
 0x4f4   : > { %v18534_v7 = vand.u32 4294901760, %v5864_v5  ;;  %v5831_v52 = vsel %vm5799_vm10, %v5783_v62, %v5815_v20  ;;  %v5787_v45 = vadd.f32 %v18376_v33, %v5764_v51  ;;  %v13897_v34 = vpop.f32.mrb[30].mxu1  ;;  %v5999_v17 = vsub.f32 %v18494_v40, %v20677_v32 }
 0x4f5   : > { %13904 = vmatmul.mubr.f32.gmra.mrb[34].mxu0 %v5990_v4  ;;  %9593 = vrot.lane.b32.xlu0 %v5831_v52, %s20831_s23  ;;  %v5867_v28 = vsel %vm5841_vm12, %v5831_v52, 0  ;;  %v5767_v59 = vadd.f32 %v13897_v34, %v18448_v29  ;;  %v6009_v53 = vsub.f32 %v18515_v26, %v20675_v18  ;;  %vm5800_vm11 = vcmp.gt.f32.partialorder %v18486_v44, 0.0  ;;  %v5719_v62 = vpop.f32.mrb[31].mxu1 }
 0x4f6   : > { %v18548_v38 = vsub.f32 %v5864_v5, %v18534_v7  ;;  %v18550_v6 = vand.u32 4294901760, %v5867_v28  ;;  %v6000_v16 = vand.u32 4294901760, %v5999_v17  ;;  %v5816_v48 = vmul.f32 0.2, %v18486_v44 }
 0x4f7   : > { %v18554_v22 = vadd.f32 %v18376_v33, %v5767_v59  ;;  %v6010_v24 = vand.u32 4294901760, %v6009_v53  ;;  %vm5801_vm13 = vcmp.gt.f32.partialorder %v5785_v36, 0.0  ;;  %v5817_v29 = vmul.f32 0.2, %v5785_v36 }
 0x4f8   : > { %v18557_v20 = vsub.f32 %v5867_v28, %v18550_v6  ;;  %13906 = vmatprep.mubr.f32.mxu0 %v6000_v16  ;;  %v5832_v51 = vsel %vm5800_vm11, %v18486_v44, %v5816_v48  ;;  %v5766_v4 = vadd.f32 %v18426_v9, %v5719_v62  ;;  %v20674_v5 = vand.u32 4294901760, %v18519_v54 }
 0x4f9   : > { %13907 = vmatmul.mubr.f32.gmra.mrb[36].mxu0 %v6010_v24  ;;  %9595 = vrot.lane.b32.xlu1 %v5832_v51, %s20831_s23  ;;  %v5870_v52 = vsel %vm5841_vm12, %v5832_v51, 0  ;;  %v5833_v34 = vsel %vm5801_vm13, %v5785_v36, %v5817_v29  ;;  %v20672_v17 = vand.u32 4294901760, %v18548_v38  ;;  %vm5802_vm15 = vcmp.gt.f32.partialorder %v18508_v43, 0.0 }
 0x4fa   : > { %v18566_v59 = vand.u32 4294901760, %v5870_v52  ;;  %9597 = vrot.lane.b32.xlu0 %v5833_v34, %s20831_s23  ;;  %v5873_v44 = vsel %vm5841_vm12, %v5833_v34, 0  ;;  %v5789_v9 = vadd.f32 %v18376_v33, %v5766_v4  ;;  %v6019_v28 = vsub.f32 %v18519_v54, %v20674_v5 }
 0x4fb   : > { %v18574_v53 = vand.u32 4294901760, %v5873_v44  ;;  %v6029_v36 = vsub.f32 %v18548_v38, %v20672_v17  ;;  %v5818_v62 = vmul.f32 0.2, %v18508_v43  ;;  %vm5803_vm1 = vcmp.gt.f32.partialorder %v5787_v45, 0.0 }
 0x4fc   : > { %v18581_v16 = vsub.f32 %v5870_v52, %v18566_v59  ;;  %v6020_v48 = vand.u32 4294901760, %v6019_v28  ;;  %v5819_v24 = vmul.f32 0.2, %v5787_v45  ;;  %v20671_v33 = vand.u32 4294901760, %v18557_v20 }
 0x4fd   : > { %v18585_v29 = vsub.f32 %v5873_v44, %v18574_v53  ;;  %v6030_v51 = vand.u32 4294901760, %v6029_v36  ;;  %v5834_v4 = vsel %vm5802_vm15, %v18508_v43, %v5818_v62  ;;  %vm5804_vm2 = vcmp.gt.f32.partialorder %v18529_v30, 0.0 }
 0x4fe   : > { %13909 = vmatprep.mubr.f32.mxu0 %v6020_v48  ;;  %9599 = vrot.lane.b32.xlu1 %v5834_v4, %s20831_s23  ;;  %v5876_v52 = vsel %vm5841_vm12, %v5834_v4, 0  ;;  %v5835_v34 = vsel %vm5803_vm1, %v5787_v45, %v5819_v24  ;;  %v6039_v28 = vsub.f32 %v18557_v20, %v20671_v33  ;;  %v20673_v44 = vand.u32 4294901760, %v18581_v16 }
 0x4ff   : > { %13910 = vmatmul.mubr.f32.gmra.mrb[38].mxu0 %v6030_v51  ;;  %v18597_v36 = vand.u32 4294901760, %v5876_v52  ;;  %9601 = vrot.lane.b32.xlu0 %v5835_v34, %s20831_s23  ;;  %v5879_v43 = vsel %vm5841_vm12, %v5835_v34, 0  ;;  %v5820_v62 = vmul.f32 0.2, %v18529_v30  ;;  %vm5805_vm3 = vcmp.gt.f32.partialorder %v5789_v9, 0.0 }
 0x500   : > { %v18602_v48 = vand.u32 4294901760, %v5879_v43  ;;  %v6040_v4 = vand.u32 4294901760, %v6039_v28  ;;  %v6049_v45 = vsub.f32 %v18581_v16, %v20673_v44  ;;  %v5821_v24 = vmul.f32 0.2, %v5789_v9 }
 0x501   : > { %v18608_v33 = vsub.f32 %v5876_v52, %v18597_v36  ;;  %v5836_v51 = vsel %vm5804_vm2, %v18529_v30, %v5820_v62  ;;  %v20676_v34 = vand.u32 4294901760, %v18585_v29  ;;  %vm5806_vm4 = vcmp.gt.f32.partialorder %v18554_v22, 0.0 }
 0x502   : > { %v18616_v17 = vsub.f32 %v5879_v43, %v18602_v48  ;;  %13912 = vmatprep.mubr.f32.mxu0 %v6040_v4  ;;  %v6050_v28 = vand.u32 4294901760, %v6049_v45  ;;  %9603 = vrot.lane.b32.xlu1 %v5836_v51, %s20831_s23  ;;  %v5882_v44 = vsel %vm5841_vm12, %v5836_v51, 0  ;;  %v5837_v5 = vsel %vm5805_vm3, %v5789_v9, %v5821_v24 }
 0x503   : > { %v18620_v52 = vand.u32 4294901760, %v5882_v44  ;;  %9605 = vrot.lane.b32.xlu0 %v5837_v5, %s20831_s23  ;;  %v5885_v30 = vsel %vm5841_vm12, %v5837_v5, 0  ;;  %v6059_v62 = vsub.f32 %v18585_v29, %v20676_v34  ;;  %v20678_v43 = vand.u32 4294901760, %v18608_v33 }
 0x504   : > { %13913 = vmatmul.mubr.f32.gmra.mrb[40].mxu0 %v6050_v28  ;;  %v18628_v4 = vand.u32 4294901760, %v5885_v30  ;;  %v5822_v45 = vmul.f32 0.2, %v18554_v22  ;;  %v20680_v51 = vand.u32 4294901760, %v18616_v17 }
 0x505   : > { %v18633_v9 = vsub.f32 %v5882_v44, %v18620_v52  ;;  %v6060_v24 = vand.u32 4294901760, %v6059_v62  ;;  %v6069_v5 = vsub.f32 %v18608_v33, %v20678_v43 }
 0x506   : > { %v18639_v18 = vsub.f32 %v5885_v30, %v18628_v4  ;;  %v5838_v28 = vsel %vm5806_vm4, %v18554_v22, %v5822_v45  ;;  %v6079_v34 = vsub.f32 %v18616_v17, %v20680_v51 }
 0x507   : > { %13915 = vmatprep.mubr.f32.mxu0 %v6060_v24  ;;  %v6070_v32 = vand.u32 4294901760, %v6069_v5  ;;  %9607 = vrot.lane.b32.xlu1 %v5838_v28, %s20831_s23  ;;  %v5888_v44 = vsel %vm5841_vm12, %v5838_v28, 0  ;;  %v6088_v62 = vand.u32 4294901760, %v18633_v9  ;;  %s20499_s23 = scalar_lea.hbm %s20562_s15, %s12205_s1  ;;  %s16380_s1 = smov [#allocation2]  }
 0x508   : > { %v18650_v43 = vand.u32 4294901760, %v5888_v44  ;;  %v6080_v30 = vand.u32 4294901760, %v6079_v34  ;;  %v6098_v61 = vand.u32 4294901760, %v18639_v18 }
 0x509   : > { %13916 = vmatmul.mubr.f32.gmra.mrb[42].mxu0 %v6070_v32  ;;  %v6089_v22 = vsub.f32 %v18633_v9, %v6088_v62 }
 0x50a   : > { %v18657_v45 = vsub.f32 %v5888_v44, %v18650_v43  ;;  %13918 = vmatprep.mubr.f32.mxu0 %v6080_v30  ;;  %v6099_v24 = vsub.f32 %v18639_v18, %v6098_v61  ;;  %v20971_v44 = vand.u32 4294901760, %v18494_v40  ;;  %v20972_v30 = vand.u32 4294901760, %v18515_v26 }
 0x50b   : > { %v6090_v5 = vand.u32 4294901760, %v6089_v22 }
 0x50c   : > { %v6100_v28 = vand.u32 4294901760, %v6099_v24  ;;  %v6108_v51 = vand.u32 4294901760, %v18657_v45 }
 0x50d   : > { %13919 = vmatmul.mubr.f32.gmra.mrb[44].mxu0 %v6090_v5 }
 0x50e   : > { %13921 = vmatprep.mubr.f32.mxu0 %v6100_v28  ;;  %v6109_v32 = vsub.f32 %v18657_v45, %v6108_v51 }
 0x510   : > { %v6110_v34 = vand.u32 4294901760, %v6109_v32 }
 0x512   : > { %13922 = vmatmul.mubr.f32.gmra.mrb[46].mxu0 %v6110_v34  ;;  %v6999_v34 = vsel %vm5841_vm12, %v17463_v12, 0 }
 0x513   : > { %13926 = vmatprep.mubr.f32.mxu0 %v18438_v31 }
 0x516   : > { %13927 = vmatmul.mubr.f32.vlgmr.msra.gmra.mrb[32].mxu0 %v18433_v13 }
 0x517   : > { %13951 = vmatpush3.msra.mxu0 %v18198_v58  ;;  %13929 = vmatprep.mubr.f32.mxu0 %v18467_v49  ;;  %v20970_v58 = vand.u32 4294901760, %v18470_v11 }
 0x518   : > { %13976 = vmatprep.subr.mxu0 %v18108_v1 }
 0x51a   : > { %13930 = vmatmul.mubr.f32.gmra.mrb[34].mxu0 %v18459_v3 }
 0x51b   : > { %13932 = vmatprep.mubr.f32.mxu0 %v18488_v56 }
 0x51e   : > { %13933 = vmatmul.mubr.f32.gmra.mrb[36].mxu0 %v18499_v2 }
 0x51f   : > { %13935 = vmatprep.mubr.f32.mxu0 %v18510_v21 }
 0x522   : > { %13936 = vmatmul.mubr.f32.gmra.mrb[38].mxu0 %v18534_v7 }
 0x523   : > { %13938 = vmatprep.mubr.f32.mxu0 %v18550_v6 }
 0x526   : > { %13939 = vmatmul.mubr.f32.gmra.mrb[40].mxu0 %v18566_v59 }
 0x527   : > { %13941 = vmatprep.mubr.f32.mxu0 %v18574_v53 }
 0x52a   : > { %13942 = vmatmul.mubr.f32.gmra.mrb[42].mxu0 %v18597_v36 }
 0x52b   : > { %13944 = vmatprep.mubr.f32.mxu0 %v18602_v48 }
 0x52e   : > { %13945 = vmatmul.mubr.f32.gmra.mrb[44].mxu0 %v18620_v52 }
 0x52f   : > { %13947 = vmatprep.mubr.f32.mxu0 %v18628_v4 }
 0x532   : > { %13948 = vmatmul.mubr.f32.gmra.mrb[46].mxu0 %v18650_v43 }
 0x533   : > { %13952 = vmatprep.mubr.f32.mxu0 %v18452_v50  ;;  %v20973_v50 = vand.u32 4294901760, %v18519_v54 }
 0x536   : > { %13953 = vmatmul.mubr.f32.vlgmr.msra.gmra.mrb[32].mxu0 %v18442_v63  ;;  %v20974_v63 = vand.u32 4294901760, %v18548_v38 }
 0x537   : > { %13977 = vmatpush3.msra.mxu0 %v18108_v1  ;;  %13955 = vmatprep.mubr.f32.mxu0 %v18477_v60  ;;  %v20979_v60 = vand.u32 4294901760, %v18616_v17 }
 0x538   : > { %14002 = vmatprep.subr.mxu0 %v18201_v0 }
 0x53a   : > { %13956 = vmatmul.mubr.f32.gmra.mrb[34].mxu0 %v18470_v11  ;;  %v20977_v11 = vand.u32 4294901760, %v18585_v29 }
 0x53b   : > { %13958 = vmatprep.mubr.f32.mxu0 %v18494_v40 }
 0x53e   : > { %13959 = vmatmul.mubr.f32.gmra.mrb[36].mxu0 %v18515_v26 }
 0x53f   : > { %13961 = vmatprep.mubr.f32.mxu0 %v18519_v54 }
 0x542   : > { %13962 = vmatmul.mubr.f32.gmra.mrb[38].mxu0 %v18548_v38  ;;  %v6989_v38 = vsel %vm5841_vm12, %v17446_v37, 0 }
 0x543   : > { %13964 = vmatprep.mubr.f32.mxu0 %v18557_v20 }
 0x546   : > { %13965 = vmatmul.mubr.f32.gmra.mrb[40].mxu0 %v18581_v16 }
 0x547   : > { %13967 = vmatprep.mubr.f32.mxu0 %v18585_v29 }
 0x54a   : > { %13968 = vmatmul.mubr.f32.gmra.mrb[42].mxu0 %v18608_v33 }
 0x54b   : > { %13970 = vmatprep.mubr.f32.mxu0 %v18616_v17 }
 0x54e   : > { %13971 = vmatmul.mubr.f32.gmra.mrb[44].mxu0 %v18633_v9  ;;  %v6995_v9 = vsel %vm5841_vm12, %v17454_v23, 0 }
 0x54f   : > { %13973 = vmatprep.mubr.f32.mxu0 %v18639_v18  ;;  %v6981_v18 = vsel %vm5841_vm12, %v17424_v25, 0  ;;  %v18840_v28 = vand.u32 4294901760, %v6995_v9 }
 0x552   : > { %13974 = vmatmul.mubr.f32.gmra.mrb[46].mxu0 %v18657_v45 }
 0x553   : > { %13978 = vmatprep.mubr.f32.mxu0 %v5958_v8  ;;  %v20978_v8 = vand.u32 4294901760, %v18608_v33  ;;  %v6993_v33 = vsel %vm5841_vm12, %v17458_v27, 0 }
 0x556   : > { %13979 = vmatmul.mubr.f32.vlgmr.msra.gmra.mrb[32].mxu0 %v5968_v55  ;;  %v20976_v55 = vand.u32 4294901760, %v18581_v16  ;;  %v18807_v16 = vand.u32 4294901760, %v6989_v38 }
 0x557   : > { %14003 = vmatpush3.msra.mxu0 %v18201_v0  ;;  %13981 = vmatprep.mubr.f32.mxu0 %v5978_v10  ;;  %v20975_v0 = vand.u32 4294901760, %v18557_v20  ;;  %v5839_v10 = vld [vmem:[%s20554_s7] sm:$0xff] }
 0x558   : > { %14028 = vmatprep.subr.mxu0 %v18108_v1  ;;  %v18736_v40 = vand.u32 4294901760, %v5839_v10  ;;  %v18825_v22 = vsub.f32 %v6989_v38, %v18807_v16 }
 0x55a   : > { %13982 = vmatmul.mubr.f32.gmra.mrb[34].mxu0 %v20970_v58 }
 0x55b   : > { %13984 = vmatprep.mubr.f32.mxu0 %v20971_v44 }
 0x55e   : > { %13985 = vmatmul.mubr.f32.gmra.mrb[36].mxu0 %v20972_v30 }
 0x55f   : > { %13987 = vmatprep.mubr.f32.mxu0 %v20973_v50  ;;  %v20683_v50 = vand.u32 4294901760, %v18825_v22 }
 0x562   : > { %13988 = vmatmul.mubr.f32.gmra.mrb[38].mxu0 %v20974_v63  ;;  %v18859_v63 = vsub.f32 %v6995_v9, %v18840_v28 }
 0x563   : > { %13990 = vmatprep.mubr.f32.mxu0 %v20975_v0  ;;  %v18861_v0 = vand.u32 4294901760, %v6999_v34 }
 0x566   : > { %13991 = vmatmul.mubr.f32.gmra.mrb[40].mxu0 %v20976_v55 }
 0x567   : > { %13993 = vmatprep.mubr.f32.mxu0 %v20977_v11 }
 0x56a   : > { %13994 = vmatmul.mubr.f32.gmra.mrb[42].mxu0 %v20978_v8 }
 0x56b   : > { %13996 = vmatprep.mubr.f32.mxu0 %v20979_v60 }
 0x56e   : > { %13997 = vmatmul.mubr.f32.gmra.mrb[44].mxu0 %v6088_v62  ;;  %v18822_v62 = vand.u32 4294901760, %v6993_v33 }
 0x56f   : > { %13999 = vmatprep.mubr.f32.mxu0 %v6098_v61 }
 0x570   : > { %v18844_v32 = vsub.f32 %v6993_v33, %v18822_v62 }
 0x572   : > { %14000 = vmatmul.mubr.f32.gmra.mrb[46].mxu0 %v6108_v51 }
 0x573   : > { %14004 = vmatprep.mubr.f32.mxu0 %v18438_v31 }
 0x576   : > { %14005 = vmatmul.mubr.f32.vlgmr.msra.gmra.mrb[32].mxu0 %v18433_v13 }
 0x577   : > { %14029 = vmatpush3.msra.mxu0 %v18108_v1  ;;  %14007 = vmatprep.mubr.f32.mxu0 %v18467_v49  ;;  %v18751_v1 = vsub.f32 %v5839_v10, %v18736_v40  ;;  %v20681_v10 = vand.u32 4294901760, %v18844_v32 }
 0x578   : > { %14054 = vmatprep.subr.mxu0 %v18736_v40 }
 0x579   : > { %v18756_v61 = vand.u32 4294901760, %v18751_v1 }
 0x57a   : > { %14008 = vmatmul.mubr.f32.gmra.mrb[34].mxu0 %v18459_v3 }
 0x57b   : > { %14010 = vmatprep.mubr.f32.mxu0 %v18488_v56  ;;  %v7243_v26 = vsub.f32 %v18751_v1, %v18756_v61 }
 0x57d   : > { %v18764_v54 = vand.u32 4294901760, %v7243_v26 }
 0x57e   : > { %14011 = vmatmul.mubr.f32.gmra.mrb[36].mxu0 %v18499_v2 }
 0x57f   : > { %14013 = vmatprep.mubr.f32.mxu0 %v18510_v21 }
 0x582   : > { %14014 = vmatmul.mubr.f32.gmra.mrb[38].mxu0 %v18534_v7 }
 0x583   : > { %14016 = vmatprep.mubr.f32.mxu0 %v18550_v6 }
 0x586   : > { %14017 = vmatmul.mubr.f32.gmra.mrb[40].mxu0 %v18566_v59 }
 0x587   : > { %14019 = vmatprep.mubr.f32.mxu0 %v18574_v53 }
 0x58a   : > { %14020 = vmatmul.mubr.f32.gmra.mrb[42].mxu0 %v18597_v36 }
 0x58b   : > { %14022 = vmatprep.mubr.f32.mxu0 %v18602_v48 }
 0x58e   : > { %14023 = vmatmul.mubr.f32.gmra.mrb[44].mxu0 %v18620_v52 }
 0x58f   : > { %14025 = vmatprep.mubr.f32.mxu0 %v18628_v4 }
 0x592   : > { %14026 = vmatmul.mubr.f32.gmra.mrb[46].mxu0 %v18650_v43 }
 0x593   : > { %14030 = vmatprep.mubr.f32.mxu0 %v18438_v31  ;;  %v18778_v31 = vand.u32 4294901760, %v6981_v18 }
 0x596   : > { %14031 = vmatmul.mubr.f32.vlgmr.msra.gmra.mrb[32].mxu0 %v18433_v13  ;;  %v6983_v13 = vsel %vm5841_vm12, %v17420_v15, 0 }
 0x597   : > { %14055 = vmatpush3.msra.mxu0 %v18736_v40  ;;  %14033 = vmatprep.mubr.f32.mxu0 %v18467_v49  ;;  %v6985_v49 = vsel %vm5841_vm12, %v17432_v35, 0 }
 0x598   : > { %14080 = vmatprep.subr.mxu0 %v18764_v54 }
 0x59a   : > { %14034 = vmatmul.mubr.f32.gmra.mrb[34].mxu0 %v18459_v3  ;;  %v18783_v3 = vand.u32 4294901760, %v6983_v13 }
 0x59b   : > { %14036 = vmatprep.mubr.f32.mxu0 %v18488_v56  ;;  %v18787_v56 = vsub.f32 %v6981_v18, %v18778_v31 }
 0x59c   : > { %v18797_v20 = vsub.f32 %v6983_v13, %v18783_v3  ;;  %v7122_v13 = vsub.f32 %v18825_v22, %v20683_v50 }
 0x59e   : > { %14037 = vmatmul.mubr.f32.gmra.mrb[36].mxu0 %v18499_v2  ;;  %v6987_v2 = vsel %vm5841_vm12, %v17428_v19, 0  ;;  %v20688_v29 = vand.u32 4294901760, %v18797_v20 }
 0x59f   : > { %14039 = vmatprep.mubr.f32.mxu0 %v18510_v21  ;;  %v18791_v21 = vand.u32 4294901760, %v6985_v49 }
 0x5a0   : > { %v7092_v24 = vsub.f32 %v18797_v20, %v20688_v29 }
 0x5a1   : > { %v18805_v17 = vsub.f32 %v6985_v49, %v18791_v21  ;;  %v7005_v49 = vsel %vm5841_vm12, %v17483_v57, 0 }
 0x5a2   : > { %14040 = vmatmul.mubr.f32.gmra.mrb[38].mxu0 %v18534_v7  ;;  %v18800_v7 = vand.u32 4294901760, %v6987_v2  ;;  %v7093_v11 = vand.u32 4294901760, %v7092_v24  ;;  %v7007_v24 = vsel %vm5841_vm12, %v17479_v14, 0 }
 0x5a3   : > { %14042 = vmatprep.mubr.f32.mxu0 %v18550_v6  ;;  %v6991_v6 = vsel %vm5841_vm12, %v17442_v47, 0 }
 0x5a4   : > { %v18818_v51 = vsub.f32 %v6987_v2, %v18800_v7  ;;  %v18881_v2 = vsub.f32 %v6999_v34, %v18861_v0  ;;  %v18900_v34 = vand.u32 4294901760, %v7005_v49 }
 0x5a6   : > { %14043 = vmatmul.mubr.f32.gmra.mrb[40].mxu0 %v18566_v59  ;;  %v20690_v59 = vand.u32 4294901760, %v18787_v56 }
 0x5a7   : > { %14045 = vmatprep.mubr.f32.mxu0 %v18574_v53  ;;  %v18814_v53 = vand.u32 4294901760, %v6991_v6 }
 0x5a8   : > { %v7082_v45 = vsub.f32 %v18787_v56, %v20690_v59 }
 0x5a9   : > { %v18838_v5 = vsub.f32 %v6991_v6, %v18814_v53  ;;  %v20684_v6 = vand.u32 4294901760, %v18859_v63 }
 0x5aa   : > { %14046 = vmatmul.mubr.f32.gmra.mrb[42].mxu0 %v18597_v36  ;;  %v6997_v36 = vsel %vm5841_vm12, %v17467_v42, 0  ;;  %v7083_v44 = vand.u32 4294901760, %v7082_v45 }
 0x5ab   : > { %14048 = vmatprep.mubr.f32.mxu0 %v18602_v48  ;;  %v20687_v48 = vand.u32 4294901760, %v18805_v17  ;;  %v18848_v58 = vand.u32 4294901760, %v6997_v36  ;;  %v20682_v55 = vand.u32 4294901760, %v18838_v5 }
 0x5ad   : > { %v7102_v30 = vsub.f32 %v18805_v17, %v20687_v48  ;;  %v18865_v8 = vsub.f32 %v6997_v36, %v18848_v58  ;;  %v7132_v38 = vsub.f32 %v18838_v5, %v20682_v55  ;;  %v7142_v36 = vsub.f32 %v18844_v32, %v20681_v10 }
 0x5ae   : > { %14049 = vmatmul.mubr.f32.gmra.mrb[44].mxu0 %v18620_v52  ;;  %v20685_v52 = vand.u32 4294901760, %v18818_v51  ;;  %v18911_v10 = vand.u32 4294901760, %v7007_v24 }
 0x5af   : > { %14051 = vmatprep.mubr.f32.mxu0 %v18628_v4  ;;  %v7001_v4 = vsel %vm5841_vm12, %v17475_v39, 0  ;;  %v7103_v18 = vand.u32 4294901760, %v7102_v30  ;;  %v20686_v45 = vand.u32 4294901760, %v18865_v8  ;;  %v7009_v30 = vsel %vm5841_vm12, %v17491_v46, 0 }
 0x5b0   : > { %v7112_v60 = vsub.f32 %v18818_v51, %v20685_v52  ;;  %v18873_v26 = vand.u32 4294901760, %v7001_v4  ;;  %v7143_v55 = vand.u32 4294901760, %v7142_v36  ;;  %v18921_v50 = vand.u32 4294901760, %v7009_v30 }
 0x5b1   : > { %v18925_v52 = vsub.f32 %v7007_v24, %v18911_v10 }
 0x5b2   : > { %14052 = vmatmul.mubr.f32.gmra.mrb[46].mxu0 %v18650_v43  ;;  %v7003_v43 = vsel %vm5841_vm12, %v17471_v41, 0  ;;  %v7113_v9 = vand.u32 4294901760, %v7112_v60  ;;  %v7152_v60 = vsub.f32 %v18859_v63, %v20684_v6  ;;  %v18934_v48 = vsub.f32 %v7009_v30, %v18921_v50 }
 0x5b3   : > { %14056 = vmatprep.mubr.f32.mxu0 %v7083_v44  ;;  %v18888_v33 = vand.u32 4294901760, %v7003_v43  ;;  %v7123_v44 = vand.u32 4294901760, %v7122_v13  ;;  %v7162_v13 = vsub.f32 %v18865_v8, %v20686_v45  ;;  %v7211_v30 = vand.u32 4294901760, %v18925_v52 }
 0x5b5   : > { %v7163_v29 = vand.u32 4294901760, %v7162_v13 }
 0x5b6   : > { %14057 = vmatmul.mubr.f32.vlgmr.msra.gmra.mrb[32].mxu0 %v7093_v11  ;;  %v7133_v11 = vand.u32 4294901760, %v7132_v38  ;;  %v20980_v38 = vld [vmem:[#allocation7_spill] sm:$0xff] }
 0x5b7   : > { %14081 = vmatpush3.msra.mxu0 %v18764_v54  ;;  %14059 = vmatprep.mubr.f32.mxu0 %v7103_v18  ;;  %v18896_v54 = vsub.f32 %v7001_v4, %v18873_v26  ;;  %v20689_v18 = vand.u32 4294901760, %v18881_v2  ;;  %v18909_v4 = vsub.f32 %v7003_v43, %v18888_v33  ;;  %v7153_v43 = vand.u32 4294901760, %v7152_v60 }
 0x5b8   : > { %14106 = vmatprep.subr.mxu0 %v18751_v1 }
 0x5b9   : > { %v20691_v6 = vand.u32 4294901760, %v18896_v54  ;;  %v20692_v45 = vand.u32 4294901760, %v18909_v4 }
 0x5ba   : > { %14060 = vmatmul.mubr.f32.gmra.mrb[34].mxu0 %v7113_v9  ;;  %v18917_v9 = vsub.f32 %v7005_v49, %v18900_v34  ;;  %v7172_v49 = vsub.f32 %v18881_v2, %v20689_v18 }
 0x5bb   : > { %14062 = vmatprep.mubr.f32.mxu0 %v7123_v44  ;;  %v7011_v44 = vsel %vm5841_vm12, %v20980_v38, 0  ;;  %v7192_v18 = vsub.f32 %v18909_v4, %v20692_v45 }
 0x5bc   : > { %v18927_v36 = vand.u32 4294901760, %v7011_v44  ;;  %v7173_v60 = vand.u32 4294901760, %v7172_v49 }
 0x5be   : > { %14063 = vmatmul.mubr.f32.gmra.mrb[36].mxu0 %v7133_v11  ;;  %v7201_v11 = vand.u32 4294901760, %v18917_v9  ;;  %v18941_v24 = vsub.f32 %v7011_v44, %v18927_v36  ;;  %v7212_v44 = vsub.f32 %v18925_v52, %v7211_v30 }
 0x5bf   : > { %14065 = vmatprep.mubr.f32.mxu0 %v7143_v55  ;;  %v7182_v55 = vsub.f32 %v18896_v54, %v20691_v6  ;;  %v7221_v6 = vand.u32 4294901760, %v18934_v48 }
 0x5c0   : > { %v7202_v13 = vsub.f32 %v18917_v9, %v7201_v11  ;;  %v7213_v45 = vand.u32 4294901760, %v7212_v44  ;;  %v20985_v44 = vand.u32 4294901760, %v18825_v22 }
 0x5c1   : > { %v7183_v59 = vand.u32 4294901760, %v7182_v55  ;;  %v7222_v55 = vsub.f32 %v18934_v48, %v7221_v6 }
 0x5c2   : > { %14066 = vmatmul.mubr.f32.gmra.mrb[38].mxu0 %v7153_v43  ;;  %v7231_v43 = vand.u32 4294901760, %v18941_v24  ;;  %v7203_v49 = vand.u32 4294901760, %v7202_v13  ;;  %v20983_v13 = vand.u32 4294901760, %v18805_v17 }
 0x5c3   : > { %14068 = vmatprep.mubr.f32.mxu0 %v7163_v29  ;;  %v7193_v29 = vand.u32 4294901760, %v7192_v18 }
 0x5c6   : > { %14069 = vmatmul.mubr.f32.gmra.mrb[40].mxu0 %v7173_v60  ;;  %v7232_v60 = vsub.f32 %v18941_v24, %v7231_v43 }
 0x5c7   : > { %14071 = vmatprep.mubr.f32.mxu0 %v7183_v59  ;;  %v7223_v59 = vand.u32 4294901760, %v7222_v55 }
 0x5c8   : > { %v7233_v18 = vand.u32 4294901760, %v7232_v60 }
 0x5ca   : > { %14072 = vmatmul.mubr.f32.gmra.mrb[42].mxu0 %v7193_v29  ;;  %v20984_v29 = vand.u32 4294901760, %v18818_v51 }
 0x5cb   : > { %14074 = vmatprep.mubr.f32.mxu0 %v7203_v49  ;;  %v20986_v49 = vand.u32 4294901760, %v18838_v5 }
 0x5ce   : > { %14075 = vmatmul.mubr.f32.gmra.mrb[44].mxu0 %v7213_v45  ;;  %v20982_v45 = vand.u32 4294901760, %v18797_v20 }
 0x5cf   : > { %14077 = vmatprep.mubr.f32.mxu0 %v7223_v59 }
 0x5d2   : > { %14078 = vmatmul.mubr.f32.gmra.mrb[46].mxu0 %v7233_v18 }
 0x5d3   : > { %14082 = vmatprep.mubr.f32.mxu0 %v18778_v31 }
 0x5d6   : > { %14083 = vmatmul.mubr.f32.vlgmr.msra.gmra.mrb[32].mxu0 %v18783_v3 }
 0x5d7   : > { %14107 = vmatpush3.msra.mxu0 %v18751_v1  ;;  %14085 = vmatprep.mubr.f32.mxu0 %v18791_v21  ;;  %v20981_v1 = vand.u32 4294901760, %v18787_v56 }
 0x5d8   : > { %14132 = vmatprep.subr.mxu0 %v18736_v40 }
 0x5da   : > { %14086 = vmatmul.mubr.f32.gmra.mrb[34].mxu0 %v18800_v7 }
 0x5db   : > { %14088 = vmatprep.mubr.f32.mxu0 %v18807_v16 }
 0x5de   : > { %14089 = vmatmul.mubr.f32.gmra.mrb[36].mxu0 %v18814_v53 }
 0x5df   : > { %14091 = vmatprep.mubr.f32.mxu0 %v18822_v62 }
 0x5e2   : > { %14092 = vmatmul.mubr.f32.gmra.mrb[38].mxu0 %v18840_v28 }
 0x5e3   : > { %14094 = vmatprep.mubr.f32.mxu0 %v18848_v58 }
 0x5e6   : > { %14095 = vmatmul.mubr.f32.gmra.mrb[40].mxu0 %v18861_v0 }
 0x5e7   : > { %14097 = vmatprep.mubr.f32.mxu0 %v18873_v26 }
 0x5ea   : > { %14098 = vmatmul.mubr.f32.gmra.mrb[42].mxu0 %v18888_v33 }
 0x5eb   : > { %14100 = vmatprep.mubr.f32.mxu0 %v18900_v34 }
 0x5ee   : > { %14101 = vmatmul.mubr.f32.gmra.mrb[44].mxu0 %v18911_v10 }
 0x5ef   : > { %14103 = vmatprep.mubr.f32.mxu0 %v18921_v50 }
 0x5f2   : > { %14104 = vmatmul.mubr.f32.gmra.mrb[46].mxu0 %v18927_v36 }
 0x5f3   : > { %14108 = vmatprep.mubr.f32.mxu0 %v18787_v56  ;;  %v20987_v56 = vand.u32 4294901760, %v18844_v32 }
 0x5f6   : > { %14109 = vmatmul.mubr.f32.vlgmr.msra.gmra.mrb[32].mxu0 %v18797_v20  ;;  %v20988_v20 = vand.u32 4294901760, %v18859_v63 }
 0x5f7   : > { %14133 = vmatpush3.msra.mxu0 %v18736_v40  ;;  %14111 = vmatprep.mubr.f32.mxu0 %v18805_v17  ;;  %v20990_v17 = vand.u32 4294901760, %v18881_v2 }
 0x5f8   : > { %14158 = vmatprep.subr.mxu0 %v18756_v61 }
 0x5fa   : > { %14112 = vmatmul.mubr.f32.gmra.mrb[34].mxu0 %v18818_v51  ;;  %v20991_v51 = vand.u32 4294901760, %v18896_v54 }
 0x5fb   : > { %14114 = vmatprep.mubr.f32.mxu0 %v18825_v22  ;;  %v20992_v22 = vand.u32 4294901760, %v18909_v4 }
 0x5fe   : > { %14115 = vmatmul.mubr.f32.gmra.mrb[36].mxu0 %v18838_v5 }
 0x5ff   : > { %14117 = vmatprep.mubr.f32.mxu0 %v18844_v32 }
 0x602   : > { %14118 = vmatmul.mubr.f32.gmra.mrb[38].mxu0 %v18859_v63 }
 0x603   : > { %14120 = vmatprep.mubr.f32.mxu0 %v18865_v8 }
 0x606   : > { %14121 = vmatmul.mubr.f32.gmra.mrb[40].mxu0 %v18881_v2 }
 0x607   : > { %14123 = vmatprep.mubr.f32.mxu0 %v18896_v54 }
 0x60a   : > { %14124 = vmatmul.mubr.f32.gmra.mrb[42].mxu0 %v18909_v4 }
 0x60b   : > { %14126 = vmatprep.mubr.f32.mxu0 %v18917_v9 }
 0x60e   : > { %14127 = vmatmul.mubr.f32.gmra.mrb[44].mxu0 %v18925_v52 }
 0x60f   : > { %14129 = vmatprep.mubr.f32.mxu0 %v18934_v48 }
 0x612   : > { %14130 = vmatmul.mubr.f32.gmra.mrb[46].mxu0 %v18941_v24 }
 0x613   : > { %14134 = vmatprep.mubr.f32.mxu0 %v20981_v1 }
 0x616   : > { %14135 = vmatmul.mubr.f32.vlgmr.msra.gmra.mrb[32].mxu0 %v20982_v45 }
 0x617   : > { %14159 = vmatpush3.msra.mxu0 %v18756_v61  ;;  %14137 = vmatprep.mubr.f32.mxu0 %v20983_v13  ;;  %v20989_v61 = vand.u32 4294901760, %v18865_v8 }
 0x618   : > { %14184 = vmatprep.subr.mxu0 %v18736_v40 }
 0x61a   : > { %14138 = vmatmul.mubr.f32.gmra.mrb[34].mxu0 %v20984_v29 }
 0x61b   : > { %14140 = vmatprep.mubr.f32.mxu0 %v20985_v44 }
 0x61e   : > { %14141 = vmatmul.mubr.f32.gmra.mrb[36].mxu0 %v20986_v49 }
 0x61f   : > { %14143 = vmatprep.mubr.f32.mxu0 %v20987_v56 }
 0x622   : > { %14144 = vmatmul.mubr.f32.gmra.mrb[38].mxu0 %v20988_v20 }
 0x623   : > { %14146 = vmatprep.mubr.f32.mxu0 %v20989_v61 }
 0x626   : > { %14147 = vmatmul.mubr.f32.gmra.mrb[40].mxu0 %v20990_v17 }
 0x627   : > { %14149 = vmatprep.mubr.f32.mxu0 %v20991_v51 }
 0x62a   : > { %14150 = vmatmul.mubr.f32.gmra.mrb[42].mxu0 %v20992_v22 }
 0x62b   : > { %14152 = vmatprep.mubr.f32.mxu0 %v7201_v11 }
 0x62e   : > { %14153 = vmatmul.mubr.f32.gmra.mrb[44].mxu0 %v7211_v30 }
 0x62f   : > { %14155 = vmatprep.mubr.f32.mxu0 %v7221_v6 }
 0x632   : > { %14156 = vmatmul.mubr.f32.gmra.mrb[46].mxu0 %v7231_v43 }
 0x633   : > { %14160 = vmatprep.mubr.f32.mxu0 %v18778_v31 }
 0x636   : > { %14161 = vmatmul.mubr.f32.vlgmr.msra.gmra.mrb[32].mxu0 %v18783_v3 }
 0x637   : > { %14185 = vmatpush3.msra.mxu0 %v18736_v40  ;;  %14163 = vmatprep.mubr.f32.mxu0 %v18791_v21  ;;  %v20993_v40 = vld [vmem:[#allocation15_spill] sm:$0xff] }
 0x63a   : > { %14164 = vmatmul.mubr.f32.gmra.mrb[34].mxu0 %v18800_v7 }
 0x63b   : > { %14166 = vmatprep.mubr.f32.mxu0 %v18807_v16 }
 0x63e   : > { %14167 = vmatmul.mubr.f32.gmra.mrb[36].mxu0 %v18814_v53 }
 0x63f   : > { %14169 = vmatprep.mubr.f32.mxu0 %v18822_v62 }
 0x642   : > { %14170 = vmatmul.mubr.f32.gmra.mrb[38].mxu0 %v18840_v28 }
 0x643   : > { %14172 = vmatprep.mubr.f32.mxu0 %v18848_v58 }
 0x646   : > { %14173 = vmatmul.mubr.f32.gmra.mrb[40].mxu0 %v18861_v0 }
 0x647   : > { %14175 = vmatprep.mubr.f32.mxu0 %v18873_v26 }
 0x64a   : > { %14176 = vmatmul.mubr.f32.gmra.mrb[42].mxu0 %v18888_v33 }
 0x64b   : > { %14178 = vmatprep.mubr.f32.mxu0 %v18900_v34 }
 0x64e   : > { %14179 = vmatmul.mubr.f32.gmra.mrb[44].mxu0 %v18911_v10 }
 0x64f   : > { %14181 = vmatprep.mubr.f32.mxu0 %v18921_v50 }
 0x652   : > { %14182 = vmatmul.mubr.f32.gmra.mrb[46].mxu0 %v18927_v36 }
 0x653   : > { %14186 = vmatprep.mubr.f32.mxu0 %v18778_v31  ;;  %v1936_v31 = vmul.u32 8, %v20993_v40 }
 0x656   : > { %14187 = vmatmul.mubr.f32.vlgmr.msra.gmra.mrb[32].mxu0 %v18783_v3  ;;  %v20994_v3 = vld [vmem:[#allocation9_spill] sm:$0xff] }
 0x657   : > { %14189 = vmatprep.mubr.f32.mxu0 %v18791_v21  ;;  %vm1938_vm5 = vcmp.ge.s32.totalorder %v20994_v3, %v1936_v31  ;;  %v1940_v21 = vadd.s32 8, %v1936_v31 }
 0x659   : > { %vm1942_vm6 = vcmp.lt.s32.totalorder %v20994_v3, %v1940_v21  ;;  %v19143_v21 = vpop.permute.xlu0 %9579 }
 0x65a   : > { %14190 = vmatmul.mubr.f32.gmra.mrb[34].mxu0 %v18800_v7  ;;  %vm19067_vm7 = vmand %vm1938_vm5, %vm1942_vm6  ;;  %v20995_v7 = vmov 0 }
 0x65b   : > { %14192 = vmatprep.mubr.f32.mxu0 %v18807_v16  ;;  %v20996_v7 = vsel %vm19067_vm7, 4294967295, %v20995_v7  ;;  %v20998_v16 = vmov 0.0  }
 0x65c   : > { %20997 = vst [vmem:[#allocation23_spill] sm:$0xff] %v20996_v7 }
 0x65e   : > { %14193 = vmatmul.mubr.f32.gmra.mrb[36].mxu0 %v18814_v53  ;;  %v12128_v53 = vsel %vm19067_vm7, 1.0, %v20998_v16 }
 0x65f   : > { %14195 = vmatprep.mubr.f32.mxu0 %v18822_v62  ;;  %v19074_v62 = vsub.f32 %v12128_v53, %v12128_v53 }
 0x661   : > { %20999 = vst [vmem:[#allocation22_spill] sm:$0xff] %v19074_v62  ;;  %v19077_v48 = vand.u32 4294901760, %v19074_v62 }
 0x662   : > { %14196 = vmatmul.mubr.f32.gmra.mrb[38].mxu0 %v18840_v28 }
 0x663   : > { %14198 = vmatprep.mubr.f32.mxu0 %v18848_v58  ;;  %21000 = vst [vmem:[#allocation14_spill] sm:$0xff] %v19077_v48  ;;  %v8273_v5 = vsub.f32 %v19074_v62, %v19077_v48 }
 0x665   : > { %v19081_v28 = vand.u32 4294901760, %v8273_v5 }
 0x666   : > { %14199 = vmatmul.mubr.f32.gmra.mrb[40].mxu0 %v18861_v0 }
 0x667   : > { %14201 = vmatprep.mubr.f32.mxu0 %v18873_v26  ;;  %21001 = vst [vmem:[#allocation25_spill] sm:$0xff] %v19081_v28  ;;  %14242 = vmatprep.mubr.f32.mxu1 %v19081_v28 }
 0x66a   : > { %14202 = vmatmul.mubr.f32.gmra.mrb[42].mxu0 %v18888_v33 }
 0x66b   : > { %14204 = vmatprep.mubr.f32.mxu0 %v18900_v34 }
 0x66e   : > { %14205 = vmatmul.mubr.f32.gmra.mrb[44].mxu0 %v18911_v10 }
 0x66f   : > { %14207 = vmatprep.mubr.f32.mxu0 %v18921_v50 }
 0x672   : > { %14208 = vmatmul.mubr.f32.gmra.mrb[46].mxu0 %v18927_v36 }
 0x673   : > { %14452 = vmatprep.mubr.f32.mxu0 %v19081_v28 }
 0x729   : > { %v19085_v32 = vpop.f32.mrb[32].mxu0 }
 0x72a   : > { %v19087_v58 = vpop.f32.mrb[33].mxu0  ;;  %v8105_v0 = vsel %vm1952_vm14, %v19085_v32, -inf }
 0x72b   : > { %v8104_v26 = vsel %vm1952_vm14, %v19087_v58, -inf }
 0x72d   : > { %v19089_v52 = vpop.f32.mrb[34].mxu0 }
 0x72e   : > { %v19091_v50 = vpop.f32.mrb[35].mxu0  ;;  %v8107_v34 = vsel %vm1952_vm14, %v19089_v52, -inf }
 0x72f   : > { %v8106_v36 = vsel %vm1952_vm14, %v19091_v50, -inf }
 0x731   : > { %v19093_v63 = vpop.f32.mrb[36].mxu0 }
 0x732   : > { %v8110_v8 = vsel %vm1952_vm14, %v19093_v63, -inf  ;;  %v19099_v10 = vpop.f32.mrb[37].mxu0 }
 0x733   : > { %v8111_v2 = vmax.f32 %v8105_v0, %v8110_v8  ;;  %v8108_v6 = vsel %vm1952_vm14, %v19099_v10, -inf }
 0x734   : > { %v8109_v33 = vmax.f32 %v8104_v26, %v8108_v6 }
 0x735   : > { %v19105_v54 = vpop.f32.mrb[38].mxu0 }
 0x736   : > { %v8114_v4 = vsel %vm1952_vm14, %v19105_v54, -inf  ;;  %v19111_v9 = vpop.f32.mrb[39].mxu0 }
 0x737   : > { %v8115_v11 = vmax.f32 %v8107_v34, %v8114_v4  ;;  %v8112_v24 = vsel %vm1952_vm14, %v19111_v9, -inf  ;;  %v19149_v34 = vpop.permute.xlu0 %9585 }
 0x738   : > { %v8113_v30 = vmax.f32 %v8106_v36, %v8112_v24  ;;  %v19151_v24 = vpop.permute.xlu1 %9577 }
 0x739   : > { %v19117_v43 = vpop.f32.mrb[40].mxu0 }
 0x73a   : > { %v8118_v55 = vsel %vm1952_vm14, %v19117_v43, -inf  ;;  %v19121_v60 = vpop.f32.mrb[41].mxu0 }
 0x73b   : > { %v8119_v59 = vmax.f32 %v8111_v2, %v8118_v55  ;;  %v8116_v18 = vsel %vm1952_vm14, %v19121_v60, -inf  ;;  %v21002_v2 = vld [vmem:[#allocation24_spill] sm:$0xff]  ;;  %v19155_v55 = vpop.permute.xlu0 %9589 }
 0x73c   : > { %v8117_v1 = vmax.f32 %v8109_v33, %v8116_v18  ;;  %v1937_v6 = vmul.u32 8, %v21002_v2 }
 0x73d   : > { %v19125_v45 = vpop.f32.mrb[42].mxu0 }
 0x73e   : > { %v8122_v13 = vsel %vm1952_vm14, %v19125_v45, -inf  ;;  %v19129_v29 = vpop.f32.mrb[43].mxu0  ;;  %v1941_v36 = vadd.s32 8, %v1937_v6  ;;  %vm1939_vm8 = vcmp.ge.s32.totalorder %v20994_v3, %v1937_v6 }
 0x73f   : > { %v8123_v44 = vmax.f32 %v8115_v11, %v8122_v13  ;;  %v8120_v49 = vsel %vm1952_vm14, %v19129_v29, -inf  ;;  %v19161_v13 = vpop.permute.xlu1 %9583 }
 0x740   : > { %v8121_v56 = vmax.f32 %v8113_v30, %v8120_v49  ;;  %vm1943_vm9 = vcmp.lt.s32.totalorder %v20994_v3, %v1941_v36  ;;  %v19163_v49 = vpop.permute.xlu0 %9593 }
 0x741   : > { %v19133_v20 = vpop.f32.mrb[44].mxu0  ;;  %vm19157_vm10 = vmand %vm1939_vm8, %vm1943_vm9 }
 0x742   : > { %v8126_v61 = vsel %vm1952_vm14, %v19133_v20, -inf  ;;  %v19137_v17 = vpop.f32.mrb[45].mxu0 }
 0x743   : > { %v8127_v51 = vmax.f32 %v8119_v59, %v8126_v61  ;;  %v8124_v22 = vsel %vm1952_vm14, %v19137_v17, -inf  ;;  %v12129_v61 = vsel %vm19157_vm10, 1.0, %v20998_v16  ;;  %v19168_v3 = vpop.permute.xlu1 %9581 }
 0x744   : > { %v8125_v40 = vmax.f32 %v8117_v1, %v8124_v22  ;;  %v21003_v1 = vmov 0  ;;  %v19170_v22 = vsub.f32 %v12129_v61, %v12129_v61 }
 0x745   : > { %v19141_v31 = vpop.f32.mrb[46].mxu0  ;;  %v21004_v1 = vsel %vm19157_vm10, 4294967295, %v21003_v1 }
 0x746   : > { %v8132_v53 = vmax.f32 %v8125_v40, %v8127_v51  ;;  %v8130_v5 = vsel %vm1952_vm14, %v19141_v31, -inf  ;;  %v8094_v0 = vpop.f32.mrb[47].mxu0  ;;  %21005 = vst [vmem:[#allocation27_spill] sm:$0xff] %v21004_v1  ;;  %21006 = vst [vmem:[#allocation29_spill] sm:$0xff] %v19170_v22 }
 0x747   : > { %v8131_v8 = vmax.f32 %v8123_v44, %v8130_v5  ;;  %v8128_v26 = vsel %vm1952_vm14, %v8094_v0, -inf }
 0x748   : > { %v8129_v33 = vmax.f32 %v8121_v56, %v8128_v26 }
 0x74a   : > { %v8133_v4 = vmax.f32 %v8129_v33, %v8131_v8  ;;  %v19179_v33 = vpop.permute.xlu0 %9597 }
 0x74c   : > { %v8134_v11 = vmax.f32 %v8132_v53, %v8133_v4 }
 0x74e   : > { %v8135_v30 = vrot.slane %v8134_v11, 4  ;;  %v19194_v61 = vpop.permute.xlu0 %9601 }
 0x750   : > { %v8136_v59 = vmax.f32 %v8134_v11, %v8135_v30 }
 0x752   : > { %v8137_v18 = vrot.slane %v8136_v59, 2 }
 0x754   : > { %v8138_v44 = vmax.f32 %v8136_v59, %v8137_v18 }
 0x756   : > { %v8139_v56 = vrot.slane %v8138_v44, 1 }
 0x758   : > { %v8140_v51 = vmax.f32 %v8138_v44, %v8139_v56 }
 0x75a   : > { %v8155_v40 = vsub.f32 %v8094_v0, %v8140_v51  ;;  %v8142_v53 = vsub.f32 %v19085_v32, %v8140_v51  ;;  %v8141_v5 = vsub.f32 %v19087_v58, %v8140_v51  ;;  %v8144_v8 = vsub.f32 %v19089_v52, %v8140_v51 }
 0x75b   : > { %v8143_v26 = vsub.f32 %v19091_v50, %v8140_v51  ;;  %v8146_v2 = vsub.f32 %v19093_v63, %v8140_v51  ;;  %v8145_v6 = vsub.f32 %v19099_v10, %v8140_v51  ;;  %v8148_v16 = vsub.f32 %v19105_v54, %v8140_v51  ;;  %v19186_v63 = vpop.permute.xlu1 %9587 }
 0x75c   : > { %v8185_v4 = vmul.f32 1.442695, %v8155_v40  ;;  %v8159_v36 = vmul.f32 1.442695, %v8142_v53  ;;  %v8157_v11 = vmul.f32 1.442695, %v8141_v5  ;;  %v8147_v0 = vsub.f32 %v19111_v9, %v8140_v51 }
 0x75d   : > { %v8163_v32 = vmul.f32 1.442695, %v8144_v8  ;;  %v8150_v58 = vsub.f32 %v19117_v43, %v8140_v51  ;;  %v8161_v52 = vmul.f32 1.442695, %v8143_v26  ;;  %v8167_v30 = vmul.f32 1.442695, %v8146_v2 }
 0x75e   : > { %16271 = vpow2.f32 %v8185_v4  ;;  %v19184_v50 = vand.u32 4294901760, %v19170_v22  ;;  %v8165_v10 = vmul.f32 1.442695, %v8145_v6  ;;  %v8149_v54 = vsub.f32 %v19121_v60, %v8140_v51 }
 0x75f   : > { %16273 = vpow2.f32 %v8159_v36  ;;  %v8152_v59 = vsub.f32 %v19125_v45, %v8140_v51  ;;  %v8151_v9 = vsub.f32 %v19129_v29, %v8140_v51  ;;  %v8154_v18 = vsub.f32 %v19133_v20, %v8140_v51  ;;  %v9592_v29 = vpop.permute.xlu1 %9591 }
 0x760   : > { %21007 = vst [vmem:[#allocation28_spill] sm:$0xff] %v19184_v50  ;;  %16275 = vpow2.f32 %v8157_v11  ;;  %v8153_v43 = vsub.f32 %v19137_v17, %v8140_v51  ;;  %v8171_v44 = vmul.f32 1.442695, %v8148_v16  ;;  %v8156_v56 = vsub.f32 %v19141_v31, %v8140_v51  ;;  %v9606_v31 = vpop.permute.xlu0 %9605 }
 0x761   : > { %16277 = vpow2.f32 %v8163_v32  ;;  %v8169_v40 = vmul.f32 1.442695, %v8147_v0  ;;  %v8175_v53 = vmul.f32 1.442695, %v8150_v58  ;;  %v8173_v60 = vmul.f32 1.442695, %v8149_v54 }
 0x762   : > { %16279 = vpow2.f32 %v8161_v52  ;;  %v8283_v45 = vsub.f32 %v19170_v22, %v19184_v50  ;;  %v8179_v20 = vmul.f32 1.442695, %v8152_v59  ;;  %v8177_v17 = vmul.f32 1.442695, %v8151_v9 }
 0x763   : > { %16281 = vpow2.f32 %v8167_v30  ;;  %v8183_v5 = vmul.f32 1.442695, %v8154_v18  ;;  %v19200_v51 = vmul.f32 1.442695, %v8153_v43  ;;  %v19202_v26 = vmul.f32 1.442695, %v8156_v56  ;;  %v9596_v30 = vpop.permute.xlu1 %9595 }
 0x764   : > { %16283 = vpow2.f32 %v8165_v10  ;;  %v19204_v2 = vand.u32 4294901760, %v8283_v45 }
 0x765   : > { %16285 = vpow2.f32 %v8171_v44 }
 0x766   : > { %16287 = vpow2.f32 %v8169_v40  ;;  %21008 = vst [vmem:[#allocation13_spill] sm:$0xff] %v19204_v2 }
 0x767   : > { %16289 = vpow2.f32 %v8175_v53  ;;  %v9600_v4 = vpop.permute.xlu1 %9599 }
 0x768   : > { %v19198_v8 = vpop.eup %16271  ;;  %16291 = vpow2.f32 %v8173_v60 }
 0x769   : > { %v19206_v6 = vpop.eup %16273  ;;  %16293 = vpow2.f32 %v8179_v20  ;;  %v19209_v16 = vmul.f32 %v19198_v8, %v9606_v31  ;;  %v19214_v36 = vmul.f32 %v19198_v8, %v17491_v46 }
 0x76a   : > { %v19216_v11 = vpop.eup %16275  ;;  %v9626_v0 = vmul.f32 %v19206_v6, %v19143_v21  ;;  %v20703_v32 = vand.u32 4294901760, %v19206_v6  ;;  %v19223_v58 = vmul.f32 %v19206_v6, %v17420_v15  ;;  %16295 = vpow2.f32 %v8177_v17 }
 0x76b   : > { %v19225_v52 = vpop.eup %16277  ;;  %v9625_v10 = vmul.f32 %v19216_v11, %v19151_v24  ;;  %v20704_v46 = vand.u32 4294901760, %v19216_v11  ;;  %v19232_v54 = vmul.f32 %v19216_v11, %v17424_v25  ;;  %16297 = vpow2.f32 %v8183_v5 }
 0x76c   : > { %v19234_v21 = vpop.eup %16279  ;;  %9659 = vrot.lane.b32.xlu1 %v9626_v0, %s16377_s17  ;;  %v9628_v15 = vmul.f32 %v19225_v52, %v19161_v13  ;;  %v20693_v59 = vand.u32 4294901760, %v19225_v52  ;;  %v20697_v9 = vand.u32 4294901760, %v19223_v58  ;;  %v19243_v24 = vmul.f32 %v19225_v52, %v17428_v19 }
 0x76d   : > { %v19245_v18 = vpop.eup %16281  ;;  %9657 = vrot.lane.b32.xlu0 %v9625_v10, %s16377_s17  ;;  %v19252_v25 = vpack.c.bf16 %v20703_v32, %v20704_v46  ;;  %v9627_v13 = vmul.f32 %v19234_v21, %v19168_v3  ;;  %v20696_v43 = vand.u32 4294901760, %v19234_v21  ;;  %v20700_v44 = vand.u32 4294901760, %v19232_v54 }
 0x76e   : > { %v19258_v56 = vpop.eup %16283  ;;  %v19262_v19 = vmul.f32 %v19234_v21, %v17432_v35  ;;  %v20698_v40 = vand.u32 4294901760, %v19243_v24  ;;  %v9630_v53 = vmul.f32 %v19245_v18, %v19186_v63  ;;  %v20694_v60 = vand.u32 4294901760, %v19245_v18 }
 0x76f   : > { %21009 = vst [vmem:[#allocation11_spill] sm:$0xff] %v19252_v25  ;;  %v19268_v45 = vpop.eup %16285  ;;  %15015 = vmatprep.subr.bf16.mxu1 %v19252_v25  ;;  %v19275_v3 = vpack.c.bf16 %v20693_v59, %v20696_v43  ;;  %v19281_v35 = vpack.c.bf16 %v20697_v9, %v20700_v44  ;;  %v9629_v63 = vmul.f32 %v19258_v56, %v19149_v34  ;;  %v20695_v20 = vand.u32 4294901760, %v19258_v56 }
 0x770   : > { %v19286_v17 = vpop.eup %16287  ;;  %15017 = vmatpush3.bf16.msra.mxu1 %v19252_v25  ;;  %9663 = vrot.lane.b32.xlu1 %v9628_v15, %s16377_s17  ;;  %v20699_v5 = vand.u32 4294901760, %v19262_v19  ;;  %v19293_v31 = vmul.f32 %v19258_v56, %v17446_v37  ;;  %v19297_v0 = vmul.f32 %v19245_v18, %v17442_v47  ;;  %v9632_v34 = vmul.f32 %v19268_v45, %v9592_v29 }
 0x771   : > { %21010 = vst [vmem:[#allocation12_spill] sm:$0xff] %v19275_v3  ;;  %21011 = vst [vmem:[#allocation10_spill] sm:$0xff] %v19281_v35  ;;  %v19300_v10 = vpop.eup %16289  ;;  %9661 = vrot.lane.b32.xlu0 %v9627_v13, %s16377_s17  ;;  %15019 = vmatprep.subr.bf16.mxu1 %v19275_v3  ;;  %v19308_v15 = vpack.c.bf16 %v20694_v60, %v20695_v20  ;;  %v9631_v37 = vmul.f32 %v19286_v17, %v19155_v55  ;;  %v20702_v47 = vand.u32 4294901760, %v19286_v17 }
 0x772   : > { %v20701_v29 = vand.u32 4294901760, %v19268_v45  ;;  %v19314_v59 = vpop.eup %16291  ;;  %15207 = vmatprep.subr.bf16.mxu0 %v19281_v35  ;;  %v19321_v13 = vpack.c.bf16 %v20698_v40, %v20699_v5  ;;  %v20706_v60 = vand.u32 4294901760, %v19293_v31  ;;  %v20705_v20 = vand.u32 4294901760, %v19297_v0 }
 0x773   : > { %21012 = vst [vmem:[#allocation16_spill] sm:$0xff] %v19308_v15  ;;  %v19327_v55 = vmul.f32 %v19286_v17, %v17458_v27  ;;  %v19329_v43 = vpop.eup %16293  ;;  %15209 = vmatpush3.bf16.msra.mxu0 %v19281_v35  ;;  %v19340_v40 = vmul.f32 %v19268_v45, %v17454_v23  ;;  %v9634_v5 = vmul.f32 %v19300_v10, %v9596_v30  ;;  %v20710_v30 = vand.u32 4294901760, %v19300_v10  ;;  %v9604_v23 = vpop.permute.xlu1 %9603 }
 0x774   : > { %21013 = vst [vmem:[#allocation17_spill] sm:$0xff] %v19321_v13  ;;  %v19336_v9 = vpack.c.bf16 %v20701_v29, %v20702_v47  ;;  %v9633_v27 = vmul.f32 %v19314_v59, %v19163_v49  ;;  %v19345_v44 = vpop.eup %16295  ;;  %15211 = vmatprep.subr.bf16.mxu0 %v19321_v13  ;;  %15021 = vmatpush3.bf16.msra.mxu1 %v19275_v3  ;;  %v20711_v47 = vand.u32 4294901760, %v19314_v59  ;;  %v20712_v49 = vand.u32 4294901760, %v19329_v43 }
 0x775   : > { %v19353_v29 = vpack.c.bf16 %v20705_v20, %v20706_v60  ;;  %v19358_v32 = vpop.eup %16297  ;;  %9667 = vrot.lane.b32.xlu1 %v9630_v53, %s16377_s17  ;;  %9665 = vrot.lane.b32.xlu0 %v9629_v63, %s16377_s17  ;;  %v19365_v46 = vmul.f32 %v19314_v59, %v17467_v42  ;;  %v19369_v20 = vmul.f32 %v19300_v10, %v17463_v12  ;;  %v20713_v42 = vand.u32 4294901760, %v19345_v44 }
 0x776   : > { %21014 = vst [vmem:[#allocation19_spill] sm:$0xff] %v19336_v9  ;;  %v9636_v60 = vmul.f32 %v19329_v43, %v9600_v4  ;;  %15023 = vmatprep.subr.bf16.mxu1 %v19308_v15  ;;  %v19377_v53 = vpack.c.bf16 %v20710_v30, %v20711_v47  ;;  %v9635_v63 = vmul.f32 %v19345_v44, %v19179_v33  ;;  %v21017_v12 = vand.u32 4294901760, %v19327_v55 }
 0x777   : > { %21015 = vst [vmem:[#allocation18_spill] sm:$0xff] %v19353_v29  ;;  %15213 = vmatpush3.bf16.msra.mxu0 %v19321_v13  ;;  %v21018_v4 = vand.u32 4294901760, %v19340_v40  ;;  %v20715_v50 = vand.u32 4294901760, %v19365_v46  ;;  %v20714_v30 = vand.u32 4294901760, %v19369_v20  ;;  %v19394_v33 = vmul.f32 %v19345_v44, %v17475_v39 }
 0x778   : > { %21016 = vst [vmem:[#allocation20_spill] sm:$0xff] %v19377_v53  ;;  %15215 = vmatprep.subr.bf16.mxu0 %v19353_v29  ;;  %15025 = vmatpush3.bf16.msra.mxu1 %v19308_v15  ;;  %v19402_v47 = vpack.c.bf16 %v20712_v49, %v20713_v42  ;;  %16299 = vpow2.f32 %v19200_v51 }
 0x779   : > { %v19388_v28 = vpack.c.bf16 %v21018_v4, %v21017_v12  ;;  %v19406_v12 = vmul.f32 %v19329_v43, %v17471_v41  ;;  %v19409_v4 = vmul.f32 %v19358_v32, %v9604_v23  ;;  %9671 = vrot.lane.b32.xlu1 %v9632_v34, %s16377_s17  ;;  %9669 = vrot.lane.b32.xlu0 %v9631_v37, %s16377_s17  ;;  %v20716_v49 = vand.u32 4294901760, %v19394_v33 }
 0x77a   : > { %21020 = vst [vmem:[#allocation21_spill] sm:$0xff] %v19402_v47  ;;  %v19418_v39 = vpack.c.bf16 %v20714_v30, %v20715_v50  ;;  %v19424_v23 = vmul.f32 %v19358_v32, %v17479_v14  ;;  %15027 = vmatprep.subr.bf16.mxu1 %v19336_v9  ;;  %16301 = vpow2.f32 %v19202_v26  ;;  %v21022_v37 = vand.u32 4294901760, %v19216_v11 }
 0x77b   : > { %21019 = vst [vmem:[#allocation26_spill] sm:$0xff] %v19388_v28  ;;  %15217 = vmatpush3.bf16.msra.mxu0 %v19353_v29  ;;  %v21023_v14 = vand.u32 4294901760, %v19206_v6  ;;  %v21024_v41 = vand.u32 4294901760, %v19232_v54  ;;  %v21025_v34 = vand.u32 4294901760, %v19223_v58  ;;  %v21030_v30 = vand.u32 4294901760, %v19262_v19 }
 0x77c   : > { %21021 = vst [vmem:[#allocation8_spill] sm:$0xff] %v19418_v39  ;;  %v19433_v42 = vsub.f32 %v19216_v11, %v21022_v37  ;;  %15219 = vmatprep.subr.bf16.mxu0 %v19388_v28  ;;  %15029 = vmatpush3.bf16.msra.mxu1 %v19336_v9  ;;  %v21026_v11 = vand.u32 4294901760, %v19406_v12 }
 0x77d   : > { %v19440_v50 = vsub.f32 %v19206_v6, %v21023_v14  ;;  %v19445_v26 = vsub.f32 %v19232_v54, %v21024_v41  ;;  %v19450_v51 = vsub.f32 %v19223_v58, %v21025_v34  ;;  %v21028_v54 = vand.u32 4294901760, %v19234_v21  ;;  %9675 = vrot.lane.b32.xlu1 %v9634_v5, %s16377_s17  ;;  %9673 = vrot.lane.b32.xlu0 %v9633_v27, %s16377_s17 }
 0x77e   : > { %v19458_v6 = vpack.c.bf16 %v21026_v11, %v20716_v49  ;;  %v20717_v37 = vand.u32 4294901760, %v19433_v42  ;;  %v21029_v58 = vand.u32 4294901760, %v19225_v52  ;;  %15031 = vmatprep.subr.bf16.mxu1 %v19377_v53  ;;  %v21069_v3 = vand.u32 4294901760, %v19433_v42 }
 0x77f   : > { %v19464_v41 = vsub.f32 %v19234_v21, %v21028_v54  ;;  %v20718_v14 = vand.u32 4294901760, %v19440_v50  ;;  %v20721_v11 = vand.u32 4294901760, %v19445_v26  ;;  %v20722_v49 = vand.u32 4294901760, %v19450_v51  ;;  %15221 = vmatpush3.bf16.msra.mxu0 %v19388_v28 }
 0x780   : > { %21027 = vst [vmem:[#allocation7_spill] sm:$0xff] %v19458_v6  ;;  %v19469_v34 = vsub.f32 %v19225_v52, %v21029_v58  ;;  %v19479_v21 = vsub.f32 %v19262_v19, %v21030_v30  ;;  %v8294_v52 = vsub.f32 %v19433_v42, %v20717_v37  ;;  %v21031_v54 = vand.u32 4294901760, %v19243_v24  ;;  %15223 = vmatprep.subr.bf16.mxu0 %v19418_v39 }
 0x781   : > { %v20729_v5 = vand.u32 4294901760, %v19464_v41  ;;  %v8301_v19 = vsub.f32 %v19440_v50, %v20718_v14  ;;  %v8994_v30 = vsub.f32 %v19445_v26, %v20721_v11  ;;  %v9001_v37 = vsub.f32 %v19450_v51, %v20722_v49  ;;  %15033 = vmatpush3.bf16.msra.mxu1 %v19377_v53  ;;  %9679 = vrot.lane.b32.xlu1 %v9636_v60, %s16377_s17 }
 0x782   : > { %v19490_v58 = vsub.f32 %v19243_v24, %v21031_v54  ;;  %v8295_v24 = vand.u32 4294901760, %v8294_v52  ;;  %v21032_v14 = vand.u32 4294901760, %v19469_v34  ;;  %9677 = vrot.lane.b32.xlu0 %v9635_v63, %s16377_s17  ;;  %v21033_v53 = vand.u32 4294901760, %v19479_v21  ;;  %v19517_v29 = vpop.eup %16299  ;;  %15035 = vmatprep.subr.bf16.mxu1 %v19402_v47 }
 0x783   : > { %v8308_v54 = vsub.f32 %v19464_v41, %v20729_v5  ;;  %v8302_v49 = vand.u32 4294901760, %v8301_v19  ;;  %v8995_v27 = vand.u32 4294901760, %v8994_v30  ;;  %v9002_v9 = vand.u32 4294901760, %v9001_v37  ;;  %15225 = vmatpush3.bf16.msra.mxu0 %v19418_v39 }
 0x784   : > { %v8315_v28 = vsub.f32 %v19469_v34, %v21032_v14  ;;  %v20732_v11 = vand.u32 4294901760, %v19490_v58  ;;  %v9008_v52 = vsub.f32 %v19479_v21, %v21033_v53  ;;  %v21034_v60 = vand.u32 4294901760, %v19258_v56  ;;  %v19538_v30 = vpop.eup %16301  ;;  %15227 = vmatprep.subr.bf16.mxu0 %v19458_v6 }
 0x785   : > { %v8309_v5 = vand.u32 4294901760, %v8308_v54  ;;  %v9637_v53 = vmul.f32 %v19517_v29, %v19194_v61  ;;  %v20736_v37 = vand.u32 4294901760, %v19517_v29  ;;  %v19534_v19 = vmul.f32 %v19517_v29, %v17483_v57  ;;  %v9608_v54 = vpop.permute.xlu1 %9607  ;;  %15037 = vmatpush3.bf16.msra.mxu1 %v19402_v47  ;;  %9683 = vrot.lane.b32.xlu1 %v19409_v4, %s16377_s17 }
 0x786   : > { %v8316_v15 = vand.u32 4294901760, %v8315_v28  ;;  %v9015_v14 = vsub.f32 %v19490_v58, %v20732_v11  ;;  %v19526_v63 = vsub.f32 %v19258_v56, %v21034_v60  ;;  %v19536_v28 = vpack.c.bf16 %v8302_v49, %v8295_v24 }
 0x787   : > { %v19542_v56 = vpack.c.bf16 %v9002_v9, %v8995_v27  ;;  %v9009_v61 = vand.u32 4294901760, %v9008_v52  ;;  %9681 = vrot.lane.b32.xlu0 %v9637_v53, %s16377_s17  ;;  %v21035_v57 = vand.u32 4294901760, %v19358_v32  ;;  %v20733_v24 = vand.u32 4294901760, %v19534_v19  ;;  %15229 = vmatpush3.bf16.msra.mxu0 %v19458_v6 }
 0x788   : > { %v19544_v60 = vpack.c.bf16 %v8316_v15, %v8309_v5  ;;  %v9016_v11 = vand.u32 4294901760, %v9015_v14  ;;  %v9640_v9 = vmul.f32 %v19538_v30, %v9608_v54  ;;  %v20734_v15 = vand.u32 4294901760, %v19538_v30 }
 0x789   : > { %v19553_v49 = vpack.c.bf16 %v21035_v57, %v20736_v37  ;;  %v19560_v5 = vmul.f32 %v19538_v30, %v20980_v38  ;;  %v20735_v4 = vand.u32 4294901760, %v19526_v63  ;;  %v21037_v52 = vand.u32 4294901760, %v19245_v18 }
 0x78a   : > { %v19562_v27 = vpack.c.bf16 %v9016_v11, %v9009_v61  ;;  %v21038_v53 = vand.u32 4294901760, %v19424_v23  ;;  %v21040_v38 = vand.u32 4294901760, %v19198_v8  ;;  %v21042_v61 = vand.u32 4294901760, %v19293_v31  ;;  %9687 = vrot.lane.b32.xlu1 %v9640_v9, %s16377_s17 }
 0x78b   : > { %21036 = vst [vmem:[#allocation15_spill] sm:$0xff] %v19553_v49  ;;  %v19568_v14 = vsub.f32 %v19245_v18, %v21037_v52  ;;  %15039 = vmatprep.subr.bf16.mxu1 %v19553_v49  ;;  %v20737_v57 = vand.u32 4294901760, %v19560_v5  ;;  %v8322_v52 = vsub.f32 %v19526_v63, %v20735_v4  ;;  %v21045_v4 = vand.u32 4294901760, %v19268_v45  ;;  %9685 = vrot.lane.b32.xlu0 %v19209_v16, %s16377_s17 }
 0x78c   : > { %v19576_v54 = vpack.c.bf16 %v21038_v53, %v20733_v24  ;;  %v19582_v11 = vpack.c.bf16 %v20734_v15, %v21040_v38  ;;  %v19587_v18 = vsub.f32 %v19293_v31, %v21042_v61  ;;  %15041 = vmatpush3.bf16.msra.mxu1 %v19553_v49  ;;  %v21043_v24 = vand.u32 4294901760, %v19297_v0 }
 0x78d   : > { %v21044_v61 = vand.u32 4294901760, %v19286_v17  ;;  %v19611_v37 = vsub.f32 %v19268_v45, %v21045_v4  ;;  %v21046_v53 = vand.u32 4294901760, %v19327_v55  ;;  %v8323_v9 = vand.u32 4294901760, %v8322_v52 }
 0x78e   : > { %21039 = vst [vmem:[#allocation9_spill] sm:$0xff] %v19576_v54  ;;  %21041 = vst [vmem:[#allocation24_spill] sm:$0xff] %v19582_v11  ;;  %v19598_v38 = vsub.f32 %v19297_v0, %v21043_v24  ;;  %15231 = vmatprep.subr.bf16.mxu0 %v19576_v54  ;;  %v20740_v31 = vand.u32 4294901760, %v19587_v18  ;;  %15043 = vmatprep.subr.bf16.mxu1 %v19582_v11  ;;  %v21047_v24 = vand.u32 4294901760, %v19214_v36  ;;  %v21049_v45 = vand.u32 4294901760, %v19568_v14 }
 0x78f   : > { %v19606_v15 = vsub.f32 %v19286_v17, %v21044_v61  ;;  %v19616_v0 = vsub.f32 %v19327_v55, %v21046_v53  ;;  %15233 = vmatpush3.bf16.msra.mxu0 %v19576_v54  ;;  %v21054_v47 = vand.u32 4294901760, %v19300_v10  ;;  %v15086_v13 = vpack.c.bf16 %v19568_v14, %v19526_v63 }
 0x790   : > { %v19625_v17 = vpack.c.bf16 %v20737_v57, %v21047_v24  ;;  %v8329_v4 = vsub.f32 %v19568_v14, %v21049_v45  ;;  %v20743_v61 = vand.u32 4294901760, %v19598_v38  ;;  %v9022_v16 = vsub.f32 %v19587_v18, %v20740_v31  ;;  %15045 = vmatpush3.bf16.msra.mxu1 %v19582_v11 }
 0x791   : > { %v20748_v55 = vand.u32 4294901760, %v19606_v15  ;;  %v21050_v57 = vand.u32 4294901760, %v19340_v40  ;;  %v21051_v31 = vand.u32 4294901760, %v19314_v59  ;;  %15047 = vmatprep.subr.bf16.mxu1 %v19536_v28  ;;  %v21052_v11 = vand.u32 4294901760, %v19611_v37 }
 0x792   : > { %21048 = vst [vmem:[#allocation30_spill] sm:$0xff] %v19625_v17  ;;  %15235 = vmatprep.subr.bf16.mxu0 %v19625_v17  ;;  %v8330_v52 = vand.u32 4294901760, %v8329_v4  ;;  %v9029_v45 = vsub.f32 %v19598_v38, %v20743_v61  ;;  %v9023_v24 = vand.u32 4294901760, %v9022_v16  ;;  %v21053_v49 = vand.u32 4294901760, %v19616_v0 }
 0x793   : > { %v19646_v54 = vsub.f32 %v19340_v40, %v21050_v57  ;;  %v19651_v53 = vsub.f32 %v19314_v59, %v21051_v31  ;;  %v8336_v4 = vsub.f32 %v19606_v15, %v20748_v55  ;;  %v8343_v61 = vsub.f32 %v19611_v37, %v21052_v11  ;;  %15237 = vmatpush3.bf16.msra.mxu0 %v19625_v17 }
 0x794   : > { %v9036_v40 = vsub.f32 %v19616_v0, %v21053_v49  ;;  %v15054_v57 = vpack.c.bf16 %v8330_v52, %v8323_v9  ;;  %v9030_v6 = vand.u32 4294901760, %v9029_v45  ;;  %14243 = vmatmul.mubr.f32.vlgmr.msra.gmra.mrb[32].mxu1 %v19204_v2  ;;  %v19670_v11 = vsub.f32 %v19300_v10, %v21054_v47  ;;  %15239 = vmatprep.subr.bf16.mxu0 %v19542_v56 }
 0x795   : > { %v20757_v59 = vand.u32 4294901760, %v19646_v54  ;;  %v20751_v31 = vand.u32 4294901760, %v19651_v53  ;;  %v8337_v16 = vand.u32 4294901760, %v8336_v4  ;;  %v8344_v55 = vand.u32 4294901760, %v8343_v61  ;;  %15049 = vmatpush3.bf16.msra.mxu1 %v19536_v28 }
 0x796   : > { %v15246_v49 = vpack.c.bf16 %v9030_v6, %v9023_v24  ;;  %v9037_v9 = vand.u32 4294901760, %v9036_v40  ;;  %15051 = vmatprep.subr.bf16.mxu1 %v19544_v60  ;;  %v20752_v10 = vand.u32 4294901760, %v19670_v11  ;;  %v21055_v47 = vand.u32 4294901760, %v19365_v46  ;;  %14453 = vmatmul.mubr.f32.vlgmr.msra.gmra.mrb[48].mxu0 %v19204_v2 }
 0x797   : > { %v9043_v52 = vsub.f32 %v19646_v54, %v20757_v59  ;;  %v8350_v45 = vsub.f32 %v19651_v53, %v20751_v31  ;;  %v15058_v61 = vpack.c.bf16 %v8344_v55, %v8337_v16  ;;  %v21056_v6 = vand.u32 4294901760, %v19369_v20  ;;  %15241 = vmatpush3.bf16.msra.mxu0 %v19542_v56 }
 0x798   : > { %v19685_v4 = vsub.f32 %v19365_v46, %v21055_v47  ;;  %v20753_v24 = vmov 1.0   ;;  %v21057_v16 = vand.u32 4294901760, %v19345_v44  ;;  %v21058_v46 = vand.u32 4294901760, %v19329_v43  ;;  %15243 = vmatprep.subr.bf16.mxu0 %v19562_v27 }
 0x799   : > { %v19690_v28 = vsub.f32 %v19369_v20, %v21056_v6  ;;  %14277 = vmatprep.mubr.msk.f32.mxu1 %vm19067_vm7, %v20753_v24  ;;  %v9044_v55 = vand.u32 4294901760, %v9043_v52  ;;  %v8351_v40 = vand.u32 4294901760, %v8350_v45  ;;  %v8357_v20 = vsub.f32 %v19670_v11, %v20752_v10  ;;  %14487 = vmatprep.mubr.msk.f32.mxu0 %vm19067_vm7, %v20753_v24 }
 0x79a   : > { %v19699_v31 = vsub.f32 %v19345_v44, %v21057_v16  ;;  %v19704_v47 = vsub.f32 %v19329_v43, %v21058_v46  ;;  %v20756_v6 = vand.u32 4294901760, %v19685_v4  ;;  %v21059_v45 = vand.u32 4294901760, %v19394_v33  ;;  %15053 = vmatpush3.bf16.msra.mxu1 %v19544_v60 }
 0x79b   : > { %v20755_v52 = vand.u32 4294901760, %v19690_v28  ;;  %v15250_v43 = vpack.c.bf16 %v9044_v55, %v9037_v9  ;;  %v21060_v46 = vand.u32 4294901760, %v19406_v12  ;;  %15055 = vmatprep.subr.bf16.mxu1 %v15054_v57  ;;  %15245 = vmatpush3.bf16.msra.mxu0 %v19562_v27  ;;  %v15278_v48 = vpack.c.bf16 %v19598_v38, %v19587_v18 }
 0x79c   : > { %v19715_v44 = vsub.f32 %v19394_v33, %v21059_v45  ;;  %v20758_v56 = vand.u32 4294901760, %v19699_v31  ;;  %v20760_v16 = vand.u32 4294901760, %v19704_v47  ;;  %v8358_v33 = vand.u32 4294901760, %v8357_v20  ;;  %15247 = vmatprep.subr.bf16.mxu0 %v15246_v49 }
 0x79d   : > { %v19727_v10 = vsub.f32 %v19406_v12, %v21060_v46  ;;  %v9050_v45 = vsub.f32 %v19685_v4, %v20756_v6  ;;  %v9057_v60 = vsub.f32 %v19690_v28, %v20755_v52  ;;  %v21061_v46 = vand.u32 4294901760, %v19517_v29 }
 0x79e   : > { %v20768_v9 = vand.u32 4294901760, %v19715_v44  ;;  %v8364_v55 = vsub.f32 %v19699_v31, %v20758_v56  ;;  %v8371_v12 = vsub.f32 %v19704_v47, %v20760_v16  ;;  %v15062_v52 = vpack.c.bf16 %v8358_v33, %v8351_v40  ;;  %15057 = vmatpush3.bf16.msra.mxu1 %v15054_v57 }
 0x79f   : > { %v20763_v20 = vand.u32 4294901760, %v19727_v10  ;;  %v19746_v24 = vsub.f32 %v19517_v29, %v21061_v46  ;;  %v9051_v6 = vand.u32 4294901760, %v9050_v45  ;;  %v9058_v59 = vand.u32 4294901760, %v9057_v60  ;;  %15059 = vmatprep.subr.bf16.mxu1 %v15058_v61  ;;  %15249 = vmatpush3.bf16.msra.mxu0 %v15246_v49 }
 0x7a0   : > { %v9064_v56 = vsub.f32 %v19715_v44, %v20768_v9  ;;  %v8365_v2 = vand.u32 4294901760, %v8364_v55  ;;  %v8372_v16 = vand.u32 4294901760, %v8371_v12  ;;  %v21062_v40 = vand.u32 4294901760, %v19358_v32  ;;  %15251 = vmatprep.subr.bf16.mxu0 %v15250_v43 }
 0x7a1   : > { %v9071_v7 = vsub.f32 %v19727_v10, %v20763_v20  ;;  %v20767_v29 = vand.u32 4294901760, %v19746_v24  ;;  %v15254_v46 = vpack.c.bf16 %v9058_v59, %v9051_v6  ;;  %v21063_v45 = vand.u32 4294901760, %v19534_v19 }
 0x7a2   : > { %v9065_v27 = vand.u32 4294901760, %v9064_v56  ;;  %v19759_v33 = vsub.f32 %v19358_v32, %v21062_v40  ;;  %v15066_v60 = vpack.c.bf16 %v8372_v16, %v8365_v2  ;;  %v21064_v20 = vand.u32 4294901760, %v19424_v23  ;;  %15061 = vmatpush3.bf16.msra.mxu1 %v15058_v61 }
 0x7a3   : > { %v19764_v57 = vsub.f32 %v19534_v19, %v21063_v45  ;;  %v9072_v55 = vand.u32 4294901760, %v9071_v7  ;;  %v8378_v12 = vsub.f32 %v19746_v24, %v20767_v29  ;;  %v21065_v56 = vand.u32 4294901760, %v19198_v8  ;;  %15063 = vmatprep.subr.bf16.mxu1 %v15062_v52  ;;  %15253 = vmatpush3.bf16.msra.mxu0 %v15250_v43 }
 0x7a4   : > { %v19772_v59 = vsub.f32 %v19424_v23, %v21064_v20  ;;  %v20765_v32 = vand.u32 4294901760, %v19759_v33  ;;  %v21066_v7 = vand.u32 4294901760, %v19538_v30  ;;  %v21067_v20 = vand.u32 4294901760, %v19214_v36  ;;  %15255 = vmatprep.subr.bf16.mxu0 %v15254_v46 }
 0x7a5   : > { %v20764_v6 = vand.u32 4294901760, %v19764_v57  ;;  %v19779_v19 = vsub.f32 %v19198_v8, %v21065_v56  ;;  %v15258_v16 = vpack.c.bf16 %v9072_v55, %v9065_v27  ;;  %v8379_v23 = vand.u32 4294901760, %v8378_v12 }
 0x7a6   : > { %v19784_v2 = vsub.f32 %v19538_v30, %v21066_v7  ;;  %v20766_v49 = vand.u32 4294901760, %v19772_v59  ;;  %v19790_v40 = vsub.f32 %v19214_v36, %v21067_v20  ;;  %v8385_v8 = vsub.f32 %v19759_v33, %v20765_v32  ;;  %15065 = vmatpush3.bf16.msra.mxu1 %v15062_v52 }
 0x7a7   : > { %v9078_v30 = vsub.f32 %v19764_v57, %v20764_v6  ;;  %v20771_v61 = vand.u32 4294901760, %v19779_v19  ;;  %v21068_v55 = vand.u32 4294901760, %v19560_v5  ;;  %v19809_v56 = vpack.c.bf16 %v19440_v50, %v19433_v42  ;;  %15067 = vmatprep.subr.bf16.mxu1 %v15066_v60  ;;  %15257 = vmatpush3.bf16.msra.mxu0 %v15254_v46 }
 0x7a8   : > { %v8398_v27 = vand.u32 4294901760, %v19784_v2  ;;  %v9085_v45 = vsub.f32 %v19772_v59, %v20766_v49  ;;  %v9091_v36 = vand.u32 4294901760, %v19790_v40  ;;  %v8386_v7 = vand.u32 4294901760, %v8385_v8  ;;  %15259 = vmatprep.subr.bf16.mxu0 %v15258_v16 }
 0x7a9   : > { %v9097_v12 = vsub.f32 %v19560_v5, %v21068_v55  ;;  %v9079_v20 = vand.u32 4294901760, %v9078_v30  ;;  %v8392_v6 = vsub.f32 %v19779_v19, %v20771_v61  ;;  %v15270_v5 = vpack.c.bf16 %v19450_v51, %v19445_v26 }
 0x7aa   : > { %v8399_v32 = vsub.f32 %v19784_v2, %v8398_v27  ;;  %v9086_v49 = vand.u32 4294901760, %v9085_v45  ;;  %v9092_v29 = vsub.f32 %v19790_v40, %v9091_v36  ;;  %v15070_v55 = vpack.c.bf16 %v8386_v7, %v8379_v23  ;;  %15069 = vmatpush3.bf16.msra.mxu1 %v15066_v60 }
 0x7ab   : > { %v9098_v9 = vand.u32 4294901760, %v9097_v12  ;;  %v8393_v43 = vand.u32 4294901760, %v8392_v6  ;;  %v15082_v30 = vpack.c.bf16 %v19469_v34, %v19464_v41  ;;  %v15274_v52 = vpack.c.bf16 %v19490_v58, %v19479_v21  ;;  %15261 = vmatpush3.bf16.msra.mxu0 %v15258_v16 }
 0x7ac   : > { %v8400_v8 = vand.u32 4294901760, %v8399_v32  ;;  %v15262_v17 = vpack.c.bf16 %v9086_v49, %v9079_v20  ;;  %v9093_v61 = vand.u32 4294901760, %v9092_v29  ;;  %v15090_v32 = vpack.c.bf16 %v19611_v37, %v19606_v15  ;;  %15071 = vmatprep.subr.bf16.mxu1 %v15070_v55 }
 0x7ad   : > { %v9099_v39 = vsub.f32 %v9097_v12, %v9098_v9  ;;  %v15282_v29 = vpack.c.bf16 %v19646_v54, %v19616_v0  ;;  %v15094_v23 = vpack.c.bf16 %v19670_v11, %v19651_v53  ;;  %v15286_v46 = vpack.c.bf16 %v19690_v28, %v19685_v4 }
 0x7ae   : > { %v15074_v45 = vpack.c.bf16 %v8400_v8, %v8393_v43  ;;  %v15098_v49 = vpack.c.bf16 %v19704_v47, %v19699_v31  ;;  %v15290_v7 = vpack.c.bf16 %v19727_v10, %v19715_v44  ;;  %v15102_v60 = vpack.c.bf16 %v19759_v33, %v19746_v24  ;;  %15263 = vmatprep.subr.bf16.mxu0 %v15262_v17 }
 0x7af   : > { %v9100_v6 = vand.u32 4294901760, %v9099_v39  ;;  %v15294_v39 = vpack.c.bf16 %v19772_v59, %v19764_v57  ;;  %v15106_v43 = vpack.c.bf16 %v19784_v2, %v19779_v19  ;;  %v15298_v8 = vpack.c.bf16 %v9097_v12, %v19790_v40  ;;  %15073 = vmatpush3.bf16.msra.mxu1 %v15070_v55  ;;  %15265 = vmatpush3.bf16.msra.mxu0 %v15262_v17  ;;  %v21103_v17 = vld [vmem:[#allocation10_spill] sm:$0xff] }
 0x7b0   : > { %v21070_v35 = vand.u32 4294901760, %v19440_v50  ;;  %v21071_v25 = vand.u32 4294901760, %v19445_v26  ;;  %v21072_v62 = vand.u32 4294901760, %v19450_v51  ;;  %v21075_v40 = vand.u32 4294901760, %v19479_v21  ;;  %15075 = vmatprep.subr.bf16.mxu1 %v15074_v45 }
 0x7b1   : > { %v15266_v20 = vpack.c.bf16 %v9100_v6, %v9093_v61  ;;  %v21073_v61 = vand.u32 4294901760, %v19464_v41  ;;  %v21074_v6 = vand.u32 4294901760, %v19469_v34  ;;  %v21076_v42 = vand.u32 4294901760, %v19490_v58 }
 0x7b2   : > { %v19849_v22 = vpack.c.bf16 %v21070_v35, %v21069_v3  ;;  %v19855_v1 = vpack.c.bf16 %v21072_v62, %v21071_v25  ;;  %v21077_v3 = vand.u32 4294901760, %v19526_v63  ;;  %v21078_v35 = vand.u32 4294901760, %v19568_v14 }
 0x7b3   : > { %v19861_v2 = vpack.c.bf16 %v21074_v6, %v21073_v61  ;;  %v19867_v50 = vpack.c.bf16 %v21076_v42, %v21075_v40  ;;  %v21079_v62 = vand.u32 4294901760, %v19587_v18  ;;  %v21080_v25 = vand.u32 4294901760, %v19598_v38  ;;  %15267 = vmatprep.subr.bf16.mxu0 %v15266_v20  ;;  %15077 = vmatpush3.bf16.msra.mxu1 %v15074_v45 }
 0x7b4   : > { %v19873_v26 = vpack.c.bf16 %v21078_v35, %v21077_v3  ;;  %v21081_v41 = vand.u32 4294901760, %v19606_v15  ;;  %v21082_v34 = vand.u32 4294901760, %v19611_v37  ;;  %v21083_v58 = vand.u32 4294901760, %v19616_v0  ;;  %15079 = vmatprep.subr.bf16.mxu1 %v19809_v56  ;;  %15269 = vmatpush3.bf16.msra.mxu0 %v15266_v20  ;;  %v21114_v35 = vld [vmem:[#allocation7_spill] sm:$0xff] }
 0x7b5   : > { %v19879_v51 = vpack.c.bf16 %v21080_v25, %v21079_v62  ;;  %v21084_v63 = vand.u32 4294901760, %v19646_v54  ;;  %v21085_v16 = vand.u32 4294901760, %v19651_v53  ;;  %v21086_v18 = vand.u32 4294901760, %v19670_v11  ;;  %15271 = vmatprep.subr.bf16.mxu0 %v15270_v5  ;;  %v21115_v25 = vld [vmem:[#allocation15_spill] sm:$0xff] }
 0x7b6   : > { %v19885_v21 = vpack.c.bf16 %v21082_v34, %v21081_v41  ;;  %v21087_v12 = vand.u32 4294901760, %v19685_v4  ;;  %v21088_v15 = vand.u32 4294901760, %v19690_v28  ;;  %v21089_v55 = vand.u32 4294901760, %v19699_v31 }
 0x7b7   : > { %v19891_v14 = vpack.c.bf16 %v21084_v63, %v21083_v58  ;;  %v19897_v38 = vpack.c.bf16 %v21086_v18, %v21085_v16  ;;  %v21090_v0 = vand.u32 4294901760, %v19704_v47  ;;  %v21091_v61 = vand.u32 4294901760, %v19715_v44 }
 0x7b8   : > { %v19903_v37 = vpack.c.bf16 %v21088_v15, %v21087_v12  ;;  %v21092_v53 = vand.u32 4294901760, %v19727_v10  ;;  %v21093_v11 = vand.u32 4294901760, %v19746_v24  ;;  %v21094_v4 = vand.u32 4294901760, %v19759_v33  ;;  %v21100_v33 = vld [vmem:[#allocation22_spill] sm:$0xff] }
 0x7b9   : > { %v19909_v54 = vpack.c.bf16 %v21090_v0, %v21089_v55  ;;  %v21095_v28 = vand.u32 4294901760, %v19764_v57  ;;  %v21096_v31 = vand.u32 4294901760, %v19772_v59  ;;  %v21097_v47 = vand.u32 4294901760, %v19779_v19  ;;  %v21105_v57 = vld [vmem:[#allocation14_spill] sm:$0xff]  ;;  %v21106_v59 = vld [vmem:[#allocation17_spill] sm:$0xff]  ;;  %v21107_v19 = vld [vmem:[#allocation16_spill] sm:$0xff] }
 0x7ba   : > { %v19915_v6 = vpack.c.bf16 %v21092_v53, %v21091_v61  ;;  %v19921_v40 = vpack.c.bf16 %v21094_v4, %v21093_v11  ;;  %v19933_v44 = vpack.c.bf16 %v9098_v9, %v9091_v36  ;;  %v21098_v10 = vmov 1.0   ;;  %v21104_v9 = vld [vmem:[#allocation12_spill] sm:$0xff]  ;;  %v21109_v36 = vld [vmem:[#allocation19_spill] sm:$0xff]  ;;  %v21117_v55 = vld [vmem:[#allocation9_spill] sm:$0xff] }
 0x7bb   : > { %v19927_v42 = vpack.c.bf16 %v21096_v31, %v21095_v28  ;;  %v19931_v3 = vpack.c.bf16 %v8398_v27, %v21097_v47  ;;  %14278 = vmatmul.mubr.msk.f32.vlgmr.msra.gmra.mrb[32].mxu1 %vm19157_vm10, %v21098_v10  ;;  %14488 = vmatmul.mubr.msk.f32.vlgmr.msra.gmra.mrb[48].mxu0 %vm19157_vm10, %v21098_v10  ;;  %v21108_v27 = vld [vmem:[#allocation18_spill] sm:$0xff]  ;;  %v21118_v0 = vld [vmem:[#allocation24_spill] sm:$0xff] }
 0x7bc   : > { %15081 = vmatpush3.bf16.msra.mxu1 %v19809_v56  ;;  %14312 = vmatprep.mubr.f32.mxu1 %v21100_v33  ;;  %v21110_v56 = vld [vmem:[#allocation26_spill] sm:$0xff] }
 0x7bd   : > { %15083 = vmatprep.subr.bf16.mxu1 %v15082_v30  ;;  %15273 = vmatpush3.bf16.msra.mxu0 %v15270_v5  ;;  %v21111_v5 = vld [vmem:[#allocation20_spill] sm:$0xff] }
 0x7be   : > { %14522 = vmatprep.mubr.f32.mxu0 %v21100_v33  ;;  %15275 = vmatprep.subr.bf16.mxu0 %v15274_v52 }
 0x7c0   : > { %15085 = vmatpush3.bf16.msra.mxu1 %v15082_v30 }
 0x7c1   : > { %15087 = vmatprep.subr.bf16.mxu1 %v15086_v13  ;;  %15277 = vmatpush3.bf16.msra.mxu0 %v15274_v52 }
 0x7c2   : > { %15279 = vmatprep.subr.bf16.mxu0 %v15278_v48 }
 0x7c4   : > { %15089 = vmatpush3.bf16.msra.mxu1 %v15086_v13  ;;  %v21101_v13 = vld [vmem:[#allocation11_spill] sm:$0xff] }
 0x7c5   : > { %15091 = vmatprep.subr.bf16.mxu1 %v15090_v32  ;;  %15281 = vmatpush3.bf16.msra.mxu0 %v15278_v48  ;;  %v21102_v48 = vld [vmem:[#allocation29_spill] sm:$0xff] }
 0x7c6   : > { %15283 = vmatprep.subr.bf16.mxu0 %v15282_v29 }
 0x7c8   : > { %15093 = vmatpush3.bf16.msra.mxu1 %v15090_v32 }
 0x7c9   : > { %15095 = vmatprep.subr.bf16.mxu1 %v15094_v23  ;;  %15285 = vmatpush3.bf16.msra.mxu0 %v15282_v29  ;;  %v21112_v29 = vld [vmem:[#allocation8_spill] sm:$0xff] }
 0x7ca   : > { %15287 = vmatprep.subr.bf16.mxu0 %v15286_v46 }
 0x7cc   : > { %15097 = vmatpush3.bf16.msra.mxu1 %v15094_v23 }
 0x7cd   : > { %15099 = vmatprep.subr.bf16.mxu1 %v15098_v49  ;;  %15289 = vmatpush3.bf16.msra.mxu0 %v15286_v46  ;;  %v21113_v46 = vld [vmem:[#allocation21_spill] sm:$0xff] }
 0x7ce   : > { %15291 = vmatprep.subr.bf16.mxu0 %v15290_v7 }
 0x7d0   : > { %15101 = vmatpush3.bf16.msra.mxu1 %v15098_v49 }
 0x7d1   : > { %15103 = vmatprep.subr.bf16.mxu1 %v15102_v60  ;;  %15293 = vmatpush3.bf16.msra.mxu0 %v15290_v7 }
 0x7d2   : > { %15295 = vmatprep.subr.bf16.mxu0 %v15294_v39 }
 0x7d4   : > { %15105 = vmatpush3.bf16.msra.mxu1 %v15102_v60 }
 0x7d5   : > { %15107 = vmatprep.subr.bf16.mxu1 %v15106_v43  ;;  %15297 = vmatpush3.bf16.msra.mxu0 %v15294_v39 }
 0x7d6   : > { %15299 = vmatprep.subr.bf16.mxu0 %v15298_v8 }
 0x7d8   : > { %15109 = vmatpush3.bf16.msra.mxu1 %v15106_v43 }
 0x7d9   : > { %15111 = vmatprep.subr.bf16.mxu1 %v21101_v13  ;;  %15301 = vmatpush3.bf16.msra.mxu0 %v15298_v8 }
 0x7da   : > { %15303 = vmatprep.subr.bf16.mxu0 %v21103_v17 }
 0x7db   : > { %14313 = vmatmul.mubr.f32.vlgmr.msra.gmra.mrb[32].mxu1 %v21102_v48 }
 0x7dc   : > { %15113 = vmatpush3.bf16.msra.mxu1 %v21101_v13  ;;  %14347 = vmatprep.mubr.f32.mxu1 %v21105_v57 }
 0x7dd   : > { %15115 = vmatprep.subr.bf16.mxu1 %v21104_v9  ;;  %14523 = vmatmul.mubr.f32.vlgmr.msra.gmra.mrb[48].mxu0 %v21102_v48 }
 0x7de   : > { %15305 = vmatpush3.bf16.msra.mxu0 %v21103_v17  ;;  %14557 = vmatprep.mubr.f32.mxu0 %v21105_v57  ;;  %v19965_v30 = vpop.permute.xlu1 %9659 }
 0x7df   : > { %15307 = vmatprep.subr.bf16.mxu0 %v21106_v59  ;;  %v20798_v52 = vand.u32 4294901760, %v19965_v30  ;;  %v19969_v45 = vpop.permute.xlu0 %9657 }
 0x7e0   : > { %15117 = vmatpush3.bf16.msra.mxu1 %v21104_v9  ;;  %v20800_v32 = vand.u32 4294901760, %v19969_v45 }
 0x7e1   : > { %15119 = vmatprep.subr.bf16.mxu1 %v21107_v19  ;;  %v19977_v23 = vsub.f32 %v19965_v30, %v20798_v52 }
 0x7e2   : > { %15309 = vmatpush3.bf16.msra.mxu0 %v21106_v59  ;;  %v19983_v49 = vsub.f32 %v19969_v45, %v20800_v32  ;;  %v19985_v7 = vpop.permute.xlu1 %9663 }
 0x7e3   : > { %15311 = vmatprep.subr.bf16.mxu0 %v21108_v27  ;;  %v20791_v60 = vand.u32 4294901760, %v19977_v23  ;;  %v20796_v39 = vand.u32 4294901760, %v19985_v7  ;;  %v19990_v20 = vpop.permute.xlu0 %9661 }
 0x7e4   : > { %15121 = vmatpush3.bf16.msra.mxu1 %v21107_v19  ;;  %v20790_v43 = vand.u32 4294901760, %v19983_v49  ;;  %v20797_v8 = vand.u32 4294901760, %v19990_v20 }
 0x7e5   : > { %15123 = vmatprep.subr.bf16.mxu1 %v21109_v36  ;;  %v19999_v62 = vsub.f32 %v19985_v7, %v20796_v39 }
 0x7e6   : > { %15313 = vmatpush3.bf16.msra.mxu0 %v21108_v27  ;;  %v20005_v41 = vsub.f32 %v19990_v20, %v20797_v8  ;;  %v20011_v34 = vpack.c.bf16 %v20791_v60, %v20790_v43  ;;  %v21122_v8 = vld [vmem:[#allocation28_spill] sm:$0xff] }
 0x7e7   : > { %15315 = vmatprep.subr.bf16.mxu0 %v21110_v56  ;;  %v20795_v58 = vand.u32 4294901760, %v19999_v62  ;;  %v20015_v63 = vpop.permute.xlu1 %9667  ;;  %v20017_v16 = vpop.permute.xlu0 %9665 }
 0x7e8   : > { %15125 = vmatpush3.bf16.msra.mxu1 %v21109_v36  ;;  %21116 = vst [vmem:[#allocation27_spill] sm:$0xff] %v20011_v34  ;;  %v20794_v18 = vand.u32 4294901760, %v20005_v41  ;;  %v20792_v12 = vand.u32 4294901760, %v20015_v63  ;;  %v20793_v15 = vand.u32 4294901760, %v20017_v16 }
 0x7e9   : > { %15127 = vmatprep.subr.bf16.mxu1 %v21111_v5 }
 0x7ea   : > { %15317 = vmatpush3.bf16.msra.mxu0 %v21110_v56  ;;  %v20028_v61 = vsub.f32 %v20015_v63, %v20792_v12  ;;  %v20033_v53 = vsub.f32 %v20017_v16, %v20793_v15  ;;  %v20044_v28 = vpack.c.bf16 %v20795_v58, %v20794_v18  ;;  %v21120_v12 = vld [vmem:[#allocation30_spill] sm:$0xff] }
 0x7eb   : > { %15319 = vmatprep.subr.bf16.mxu0 %v21112_v29  ;;  %v20036_v11 = vpop.permute.xlu1 %9671  ;;  %v20038_v4 = vpop.permute.xlu0 %9669 }
 0x7ec   : > { %15129 = vmatpush3.bf16.msra.mxu1 %v21111_v5  ;;  %21119 = vst [vmem:[#allocation11_spill] sm:$0xff] %v20044_v28  ;;  %v20805_v31 = vand.u32 4294901760, %v20028_v61  ;;  %v20804_v47 = vand.u32 4294901760, %v20033_v53  ;;  %v20799_v43 = vand.u32 4294901760, %v20036_v11  ;;  %v20801_v60 = vand.u32 4294901760, %v20038_v4 }
 0x7ed   : > { %15131 = vmatprep.subr.bf16.mxu1 %v21113_v46 }
 0x7ee   : > { %15321 = vmatpush3.bf16.msra.mxu0 %v21112_v29  ;;  %v20056_v15 = vsub.f32 %v20036_v11, %v20799_v43  ;;  %v20061_v18 = vsub.f32 %v20038_v4, %v20801_v60  ;;  %v20073_v52 = vpack.c.bf16 %v20805_v31, %v20804_v47 }
 0x7ef   : > { %15323 = vmatprep.subr.bf16.mxu0 %v21114_v35  ;;  %v20064_v58 = vpop.permute.xlu1 %9675  ;;  %v20066_v39 = vpop.permute.xlu0 %9673 }
 0x7f0   : > { %15133 = vmatpush3.bf16.msra.mxu1 %v21113_v46  ;;  %21121 = vst [vmem:[#allocation10_spill] sm:$0xff] %v20061_v18  ;;  %21123 = vst [vmem:[#allocation12_spill] sm:$0xff] %v20073_v52  ;;  %v20806_v32 = vand.u32 4294901760, %v20064_v58  ;;  %v20808_v60 = vand.u32 4294901760, %v20066_v39  ;;  %v20812_v28 = vand.u32 4294901760, %v20061_v18 }
 0x7f1   : > { %15135 = vmatprep.subr.bf16.mxu1 %v21115_v25 }
 0x7f2   : > { %15325 = vmatpush3.bf16.msra.mxu0 %v21114_v35  ;;  %v20088_v47 = vsub.f32 %v20064_v58, %v20806_v32  ;;  %v20093_v31 = vsub.f32 %v20066_v39, %v20808_v60  ;;  %v21127_v32 = vand.u32 4294901760, %v20056_v15 }
 0x7f3   : > { %15327 = vmatprep.subr.bf16.mxu0 %v21117_v55 }
 0x7f4   : > { %15137 = vmatpush3.bf16.msra.mxu1 %v21115_v25  ;;  %21125 = vst [vmem:[#allocation17_spill] sm:$0xff] %v20088_v47  ;;  %21126 = vst [vmem:[#allocation16_spill] sm:$0xff] %v20093_v31  ;;  %v20099_v43 = vpop.permute.xlu0 %9677  ;;  %v20108_v52 = vpack.c.bf16 %v21127_v32, %v20812_v28 }
 0x7f5   : > { %15139 = vmatprep.subr.bf16.mxu1 %v21118_v0  ;;  %v20818_v57 = vand.u32 4294901760, %v20099_v43 }
 0x7f6   : > { %15329 = vmatpush3.bf16.msra.mxu0 %v21117_v55  ;;  %21128 = vst [vmem:[#allocation18_spill] sm:$0xff] %v20108_v52 }
 0x7f7   : > { %15331 = vmatprep.subr.bf16.mxu0 %v21120_v12  ;;  %v20125_v32 = vsub.f32 %v20099_v43, %v20818_v57 }
 0x7f8   : > { %15141 = vmatpush3.bf16.msra.mxu1 %v21118_v0 }
 0x7f9   : > { %15143 = vmatprep.subr.bf16.mxu1 %v19849_v22  ;;  %v20130_v60 = vpop.permute.xlu0 %9681 }
 0x7fa   : > { %15333 = vmatpush3.bf16.msra.mxu0 %v21120_v12  ;;  %v20828_v18 = vand.u32 4294901760, %v20130_v60 }
 0x7fb   : > { %14348 = vmatmul.mubr.f32.vlgmr.msra.gmra.mrb[32].mxu1 %v21122_v8  ;;  %15335 = vmatprep.subr.bf16.mxu0 %v19855_v1 }
 0x7fc   : > { %15145 = vmatpush3.bf16.msra.mxu1 %v19849_v22  ;;  %14382 = vmatprep.mubr.msk.f32.mxu1 %vm19067_vm7, %v21098_v10  ;;  %v20097_v22 = vpop.permute.xlu1 %9679 }
 0x7fd   : > { %15147 = vmatprep.subr.bf16.mxu1 %v19861_v2  ;;  %14558 = vmatmul.mubr.f32.vlgmr.msra.gmra.mrb[48].mxu0 %v21122_v8  ;;  %v20819_v8 = vand.u32 4294901760, %v20093_v31 }
 0x7fe   : > { %15337 = vmatpush3.bf16.msra.mxu0 %v19855_v1  ;;  %14592 = vmatprep.mubr.msk.f32.mxu0 %vm19067_vm7, %v21098_v10  ;;  %v20814_v1 = vand.u32 4294901760, %v20097_v22 }
 0x7ff   : > { %15339 = vmatprep.subr.bf16.mxu0 %v19867_v50 }
 0x800   : > { %15149 = vmatpush3.bf16.msra.mxu1 %v19861_v2  ;;  %v20120_v48 = vsub.f32 %v20097_v22, %v20814_v1  ;;  %v20128_v28 = vpop.permute.xlu1 %9683  ;;  %v21129_v2 = vand.u32 4294901760, %v20088_v47  ;;  %v20167_v47 = vpop.permute.xlu0 %9685 }
 0x801   : > { %15151 = vmatprep.subr.bf16.mxu1 %v19873_v26  ;;  %v20821_v33 = vand.u32 4294901760, %v20128_v28 }
 0x802   : > { %15341 = vmatpush3.bf16.msra.mxu0 %v19867_v50  ;;  %v20136_v52 = vpack.c.bf16 %v21129_v2, %v20819_v8  ;;  %v20827_v1 = vand.u32 4294901760, %v20120_v48  ;;  %v20826_v50 = vand.u32 4294901760, %v20125_v32  ;;  %v20153_v2 = vsub.f32 %v20130_v60, %v20828_v18 }
 0x803   : > { %15343 = vmatprep.subr.bf16.mxu0 %v19879_v51  ;;  %v20148_v57 = vsub.f32 %v20128_v28, %v20821_v33 }
 0x804   : > { %21130 = vst [vmem:[#allocation19_spill] sm:$0xff] %v20136_v52  ;;  %15153 = vmatpush3.bf16.msra.mxu1 %v19873_v26  ;;  %v20156_v8 = vpop.permute.xlu1 %9687  ;;  %v20162_v26 = vpack.c.bf16 %v20827_v1, %v20826_v50  ;;  %v20830_v33 = vand.u32 4294901760, %v20153_v2 }
 0x805   : > { %15155 = vmatprep.subr.bf16.mxu1 %v19885_v21  ;;  %v9900_v52 = vand.u32 4294901760, %v20148_v57  ;;  %v20829_v31 = vand.u32 4294901760, %v20156_v8 }
 0x806   : > { %15345 = vmatpush3.bf16.msra.mxu0 %v19879_v51  ;;  %v9748_v51 = vand.u32 4294901760, %v20167_v47 }
 0x807   : > { %15347 = vmatprep.subr.bf16.mxu0 %v19891_v14  ;;  %v20176_v50 = vsub.f32 %v20156_v8, %v20829_v31  ;;  %v20182_v1 = vpack.c.bf16 %v9900_v52, %v20830_v33 }
 0x808   : > { %15157 = vmatpush3.bf16.msra.mxu1 %v19885_v21  ;;  %v20187_v18 = vsub.f32 %v20167_v47, %v9748_v51 }
 0x809   : > { %15159 = vmatprep.subr.bf16.mxu1 %v19897_v38  ;;  %v9914_v21 = vand.u32 4294901760, %v20176_v50 }
 0x80a   : > { %15349 = vmatpush3.bf16.msra.mxu0 %v19891_v14  ;;  %v9907_v31 = vand.u32 4294901760, %v20187_v18  ;;  %v21131_v14 = vand.u32 4294901760, %v19969_v45  ;;  %v21144_v45 = vand.u32 4294901760, %v19977_v23 }
 0x80b   : > { %15351 = vmatprep.subr.bf16.mxu0 %v19903_v37 }
 0x80c   : > { %15161 = vmatpush3.bf16.msra.mxu1 %v19897_v38  ;;  %v20200_v33 = vpack.c.bf16 %v9914_v21, %v9907_v31  ;;  %v21132_v38 = vand.u32 4294901760, %v19965_v30 }
 0x80d   : > { %15163 = vmatprep.subr.bf16.mxu1 %v19909_v54 }
 0x80e   : > { %15353 = vmatpush3.bf16.msra.mxu0 %v19903_v37  ;;  %v20257_v37 = vpack.c.bf16 %v21132_v38, %v21131_v14  ;;  %v21153_v38 = vand.u32 4294901760, %v20056_v15 }
 0x80f   : > { %15355 = vmatprep.subr.bf16.mxu0 %v19915_v6 }
 0x810   : > { %15165 = vmatpush3.bf16.msra.mxu1 %v19909_v54  ;;  %v21133_v54 = vand.u32 4294901760, %v19990_v20  ;;  %v21147_v20 = vand.u32 4294901760, %v20128_v28 }
 0x811   : > { %15167 = vmatprep.subr.bf16.mxu1 %v19921_v40 }
 0x812   : > { %15357 = vmatpush3.bf16.msra.mxu0 %v19915_v6  ;;  %v21134_v6 = vand.u32 4294901760, %v19985_v7 }
 0x813   : > { %15359 = vmatprep.subr.bf16.mxu0 %v19927_v42 }
 0x814   : > { %15169 = vmatpush3.bf16.msra.mxu1 %v19921_v40  ;;  %v20267_v40 = vpack.c.bf16 %v21134_v6, %v21133_v54  ;;  %v9859_v54 = vsub.f32 %v20056_v15, %v21153_v38  ;;  %v21154_v6 = vld [vmem:[#allocation10_spill] sm:$0xff] }
 0x815   : > { %15171 = vmatprep.subr.bf16.mxu1 %v19931_v3 }
 0x816   : > { %15361 = vmatpush3.bf16.msra.mxu0 %v19927_v42  ;;  %v21135_v42 = vld [vmem:[#allocation25_spill] sm:$0xff] }
 0x817   : > { %15363 = vmatprep.subr.bf16.mxu0 %v19933_v44 }
 0x818   : > { %15173 = vmatpush3.bf16.msra.mxu1 %v19931_v3  ;;  %v21136_v3 = vand.u32 4294901760, %v20017_v16 }
 0x819   : > { %15175 = vmatprep.subr.bf16.mxu1 %v21101_v13 }
 0x81a   : > { %15365 = vmatpush3.bf16.msra.mxu0 %v19933_v44  ;;  %v21137_v44 = vand.u32 4294901760, %v20015_v63  ;;  %v21149_v63 = vand.u32 4294901760, %v20005_v41 }
 0x81b   : > { %14383 = vmatmul.mubr.msk.f32.vlgmr.msra.gmra.mrb[32].mxu1 %vm19157_vm10, %v21098_v10  ;;  %15367 = vmatprep.subr.bf16.mxu0 %v21103_v17 }
 0x81c   : > { %15177 = vmatpush3.bf16.msra.mxu1 %v21101_v13  ;;  %14417 = vmatprep.mubr.msk.f32.mxu1 %vm19067_vm7, %v21098_v10  ;;  %v20283_v13 = vpack.c.bf16 %v21137_v44, %v21136_v3  ;;  %v9824_v16 = vsub.f32 %v20005_v41, %v21149_v63  ;;  %v21156_v44 = vld [vmem:[#allocation13_spill] sm:$0xff] }
 0x81d   : > { %15179 = vmatprep.subr.bf16.mxu1 %v21104_v9  ;;  %14593 = vmatmul.mubr.msk.f32.vlgmr.msra.gmra.mrb[48].mxu0 %vm19157_vm10, %v21098_v10 }
 0x81e   : > { %15369 = vmatpush3.bf16.msra.mxu0 %v21103_v17  ;;  %14627 = vmatprep.mubr.msk.f32.mxu0 %vm19067_vm7, %v21098_v10  ;;  %v21138_v17 = vand.u32 4294901760, %v20038_v4  ;;  %v21152_v4 = vand.u32 4294901760, %v20033_v53  ;;  %v9825_v14 = vand.u32 4294901760, %v9824_v16 }
 0x81f   : > { %15371 = vmatprep.subr.bf16.mxu0 %v21106_v59 }
 0x820   : > { %15181 = vmatpush3.bf16.msra.mxu1 %v21104_v9  ;;  %v21139_v9 = vand.u32 4294901760, %v20036_v11  ;;  %v9838_v28 = vsub.f32 %v20033_v53, %v21152_v4 }
 0x821   : > { %15183 = vmatprep.subr.bf16.mxu1 %v21107_v19 }
 0x822   : > { %15373 = vmatpush3.bf16.msra.mxu0 %v21106_v59  ;;  %v20291_v59 = vpack.c.bf16 %v21139_v9, %v21138_v17 }
 0x823   : > { %15375 = vmatprep.subr.bf16.mxu0 %v21108_v27 }
 0x824   : > { %15185 = vmatpush3.bf16.msra.mxu1 %v21107_v19  ;;  %v21140_v19 = vand.u32 4294901760, %v20066_v39  ;;  %v21146_v39 = vand.u32 4294901760, %v20130_v60  ;;  %v21150_v60 = vand.u32 4294901760, %v20156_v8  ;;  %v9839_v8 = vand.u32 4294901760, %v9838_v28 }
 0x825   : > { %15187 = vmatprep.subr.bf16.mxu1 %v21109_v36 }
 0x826   : > { %15377 = vmatpush3.bf16.msra.mxu0 %v21108_v27  ;;  %v21141_v27 = vand.u32 4294901760, %v20064_v58 }
 0x827   : > { %15379 = vmatprep.subr.bf16.mxu0 %v21110_v56 }
 0x828   : > { %15189 = vmatpush3.bf16.msra.mxu1 %v21109_v36  ;;  %v20299_v36 = vpack.c.bf16 %v21141_v27, %v21140_v19  ;;  %v21157_v19 = vld [vmem:[#allocation17_spill] sm:$0xff] }
 0x829   : > { %15191 = vmatprep.subr.bf16.mxu1 %v21111_v5  ;;  %v21158_v27 = vand.u32 4294901760, %v21157_v19 }
 0x82a   : > { %15381 = vmatpush3.bf16.msra.mxu0 %v21110_v56  ;;  %v21142_v56 = vand.u32 4294901760, %v20099_v43  ;;  %v20321_v43 = vpack.c.bf16 %v21147_v20, %v21146_v39  ;;  %v21161_v39 = vand.u32 4294901760, %v20120_v48 }
 0x82b   : > { %15383 = vmatprep.subr.bf16.mxu0 %v21112_v29 }
 0x82c   : > { %15193 = vmatpush3.bf16.msra.mxu1 %v21111_v5  ;;  %v21143_v5 = vand.u32 4294901760, %v20097_v22  ;;  %v9887_v20 = vsub.f32 %v20120_v48, %v21161_v39 }
 0x82d   : > { %15195 = vmatprep.subr.bf16.mxu1 %v21113_v46 }
 0x82e   : > { %15385 = vmatpush3.bf16.msra.mxu0 %v21112_v29  ;;  %v20307_v30 = vpack.c.bf16 %v21143_v5, %v21142_v56  ;;  %v9817_v29 = vsub.f32 %v19977_v23, %v21144_v45  ;;  %v9873_v56 = vsub.f32 %v21157_v19, %v21158_v27  ;;  %v21159_v5 = vld [vmem:[#allocation16_spill] sm:$0xff] }
 0x82f   : > { %15387 = vmatprep.subr.bf16.mxu0 %v21114_v35  ;;  %v21160_v45 = vand.u32 4294901760, %v21159_v5 }
 0x830   : > { %15197 = vmatpush3.bf16.msra.mxu1 %v21113_v46  ;;  %v21145_v46 = vand.u32 4294901760, %v19983_v49  ;;  %v9874_v16 = vand.u32 4294901760, %v9873_v56 }
 0x831   : > { %15199 = vmatprep.subr.bf16.mxu1 %v21115_v25 }
 0x832   : > { %15389 = vmatpush3.bf16.msra.mxu0 %v21114_v35  ;;  %v9810_v7 = vsub.f32 %v19983_v49, %v21145_v46  ;;  %v9818_v35 = vand.u32 4294901760, %v9817_v29  ;;  %v9866_v29 = vsub.f32 %v21159_v5, %v21160_v45 }
 0x833   : > { %15391 = vmatprep.subr.bf16.mxu0 %v21117_v55 }
 0x834   : > { %15201 = vmatpush3.bf16.msra.mxu1 %v21115_v25  ;;  %v21148_v25 = vand.u32 4294901760, %v19999_v62  ;;  %v9867_v63 = vand.u32 4294901760, %v9866_v29 }
 0x835   : > { %15203 = vmatprep.subr.bf16.mxu1 %v21118_v0 }
 0x836   : > { %15393 = vmatpush3.bf16.msra.mxu0 %v21117_v55  ;;  %v9831_v58 = vsub.f32 %v19999_v62, %v21148_v25  ;;  %v9811_v55 = vand.u32 4294901760, %v9810_v7  ;;  %v9860_v7 = vand.u32 4294901760, %v9859_v54  ;;  %v15446_v28 = vpack.c.bf16 %v9874_v16, %v9867_v63 }
 0x837   : > { %15395 = vmatprep.subr.bf16.mxu0 %v21120_v12 }
 0x838   : > { %15205 = vmatpush3.bf16.msra.mxu1 %v21118_v0  ;;  %v21151_v0 = vand.u32 4294901760, %v20028_v61  ;;  %v15430_v22 = vpack.c.bf16 %v9818_v35, %v9811_v55  ;;  %v9832_v47 = vand.u32 4294901760, %v9831_v58  ;;  %v21162_v35 = vand.u32 4294901760, %v20125_v32 }
 0x839   : > { %15399 = vmatprep.subr.bf16.mxu1 %v20257_v37  ;;  %v9888_v55 = vand.u32 4294901760, %v9887_v20 }
 0x83a   : > { %15397 = vmatpush3.bf16.msra.mxu0 %v21120_v12  ;;  %v20335_v12 = vpack.c.bf16 %v21150_v60, %v9748_v51  ;;  %v9845_v11 = vsub.f32 %v20028_v61, %v21151_v0  ;;  %v15434_v17 = vpack.c.bf16 %v9832_v47, %v9825_v14  ;;  %v9880_v25 = vsub.f32 %v20125_v32, %v21162_v35 }
 0x83b   : > { %14418 = vmatmul.mubr.msk.f32.vlgmr.msra.gmra.mrb[32].mxu1 %vm19157_vm10, %v21098_v10  ;;  %v9901_v0 = vsub.f32 %v20148_v57, %v9900_v52  ;;  %v9915_v14 = vsub.f32 %v20176_v50, %v9914_v21  ;;  %v9908_v47 = vsub.f32 %v20187_v18, %v9907_v31  ;;  %v15466_v31 = vpack.c.bf16 %v19999_v62, %v20005_v41  ;;  %v21164_v21 = vld [vmem:[#allocation22_spill] sm:$0xff] }
 0x83c   : > { %15401 = vmatpush3.bf16.msra.mxu1 %v20257_v37  ;;  %14662 = vmatprep.mubr.f32.mxu1 %v21135_v42  ;;  %v9846_v51 = vand.u32 4294901760, %v9845_v11  ;;  %v21155_v42 = vand.u32 4294901760, %v21154_v6  ;;  %v9881_v60 = vand.u32 4294901760, %v9880_v25  ;;  %v21163_v11 = vand.u32 4294901760, %v20153_v2 }
 0x83d   : > { %15403 = vmatprep.subr.bf16.mxu1 %v20267_v40  ;;  %14628 = vmatmul.mubr.msk.f32.vlgmr.msra.gmra.mrb[48].mxu0 %vm19157_vm10, %v21098_v10  ;;  %v9909_v38 = vand.u32 4294901760, %v9908_v47  ;;  %v9916_v54 = vand.u32 4294901760, %v9915_v14  ;;  %v15482_v62 = vpack.c.bf16 %v20120_v48, %v20125_v32  ;;  %v15486_v41 = vpack.c.bf16 %v20148_v57, %v20153_v2  ;;  %v21166_v48 = vld [vmem:[#allocation14_spill] sm:$0xff]  ;;  %v21167_v57 = vld [vmem:[#allocation27_spill] sm:$0xff]  ;;  %v21170_v32 = vld [vmem:[#allocation12_spill] sm:$0xff] }
 0x83e   : > { %v9852_v3 = vsub.f32 %v21154_v6, %v21155_v42  ;;  %v15438_v9 = vpack.c.bf16 %v9846_v51, %v9839_v8  ;;  %v9894_v4 = vsub.f32 %v20153_v2, %v21163_v11  ;;  %v9902_v51 = vand.u32 4294901760, %v9901_v0  ;;  %v21172_v2 = vld [vmem:[#allocation19_spill] sm:$0xff] }
 0x83f   : > { %v15458_v42 = vpack.c.bf16 %v9916_v54, %v9909_v38  ;;  %v10401_v0 = vld [vmem:[%s20556_s9] sm:$0xff] }
 0x840   : > { %15405 = vmatpush3.bf16.msra.mxu1 %v20267_v40  ;;  %v9853_v46 = vand.u32 4294901760, %v9852_v3  ;;  %v9895_v8 = vand.u32 4294901760, %v9894_v4  ;;  %v15462_v3 = vpack.c.bf16 %v19977_v23, %v19983_v49  ;;  %v15474_v23 = vpack.c.bf16 %v20056_v15, %v21154_v6 }
 0x841   : > { %15407 = vmatprep.subr.bf16.mxu1 %v20283_v13  ;;  %v15478_v49 = vpack.c.bf16 %v21157_v19, %v21159_v5  ;;  %v15490_v15 = vpack.c.bf16 %v20176_v50, %v20187_v18  ;;  %v21168_v18 = vld [vmem:[#allocation28_spill] sm:$0xff]  ;;  %v21171_v50 = vld [vmem:[#allocation18_spill] sm:$0xff]  ;;  %v10905_v4 = vand.u32 4294901760, %v10401_v0 }
 0x842   : > { %v15442_v58 = vpack.c.bf16 %v9860_v7, %v9853_v46  ;;  %v15454_v52 = vpack.c.bf16 %v9902_v51, %v9895_v8 }
 0x844   : > { %15409 = vmatpush3.bf16.msra.mxu1 %v20283_v13 }
 0x845   : > { %15411 = vmatprep.subr.bf16.mxu1 %v20291_v59 }
 0x848   : > { %15413 = vmatpush3.bf16.msra.mxu1 %v20291_v59 }
 0x849   : > { %15415 = vmatprep.subr.bf16.mxu1 %v20299_v36 }
 0x84c   : > { %15417 = vmatpush3.bf16.msra.mxu1 %v20299_v36 }
 0x84d   : > { %15419 = vmatprep.subr.bf16.mxu1 %v20307_v30 }
 0x850   : > { %15421 = vmatpush3.bf16.msra.mxu1 %v20307_v30 }
 0x851   : > { %15423 = vmatprep.subr.bf16.mxu1 %v20321_v43 }
 0x854   : > { %15425 = vmatpush3.bf16.msra.mxu1 %v20321_v43 }
 0x855   : > { %15427 = vmatprep.subr.bf16.mxu1 %v20335_v12 }
 0x858   : > { %15429 = vmatpush3.bf16.msra.mxu1 %v20335_v12 }
 0x859   : > { %15431 = vmatprep.subr.bf16.mxu1 %v15430_v22 }
 0x85b   : > { %14663 = vmatmul.mubr.f32.vlgmr.msra.gmra.mrb[34].mxu1 %v21156_v44  ;;  %v15470_v44 = vpack.c.bf16 %v20028_v61, %v20033_v53  ;;  %v21165_v61 = vld [vmem:[#allocation29_spill] sm:$0xff]  ;;  %v21169_v53 = vld [vmem:[#allocation11_spill] sm:$0xff] }
 0x85c   : > { %15433 = vmatpush3.bf16.msra.mxu1 %v15430_v22  ;;  %14697 = vmatprep.mubr.msk.f32.mxu1 %vm19067_vm7, %v21098_v10  ;;  %v15450_v22 = vpack.c.bf16 %v9888_v55, %v9881_v60 }
 0x85d   : > { %15435 = vmatprep.subr.bf16.mxu1 %v15434_v17 }
 0x860   : > { %15437 = vmatpush3.bf16.msra.mxu1 %v15434_v17 }
 0x861   : > { %15439 = vmatprep.subr.bf16.mxu1 %v15438_v9 }
 0x864   : > { %15441 = vmatpush3.bf16.msra.mxu1 %v15438_v9 }
 0x865   : > { %15443 = vmatprep.subr.bf16.mxu1 %v15442_v58 }
 0x868   : > { %15445 = vmatpush3.bf16.msra.mxu1 %v15442_v58 }
 0x869   : > { %15447 = vmatprep.subr.bf16.mxu1 %v15446_v28 }
 0x86c   : > { %15449 = vmatpush3.bf16.msra.mxu1 %v15446_v28 }
 0x86d   : > { %15451 = vmatprep.subr.bf16.mxu1 %v15450_v22 }
 0x870   : > { %15453 = vmatpush3.bf16.msra.mxu1 %v15450_v22  ;;  %v10992_v22 = vsub.f32 %v10401_v0, %v10905_v4 }
 0x871   : > { %15455 = vmatprep.subr.bf16.mxu1 %v15454_v52 }
 0x872   : > { %v10993_v51 = vand.u32 4294901760, %v10992_v22 }
 0x874   : > { %15457 = vmatpush3.bf16.msra.mxu1 %v15454_v52  ;;  %v10994_v54 = vsub.f32 %v10992_v22, %v10993_v51 }
 0x875   : > { %15459 = vmatprep.subr.bf16.mxu1 %v15458_v42 }
 0x878   : > { %15461 = vmatpush3.bf16.msra.mxu1 %v15458_v42 }
 0x879   : > { %15463 = vmatprep.subr.bf16.mxu1 %v15462_v3 }
 0x87b   : > { %14698 = vmatmul.mubr.msk.f32.vlgmr.msra.gmra.mrb[34].mxu1 %vm19157_vm10, %v21098_v10 }
 0x87c   : > { %15465 = vmatpush3.bf16.msra.mxu1 %v15462_v3  ;;  %14732 = vmatprep.mubr.f32.mxu1 %v21164_v21 }
 0x87d   : > { %15467 = vmatprep.subr.bf16.mxu1 %v15466_v31 }
 0x880   : > { %15469 = vmatpush3.bf16.msra.mxu1 %v15466_v31  ;;  %v10995_v31 = vand.u32 4294901760, %v10994_v54 }
 0x881   : > { %15471 = vmatprep.subr.bf16.mxu1 %v15470_v44 }
 0x884   : > { %15473 = vmatpush3.bf16.msra.mxu1 %v15470_v44 }
 0x885   : > { %15475 = vmatprep.subr.bf16.mxu1 %v15474_v23 }
 0x888   : > { %15477 = vmatpush3.bf16.msra.mxu1 %v15474_v23 }
 0x889   : > { %15479 = vmatprep.subr.bf16.mxu1 %v15478_v49 }
 0x88c   : > { %15481 = vmatpush3.bf16.msra.mxu1 %v15478_v49  ;;  %v11408_v49 = vld [vmem:[%s20559_s12] sm:$0xff] }
 0x88d   : > { %15483 = vmatprep.subr.bf16.mxu1 %v15482_v62 }
 0x890   : > { %15485 = vmatpush3.bf16.msra.mxu1 %v15482_v62  ;;  %v11409_v62 = vld [vmem:[%s20559_s12 + $0x8] sm:$0xff] }
 0x891   : > { %15487 = vmatprep.subr.bf16.mxu1 %v15486_v41 }
 0x894   : > { %15489 = vmatpush3.bf16.msra.mxu1 %v15486_v41  ;;  %v11424_v41 = vand.u32 4294901760, %v11408_v49 }
 0x895   : > { %15491 = vmatprep.subr.bf16.mxu1 %v15490_v15 }
 0x898   : > { %15493 = vmatpush3.bf16.msra.mxu1 %v15490_v15  ;;  %v11427_v15 = vand.u32 4294901760, %v11409_v62 }
 0x899   : > { %15495 = vmatprep.subr.bf16.mxu1 %v20257_v37 }
 0x89b   : > { %14733 = vmatmul.mubr.f32.vlgmr.msra.gmra.mrb[34].mxu1 %v21165_v61  ;;  %v15590_v61 = vpack.c.bf16 %v11427_v15, %v11424_v41 }
 0x89c   : > { %15497 = vmatpush3.bf16.msra.mxu1 %v20257_v37  ;;  %14767 = vmatprep.mubr.f32.mxu1 %v21166_v48  ;;  %v11512_v48 = vsub.f32 %v11408_v49, %v11424_v41 }
 0x89d   : > { %15499 = vmatprep.subr.bf16.mxu1 %v20267_v40 }
 0x8a0   : > { %15501 = vmatpush3.bf16.msra.mxu1 %v20267_v40 }
 0x8a1   : > { %15503 = vmatprep.subr.bf16.mxu1 %v20283_v13 }
 0x8a4   : > { %15505 = vmatpush3.bf16.msra.mxu1 %v20283_v13 }
 0x8a5   : > { %15507 = vmatprep.subr.bf16.mxu1 %v20291_v59 }
 0x8a8   : > { %15509 = vmatpush3.bf16.msra.mxu1 %v20291_v59 }
 0x8a9   : > { %15511 = vmatprep.subr.bf16.mxu1 %v20299_v36 }
 0x8ac   : > { %15513 = vmatpush3.bf16.msra.mxu1 %v20299_v36 }
 0x8ad   : > { %15515 = vmatprep.subr.bf16.mxu1 %v20307_v30 }
 0x8b0   : > { %15517 = vmatpush3.bf16.msra.mxu1 %v20307_v30 }
 0x8b1   : > { %15519 = vmatprep.subr.bf16.mxu1 %v20321_v43 }
 0x8b4   : > { %15521 = vmatpush3.bf16.msra.mxu1 %v20321_v43 }
 0x8b5   : > { %15523 = vmatprep.subr.bf16.mxu1 %v20335_v12 }
 0x8b8   : > { %15525 = vmatpush3.bf16.msra.mxu1 %v20335_v12 }
 0x8b9   : > { %15527 = vmatprep.subr.bf16.mxu1 %v21167_v57 }
 0x8bb   : > { %14768 = vmatmul.mubr.f32.vlgmr.msra.gmra.mrb[34].mxu1 %v21168_v18  ;;  %v11513_v18 = vand.u32 4294901760, %v11512_v48 }
 0x8bc   : > { %15529 = vmatpush3.bf16.msra.mxu1 %v21167_v57  ;;  %14802 = vmatprep.mubr.msk.f32.mxu1 %vm19067_vm7, %v21098_v10  ;;  %v11519_v57 = vsub.f32 %v11409_v62, %v11427_v15 }
 0x8bd   : > { %15531 = vmatprep.subr.bf16.mxu1 %v21169_v53 }
 0x8c0   : > { %15533 = vmatpush3.bf16.msra.mxu1 %v21169_v53  ;;  %v11520_v53 = vand.u32 4294901760, %v11519_v57 }
 0x8c1   : > { %15535 = vmatprep.subr.bf16.mxu1 %v21170_v32 }
 0x8c4   : > { %15537 = vmatpush3.bf16.msra.mxu1 %v21170_v32  ;;  %v15598_v32 = vpack.c.bf16 %v11519_v57, %v11512_v48 }
 0x8c5   : > { %15539 = vmatprep.subr.bf16.mxu1 %v21171_v50 }
 0x8c8   : > { %15541 = vmatpush3.bf16.msra.mxu1 %v21171_v50  ;;  %v11514_v50 = vsub.f32 %v11512_v48, %v11513_v18 }
 0x8c9   : > { %15543 = vmatprep.subr.bf16.mxu1 %v21172_v2 }
 0x8cc   : > { %15545 = vmatpush3.bf16.msra.mxu1 %v21172_v2  ;;  %v11521_v2 = vsub.f32 %v11519_v57, %v11520_v53 }
 0x8cd   : > { %15547 = vmatprep.subr.bf16.mxu1 %v20162_v26 }
 0x8d0   : > { %15549 = vmatpush3.bf16.msra.mxu1 %v20162_v26 }
 0x8d1   : > { %15551 = vmatprep.subr.bf16.mxu1 %v20182_v1 }
 0x8d4   : > { %15553 = vmatpush3.bf16.msra.mxu1 %v20182_v1 }
 0x8d5   : > { %15555 = vmatprep.subr.bf16.mxu1 %v20200_v33 }
 0x8d8   : > { %15557 = vmatpush3.bf16.msra.mxu1 %v20200_v33 }
 0x8d9   : > { %15559 = vmatprep.subr.bf16.mxu1 %v20257_v37 }
 0x8db   : > { %14803 = vmatmul.mubr.msk.f32.vlgmr.msra.gmra.mrb[34].mxu1 %vm19157_vm10, %v21098_v10 }
 0x8dc   : > { %15561 = vmatpush3.bf16.msra.mxu1 %v20257_v37  ;;  %14837 = vmatprep.mubr.msk.f32.mxu1 %vm19067_vm7, %v21098_v10 }
 0x8dd   : > { %15563 = vmatprep.subr.bf16.mxu1 %v20267_v40 }
 0x8e0   : > { %15565 = vmatpush3.bf16.msra.mxu1 %v20267_v40 }
 0x8e1   : > { %15567 = vmatprep.subr.bf16.mxu1 %v20283_v13 }
 0x8e4   : > { %15569 = vmatpush3.bf16.msra.mxu1 %v20283_v13 }
 0x8e5   : > { %15571 = vmatprep.subr.bf16.mxu1 %v20291_v59 }
 0x8e8   : > { %15573 = vmatpush3.bf16.msra.mxu1 %v20291_v59 }
 0x8e9   : > { %15575 = vmatprep.subr.bf16.mxu1 %v20299_v36 }
 0x8ec   : > { %15577 = vmatpush3.bf16.msra.mxu1 %v20299_v36  ;;  %v10402_v36 = vld [vmem:[%s20557_s10] sm:$0xff] }
 0x8ed   : > { %15579 = vmatprep.subr.bf16.mxu1 %v20307_v30  ;;  %v10410_v24 = vand.u32 4294901760, %v10402_v36 }
 0x8ef   : > { %14840 = vmatprep.subr.mxu0 %v10410_v24 }
 0x8f0   : > { %15581 = vmatpush3.bf16.msra.mxu1 %v20307_v30  ;;  %14841 = vmatpush3.msra.mxu0 %v10410_v24 }
 0x8f1   : > { %15583 = vmatprep.subr.bf16.mxu1 %v20321_v43 }
 0x8f4   : > { %15585 = vmatpush3.bf16.msra.mxu1 %v20321_v43 }
 0x8f5   : > { %15587 = vmatprep.subr.bf16.mxu1 %v20335_v12 }
 0x8f8   : > { %15589 = vmatpush3.bf16.msra.mxu1 %v20335_v12 }
 0x8fb   : > { %14838 = vmatmul.mubr.msk.f32.vlgmr.msra.gmra.mrb[34].mxu1 %vm19157_vm10, %v21098_v10  ;;  %v10497_v10 = vsub.f32 %v10402_v36, %v10410_v24 }
 0x8fd   : > { %v10498_v30 = vand.u32 4294901760, %v10497_v10 }
 0x8ff   : > { %v10499_v43 = vsub.f32 %v10497_v10, %v10498_v30 }
 0x901   : > { %v10500_v12 = vand.u32 4294901760, %v10499_v43 }
 0x903   : > { %14845 = vmatprep.subr.mxu0 %v10500_v12 }
 0x90e   : > { %v14419_v33 = vpop.f32.mrb[32].mxu1 }
 0x90f   : > { %16303 = vrcp.f32 %v14419_v33  ;;  %10393 = vrot.lane.b32.xlu1 %v14419_v33, %s16377_s17  ;;  %v8863_v34 = vpop.f32.mrb[33].mxu1  ;;  %v11515_v33 = vand.u32 4294901760, %v11514_v50 }
 0x910   : > { %16305 = vrcp.f32 %v8863_v34  ;;  %10391 = vrot.lane.b32.xlu0 %v8863_v34, %s16377_s17  ;;  %v14629_v1 = vpop.f32.mrb[48].mxu0  ;;  %v11522_v34 = vand.u32 4294901760, %v11521_v2  ;;  %s12041_s17 = sshll.u32 %s518_s30, 4 }
 0x911   : > { %v9563_v26 = vpop.f32.mrb[49].mxu0  ;;  %s520_s0 = scalar_lea.vmem [#allocation2], %s12041_s17 }
 0x912   : > { %s11951_s2 = sshll.u32 %s520_s0, 4  ;;  %s20501_s2 = int_to_ptr.vmem [resolvable:$true] %s11951_s2 }
 0x913   : > { %s16311_s27 = scalar_lea.vmem %s20501_s2, 256 }
 0x914   : > { %p16312_p12 = scmp.ne.s32.totalorder %s20501_s2, %s16311_s27 }
 0x916   : > { %p16313_p13 = pnand %p16312_p12, %p16500_p5 }
 0x918   : > { %p16314_p0 = pneg %p16313_p13 }
 0x919   : > { %v16304_v37 = vpop.eup %16303 }
 0x91a   : > { %v16306_v40 = vpop.eup %16305  ;;  %v9576_v13 = vmul.f32 %v16304_v37, %v14629_v1  ;;  %v15594_v1 = vpack.c.bf16 %v11522_v34, %v11515_v33  ;;  %v12198_v37 = vld [vmem:[%s20558_s11] ss:$0 sm:$0xff] }
 0x91b   : > { %v9574_v59 = vmul.f32 %v16306_v40, %v9563_v26  ;;  %v15606_v26 = vpack.c.bf16 %v11520_v53, %v11513_v18 }
 0x91c   : > { %v10902_v14 = vsel %vm5841_vm12, %v9576_v13, 0 }
 0x91d   : > { %v10899_v11 = vsel %vm5841_vm12, %v9574_v59, 0  ;;  %v10980_v8 = vand.u32 4294901760, %v10902_v14 }
 0x91e   : > { %v10970_v28 = vand.u32 4294901760, %v10899_v11 }
 0x91f   : > { %v10981_v38 = vsub.f32 %v10902_v14, %v10980_v8 }
 0x920   : > { %v10971_v47 = vsub.f32 %v10899_v11, %v10970_v28 }
 0x921   : > { %v10982_v3 = vand.u32 4294901760, %v10981_v38 }
 0x922   : > { %v10972_v52 = vand.u32 4294901760, %v10971_v47 }
 0x923   : > { %v10983_v44 = vsub.f32 %v10981_v38, %v10982_v3 }
 0x924   : > { %v10973_v42 = vsub.f32 %v10971_v47, %v10972_v52 }
 0x925   : > { %v10984_v23 = vand.u32 4294901760, %v10983_v44 }
 0x926   : > { %v10974_v21 = vand.u32 4294901760, %v10973_v42 }
 0x981   : > { %v10394_v6 = vpop.permute.xlu1 %10393 }
 0x982   : > { %v10392_v17 = vpop.permute.xlu0 %10391  ;;  %16307 = vrcp.f32 %v10394_v6 }
 0x983   : > { %16309 = vrcp.f32 %v10392_v17 }
 0x98c   : > { %v16308_v9 = vpop.eup %16307 }
 0x98d   : > { %v16310_v27 = vpop.eup %16309 }
 0x9ce   : > { %v14839_v19 = vpop.f32.mrb[34].mxu1 }
 0x9cf   : > { %v10400_v56 = vmul.f32 %v16308_v9, %v14839_v19  ;;  %v10379_v5 = vpop.f32.mrb[35].mxu1 }
 0x9d0   : > { %v10398_v45 = vmul.f32 %v16310_v27, %v10379_v5 }
 0x9d1   : > { %v10407_v29 = vsel %vm5841_vm12, %v10400_v56, 0 }
 0x9d2   : > { %v10485_v46 = vand.u32 4294901760, %v10407_v29  ;;  %v10404_v7 = vsel %vm5841_vm12, %v10398_v45, 0 }
 0x9d3   : > { %v10475_v39 = vand.u32 4294901760, %v10404_v7 }
 0x9d4   : > { %v10486_v20 = vsub.f32 %v10407_v29, %v10485_v46 }
 0x9d5   : > { %v10476_v35 = vsub.f32 %v10404_v7, %v10475_v39 }
 0x9d6   : > { %v10487_v25 = vand.u32 4294901760, %v10486_v20 }
 0x9d7   : > { %v10477_v58 = vand.u32 4294901760, %v10476_v35 }
 0x9d8   : > { %v10488_v63 = vsub.f32 %v10486_v20, %v10487_v25 }
 0x9d9   : > { %v10478_v16 = vsub.f32 %v10476_v35, %v10477_v58 }
 0x9da   : > { %v10489_v55 = vand.u32 4294901760, %v10488_v63  ;;  %v11925_v63 = vld [vmem:[%s537_s25] sm:$0xff] }
 0x9db   : > { %v10479_v60 = vand.u32 4294901760, %v10478_v16 }
 0x9dd   : > { %14842 = vmatprep.mubr.f32.mxu0 %v10479_v60 }
 0x9de   : > { %14843 = vmatmul.mubr.f32.vlgmr.msra.gmra.mrb[50].mxu0 %v10489_v55 }
 0x9df   : > { %14846 = vmatpush3.msra.mxu0 %v10500_v12  ;;  %14847 = vmatprep.mubr.f32.mxu0 %v10475_v39 }
 0x9e0   : > { %14850 = vmatprep.subr.mxu0 %v10497_v10 }
 0x9e6   : > { %14848 = vmatmul.mubr.f32.vlgmr.msra.gmra.mrb[50].mxu0 %v10485_v46 }
 0x9e7   : > { %14851 = vmatpush3.msra.mxu0 %v10497_v10  ;;  %14852 = vmatprep.mubr.f32.mxu0 %v10476_v35  ;;  %v11926_v35 = vld [vmem:[%s537_s25 + $0x8] sm:$0xff]  ;;  %s16315_s25 = sshll.u32 %s16380_s1, 4  ;;  %s16316_s25 = int_to_ptr.vmem [resolvable:$false] %s16315_s25 }
 0x9e8   : > { %14855 = vmatprep.subr.mxu0 %v10410_v24  ;;  %s16317_s17 = scalar_lea.vmem %s16316_s25, 512  ;;  %p16318_p1 = scmp.lt.s32.totalorder %s20501_s2, %s16316_s25 }
 0x9e9   : > { %p16319_p2 = scmp.lt.s32.totalorder %s16317_s17, %s16311_s27 }
 0x9eb   : > { %p16320_p3 = por %p16319_p2, %p16318_p1 }
 0x9ed   : > { %p16321_p4 = pnand %p16320_p3, %p16314_p0 }
 0x9ee   : > { %14853 = vmatmul.mubr.f32.vlgmr.msra.gmra.mrb[50].mxu0 %v10486_v20 }
 0x9ef   : > { %14856 = vmatpush3.msra.mxu0 %v10410_v24  ;;  %14857 = vmatprep.mubr.f32.mxu0 %v10477_v58 }
 0x9f0   : > { %14860 = vmatprep.subr.mxu0 %v10498_v30 }
 0x9f6   : > { %14858 = vmatmul.mubr.f32.vlgmr.msra.gmra.mrb[50].mxu0 %v10487_v25 }
 0x9f7   : > { %14861 = vmatpush3.msra.mxu0 %v10498_v30  ;;  %14862 = vmatprep.mubr.f32.mxu0 %v10475_v39 }
 0x9f8   : > { %14865 = vmatprep.subr.mxu0 %v10410_v24 }
 0x9fe   : > { %14863 = vmatmul.mubr.f32.vlgmr.msra.gmra.mrb[50].mxu0 %v10485_v46 }
 0x9ff   : > { %14866 = vmatpush3.msra.mxu0 %v10410_v24  ;;  %14867 = vmatprep.mubr.f32.mxu0 %v10475_v39  ;;  %v12199_v39 = vld [vmem:[%s20560_s13] ss:$0 sm:$0xff] }
 0xa00   : > { %14870 = vmatprep.subr.mxu0 %v10905_v4 }
 0xa06   : > { %14868 = vmatmul.mubr.f32.vlgmr.msra.gmra.mrb[50].mxu0 %v10485_v46 }
 0xa07   : > { %14871 = vmatpush3.msra.mxu0 %v10905_v4  ;;  %14872 = vmatprep.mubr.f32.mxu0 %v10974_v21 }
 0xa08   : > { %14875 = vmatprep.subr.mxu0 %v10995_v31 }
 0xa0e   : > { %14873 = vmatmul.mubr.f32.vlgmr.msra.gmra.mrb[50].mxu0 %v10984_v23 }
 0xa0f   : > { %14876 = vmatpush3.msra.mxu0 %v10995_v31  ;;  %14877 = vmatprep.mubr.f32.mxu0 %v10970_v28 }
 0xa10   : > { %14880 = vmatprep.subr.mxu0 %v10992_v22 }
 0xa16   : > { %14878 = vmatmul.mubr.f32.vlgmr.msra.gmra.mrb[50].mxu0 %v10980_v8 }
 0xa17   : > { %14881 = vmatpush3.msra.mxu0 %v10992_v22  ;;  %14882 = vmatprep.mubr.f32.mxu0 %v10971_v47 }
 0xa18   : > { %14885 = vmatprep.subr.mxu0 %v10905_v4 }
 0xa1e   : > { %14883 = vmatmul.mubr.f32.vlgmr.msra.gmra.mrb[50].mxu0 %v10981_v38 }
 0xa1f   : > { %14886 = vmatpush3.msra.mxu0 %v10905_v4  ;;  %14887 = vmatprep.mubr.f32.mxu0 %v10972_v52 }
 0xa20   : > { %14890 = vmatprep.subr.mxu0 %v10993_v51 }
 0xa26   : > { %14888 = vmatmul.mubr.f32.vlgmr.msra.gmra.mrb[50].mxu0 %v10982_v3 }
 0xa27   : > { %14891 = vmatpush3.msra.mxu0 %v10993_v51  ;;  %14892 = vmatprep.mubr.f32.mxu0 %v10970_v28 }
 0xa28   : > { %14895 = vmatprep.subr.mxu0 %v10905_v4 }
 0xa2e   : > { %14893 = vmatmul.mubr.f32.vlgmr.msra.gmra.mrb[50].mxu0 %v10980_v8 }
 0xa2f   : > { %14896 = vmatpush3.msra.mxu0 %v10905_v4  ;;  %14897 = vmatprep.mubr.f32.mxu0 %v10970_v28 }
 0xa30   : > { %15591 = vmatprep.subr.bf16.mxu0 %v15590_v61 }
 0xa36   : > { %14898 = vmatmul.mubr.f32.vlgmr.msra.gmra.mrb[50].mxu0 %v10980_v8 }
 0xa37   : > { %15593 = vmatpush3.bf16.msra.mxu0 %v15590_v61 }
 0xa38   : > { %15595 = vmatprep.subr.bf16.mxu0 %v15594_v1 }
 0xb09   : > { %v14899_v40 = vpop.f32.mrb[50].mxu0 }
 0xb0a   : > { %v11401_v13 = vadd.f32 %v14899_v40, %v12198_v37  ;;  %v11383_v59 = vpop.f32.mrb[51].mxu0 }
 0xb0b   : > { %v11400_v36 = vadd.f32 %v12198_v37, %v11383_v59 }
 0xb0c   : > { %vm11403_vm12 = vcmp.gt.f32.partialorder %v11401_v13, 0.0  ;;  %v11405_v24 = vmul.f32 0.2, %v11401_v13 }
 0xb0d   : > { %vm11402_vm11 = vcmp.gt.f32.partialorder %v11400_v36, 0.0  ;;  %v11404_v10 = vmul.f32 0.2, %v11400_v36 }
 0xb0e   : > { %v11407_v30 = vsel %vm11403_vm12, %v11401_v13, %v11405_v24 }
 0xb0f   : > { %v11421_v43 = vsel %vm1952_vm14, %v11407_v30, 0  ;;  %v11406_v12 = vsel %vm11402_vm11, %v11400_v36, %v11404_v10 }
 0xb10   : > { %v11500_v6 = vand.u32 4294901760, %v11421_v43  ;;  %v11418_v17 = vsel %vm1952_vm14, %v11406_v12, 0 }
 0xb11   : > { %v11490_v9 = vand.u32 4294901760, %v11418_v17 }
 0xb12   : > { %v11501_v19 = vsub.f32 %v11421_v43, %v11500_v6 }
 0xb13   : > { %v11491_v27 = vsub.f32 %v11418_v17, %v11490_v9 }
 0xb14   : > { %v11502_v56 = vand.u32 4294901760, %v11501_v19 }
 0xb15   : > { %v11492_v5 = vand.u32 4294901760, %v11491_v27 }
 0xb16   : > { %v11503_v45 = vsub.f32 %v11501_v19, %v11502_v56 }
 0xb17   : > { %v11493_v29 = vsub.f32 %v11491_v27, %v11492_v5 }
 0xb18   : > { %v11504_v7 = vand.u32 4294901760, %v11503_v45 }
 0xb19   : > { %v11494_v46 = vand.u32 4294901760, %v11493_v29 }
 0xb1b   : > { %14904 = vmatprep.mubr.f32.mxu0 %v11494_v46 }
 0xb1c   : > { %14905 = vmatmul.mubr.f32.vlgmr.msra.gmra.mrb[52].mxu0 %v11504_v7 }
 0xb1d   : > { %15597 = vmatpush3.bf16.msra.mxu0 %v15594_v1  ;;  %14911 = vmatprep.mubr.f32.mxu0 %v11490_v9 }
 0xb1e   : > { %15599 = vmatprep.subr.bf16.mxu0 %v15598_v32 }
 0xb24   : > { %14912 = vmatmul.mubr.f32.vlgmr.msra.gmra.mrb[52].mxu0 %v11500_v6 }
 0xb25   : > { %15601 = vmatpush3.bf16.msra.mxu0 %v15598_v32  ;;  %14918 = vmatprep.mubr.f32.mxu0 %v11491_v27 }
 0xb26   : > { %15603 = vmatprep.subr.bf16.mxu0 %v15590_v61 }
 0xb2c   : > { %14919 = vmatmul.mubr.f32.vlgmr.msra.gmra.mrb[52].mxu0 %v11501_v19 }
 0xb2d   : > { %15605 = vmatpush3.bf16.msra.mxu0 %v15590_v61  ;;  %14925 = vmatprep.mubr.f32.mxu0 %v11492_v5 }
 0xb2e   : > { %15607 = vmatprep.subr.bf16.mxu0 %v15606_v26 }
 0xb34   : > { %14926 = vmatmul.mubr.f32.vlgmr.msra.gmra.mrb[52].mxu0 %v11502_v56 }
 0xb35   : > { %15609 = vmatpush3.bf16.msra.mxu0 %v15606_v26  ;;  %14932 = vmatprep.mubr.f32.mxu0 %v11490_v9 }
 0xb36   : > { %15611 = vmatprep.subr.bf16.mxu0 %v15590_v61 }
 0xb3c   : > { %14933 = vmatmul.mubr.f32.vlgmr.msra.gmra.mrb[52].mxu0 %v11500_v6 }
 0xb3d   : > { %15613 = vmatpush3.bf16.msra.mxu0 %v15590_v61  ;;  %14939 = vmatprep.mubr.f32.mxu0 %v11490_v9 }
 0xb44   : > { %14940 = vmatmul.mubr.f32.vlgmr.msra.gmra.mrb[52].mxu0 %v11500_v6 }
 0xc17   : > { %v14941_v20 = vpop.f32.mrb[52].mxu0 }
 0xc18   : > { %v15632_v25 = vadd.f32 %v14941_v20, %v12199_v39  ;;  %v11915_v58 = vpop.f32.mrb[53].mxu0 }
 0xc19   : > { %v15633_v16 = vadd.f32 %v12199_v39, %v11915_v58 }
 0xc1a   : > { %v11928_v60 = vadd.f32 %v15632_v25, %v11926_v35 }
 0xc1b   : > { %v11927_v55 = vadd.f32 %v15633_v16, %v11925_v63 }
 0xc1c   : > { %vm11930_vm14 = vcmp.gt.f32.partialorder %v11928_v60, 0.0  ;;  %v11932_v0 = vmul.f32 0.2, %v11928_v60 }
 0xc1d   : > { %vm11929_vm13 = vcmp.gt.f32.partialorder %v11927_v55, 0.0  ;;  %v11931_v11 = vmul.f32 0.2, %v11927_v55 }
 0xc1e   : > { %v11934_v4 = vsel %vm11930_vm14, %v11928_v60, %v11932_v0 }
 0xc1f   : > { %11936 = vst.msk [vmem:[%s520_s0 + $0x8] sm:$0xff] %vm658_vm0, %v11934_v4  ;;  %v11933_v28 = vsel %vm11929_vm13, %v11927_v55, %v11931_v11 }
 0xc20   : > { %11935 = vst.msk [vmem:[%s520_s0] sm:$0xff] %vm658_vm0, %v11933_v28 }
 0xc21   : > { %16324 = shalt.err (!%p16321_p4)
}
 0xc22   : > { %s16325_s30 = scalar_lea.hbm %s20499_s23, 256  ;;  %s16329_s20 = scalar_lea.hbm %s20562_s15, 512 }
 0xc23   : > { %p16326_p7 = scmp.ne.s32.totalorder %s20499_s23, %s16325_s30  ;;  %p16330_p10 = scmp.lt.u32.totalorder %s20499_s23, %s20562_s15 }
 0xc24   : > { %p16331_p11 = scmp.lt.u32.totalorder %s16329_s20, %s16325_s30  ;;  %p16333_p13 = scmp.lt.u32.totalorder %s16325_s30, %s20499_s23 }
 0xc25   : > { %p16327_p8 = pnand %p16326_p7, %p16500_p5 }
 0xc26   : > { %p16332_p12 = por %p16331_p11, %p16330_p10 }
 0xc27   : > { %p16328_p9 = pneg %p16327_p8 }
 0xc28   : > { %p16334_p0 = por %p16333_p13, %p16332_p12 }
 0xc2a   : > { %p16335_p1 = pnand %p16334_p0, %p16328_p9 }
 0xc2c   : > { %16338 = shalt.err (!%p16335_p1)
}
 0xc2d   : > { %s16381_s27 = smov 128   ;;  %s21173_s25 = smov 8  }
 0xc2e   : > { %16192 = dma.vmem_to_hbm [thread:$0]  (%p16500_p5), %s20501_s2, 256, %s20499_s23, %s20505_s22, %s16381_s27, %s16381_s27, %s21173_s25  }
 0xc2f PF: > { %p16198_p2 = scmp.ge.s32.totalorder %s16373_s21, 2  ;;  %s11966_s17 = sand.u32 1, %s16361_s18  }
 0xc30   : > { %s11967_s30 = scalar_lea.sflag [#allocation3], %s11966_s17 }
 0xc31   : > { %p16195_p3 = pnand %p16198_p2, %p16504_p6 }
 0xc33   : > { %16356 = dma.done.wait (!%p16195_p3), %s11967_s30, 256  }
 0xc34   : > { %16358 = vsyncadd (!%p16195_p3), %s11967_s30, 4294967040  ;;  %s21174_s26 = sld [smem:[#allocation5_spill]]  ;;  %s21175_s20 = sld [smem:[#allocation6_spill]] }
 0xc35   : > { %p25_p4 = scmp.ge.s32.totalorder %s16487_s24, 4   ;;  %s21176_s18 = smov %s16365_s19 }
 0xc36   : > { %s21178_s21 = smov %s16487_s24 }
 0xc37   :  { %27 = sbr.rel (!%p25_p4) target bundleno = 7 (0x7), region = 121 }
 0xc3a   : > { %s21177_s19 = smov %s21174_s26 }
 0xc3e   :  { %11972 = vsyncpa [#allocation3], 1 }
 0xc3f   :  { %11974 = vsyncpa [#allocation3 + $0x1], 1 }

</bundles_post_ra>
